<compile_context>
chip_gen: v5e
topology: v5e:2x2
jax: 0.10.0
libtpu: 0.0.40
codegen_flags: <defaults>
</compile_context>

<pallas_src>
import time

import jax
import jax.numpy as jnp
from jax import lax
from jax.experimental import pallas as pl
from jax.experimental.pallas import tpu as pltpu

_ROW_STRIP = 4   # rows of H processed per depthwise strip (bounds the vreg live set, v5e-safe)


def _fused_mbconv_kernel(x_ref, w_exp_ref, b1_ref, w_dw_ref, b2_ref,
                         w_prj_ref, b3_ref, o_ref, pad_ref, dw_ref):
    """All T MBConv blocks (t=6, stride=1, pad=1) for one batch element.

    x_ref     : (H*W, Cin)           bf16
    w_exp_ref : (T, Cin, Cmid)       bf16  (BN1 scale folded in)
    b1_ref    : (T, 1, Cmid)         f32
    w_dw_ref  : (T, 3, 3, Cmid)      bf16  (BN2 scale folded in)
    b2_ref    : (T, 1, Cmid)         f32
    w_prj_ref : (T, Cmid, Cout_pad)  bf16  (BN3 scale folded in, zero-padded lanes)
    b3_ref    : (T, 1, Cout_pad)     f32   (zero-padded lanes)
    o_ref     : (T, H*W, Cout_pad)   bf16
    pad_ref   : (H+2, W+2, Cmid)     bf16 VMEM scratch (halo buffer for the depthwise conv)
    dw_ref    : (H*W, Cmid)          bf16 VMEM scratch (staged dw output -> M=256 project dot)
    """
    HP2, WP2, Cmid = pad_ref.shape
    H, W = HP2 - 2, WP2 - 2
    T = o_ref.shape[0]
    RS = _ROW_STRIP

    # Zero the halo border ONCE per batch element (invariant across blocks; the interior
    # is fully rewritten by every block).  Done unconditionally per grid step so it is
    # correct under megacore grid splitting (each core has its own scratch).
    pad_ref[0:1, :, :] = jnp.zeros((1, WP2, Cmid), pad_ref.dtype)
    pad_ref[H + 1:H + 2, :, :] = jnp.zeros((1, WP2, Cmid), pad_ref.dtype)
    pad_ref[:, 0:1, :] = jnp.zeros((HP2, 1, Cmid), pad_ref.dtype)
    pad_ref[:, W + 1:W + 2, :] = jnp.zeros((HP2, 1, Cmid), pad_ref.dtype)

    def block_body(t, carry):
        # ---- expand 1x1: single (H*W, Cin) x (Cin, Cmid) MXU dot + bias + ReLU6 ----
        h = jnp.dot(x_ref[...], w_exp_ref[t],
                    preferred_element_type=jnp.float32)              # (H*W, Cmid) f32
        h = jnp.clip(h + b1_ref[t], 0.0, 6.0)
        pad_ref[1:1 + H, 1:1 + W, :] = h.astype(pad_ref.dtype).reshape(H, W, Cmid)

        # ---- depthwise 3x3 (bf16 windows, f32 accumulate) + bias + ReLU6, by strip ----
        w_dw = w_dw_ref[t]                                            # (3, 3, Cmid) bf16
        b2 = b2_ref[t]                                                # (1, Cmid) f32
        for r0 in range(0, H, RS):                                    # static, H // RS iters
            acc = jnp.zeros((RS, W, Cmid), jnp.float32)
            for kh in range(3):
                for kw in range(3):
                    win = pad_ref[r0 + kh:r0 + kh + RS, kw:kw + W, :]   # static halo slices
                    acc = acc + win * w_dw[kh:kh + 1, kw:kw + 1, :]      # bf16 mul, f32 acc
            acc = jnp.clip(acc.reshape(RS * W, Cmid) + b2, 0.0, 6.0)
            dw_ref[r0 * W:(r0 + RS) * W, :] = acc.astype(dw_ref.dtype)

        # ---- project 1x1: single M=256 MXU dot + bias; lane-dense bf16 store ----
        y = jnp.dot(dw_ref[...], w_prj_ref[t],
                    preferred_element_type=jnp.float32) + b3_ref[t]    # (H*W, Cout_pad) f32
        o_ref[t] = y.astype(o_ref.dtype)
        return carry

    lax.fori_loop(0, T, block_body, None)


def fused_collect_blocks(x_nhwc, w_exp, b1, w_dw, b2, w_prj, b3, *, c_out):
    """Run all stacked MBConv blocks on x in a single pallas_call.

    Returns (TIMES, N, H, W, c_out) float32 — one output per block, all computed on
    the same input (matching `res = block(x)` in the PyTorch loop).
    """
    N, H, W, Cin = x_nhwc.shape
    T, _, Cmid = w_exp.shape
    Cpad = w_prj.shape[-1]

    x_flat = x_nhwc.astype(jnp.bfloat16).reshape(N, H * W, Cin)

    out = pl.pallas_call(
        _fused_mbconv_kernel,
        out_shape=jax.ShapeDtypeStruct((N, T, H * W, Cpad), jnp.bfloat16),
        grid=(N,),
        in_specs=[
            pl.BlockSpec((None, H * W, Cin), lambda n: (n, 0, 0)),
            pl.BlockSpec((T, Cin, Cmid), lambda n: (0, 0, 0)),
            pl.BlockSpec((T, 1, Cmid), lambda n: (0, 0, 0)),
            pl.BlockSpec((T, 3, 3, Cmid), lambda n: (0, 0, 0, 0)),
            pl.BlockSpec((T, 1, Cmid), lambda n: (0, 0, 0)),
            pl.BlockSpec((T, Cmid, Cpad), lambda n: (0, 0, 0)),
            pl.BlockSpec((T, 1, Cpad), lambda n: (0, 0, 0)),
        ],
        out_specs=pl.BlockSpec((None, T, H * W, Cpad), lambda n: (n, 0, 0, 0)),
        scratch_shapes=[
            pltpu.VMEM((H + 2, W + 2, Cmid), jnp.bfloat16),   # halo buffer
            pltpu.VMEM((H * W, Cmid), jnp.bfloat16),          # staged dw output
        ],
        compiler_params=pltpu.CompilerParams(
            dimension_semantics=("parallel",),
            vmem_limit_bytes=32 * 1024 * 1024),
    )(x_flat, w_exp, b1, w_dw, b2, w_prj, b3)

    out = out.reshape(N, T, H, W, Cpad).transpose(1, 0, 2, 3, 4)[..., :c_out]
    out = out.astype(jnp.float32)
    # MBConv residual only when the block preserves the shape (24 -> 36 here: no residual).
    if c_out == Cin:
        out = out + x_nhwc[None].astype(out.dtype)
    return out


def init_block_params(key, c_in, c_out, t=6):
    """Deterministic synthetic raw parameters for one MBConv block (conv weights + BN stats)."""
    c_mid = c_in * t
    ks = jax.random.split(key, 15)

    def bn(kg, kb, km, kv, c):
        gamma = 1.0 + 0.1 * jax.random.normal(kg, (c,))
        beta = 0.1 * jax.random.normal(kb, (c,))
        mean = 0.1 * jax.random.normal(km, (c,))
        var = jax.random.uniform(kv, (c,), minval=0.5, maxval=1.5)
        return gamma, beta, mean, var

    w_exp = (jax.random.normal(ks[0], (c_in, c_mid)) / jnp.sqrt(c_in)).astype(jnp.float32)
    bn1 = bn(ks[1], ks[2], ks[3], ks[4], c_mid)
    w_dw = (jax.random.normal(ks[5], (3, 3, c_mid)) / 3.0).astype(jnp.float32)
    bn2 = bn(ks[6], ks[7], ks[8], ks[9], c_mid)
    w_prj = (jax.random.normal(ks[10], (c_mid, c_out)) / jnp.sqrt(c_mid)).astype(jnp.float32)
    bn3 = bn(ks[11], ks[12], ks[13], ks[14], c_out)
    return w_exp, bn1, w_dw, bn2, w_prj, bn3


def _fold_bn(w, bn_params, channel_axis, eps=1e-5):
    """Fold inference-mode BatchNorm scale into the conv weight; return (w_folded, bias)."""
    gamma, beta, mean, var = bn_params
    scale = gamma * jax.lax.rsqrt(var + eps)
    bias = beta - mean * scale
    shape = [1] * w.ndim
    shape[channel_axis] = -1
    return (w * scale.reshape(shape)).astype(jnp.float32), bias.astype(jnp.float32)


def fold_and_stack(blocks, c_out, c_pad):
    """Fold BN into weights, pad Cout->c_pad (lane-dense), cast weights to bf16, stack over T."""
    w_exps, b1s, w_dws, b2s, w_prjs, b3s = [], [], [], [], [], []
    for (w_exp, bn1, w_dw, bn2, w_prj, bn3) in blocks:
        we, b1 = _fold_bn(w_exp, bn1, channel_axis=1)
        wd, b2 = _fold_bn(w_dw, bn2, channel_axis=2)
        wp, b3 = _fold_bn(w_prj, bn3, channel_axis=1)
        wp = jnp.pad(wp, ((0, 0), (0, c_pad - c_out)))   # zero lanes -> no garbage leakage
        b3 = jnp.pad(b3, (0, c_pad - c_out))
        w_exps.append(we.astype(jnp.bfloat16))
        b1s.append(b1.reshape(1, -1))
        w_dws.append(wd.astype(jnp.bfloat16))
        b2s.append(b2.reshape(1, -1))
        w_prjs.append(wp.astype(jnp.bfloat16))
        b3s.append(b3.reshape(1, -1))
    stack = lambda xs: jnp.stack(xs, axis=0)
    return (stack(w_exps), stack(b1s), stack(w_dws), stack(b2s),
            stack(w_prjs), stack(b3s))


def reference_all_blocks(x_nhwc, w_exp, b1, w_dw, b2, w_prj, b3, c_out):
    """Pure-JAX f32 reference of the fused kernel math (BN already folded)."""
    H, W = x_nhwc.shape[1], x_nhwc.shape[2]
    xb = x_nhwc.astype(jnp.bfloat16).astype(jnp.float32)   # same input rounding as the kernel
    we = w_exp.astype(jnp.float32)
    wd = w_dw.astype(jnp.float32)
    wp = w_prj.astype(jnp.float32)
    h = jnp.einsum('nhwi,tio->tnhwo', xb, we) + b1[:, 0][:, None, None, None, :]
    h = jnp.clip(h, 0.0, 6.0)
    hp = jnp.pad(h, ((0, 0), (0, 0), (1, 1), (1, 1), (0, 0)))
    acc = 0.0
    for kh in range(3):
        for kw in range(3):
            acc = acc + (hp[:, :, kh:kh + H, kw:kw + W, :]
                         * wd[:, kh, kw][:, None, None, None, :])
    acc = jnp.clip(acc + b2[:, 0][:, None, None, None, :], 0.0, 6.0)
    y = jnp.einsum('tnhwc,tco->tnhwo', acc, wp) + b3[:, 0][:, None, None, None, :]
    return y[..., :c_out]


def collect_data_forward(x_nhwc, stacked, fused_fn):
    """Equivalent of CollectData.forward: run every block on x and return elapsed seconds."""
    jax.block_until_ready(x_nhwc)          # analogue of torch.cuda.synchronize()
    start_time = time.time()
    res = fused_fn(x_nhwc, *stacked)       # all 30 block outputs in one fused pallas_call
    jax.block_until_ready(res)             # analogue of torch.cuda.synchronize()
    end_time = time.time()
    return end_time - start_time, res


if __name__ == "__main__":
    # Shapes implied by the module: input_channel=24, output_channel=36, t=6, 30 blocks.
    N, C_IN, H, W = 2, 24, 16, 16
    C_OUT, TIMES, T_EXPAND = 36, 30, 6
    C_PAD = 128   # lane-dense padded output width (sliced back to C_OUT in the wrapper)

    key = jax.random.PRNGKey(0)
    kx, kp = jax.random.split(key)
    x_nchw = jax.random.normal(kx, (N, C_IN, H, W), jnp.float32)   # PyTorch NCHW input
    x_nhwc = jnp.transpose(x_nchw, (0, 2, 3, 1))                   # kernel layout: NHWC

    block_keys = jax.random.split(kp, TIMES)
    blocks = [init_block_params(block_keys[i], C_IN, C_OUT, t=T_EXPAND)
              for i in range(TIMES)]
    # TODO(synk): PyTorch BatchNorm in training mode uses batch statistics; here BN is
    # folded with running stats (inference semantics) since this is a synthetic benchmark.
    stacked = fold_and_stack(blocks, C_OUT, C_PAD)

    fused_fn = jax.jit(lambda x, *p: fused_collect_blocks(x, *p, c_out=C_OUT))

    # Warm up / compile once; check output shape and numerics vs a pure-JAX reference.
    warm = fused_fn(x_nhwc, *stacked)
    jax.block_until_ready(warm)
    assert warm.shape == (TIMES, N, H, W, C_OUT), warm.shape
    ref = reference_all_blocks(x_nhwc, *stacked, c_out=C_OUT)
    max_err = float(jnp.max(jnp.abs(warm - ref)))
    rel_err = float(jnp.linalg.norm(warm - ref) / (jnp.linalg.norm(ref) + 1e-6))
    assert max_err < 0.3, f"max abs err {max_err}"
    assert rel_err < 2e-2, f"rel err {rel_err}"

    elapsed_seconds, res = collect_data_forward(x_nhwc, stacked, fused_fn)
    jax.block_until_ready(res)
    assert elapsed_seconds >= 0.0

    print("KERNEL_OK")
</pallas_src>

<mosaic_0001>
module attributes {stable_mosaic.version = 11 : i64} {
  func.func @_fused_mbconv_kernel(%arg0: i32, %arg1: memref<1x256x24xbf16, #tpu.memory_space<vmem>>, %arg2: memref<30x24x144xbf16, #tpu.memory_space<vmem>>, %arg3: memref<30x1x144xf32, #tpu.memory_space<vmem>>, %arg4: memref<30x3x3x144xbf16, #tpu.memory_space<vmem>>, %arg5: memref<30x1x144xf32, #tpu.memory_space<vmem>>, %arg6: memref<30x144x128xbf16, #tpu.memory_space<vmem>>, %arg7: memref<30x1x128xf32, #tpu.memory_space<vmem>>, %arg8: memref<1x30x256x128xbf16, #tpu.memory_space<vmem>>, %arg9: memref<18x18x144xbf16, #tpu.memory_space<vmem>>, %arg10: memref<256x144xbf16, #tpu.memory_space<vmem>>) attributes {dimension_semantics = [#tpu.dimension_semantics<parallel>], iteration_bounds = array<i64: 2>, scalar_prefetch = 0 : i64, scratch_operands = 2 : i64, tpu.core_type = #tpu.core_type<tc>, window_params = [{transform_indices = @transform_0, window_bounds = array<i64: 1, 256, 24>}, {pipeline_mode = #tpu.pipeline_mode<synchronous>, transform_indices = @transform_1, window_bounds = array<i64: 30, 24, 144>}, {pipeline_mode = #tpu.pipeline_mode<synchronous>, transform_indices = @transform_2, window_bounds = array<i64: 30, 1, 144>}, {pipeline_mode = #tpu.pipeline_mode<synchronous>, transform_indices = @transform_3, window_bounds = array<i64: 30, 3, 3, 144>}, {pipeline_mode = #tpu.pipeline_mode<synchronous>, transform_indices = @transform_4, window_bounds = array<i64: 30, 1, 144>}, {pipeline_mode = #tpu.pipeline_mode<synchronous>, transform_indices = @transform_5, window_bounds = array<i64: 30, 144, 128>}, {pipeline_mode = #tpu.pipeline_mode<synchronous>, transform_indices = @transform_6, window_bounds = array<i64: 30, 1, 128>}, {transform_indices = @transform_7, window_bounds = array<i64: 1, 30, 256, 128>}]} {
    %cst = arith.constant 0.000000e+00 : bf16
    %0 = vector.broadcast %cst : bf16 to vector<1x18x144xbf16>
    %c0 = arith.constant 0 : index
    %c0_0 = arith.constant 0 : index
    %c0_1 = arith.constant 0 : index
    %1 = vector.load %arg9[%c0, %c0_0, %c0_1] : memref<18x18x144xbf16, #tpu.memory_space<vmem>>, vector<1x18x144xbf16>
    tpu.vector_store %arg9[%c0, %c0_0, %c0_1], %0 {strides = array<i32>} : memref<18x18x144xbf16, #tpu.memory_space<vmem>>, vector<1x18x144xbf16>,
    %cst_2 = arith.constant 0.000000e+00 : bf16
    %2 = vector.broadcast %cst_2 : bf16 to vector<1x18x144xbf16>
    %c17 = arith.constant 17 : index
    %c0_3 = arith.constant 0 : index
    %c0_4 = arith.constant 0 : index
    %3 = vector.load %arg9[%c17, %c0_3, %c0_4] : memref<18x18x144xbf16, #tpu.memory_space<vmem>>, vector<1x18x144xbf16>
    tpu.vector_store %arg9[%c17, %c0_3, %c0_4], %2 {strides = array<i32>} : memref<18x18x144xbf16, #tpu.memory_space<vmem>>, vector<1x18x144xbf16>,
    %cst_5 = arith.constant 0.000000e+00 : bf16
    %4 = vector.broadcast %cst_5 : bf16 to vector<18x1x144xbf16>
    %c0_6 = arith.constant 0 : index
    %c0_7 = arith.constant 0 : index
    %c0_8 = arith.constant 0 : index
    %5 = vector.load %arg9[%c0_6, %c0_7, %c0_8] : memref<18x18x144xbf16, #tpu.memory_space<vmem>>, vector<18x1x144xbf16>
    tpu.vector_store %arg9[%c0_6, %c0_7, %c0_8], %4 {strides = array<i32>} : memref<18x18x144xbf16, #tpu.memory_space<vmem>>, vector<18x1x144xbf16>,
    %cst_9 = arith.constant 0.000000e+00 : bf16
    %6 = vector.broadcast %cst_9 : bf16 to vector<18x1x144xbf16>
    %c0_10 = arith.constant 0 : index
    %c17_11 = arith.constant 17 : index
    %c0_12 = arith.constant 0 : index
    %7 = vector.load %arg9[%c0_10, %c17_11, %c0_12] : memref<18x18x144xbf16, #tpu.memory_space<vmem>>, vector<18x1x144xbf16>
    tpu.vector_store %arg9[%c0_10, %c17_11, %c0_12], %6 {strides = array<i32>} : memref<18x18x144xbf16, #tpu.memory_space<vmem>>, vector<18x1x144xbf16>,
    %c0_i32 = arith.constant 0 : i32
    %c30_i32 = arith.constant 30 : i32
    %8 = arith.addi %c0_i32, %c30_i32 : i32
    %c1_i32 = arith.constant 1 : i32
    scf.for %arg11 = %c0_i32 to %8 step %c1_i32  : i32 {
      %c0_14 = arith.constant 0 : index
      %c0_15 = arith.constant 0 : index
      %c0_16 = arith.constant 0 : index
      %9 = vector.load %arg1[%c0_14, %c0_15, %c0_16] : memref<1x256x24xbf16, #tpu.memory_space<vmem>>, vector<1x256x24xbf16>
      %10 = vector.shape_cast %9 : vector<1x256x24xbf16> to vector<256x24xbf16>
      %11 = arith.index_cast %arg11 : i32 to index
      %c0_17 = arith.constant 0 : index
      %c0_18 = arith.constant 0 : index
      %12 = vector.load %arg2[%11, %c0_17, %c0_18] : memref<30x24x144xbf16, #tpu.memory_space<vmem>>, vector<1x24x144xbf16>
      %13 = vector.shape_cast %12 : vector<1x24x144xbf16> to vector<24x144xbf16>
      %cst_19 = arith.constant dense<0.000000e+00> : vector<256x144xf32>
      %14 = tpu.matmul %10, %13, %cst_19 {dimension_numbers = #tpu.dot_dimension_numbers<[1], [0], [0], [1], [0, 0, 1, 1], [], []>} : vector<256x24xbf16>, vector<24x144xbf16>, vector<256x144xf32> -> vector<256x144xf32>
      %15 = arith.index_cast %arg11 : i32 to index
      %c0_20 = arith.constant 0 : index
      %c0_21 = arith.constant 0 : index
      %16 = vector.load %arg3[%15, %c0_20, %c0_21] : memref<30x1x144xf32, #tpu.memory_space<vmem>>, vector<1x1x144xf32>
      %17 = vector.shape_cast %16 : vector<1x1x144xf32> to vector<1x144xf32>
      %18 = vector.broadcast %17 : vector<1x144xf32> to vector<256x144xf32>
      %19 = arith.addf %14, %18 : vector<256x144xf32>
      %cst_22 = arith.constant 0.000000e+00 : f32
      %cst_23 = arith.constant 6.000000e+00 : f32
      %20 = vector.broadcast %cst_22 : f32 to vector<256x144xf32>
      %21 = arith.maximumf %20, %19 : vector<256x144xf32>
      %22 = vector.broadcast %cst_23 : f32 to vector<256x144xf32>
      %23 = arith.minimumf %22, %21 : vector<256x144xf32>
      %24 = arith.truncf %23 : vector<256x144xf32> to vector<256x144xbf16>
      %25 = vector.shape_cast %24 : vector<256x144xbf16> to vector<16x16x144xbf16>
      %c1 = arith.constant 1 : index
      %c1_24 = arith.constant 1 : index
      %c0_25 = arith.constant 0 : index
      %26 = vector.load %arg9[%c1, %c1_24, %c0_25] : memref<18x18x144xbf16, #tpu.memory_space<vmem>>, vector<16x16x144xbf16>
      tpu.vector_store %arg9[%c1, %c1_24, %c0_25], %25 {strides = array<i32>} : memref<18x18x144xbf16, #tpu.memory_space<vmem>>, vector<16x16x144xbf16>,
      %27 = arith.index_cast %arg11 : i32 to index
      %c0_26 = arith.constant 0 : index
      %c0_27 = arith.constant 0 : index
      %c0_28 = arith.constant 0 : index
      %28 = vector.load %arg4[%27, %c0_26, %c0_27, %c0_28] : memref<30x3x3x144xbf16, #tpu.memory_space<vmem>>, vector<1x3x3x144xbf16>
      %29 = vector.shape_cast %28 : vector<1x3x3x144xbf16> to vector<3x3x144xbf16>
      %30 = arith.index_cast %arg11 : i32 to index
      %c0_29 = arith.constant 0 : index
      %c0_30 = arith.constant 0 : index
      %31 = vector.load %arg5[%30, %c0_29, %c0_30] : memref<30x1x144xf32, #tpu.memory_space<vmem>>, vector<1x1x144xf32>
      %32 = vector.shape_cast %31 : vector<1x1x144xf32> to vector<1x144xf32>
      %cst_31 = arith.constant 0.000000e+00 : f32
      %33 = vector.broadcast %cst_31 : f32 to vector<4x16x144xf32>
      %c0_32 = arith.constant 0 : index
      %c0_33 = arith.constant 0 : index
      %c0_34 = arith.constant 0 : index
      %34 = vector.load %arg9[%c0_32, %c0_33, %c0_34] : memref<18x18x144xbf16, #tpu.memory_space<vmem>>, vector<4x16x144xbf16>
      %35 = vector.extract_strided_slice %29 {offsets = [0, 0, 0], sizes = [1, 1, 144], strides = [1, 1, 1]} : vector<3x3x144xbf16> to vector<1x1x144xbf16>
      %36 = vector.broadcast %35 : vector<1x1x144xbf16> to vector<4x16x144xbf16>
      %37 = arith.mulf %34, %36 : vector<4x16x144xbf16>
      %38 = arith.extf %37 : vector<4x16x144xbf16> to vector<4x16x144xf32>
      %39 = arith.addf %33, %38 : vector<4x16x144xf32>
      %c0_35 = arith.constant 0 : index
      %c1_36 = arith.constant 1 : index
      %c0_37 = arith.constant 0 : index
      %40 = vector.load %arg9[%c0_35, %c1_36, %c0_37] : memref<18x18x144xbf16, #tpu.memory_space<vmem>>, vector<4x16x144xbf16>
      %41 = vector.extract_strided_slice %29 {offsets = [0, 1, 0], sizes = [1, 1, 144], strides = [1, 1, 1]} : vector<3x3x144xbf16> to vector<1x1x144xbf16>
      %42 = vector.broadcast %41 : vector<1x1x144xbf16> to vector<4x16x144xbf16>
      %43 = arith.mulf %40, %42 : vector<4x16x144xbf16>
      %44 = arith.extf %43 : vector<4x16x144xbf16> to vector<4x16x144xf32>
      %45 = arith.addf %39, %44 : vector<4x16x144xf32>
      %c0_38 = arith.constant 0 : index
      %c2 = arith.constant 2 : index
      %c0_39 = arith.constant 0 : index
      %46 = vector.load %arg9[%c0_38, %c2, %c0_39] : memref<18x18x144xbf16, #tpu.memory_space<vmem>>, vector<4x16x144xbf16>
      %47 = vector.extract_strided_slice %29 {offsets = [0, 2, 0], sizes = [1, 1, 144], strides = [1, 1, 1]} : vector<3x3x144xbf16> to vector<1x1x144xbf16>
      %48 = vector.broadcast %47 : vector<1x1x144xbf16> to vector<4x16x144xbf16>
      %49 = arith.mulf %46, %48 : vector<4x16x144xbf16>
      %50 = arith.extf %49 : vector<4x16x144xbf16> to vector<4x16x144xf32>
      %51 = arith.addf %45, %50 : vector<4x16x144xf32>
      %c1_40 = arith.constant 1 : index
      %c0_41 = arith.constant 0 : index
      %c0_42 = arith.constant 0 : index
      %52 = vector.load %arg9[%c1_40, %c0_41, %c0_42] : memref<18x18x144xbf16, #tpu.memory_space<vmem>>, vector<4x16x144xbf16>
      %53 = vector.extract_strided_slice %29 {offsets = [1, 0, 0], sizes = [1, 1, 144], strides = [1, 1, 1]} : vector<3x3x144xbf16> to vector<1x1x144xbf16>
      %54 = vector.broadcast %53 : vector<1x1x144xbf16> to vector<4x16x144xbf16>
      %55 = arith.mulf %52, %54 : vector<4x16x144xbf16>
      %56 = arith.extf %55 : vector<4x16x144xbf16> to vector<4x16x144xf32>
      %57 = arith.addf %51, %56 : vector<4x16x144xf32>
      %c1_43 = arith.constant 1 : index
      %c1_44 = arith.constant 1 : index
      %c0_45 = arith.constant 0 : index
      %58 = vector.load %arg9[%c1_43, %c1_44, %c0_45] : memref<18x18x144xbf16, #tpu.memory_space<vmem>>, vector<4x16x144xbf16>
      %59 = vector.extract_strided_slice %29 {offsets = [1, 1, 0], sizes = [1, 1, 144], strides = [1, 1, 1]} : vector<3x3x144xbf16> to vector<1x1x144xbf16>
      %60 = vector.broadcast %59 : vector<1x1x144xbf16> to vector<4x16x144xbf16>
      %61 = arith.mulf %58, %60 : vector<4x16x144xbf16>
      %62 = arith.extf %61 : vector<4x16x144xbf16> to vector<4x16x144xf32>
      %63 = arith.addf %57, %62 : vector<4x16x144xf32>
      %c1_46 = arith.constant 1 : index
      %c2_47 = arith.constant 2 : index
      %c0_48 = arith.constant 0 : index
      %64 = vector.load %arg9[%c1_46, %c2_47, %c0_48] : memref<18x18x144xbf16, #tpu.memory_space<vmem>>, vector<4x16x144xbf16>
      %65 = vector.extract_strided_slice %29 {offsets = [1, 2, 0], sizes = [1, 1, 144], strides = [1, 1, 1]} : vector<3x3x144xbf16> to vector<1x1x144xbf16>
      %66 = vector.broadcast %65 : vector<1x1x144xbf16> to vector<4x16x144xbf16>
      %67 = arith.mulf %64, %66 : vector<4x16x144xbf16>
      %68 = arith.extf %67 : vector<4x16x144xbf16> to vector<4x16x144xf32>
      %69 = arith.addf %63, %68 : vector<4x16x144xf32>
      %c2_49 = arith.constant 2 : index
      %c0_50 = arith.constant 0 : index
      %c0_51 = arith.constant 0 : index
      %70 = vector.load %arg9[%c2_49, %c0_50, %c0_51] : memref<18x18x144xbf16, #tpu.memory_space<vmem>>, vector<4x16x144xbf16>
      %71 = vector.extract_strided_slice %29 {offsets = [2, 0, 0], sizes = [1, 1, 144], strides = [1, 1, 1]} : vector<3x3x144xbf16> to vector<1x1x144xbf16>
      %72 = vector.broadcast %71 : vector<1x1x144xbf16> to vector<4x16x144xbf16>
      %73 = arith.mulf %70, %72 : vector<4x16x144xbf16>
      %74 = arith.extf %73 : vector<4x16x144xbf16> to vector<4x16x144xf32>
      %75 = arith.addf %69, %74 : vector<4x16x144xf32>
      %c2_52 = arith.constant 2 : index
      %c1_53 = arith.constant 1 : index
      %c0_54 = arith.constant 0 : index
      %76 = vector.load %arg9[%c2_52, %c1_53, %c0_54] : memref<18x18x144xbf16, #tpu.memory_space<vmem>>, vector<4x16x144xbf16>
      %77 = vector.extract_strided_slice %29 {offsets = [2, 1, 0], sizes = [1, 1, 144], strides = [1, 1, 1]} : vector<3x3x144xbf16> to vector<1x1x144xbf16>
      %78 = vector.broadcast %77 : vector<1x1x144xbf16> to vector<4x16x144xbf16>
      %79 = arith.mulf %76, %78 : vector<4x16x144xbf16>
      %80 = arith.extf %79 : vector<4x16x144xbf16> to vector<4x16x144xf32>
      %81 = arith.addf %75, %80 : vector<4x16x144xf32>
      %c2_55 = arith.constant 2 : index
      %c2_56 = arith.constant 2 : index
      %c0_57 = arith.constant 0 : index
      %82 = vector.load %arg9[%c2_55, %c2_56, %c0_57] : memref<18x18x144xbf16, #tpu.memory_space<vmem>>, vector<4x16x144xbf16>
      %83 = vector.extract_strided_slice %29 {offsets = [2, 2, 0], sizes = [1, 1, 144], strides = [1, 1, 1]} : vector<3x3x144xbf16> to vector<1x1x144xbf16>
      %84 = vector.broadcast %83 : vector<1x1x144xbf16> to vector<4x16x144xbf16>
      %85 = arith.mulf %82, %84 : vector<4x16x144xbf16>
      %86 = arith.extf %85 : vector<4x16x144xbf16> to vector<4x16x144xf32>
      %87 = arith.addf %81, %86 : vector<4x16x144xf32>
      %88 = vector.shape_cast %87 : vector<4x16x144xf32> to vector<64x144xf32>
      %89 = vector.broadcast %32 : vector<1x144xf32> to vector<64x144xf32>
      %90 = arith.addf %88, %89 : vector<64x144xf32>
      %cst_58 = arith.constant 0.000000e+00 : f32
      %cst_59 = arith.constant 6.000000e+00 : f32
      %91 = vector.broadcast %cst_58 : f32 to vector<64x144xf32>
      %92 = arith.maximumf %91, %90 : vector<64x144xf32>
      %93 = vector.broadcast %cst_59 : f32 to vector<64x144xf32>
      %94 = arith.minimumf %93, %92 : vector<64x144xf32>
      %95 = arith.truncf %94 : vector<64x144xf32> to vector<64x144xbf16>
      %c0_60 = arith.constant 0 : index
      %c0_61 = arith.constant 0 : index
      %96 = vector.load %arg10[%c0_60, %c0_61] : memref<256x144xbf16, #tpu.memory_space<vmem>>, vector<64x144xbf16>
      tpu.vector_store %arg10[%c0_60, %c0_61], %95 {strides = array<i32>} : memref<256x144xbf16, #tpu.memory_space<vmem>>, vector<64x144xbf16>,
      %cst_62 = arith.constant 0.000000e+00 : f32
      %97 = vector.broadcast %cst_62 : f32 to vector<4x16x144xf32>
      %c4 = arith.constant 4 : index
      %c0_63 = arith.constant 0 : index
      %c0_64 = arith.constant 0 : index
      %98 = vector.load %arg9[%c4, %c0_63, %c0_64] : memref<18x18x144xbf16, #tpu.memory_space<vmem>>, vector<4x16x144xbf16>
      %99 = vector.extract_strided_slice %29 {offsets = [0, 0, 0], sizes = [1, 1, 144], strides = [1, 1, 1]} : vector<3x3x144xbf16> to vector<1x1x144xbf16>
      %100 = vector.broadcast %99 : vector<1x1x144xbf16> to vector<4x16x144xbf16>
      %101 = arith.mulf %98, %100 : vector<4x16x144xbf16>
      %102 = arith.extf %101 : vector<4x16x144xbf16> to vector<4x16x144xf32>
      %103 = arith.addf %97, %102 : vector<4x16x144xf32>
      %c4_65 = arith.constant 4 : index
      %c1_66 = arith.constant 1 : index
      %c0_67 = arith.constant 0 : index
      %104 = vector.load %arg9[%c4_65, %c1_66, %c0_67] : memref<18x18x144xbf16, #tpu.memory_space<vmem>>, vector<4x16x144xbf16>
      %105 = vector.extract_strided_slice %29 {offsets = [0, 1, 0], sizes = [1, 1, 144], strides = [1, 1, 1]} : vector<3x3x144xbf16> to vector<1x1x144xbf16>
      %106 = vector.broadcast %105 : vector<1x1x144xbf16> to vector<4x16x144xbf16>
      %107 = arith.mulf %104, %106 : vector<4x16x144xbf16>
      %108 = arith.extf %107 : vector<4x16x144xbf16> to vector<4x16x144xf32>
      %109 = arith.addf %103, %108 : vector<4x16x144xf32>
      %c4_68 = arith.constant 4 : index
      %c2_69 = arith.constant 2 : index
      %c0_70 = arith.constant 0 : index
      %110 = vector.load %arg9[%c4_68, %c2_69, %c0_70] : memref<18x18x144xbf16, #tpu.memory_space<vmem>>, vector<4x16x144xbf16>
      %111 = vector.extract_strided_slice %29 {offsets = [0, 2, 0], sizes = [1, 1, 144], strides = [1, 1, 1]} : vector<3x3x144xbf16> to vector<1x1x144xbf16>
      %112 = vector.broadcast %111 : vector<1x1x144xbf16> to vector<4x16x144xbf16>
      %113 = arith.mulf %110, %112 : vector<4x16x144xbf16>
      %114 = arith.extf %113 : vector<4x16x144xbf16> to vector<4x16x144xf32>
      %115 = arith.addf %109, %114 : vector<4x16x144xf32>
      %c5 = arith.constant 5 : index
      %c0_71 = arith.constant 0 : index
      %c0_72 = arith.constant 0 : index
      %116 = vector.load %arg9[%c5, %c0_71, %c0_72] : memref<18x18x144xbf16, #tpu.memory_space<vmem>>, vector<4x16x144xbf16>
      %117 = vector.extract_strided_slice %29 {offsets = [1, 0, 0], sizes = [1, 1, 144], strides = [1, 1, 1]} : vector<3x3x144xbf16> to vector<1x1x144xbf16>
      %118 = vector.broadcast %117 : vector<1x1x144xbf16> to vector<4x16x144xbf16>
      %119 = arith.mulf %116, %118 : vector<4x16x144xbf16>
      %120 = arith.extf %119 : vector<4x16x144xbf16> to vector<4x16x144xf32>
      %121 = arith.addf %115, %120 : vector<4x16x144xf32>
      %c5_73 = arith.constant 5 : index
      %c1_74 = arith.constant 1 : index
      %c0_75 = arith.constant 0 : index
      %122 = vector.load %arg9[%c5_73, %c1_74, %c0_75] : memref<18x18x144xbf16, #tpu.memory_space<vmem>>, vector<4x16x144xbf16>
      %123 = vector.extract_strided_slice %29 {offsets = [1, 1, 0], sizes = [1, 1, 144], strides = [1, 1, 1]} : vector<3x3x144xbf16> to vector<1x1x144xbf16>
      %124 = vector.broadcast %123 : vector<1x1x144xbf16> to vector<4x16x144xbf16>
      %125 = arith.mulf %122, %124 : vector<4x16x144xbf16>
      %126 = arith.extf %125 : vector<4x16x144xbf16> to vector<4x16x144xf32>
      %127 = arith.addf %121, %126 : vector<4x16x144xf32>
      %c5_76 = arith.constant 5 : index
      %c2_77 = arith.constant 2 : index
      %c0_78 = arith.constant 0 : index
      %128 = vector.load %arg9[%c5_76, %c2_77, %c0_78] : memref<18x18x144xbf16, #tpu.memory_space<vmem>>, vector<4x16x144xbf16>
      %129 = vector.extract_strided_slice %29 {offsets = [1, 2, 0], sizes = [1, 1, 144], strides = [1, 1, 1]} : vector<3x3x144xbf16> to vector<1x1x144xbf16>
      %130 = vector.broadcast %129 : vector<1x1x144xbf16> to vector<4x16x144xbf16>
      %131 = arith.mulf %128, %130 : vector<4x16x144xbf16>
      %132 = arith.extf %131 : vector<4x16x144xbf16> to vector<4x16x144xf32>
      %133 = arith.addf %127, %132 : vector<4x16x144xf32>
      %c6 = arith.constant 6 : index
      %c0_79 = arith.constant 0 : index
      %c0_80 = arith.constant 0 : index
      %134 = vector.load %arg9[%c6, %c0_79, %c0_80] : memref<18x18x144xbf16, #tpu.memory_space<vmem>>, vector<4x16x144xbf16>
      %135 = vector.extract_strided_slice %29 {offsets = [2, 0, 0], sizes = [1, 1, 144], strides = [1, 1, 1]} : vector<3x3x144xbf16> to vector<1x1x144xbf16>
      %136 = vector.broadcast %135 : vector<1x1x144xbf16> to vector<4x16x144xbf16>
      %137 = arith.mulf %134, %136 : vector<4x16x144xbf16>
      %138 = arith.extf %137 : vector<4x16x144xbf16> to vector<4x16x144xf32>
      %139 = arith.addf %133, %138 : vector<4x16x144xf32>
      %c6_81 = arith.constant 6 : index
      %c1_82 = arith.constant 1 : index
      %c0_83 = arith.constant 0 : index
      %140 = vector.load %arg9[%c6_81, %c1_82, %c0_83] : memref<18x18x144xbf16, #tpu.memory_space<vmem>>, vector<4x16x144xbf16>
      %141 = vector.extract_strided_slice %29 {offsets = [2, 1, 0], sizes = [1, 1, 144], strides = [1, 1, 1]} : vector<3x3x144xbf16> to vector<1x1x144xbf16>
      %142 = vector.broadcast %141 : vector<1x1x144xbf16> to vector<4x16x144xbf16>
      %143 = arith.mulf %140, %142 : vector<4x16x144xbf16>
      %144 = arith.extf %143 : vector<4x16x144xbf16> to vector<4x16x144xf32>
      %145 = arith.addf %139, %144 : vector<4x16x144xf32>
      %c6_84 = arith.constant 6 : index
      %c2_85 = arith.constant 2 : index
      %c0_86 = arith.constant 0 : index
      %146 = vector.load %arg9[%c6_84, %c2_85, %c0_86] : memref<18x18x144xbf16, #tpu.memory_space<vmem>>, vector<4x16x144xbf16>
      %147 = vector.extract_strided_slice %29 {offsets = [2, 2, 0], sizes = [1, 1, 144], strides = [1, 1, 1]} : vector<3x3x144xbf16> to vector<1x1x144xbf16>
      %148 = vector.broadcast %147 : vector<1x1x144xbf16> to vector<4x16x144xbf16>
      %149 = arith.mulf %146, %148 : vector<4x16x144xbf16>
      %150 = arith.extf %149 : vector<4x16x144xbf16> to vector<4x16x144xf32>
      %151 = arith.addf %145, %150 : vector<4x16x144xf32>
      %152 = vector.shape_cast %151 : vector<4x16x144xf32> to vector<64x144xf32>
      %153 = vector.broadcast %32 : vector<1x144xf32> to vector<64x144xf32>
      %154 = arith.addf %152, %153 : vector<64x144xf32>
      %cst_87 = arith.constant 0.000000e+00 : f32
      %cst_88 = arith.constant 6.000000e+00 : f32
      %155 = vector.broadcast %cst_87 : f32 to vector<64x144xf32>
      %156 = arith.maximumf %155, %154 : vector<64x144xf32>
      %157 = vector.broadcast %cst_88 : f32 to vector<64x144xf32>
      %158 = arith.minimumf %157, %156 : vector<64x144xf32>
      %159 = arith.truncf %158 : vector<64x144xf32> to vector<64x144xbf16>
      %c64 = arith.constant 64 : index
      %c0_89 = arith.constant 0 : index
      %160 = vector.load %arg10[%c64, %c0_89] : memref<256x144xbf16, #tpu.memory_space<vmem>>, vector<64x144xbf16>
      tpu.vector_store %arg10[%c64, %c0_89], %159 {strides = array<i32>} : memref<256x144xbf16, #tpu.memory_space<vmem>>, vector<64x144xbf16>,
      %cst_90 = arith.constant 0.000000e+00 : f32
      %161 = vector.broadcast %cst_90 : f32 to vector<4x16x144xf32>
      %c8 = arith.constant 8 : index
      %c0_91 = arith.constant 0 : index
      %c0_92 = arith.constant 0 : index
      %162 = vector.load %arg9[%c8, %c0_91, %c0_92] : memref<18x18x144xbf16, #tpu.memory_space<vmem>>, vector<4x16x144xbf16>
      %163 = vector.extract_strided_slice %29 {offsets = [0, 0, 0], sizes = [1, 1, 144], strides = [1, 1, 1]} : vector<3x3x144xbf16> to vector<1x1x144xbf16>
      %164 = vector.broadcast %163 : vector<1x1x144xbf16> to vector<4x16x144xbf16>
      %165 = arith.mulf %162, %164 : vector<4x16x144xbf16>
      %166 = arith.extf %165 : vector<4x16x144xbf16> to vector<4x16x144xf32>
      %167 = arith.addf %161, %166 : vector<4x16x144xf32>
      %c8_93 = arith.constant 8 : index
      %c1_94 = arith.constant 1 : index
      %c0_95 = arith.constant 0 : index
      %168 = vector.load %arg9[%c8_93, %c1_94, %c0_95] : memref<18x18x144xbf16, #tpu.memory_space<vmem>>, vector<4x16x144xbf16>
      %169 = vector.extract_strided_slice %29 {offsets = [0, 1, 0], sizes = [1, 1, 144], strides = [1, 1, 1]} : vector<3x3x144xbf16> to vector<1x1x144xbf16>
      %170 = vector.broadcast %169 : vector<1x1x144xbf16> to vector<4x16x144xbf16>
      %171 = arith.mulf %168, %170 : vector<4x16x144xbf16>
      %172 = arith.extf %171 : vector<4x16x144xbf16> to vector<4x16x144xf32>
      %173 = arith.addf %167, %172 : vector<4x16x144xf32>
      %c8_96 = arith.constant 8 : index
      %c2_97 = arith.constant 2 : index
      %c0_98 = arith.constant 0 : index
      %174 = vector.load %arg9[%c8_96, %c2_97, %c0_98] : memref<18x18x144xbf16, #tpu.memory_space<vmem>>, vector<4x16x144xbf16>
      %175 = vector.extract_strided_slice %29 {offsets = [0, 2, 0], sizes = [1, 1, 144], strides = [1, 1, 1]} : vector<3x3x144xbf16> to vector<1x1x144xbf16>
      %176 = vector.broadcast %175 : vector<1x1x144xbf16> to vector<4x16x144xbf16>
      %177 = arith.mulf %174, %176 : vector<4x16x144xbf16>
      %178 = arith.extf %177 : vector<4x16x144xbf16> to vector<4x16x144xf32>
      %179 = arith.addf %173, %178 : vector<4x16x144xf32>
      %c9 = arith.constant 9 : index
      %c0_99 = arith.constant 0 : index
      %c0_100 = arith.constant 0 : index
      %180 = vector.load %arg9[%c9, %c0_99, %c0_100] : memref<18x18x144xbf16, #tpu.memory_space<vmem>>, vector<4x16x144xbf16>
      %181 = vector.extract_strided_slice %29 {offsets = [1, 0, 0], sizes = [1, 1, 144], strides = [1, 1, 1]} : vector<3x3x144xbf16> to vector<1x1x144xbf16>
      %182 = vector.broadcast %181 : vector<1x1x144xbf16> to vector<4x16x144xbf16>
      %183 = arith.mulf %180, %182 : vector<4x16x144xbf16>
      %184 = arith.extf %183 : vector<4x16x144xbf16> to vector<4x16x144xf32>
      %185 = arith.addf %179, %184 : vector<4x16x144xf32>
      %c9_101 = arith.constant 9 : index
      %c1_102 = arith.constant 1 : index
      %c0_103 = arith.constant 0 : index
      %186 = vector.load %arg9[%c9_101, %c1_102, %c0_103] : memref<18x18x144xbf16, #tpu.memory_space<vmem>>, vector<4x16x144xbf16>
      %187 = vector.extract_strided_slice %29 {offsets = [1, 1, 0], sizes = [1, 1, 144], strides = [1, 1, 1]} : vector<3x3x144xbf16> to vector<1x1x144xbf16>
      %188 = vector.broadcast %187 : vector<1x1x144xbf16> to vector<4x16x144xbf16>
      %189 = arith.mulf %186, %188 : vector<4x16x144xbf16>
      %190 = arith.extf %189 : vector<4x16x144xbf16> to vector<4x16x144xf32>
      %191 = arith.addf %185, %190 : vector<4x16x144xf32>
      %c9_104 = arith.constant 9 : index
      %c2_105 = arith.constant 2 : index
      %c0_106 = arith.constant 0 : index
      %192 = vector.load %arg9[%c9_104, %c2_105, %c0_106] : memref<18x18x144xbf16, #tpu.memory_space<vmem>>, vector<4x16x144xbf16>
      %193 = vector.extract_strided_slice %29 {offsets = [1, 2, 0], sizes = [1, 1, 144], strides = [1, 1, 1]} : vector<3x3x144xbf16> to vector<1x1x144xbf16>
      %194 = vector.broadcast %193 : vector<1x1x144xbf16> to vector<4x16x144xbf16>
      %195 = arith.mulf %192, %194 : vector<4x16x144xbf16>
      %196 = arith.extf %195 : vector<4x16x144xbf16> to vector<4x16x144xf32>
      %197 = arith.addf %191, %196 : vector<4x16x144xf32>
      %c10 = arith.constant 10 : index
      %c0_107 = arith.constant 0 : index
      %c0_108 = arith.constant 0 : index
      %198 = vector.load %arg9[%c10, %c0_107, %c0_108] : memref<18x18x144xbf16, #tpu.memory_space<vmem>>, vector<4x16x144xbf16>
      %199 = vector.extract_strided_slice %29 {offsets = [2, 0, 0], sizes = [1, 1, 144], strides = [1, 1, 1]} : vector<3x3x144xbf16> to vector<1x1x144xbf16>
      %200 = vector.broadcast %199 : vector<1x1x144xbf16> to vector<4x16x144xbf16>
      %201 = arith.mulf %198, %200 : vector<4x16x144xbf16>
      %202 = arith.extf %201 : vector<4x16x144xbf16> to vector<4x16x144xf32>
      %203 = arith.addf %197, %202 : vector<4x16x144xf32>
      %c10_109 = arith.constant 10 : index
      %c1_110 = arith.constant 1 : index
      %c0_111 = arith.constant 0 : index
      %204 = vector.load %arg9[%c10_109, %c1_110, %c0_111] : memref<18x18x144xbf16, #tpu.memory_space<vmem>>, vector<4x16x144xbf16>
      %205 = vector.extract_strided_slice %29 {offsets = [2, 1, 0], sizes = [1, 1, 144], strides = [1, 1, 1]} : vector<3x3x144xbf16> to vector<1x1x144xbf16>
      %206 = vector.broadcast %205 : vector<1x1x144xbf16> to vector<4x16x144xbf16>
      %207 = arith.mulf %204, %206 : vector<4x16x144xbf16>
      %208 = arith.extf %207 : vector<4x16x144xbf16> to vector<4x16x144xf32>
      %209 = arith.addf %203, %208 : vector<4x16x144xf32>
      %c10_112 = arith.constant 10 : index
      %c2_113 = arith.constant 2 : index
      %c0_114 = arith.constant 0 : index
      %210 = vector.load %arg9[%c10_112, %c2_113, %c0_114] : memref<18x18x144xbf16, #tpu.memory_space<vmem>>, vector<4x16x144xbf16>
      %211 = vector.extract_strided_slice %29 {offsets = [2, 2, 0], sizes = [1, 1, 144], strides = [1, 1, 1]} : vector<3x3x144xbf16> to vector<1x1x144xbf16>
      %212 = vector.broadcast %211 : vector<1x1x144xbf16> to vector<4x16x144xbf16>
      %213 = arith.mulf %210, %212 : vector<4x16x144xbf16>
      %214 = arith.extf %213 : vector<4x16x144xbf16> to vector<4x16x144xf32>
      %215 = arith.addf %209, %214 : vector<4x16x144xf32>
      %216 = vector.shape_cast %215 : vector<4x16x144xf32> to vector<64x144xf32>
      %217 = vector.broadcast %32 : vector<1x144xf32> to vector<64x144xf32>
      %218 = arith.addf %216, %217 : vector<64x144xf32>
      %cst_115 = arith.constant 0.000000e+00 : f32
      %cst_116 = arith.constant 6.000000e+00 : f32
      %219 = vector.broadcast %cst_115 : f32 to vector<64x144xf32>
      %220 = arith.maximumf %219, %218 : vector<64x144xf32>
      %221 = vector.broadcast %cst_116 : f32 to vector<64x144xf32>
      %222 = arith.minimumf %221, %220 : vector<64x144xf32>
      %223 = arith.truncf %222 : vector<64x144xf32> to vector<64x144xbf16>
      %c128 = arith.constant 128 : index
      %c0_117 = arith.constant 0 : index
      %224 = vector.load %arg10[%c128, %c0_117] : memref<256x144xbf16, #tpu.memory_space<vmem>>, vector<64x144xbf16>
      tpu.vector_store %arg10[%c128, %c0_117], %223 {strides = array<i32>} : memref<256x144xbf16, #tpu.memory_space<vmem>>, vector<64x144xbf16>,
      %cst_118 = arith.constant 0.000000e+00 : f32
      %225 = vector.broadcast %cst_118 : f32 to vector<4x16x144xf32>
      %c12 = arith.constant 12 : index
      %c0_119 = arith.constant 0 : index
      %c0_120 = arith.constant 0 : index
      %226 = vector.load %arg9[%c12, %c0_119, %c0_120] : memref<18x18x144xbf16, #tpu.memory_space<vmem>>, vector<4x16x144xbf16>
      %227 = vector.extract_strided_slice %29 {offsets = [0, 0, 0], sizes = [1, 1, 144], strides = [1, 1, 1]} : vector<3x3x144xbf16> to vector<1x1x144xbf16>
      %228 = vector.broadcast %227 : vector<1x1x144xbf16> to vector<4x16x144xbf16>
      %229 = arith.mulf %226, %228 : vector<4x16x144xbf16>
      %230 = arith.extf %229 : vector<4x16x144xbf16> to vector<4x16x144xf32>
      %231 = arith.addf %225, %230 : vector<4x16x144xf32>
      %c12_121 = arith.constant 12 : index
      %c1_122 = arith.constant 1 : index
      %c0_123 = arith.constant 0 : index
      %232 = vector.load %arg9[%c12_121, %c1_122, %c0_123] : memref<18x18x144xbf16, #tpu.memory_space<vmem>>, vector<4x16x144xbf16>
      %233 = vector.extract_strided_slice %29 {offsets = [0, 1, 0], sizes = [1, 1, 144], strides = [1, 1, 1]} : vector<3x3x144xbf16> to vector<1x1x144xbf16>
      %234 = vector.broadcast %233 : vector<1x1x144xbf16> to vector<4x16x144xbf16>
      %235 = arith.mulf %232, %234 : vector<4x16x144xbf16>
      %236 = arith.extf %235 : vector<4x16x144xbf16> to vector<4x16x144xf32>
      %237 = arith.addf %231, %236 : vector<4x16x144xf32>
      %c12_124 = arith.constant 12 : index
      %c2_125 = arith.constant 2 : index
      %c0_126 = arith.constant 0 : index
      %238 = vector.load %arg9[%c12_124, %c2_125, %c0_126] : memref<18x18x144xbf16, #tpu.memory_space<vmem>>, vector<4x16x144xbf16>
      %239 = vector.extract_strided_slice %29 {offsets = [0, 2, 0], sizes = [1, 1, 144], strides = [1, 1, 1]} : vector<3x3x144xbf16> to vector<1x1x144xbf16>
      %240 = vector.broadcast %239 : vector<1x1x144xbf16> to vector<4x16x144xbf16>
      %241 = arith.mulf %238, %240 : vector<4x16x144xbf16>
      %242 = arith.extf %241 : vector<4x16x144xbf16> to vector<4x16x144xf32>
      %243 = arith.addf %237, %242 : vector<4x16x144xf32>
      %c13 = arith.constant 13 : index
      %c0_127 = arith.constant 0 : index
      %c0_128 = arith.constant 0 : index
      %244 = vector.load %arg9[%c13, %c0_127, %c0_128] : memref<18x18x144xbf16, #tpu.memory_space<vmem>>, vector<4x16x144xbf16>
      %245 = vector.extract_strided_slice %29 {offsets = [1, 0, 0], sizes = [1, 1, 144], strides = [1, 1, 1]} : vector<3x3x144xbf16> to vector<1x1x144xbf16>
      %246 = vector.broadcast %245 : vector<1x1x144xbf16> to vector<4x16x144xbf16>
      %247 = arith.mulf %244, %246 : vector<4x16x144xbf16>
      %248 = arith.extf %247 : vector<4x16x144xbf16> to vector<4x16x144xf32>
      %249 = arith.addf %243, %248 : vector<4x16x144xf32>
      %c13_129 = arith.constant 13 : index
      %c1_130 = arith.constant 1 : index
      %c0_131 = arith.constant 0 : index
      %250 = vector.load %arg9[%c13_129, %c1_130, %c0_131] : memref<18x18x144xbf16, #tpu.memory_space<vmem>>, vector<4x16x144xbf16>
      %251 = vector.extract_strided_slice %29 {offsets = [1, 1, 0], sizes = [1, 1, 144], strides = [1, 1, 1]} : vector<3x3x144xbf16> to vector<1x1x144xbf16>
      %252 = vector.broadcast %251 : vector<1x1x144xbf16> to vector<4x16x144xbf16>
      %253 = arith.mulf %250, %252 : vector<4x16x144xbf16>
      %254 = arith.extf %253 : vector<4x16x144xbf16> to vector<4x16x144xf32>
      %255 = arith.addf %249, %254 : vector<4x16x144xf32>
      %c13_132 = arith.constant 13 : index
      %c2_133 = arith.constant 2 : index
      %c0_134 = arith.constant 0 : index
      %256 = vector.load %arg9[%c13_132, %c2_133, %c0_134] : memref<18x18x144xbf16, #tpu.memory_space<vmem>>, vector<4x16x144xbf16>
      %257 = vector.extract_strided_slice %29 {offsets = [1, 2, 0], sizes = [1, 1, 144], strides = [1, 1, 1]} : vector<3x3x144xbf16> to vector<1x1x144xbf16>
      %258 = vector.broadcast %257 : vector<1x1x144xbf16> to vector<4x16x144xbf16>
      %259 = arith.mulf %256, %258 : vector<4x16x144xbf16>
      %260 = arith.extf %259 : vector<4x16x144xbf16> to vector<4x16x144xf32>
      %261 = arith.addf %255, %260 : vector<4x16x144xf32>
      %c14 = arith.constant 14 : index
      %c0_135 = arith.constant 0 : index
      %c0_136 = arith.constant 0 : index
      %262 = vector.load %arg9[%c14, %c0_135, %c0_136] : memref<18x18x144xbf16, #tpu.memory_space<vmem>>, vector<4x16x144xbf16>
      %263 = vector.extract_strided_slice %29 {offsets = [2, 0, 0], sizes = [1, 1, 144], strides = [1, 1, 1]} : vector<3x3x144xbf16> to vector<1x1x144xbf16>
      %264 = vector.broadcast %263 : vector<1x1x144xbf16> to vector<4x16x144xbf16>
      %265 = arith.mulf %262, %264 : vector<4x16x144xbf16>
      %266 = arith.extf %265 : vector<4x16x144xbf16> to vector<4x16x144xf32>
      %267 = arith.addf %261, %266 : vector<4x16x144xf32>
      %c14_137 = arith.constant 14 : index
      %c1_138 = arith.constant 1 : index
      %c0_139 = arith.constant 0 : index
      %268 = vector.load %arg9[%c14_137, %c1_138, %c0_139] : memref<18x18x144xbf16, #tpu.memory_space<vmem>>, vector<4x16x144xbf16>
      %269 = vector.extract_strided_slice %29 {offsets = [2, 1, 0], sizes = [1, 1, 144], strides = [1, 1, 1]} : vector<3x3x144xbf16> to vector<1x1x144xbf16>
      %270 = vector.broadcast %269 : vector<1x1x144xbf16> to vector<4x16x144xbf16>
      %271 = arith.mulf %268, %270 : vector<4x16x144xbf16>
      %272 = arith.extf %271 : vector<4x16x144xbf16> to vector<4x16x144xf32>
      %273 = arith.addf %267, %272 : vector<4x16x144xf32>
      %c14_140 = arith.constant 14 : index
      %c2_141 = arith.constant 2 : index
      %c0_142 = arith.constant 0 : index
      %274 = vector.load %arg9[%c14_140, %c2_141, %c0_142] : memref<18x18x144xbf16, #tpu.memory_space<vmem>>, vector<4x16x144xbf16>
      %275 = vector.extract_strided_slice %29 {offsets = [2, 2, 0], sizes = [1, 1, 144], strides = [1, 1, 1]} : vector<3x3x144xbf16> to vector<1x1x144xbf16>
      %276 = vector.broadcast %275 : vector<1x1x144xbf16> to vector<4x16x144xbf16>
      %277 = arith.mulf %274, %276 : vector<4x16x144xbf16>
      %278 = arith.extf %277 : vector<4x16x144xbf16> to vector<4x16x144xf32>
      %279 = arith.addf %273, %278 : vector<4x16x144xf32>
      %280 = vector.shape_cast %279 : vector<4x16x144xf32> to vector<64x144xf32>
      %281 = vector.broadcast %32 : vector<1x144xf32> to vector<64x144xf32>
      %282 = arith.addf %280, %281 : vector<64x144xf32>
      %cst_143 = arith.constant 0.000000e+00 : f32
      %cst_144 = arith.constant 6.000000e+00 : f32
      %283 = vector.broadcast %cst_143 : f32 to vector<64x144xf32>
      %284 = arith.maximumf %283, %282 : vector<64x144xf32>
      %285 = vector.broadcast %cst_144 : f32 to vector<64x144xf32>
      %286 = arith.minimumf %285, %284 : vector<64x144xf32>
      %287 = arith.truncf %286 : vector<64x144xf32> to vector<64x144xbf16>
      %c192 = arith.constant 192 : index
      %c0_145 = arith.constant 0 : index
      %288 = vector.load %arg10[%c192, %c0_145] : memref<256x144xbf16, #tpu.memory_space<vmem>>, vector<64x144xbf16>
      tpu.vector_store %arg10[%c192, %c0_145], %287 {strides = array<i32>} : memref<256x144xbf16, #tpu.memory_space<vmem>>, vector<64x144xbf16>,
      %c0_146 = arith.constant 0 : index
      %c0_147 = arith.constant 0 : index
      %289 = vector.load %arg10[%c0_146, %c0_147] : memref<256x144xbf16, #tpu.memory_space<vmem>>, vector<256x144xbf16>
      %290 = arith.index_cast %arg11 : i32 to index
      %c0_148 = arith.constant 0 : index
      %c0_149 = arith.constant 0 : index
      %291 = vector.load %arg6[%290, %c0_148, %c0_149] : memref<30x144x128xbf16, #tpu.memory_space<vmem>>, vector<1x144x128xbf16>
      %292 = vector.shape_cast %291 : vector<1x144x128xbf16> to vector<144x128xbf16>
      %cst_150 = arith.constant dense<0.000000e+00> : vector<256x128xf32>
      %293 = tpu.matmul %289, %292, %cst_150 {dimension_numbers = #tpu.dot_dimension_numbers<[1], [0], [0], [1], [0, 0, 1, 1], [], []>} : vector<256x144xbf16>, vector<144x128xbf16>, vector<256x128xf32> -> vector<256x128xf32>
      %294 = arith.index_cast %arg11 : i32 to index
      %c0_151 = arith.constant 0 : index
      %c0_152 = arith.constant 0 : index
      %295 = vector.load %arg7[%294, %c0_151, %c0_152] : memref<30x1x128xf32, #tpu.memory_space<vmem>>, vector<1x1x128xf32>
      %296 = vector.shape_cast %295 : vector<1x1x128xf32> to vector<1x128xf32>
      %297 = vector.broadcast %296 : vector<1x128xf32> to vector<256x128xf32>
      %298 = arith.addf %293, %297 : vector<256x128xf32>
      %299 = arith.truncf %298 : vector<256x128xf32> to vector<256x128xbf16>
      %c0_153 = arith.constant 0 : index
      %300 = arith.index_cast %arg11 : i32 to index
      %c0_154 = arith.constant 0 : index
      %c0_155 = arith.constant 0 : index
      %301 = vector.load %arg8[%c0_153, %300, %c0_154, %c0_155] : memref<1x30x256x128xbf16, #tpu.memory_space<vmem>>, vector<1x1x256x128xbf16>
      %302 = vector.shape_cast %301 : vector<1x1x256x128xbf16> to vector<256x128xbf16>
      %303 = vector.shape_cast %299 : vector<256x128xbf16> to vector<1x1x256x128xbf16>
      tpu.vector_store %arg8[%c0_153, %300, %c0_154, %c0_155], %303 {strides = array<i32>} : memref<1x30x256x128xbf16, #tpu.memory_space<vmem>>, vector<1x1x256x128xbf16>,
    }
    %c30_i32_13 = arith.constant 30 : i32
    return
  }
  func.func @transform_0(%arg0: i32) -> (i32, i32, i32) {
    %c0_i32 = arith.constant 0 : i32
    %c0_i32_0 = arith.constant 0 : i32
    %c0_i32_1 = arith.constant 0 : i32
    return %arg0, %c0_i32, %c0_i32_0 : i32, i32, i32
  }
  func.func @transform_1(%arg0: i32) -> (i32, i32, i32) {
    %c0_i32 = arith.constant 0 : i32
    %c0_i32_0 = arith.constant 0 : i32
    %c0_i32_1 = arith.constant 0 : i32
    %c0_i32_2 = arith.constant 0 : i32
    return %c0_i32, %c0_i32_0, %c0_i32_1 : i32, i32, i32
  }
  func.func @transform_2(%arg0: i32) -> (i32, i32, i32) {
    %c0_i32 = arith.constant 0 : i32
    %c0_i32_0 = arith.constant 0 : i32
    %c0_i32_1 = arith.constant 0 : i32
    %c0_i32_2 = arith.constant 0 : i32
    return %c0_i32, %c0_i32_0, %c0_i32_1 : i32, i32, i32
  }
  func.func @transform_3(%arg0: i32) -> (i32, i32, i32, i32) {
    %c0_i32 = arith.constant 0 : i32
    %c0_i32_0 = arith.constant 0 : i32
    %c0_i32_1 = arith.constant 0 : i32
    %c0_i32_2 = arith.constant 0 : i32
    %c0_i32_3 = arith.constant 0 : i32
    return %c0_i32, %c0_i32_0, %c0_i32_1, %c0_i32_2 : i32, i32, i32, i32
  }
  func.func @transform_4(%arg0: i32) -> (i32, i32, i32) {
    %c0_i32 = arith.constant 0 : i32
    %c0_i32_0 = arith.constant 0 : i32
    %c0_i32_1 = arith.constant 0 : i32
    %c0_i32_2 = arith.constant 0 : i32
    return %c0_i32, %c0_i32_0, %c0_i32_1 : i32, i32, i32
  }
  func.func @transform_5(%arg0: i32) -> (i32, i32, i32) {
    %c0_i32 = arith.constant 0 : i32
    %c0_i32_0 = arith.constant 0 : i32
    %c0_i32_1 = arith.constant 0 : i32
    %c0_i32_2 = arith.constant 0 : i32
    return %c0_i32, %c0_i32_0, %c0_i32_1 : i32, i32, i32
  }
  func.func @transform_6(%arg0: i32) -> (i32, i32, i32) {
    %c0_i32 = arith.constant 0 : i32
    %c0_i32_0 = arith.constant 0 : i32
    %c0_i32_1 = arith.constant 0 : i32
    %c0_i32_2 = arith.constant 0 : i32
    return %c0_i32, %c0_i32_0, %c0_i32_1 : i32, i32, i32
  }
  func.func @transform_7(%arg0: i32) -> (i32, i32, i32, i32) {
    %c0_i32 = arith.constant 0 : i32
    %c0_i32_0 = arith.constant 0 : i32
    %c0_i32_1 = arith.constant 0 : i32
    %c0_i32_2 = arith.constant 0 : i32
    return %arg0, %c0_i32, %c0_i32_0, %c0_i32_1 : i32, i32, i32, i32
  }
}

</mosaic_0001>

<bundles_post_ra>
// kernel: _lambda_.1
= control target key start
LH: loop header
LB: loop body
LE: loop exit
PB: predicated region body
PF: predicated region fallthrough
CT: control target
= control target key end

     0   :  { %12 = vsyncpa [#allocation5], 0  ;;  %s13869_s0 = inlined_call_operand.vmem [shape: bf16[2,256,24], index: 0, kind: input, shape index: {}]   ;;  %s13870_s1 = inlined_call_operand.hbm [shape: bf16[30,24,144], index: 1, kind: input, shape index: {}]   ;;  %s13871_s2 = inlined_call_operand.hbm [shape: f32[30,1,144], index: 2, kind: input, shape index: {}]   ;;  %s13872_s3 = inlined_call_operand.vmem [shape: bf16[30,3,3,144], index: 3, kind: input, shape index: {}]   ;;  %s13873_s4 = inlined_call_operand.hbm [shape: f32[30,1,144], index: 4, kind: input, shape index: {}]   ;;  %s13874_s5 = inlined_call_operand.hbm [shape: bf16[30,144,128], index: 5, kind: input, shape index: {}]   ;;  %s13875_s6 = inlined_call_operand.hbm [shape: f32[30,1,128], index: 6, kind: input, shape index: {}]   ;;  %s13876_s7 = inlined_call_operand.vmem [shape: bf16[2,30,256,128], index: 7, kind: output, shape index: {}]  }
   0x1   :  { %13 = vsyncpa [#allocation7], 0 }
   0x2   :  { %14 = vsyncpa [#allocation10], 0  ;;  %s8454_s24 = smov 0  }
   0x3 LB: > { %s228_s27 = sshll.u32 %s13871_s2, 4  ;;  %s8463_s28 = sadd.s32 4294967295, %s8394_s24   ;;  %s8394_s24 = sphi %s8454_s24, %s20_s24   ;;  %s229_s27 = int_to_ptr.hbm [resolvable:$true] %s228_s27 }
   0x4   : > { %p7675_p0 = scmp.ge.s32.totalorder %s8394_s24, 1  ;;  %p203_p1 = scmp.lt.s32.totalorder %s8394_s24, 3 }
   0x5   : > { %p8179_p2 = scmp.eq.s32.totalorder %s8463_s28, 0  ;;  %s8400_s30 = smov [#allocation6]  }
   0x6   : > { %p8468_p3 = pnand %p7675_p0, %p203_p1  ;;  %s230_s8 = sshll.u32 %s8400_s30, 4  ;;  %s231_s8 = int_to_ptr.vmem [resolvable:$true] %s230_s8 }
   0x7   : > { %s259_s11 = sshll.u32 %s13874_s5, 4  ;;  %s8401_s13 = smov [#allocation9]   ;;  %s260_s11 = int_to_ptr.hbm [resolvable:$true] %s259_s11 }
   0x8   : > { %p8163_p4 = pneg %p8468_p3  ;;  %s261_s14 = sshll.u32 %s8401_s13, 4  ;;  %s262_s14 = int_to_ptr.vmem [resolvable:$true] %s261_s14 }
   0x9   : > { %s8402_s15 = smov 32   ;;  %s8403_s16 = smov 2  }
   0xa   : > { %p8479_p5 = pnand %p8179_p2, %p8163_p4  ;;  %s214_s19 = sshll.u32 %s13870_s1, 4  ;;  %s215_s19 = int_to_ptr.hbm [resolvable:$true] %s214_s19 }
   0xb   : > { %s8404_s20 = smov 64   ;;  %s8405_s21 = smov 4  }
   0xc   : > { %8169 = dma.hbm_to_vmem [thread:$0]  (!%p8479_p5), %s229_s27, 960, %s231_s8, [#allocation7], %s8402_s15, %s8402_s15, %s8403_s16  }
   0xd   : > { %8175 = dma.hbm_to_vmem [thread:$0]  (!%p8479_p5), %s260_s11, 34560, %s262_s14, [#allocation10], %s8404_s20, %s8404_s20, %s8405_s21  }
   0xe   : > { %s8406_s22 = smov [#allocation4]   ;;  %s8407_s25 = smov 128  }
   0xf   : > { %s216_s23 = sshll.u32 %s8406_s22, 4  ;;  %s8408_s26 = smov 8   ;;  %s217_s23 = int_to_ptr.vmem [resolvable:$true] %s216_s23 }
  0x10   : > { %8166 = dma.hbm_to_vmem [thread:$0]  (!%p8479_p5), %s215_s19, 11520, %s217_s23, [#allocation5], %s8407_s25, %s8407_s25, %s8408_s26  }
  0x11   : > { %s245_s8 = sshll.u32 %s13873_s4, 4  ;;  %s8409_s9 = smov [#allocation8]   ;;  %s246_s8 = int_to_ptr.hbm [resolvable:$true] %s245_s8 }
  0x12   : > { %s247_s10 = sshll.u32 %s8409_s9, 4  ;;  %s273_s11 = sshll.u32 %s13875_s6, 4  ;;  %s248_s10 = int_to_ptr.vmem [resolvable:$true] %s247_s10  ;;  %s274_s11 = int_to_ptr.hbm [resolvable:$true] %s273_s11 }
  0x13   : > { %8172 = dma.hbm_to_vmem [thread:$0]  (!%p8479_p5), %s246_s8, 960, %s248_s10, [#allocation7], %s8402_s15, %s8402_s15, %s8403_s16  }
  0x14   : > { %s8410_s14 = smov [#allocation11]   ;;  %s8411_s20 = smov 16  }
  0x15   : > { %s275_s18 = sshll.u32 %s8410_s14, 4  ;;  %s8412_s19 = smov 1   ;;  %s276_s18 = int_to_ptr.vmem [resolvable:$true] %s275_s18 }
  0x16   : > { %8178 = dma.hbm_to_vmem [thread:$0]  (!%p8479_p5), %s274_s11, 480, %s276_s18, [#allocation10], %s8411_s20, %s8411_s20, %s8412_s19  }
  0x17   : > { %299 = sbr.rel (%p8468_p3) target bundleno = 1594 (0x63a), region = 48 }
  0x1c   : > { %8381 = dma.done.wait (%p8179_p2), [#allocation5], 11520  }
  0x1d   : > { %8383 = vsyncadd (%p8179_p2), [#allocation5], 4294955776 }
  0x1e   : > { %8385 = dma.done.wait (%p8179_p2), [#allocation7], 1920  }
  0x1f   : > { %8387 = vsyncadd (%p8179_p2), [#allocation7], 4294965376 }
  0x20   : > { %8389 = dma.done.wait (%p8179_p2), [#allocation10], 35040  }
  0x21   : > { %8391 = vsyncadd (%p8179_p2), [#allocation10], 4294932256  ;;  %p352_p6 = scmp.lt.s32.totalorder %s8463_s28, 1  ;;  %vm363_vm0 = vcmask 1043456   ;;  %vm364_vm1 = vcmask 130052   ;;  %v14156_v0 = vmov 0 }
  0x22   : > { %vm8519_vm2 = vmor %vm364_vm1, %vm363_vm0  ;;  %vm368_vm3 = vcmask 1040384   ;;  %vm369_vm4 = vcmask 126980   ;;  %vm377_vm5 = vsmask.f32 256  ;;  %vm380_vm6 = vsmask.f32 4352 }
  0x23   : > { %v14157_v0 = vsel %vm8519_vm2, 4294967295, %v14156_v0  ;;  %s15541_s28 = smov (!%p352_p6, %s8463_s28), 1  ;;  %v8413_v1 = vmov 0   ;;  %vm370_vm7 = vmor %vm369_vm4, %vm368_vm3  ;;  %v14159_v2 = vmov 0  ;;  %vm437_vm11 = vsmask.f32 7938 }
  0x24   : > { %14158 = vst [vmem:[#allocation15_spill] sm:$0xff] %v14157_v0  ;;  %vm378_vm8 = vmand %vm368_vm3, %vm377_vm5  ;;  %s7983_s29 = sshll.u32 %s15541_s28, 7  ;;  %s8142_s12 = smul.u32 3840, %s15541_s28  ;;  %vm439_vm12 = vsmask.f32 7954 }
  0x25   : > { %366 = vst.msk [vmem:[#allocation2] sm:$0xff] %vm8519_vm2, %v8413_v1  ;;  %vm381_vm9 = vmand %vm369_vm4, %vm380_vm6  ;;  %s8538_s21 = scalar_lea.vmem %s13869_s0, %s7983_s29  ;;  %v386_v3 = vld [vmem:[#allocation2 + $0x18] sm:$0x11]  ;;  %v389_v4 = vld [vmem:[#allocation2 + $0x30] sm:$0x11]  ;;  %s8631_s25 = smov 0  }
  0x26   : > { %367 = vst.msk [vmem:[#allocation2 + $0x8] sm:$0xff] %vm8519_vm2, %v8413_v1  ;;  %vm8542_vm10 = vmor %vm381_vm9, %vm378_vm8  ;;  %s8549_s28 = scalar_lea.vmem %s13876_s7, %s8142_s12  ;;  %v392_v7 = vld [vmem:[#allocation2 + $0x48] sm:$0x11]  ;;  %v395_v8 = vld [vmem:[#allocation2 + $0x60] sm:$0x11] }
  0x27   : > { %373 = vst.msk [vmem:[#allocation2 + $0x198] sm:$0xff] %vm8519_vm2, %v8413_v1  ;;  %v14160_v2 = vsel %vm8542_vm10, 4294967295, %v14159_v2  ;;  %v387_v5 = vsel %vm8542_vm10, 0, %v386_v3  ;;  %v390_v6 = vsel %vm8542_vm10, 0, %v389_v4  ;;  %v393_v10 = vsel %vm8542_vm10, 0, %v392_v7  ;;  %vm438_vm13 = vmand %vm368_vm3, %vm437_vm11 }
  0x28   : > { %374 = vst.msk [vmem:[#allocation2 + $0x1a0] sm:$0xff] %vm8519_vm2, %v8413_v1  ;;  %v396_v12 = vsel %vm8542_vm10, 0, %v395_v8  ;;  %v398_v13 = vld [vmem:[#allocation2 + $0x78] sm:$0x11]  ;;  %v401_v15 = vld [vmem:[#allocation2 + $0x90] sm:$0x11]  ;;  %vm440_vm14 = vmand %vm369_vm4, %vm439_vm12 }
  0x29   : > { %14161 = vst [vmem:[#allocation16_spill] sm:$0xff] %v14160_v2  ;;  %v399_v14 = vsel %vm8542_vm10, 0, %v398_v13  ;;  %v402_v16 = vsel %vm8542_vm10, 0, %v401_v15  ;;  %v404_v17 = vld [vmem:[#allocation2 + $0xa8] sm:$0x11]  ;;  %vm8585_vm15 = vmor %vm440_vm14, %vm438_vm13 }
  0x2a   : > { %371 = vst.msk [vmem:[#allocation2 + $0x10] sm:$0x11] %vm370_vm7, %v8413_v1  ;;  %v405_v18 = vsel %vm8542_vm10, 0, %v404_v17  ;;  %v407_v19 = vld [vmem:[#allocation2 + $0xc0] sm:$0x11] }
  0x2b   : > { %375 = vst.msk [vmem:[#allocation2 + $0x1a8] sm:$0x11] %vm370_vm7, %v8413_v1  ;;  %v408_v20 = vsel %vm8542_vm10, 0, %v407_v19  ;;  %v410_v21 = vld [vmem:[#allocation2 + $0xd8] sm:$0x11] }
  0x2c   : > { %v383_v9 = vld [vmem:[#allocation2] sm:$0x11]  ;;  %388 = vst [vmem:[#allocation2 + $0x18] sm:$0x11] %v387_v5  ;;  %v411_v22 = vsel %vm8542_vm10, 0, %v410_v21 }
  0x2d   : > { %v384_v11 = vsel %vm8542_vm10, 0, %v383_v9  ;;  %391 = vst [vmem:[#allocation2 + $0x30] sm:$0x11] %v390_v6  ;;  %v413_v23 = vld [vmem:[#allocation2 + $0xf0] sm:$0x11] }
  0x2e   : > { %385 = vst [vmem:[#allocation2] sm:$0x11] %v384_v11  ;;  %v414_v24 = vsel %vm8542_vm10, 0, %v413_v23  ;;  %v416_v25 = vld [vmem:[#allocation2 + $0x108] sm:$0x11] }
  0x2f   : > { %394 = vst [vmem:[#allocation2 + $0x48] sm:$0x11] %v393_v10  ;;  %v417_v26 = vsel %vm8542_vm10, 0, %v416_v25  ;;  %v419_v27 = vld [vmem:[#allocation2 + $0x120] sm:$0x11] }
  0x30   : > { %397 = vst [vmem:[#allocation2 + $0x60] sm:$0x11] %v396_v12  ;;  %v420_v28 = vsel %vm8542_vm10, 0, %v419_v27  ;;  %v422_v29 = vld [vmem:[#allocation2 + $0x138] sm:$0x11] }
  0x31   : > { %400 = vst [vmem:[#allocation2 + $0x78] sm:$0x11] %v399_v14  ;;  %v423_v30 = vsel %vm8542_vm10, 0, %v422_v29  ;;  %v425_v31 = vld [vmem:[#allocation2 + $0x150] sm:$0x11] }
  0x32   : > { %403 = vst [vmem:[#allocation2 + $0x90] sm:$0x11] %v402_v16  ;;  %v426_v32 = vsel %vm8542_vm10, 0, %v425_v31  ;;  %v428_v33 = vld [vmem:[#allocation2 + $0x168] sm:$0x11] }
  0x33   : > { %406 = vst [vmem:[#allocation2 + $0xa8] sm:$0x11] %v405_v18  ;;  %v429_v35 = vsel %vm8542_vm10, 0, %v428_v33  ;;  %v431_v36 = vld [vmem:[#allocation2 + $0x180] sm:$0x11] }
  0x34   : > { %409 = vst [vmem:[#allocation2 + $0xc0] sm:$0x11] %v408_v20  ;;  %v432_v37 = vsel %vm8542_vm10, 0, %v431_v36  ;;  %v434_v38 = vld [vmem:[#allocation2 + $0x198] sm:$0x11] }
  0x35   : > { %412 = vst [vmem:[#allocation2 + $0xd8] sm:$0x11] %v411_v22  ;;  %v435_v39 = vsel %vm8542_vm10, 0, %v434_v38  ;;  %v442_v40 = vld [vmem:[#allocation2 + $0x10] sm:$0x11] }
  0x36   : > { %415 = vst [vmem:[#allocation2 + $0xf0] sm:$0x11] %v414_v24  ;;  %v443_v41 = vsel %vm8585_vm15, 0, %v442_v40  ;;  %v445_v42 = vld [vmem:[#allocation2 + $0x28] sm:$0x11] }
  0x37   : > { %418 = vst [vmem:[#allocation2 + $0x108] sm:$0x11] %v417_v26  ;;  %v446_v43 = vsel %vm8585_vm15, 0, %v445_v42  ;;  %v448_v44 = vld [vmem:[#allocation2 + $0x40] sm:$0x11] }
  0x38   : > { %421 = vst [vmem:[#allocation2 + $0x120] sm:$0x11] %v420_v28  ;;  %v449_v45 = vsel %vm8585_vm15, 0, %v448_v44  ;;  %v451_v46 = vld [vmem:[#allocation2 + $0x58] sm:$0x11] }
  0x39   : > { %424 = vst [vmem:[#allocation2 + $0x138] sm:$0x11] %v423_v30  ;;  %v452_v47 = vsel %vm8585_vm15, 0, %v451_v46  ;;  %v454_v48 = vld [vmem:[#allocation2 + $0x70] sm:$0x11] }
  0x3a   : > { %427 = vst [vmem:[#allocation2 + $0x150] sm:$0x11] %v426_v32  ;;  %v455_v49 = vsel %vm8585_vm15, 0, %v454_v48  ;;  %v457_v50 = vld [vmem:[#allocation2 + $0x88] sm:$0x11] }
  0x3b   : > { %430 = vst [vmem:[#allocation2 + $0x168] sm:$0x11] %v429_v35  ;;  %v458_v51 = vsel %vm8585_vm15, 0, %v457_v50  ;;  %v460_v52 = vld [vmem:[#allocation2 + $0xa0] sm:$0x11] }
  0x3c   : > { %433 = vst [vmem:[#allocation2 + $0x180] sm:$0x11] %v432_v37  ;;  %v461_v53 = vsel %vm8585_vm15, 0, %v460_v52  ;;  %v463_v54 = vld [vmem:[#allocation2 + $0xb8] sm:$0x11] }
  0x3d   : > { %436 = vst [vmem:[#allocation2 + $0x198] sm:$0x11] %v435_v39  ;;  %v464_v55 = vsel %vm8585_vm15, 0, %v463_v54  ;;  %v466_v56 = vld [vmem:[#allocation2 + $0xd0] sm:$0x11] }
  0x3e   : > { %444 = vst [vmem:[#allocation2 + $0x10] sm:$0x11] %v443_v41  ;;  %v467_v57 = vsel %vm8585_vm15, 0, %v466_v56  ;;  %v469_v58 = vld [vmem:[#allocation2 + $0xe8] sm:$0x11] }
  0x3f   : > { %447 = vst [vmem:[#allocation2 + $0x28] sm:$0x11] %v446_v43  ;;  %v470_v59 = vsel %vm8585_vm15, 0, %v469_v58  ;;  %v472_v60 = vld [vmem:[#allocation2 + $0x100] sm:$0x11] }
  0x40   : > { %450 = vst [vmem:[#allocation2 + $0x40] sm:$0x11] %v449_v45  ;;  %v473_v61 = vsel %vm8585_vm15, 0, %v472_v60  ;;  %v475_v62 = vld [vmem:[#allocation2 + $0x118] sm:$0x11] }
  0x41   : > { %453 = vst [vmem:[#allocation2 + $0x58] sm:$0x11] %v452_v47  ;;  %v476_v63 = vsel %vm8585_vm15, 0, %v475_v62  ;;  %v478_v1 = vld [vmem:[#allocation2 + $0x130] sm:$0x11] }
  0x42   : > { %456 = vst [vmem:[#allocation2 + $0x70] sm:$0x11] %v455_v49  ;;  %v479_v3 = vsel %vm8585_vm15, 0, %v478_v1  ;;  %v481_v4 = vld [vmem:[#allocation2 + $0x148] sm:$0x11] }
  0x43   : > { %459 = vst [vmem:[#allocation2 + $0x88] sm:$0x11] %v458_v51  ;;  %v482_v5 = vsel %vm8585_vm15, 0, %v481_v4  ;;  %v484_v6 = vld [vmem:[#allocation2 + $0x160] sm:$0x11] }
  0x44   : > { %462 = vst [vmem:[#allocation2 + $0xa0] sm:$0x11] %v461_v53  ;;  %v485_v7 = vsel %vm8585_vm15, 0, %v484_v6  ;;  %v487_v8 = vld [vmem:[#allocation2 + $0x178] sm:$0x11] }
  0x45   : > { %465 = vst [vmem:[#allocation2 + $0xb8] sm:$0x11] %v464_v55  ;;  %v488_v9 = vsel %vm8585_vm15, 0, %v487_v8  ;;  %v490_v10 = vld [vmem:[#allocation2 + $0x190] sm:$0x11] }
  0x46   : > { %468 = vst [vmem:[#allocation2 + $0xd0] sm:$0x11] %v467_v57  ;;  %v491_v11 = vsel %vm8585_vm15, 0, %v490_v10  ;;  %v493_v12 = vld [vmem:[#allocation2 + $0x1a8] sm:$0x11] }
  0x47   : > { %471 = vst [vmem:[#allocation2 + $0xe8] sm:$0x11] %v470_v59  ;;  %v494_v13 = vsel %vm8585_vm15, 0, %v493_v12 }
  0x48   : > { %474 = vst [vmem:[#allocation2 + $0x100] sm:$0x11] %v473_v61 }
  0x49   : > { %477 = vst [vmem:[#allocation2 + $0x118] sm:$0x11] %v476_v63 }
  0x4a   : > { %480 = vst [vmem:[#allocation2 + $0x130] sm:$0x11] %v479_v3 }
  0x4b   : > { %483 = vst [vmem:[#allocation2 + $0x148] sm:$0x11] %v482_v5 }
  0x4c   : > { %486 = vst [vmem:[#allocation2 + $0x160] sm:$0x11] %v485_v7 }
  0x4d   : > { %489 = vst [vmem:[#allocation2 + $0x178] sm:$0x11] %v488_v9 }
  0x4e   : > { %492 = vst [vmem:[#allocation2 + $0x190] sm:$0x11] %v491_v11 }
  0x4f   : > { %495 = vst [vmem:[#allocation2 + $0x1a8] sm:$0x11] %v494_v13 }
  0x50 LB: >> { %s8000_s26 = smul.u32 24, %s8398_s25  ;;  %v7984_v27 = vld [vmem:[%s8538_s21] sm:$0xff]  ;;  %vm643_vm3 = vcmask 195584   ;;  %v7985_v28 = vld [vmem:[%s8538_s21 + $0x8] sm:$0xff]  ;;  %v7986_v29 = vld [vmem:[%s8538_s21 + $0x10] sm:$0xff]  ;;  %s7692_s13 = sshll.u32 %s8398_s25, 1  ;;  %s8398_s25 = sphi %s8631_s25, %s501_s25  }
  0x51   : >> { %v7987_v30 = vld [vmem:[%s8538_s21 + $0x18] sm:$0xff]  ;;  %s8003_s27 = smul.u32 12, %s8398_s25  ;;  %v7988_v32 = vld [vmem:[%s8538_s21 + $0x20] sm:$0xff]  ;;  %v7989_v37 = vld [vmem:[%s8538_s21 + $0x28] sm:$0xff]  ;;  %s541_s17 = scalar_lea.vmem [#allocation6], %s7692_s13  ;;  %vm1708_vm13 = vcmask 1046528  }
  0x52   : >> { %s536_s30 = scalar_lea.vmem [#allocation4], %s8000_s26  ;;  %v7990_v43 = vld [vmem:[%s8538_s21 + $0x30] sm:$0xff]  ;;  %v7991_v46 = vld [vmem:[%s8538_s21 + $0x38] sm:$0xff]  ;;  %v542_v47 = vld [vmem:[%s541_s17] sm:$0x3]  ;;  %s8036_s11 = smul.u32 72, %s8398_s25 }
  0x53   : >> { %v539_v14 = vld [vmem:[%s536_s30 + $0x10] sm:$0xff]  ;;  %v7759_v17 = vld [vmem:[%s536_s30] sm:$0xf]  ;;  %v8002_v20 = vld [vmem:[%s536_s30 + $0x4] sm:$0xf0]  ;;  %s8655_s10 = scalar_lea.vmem %s13872_s3, %s8003_s27  ;;  %v8699_v51 = vperm.slane %v542_v47, 0 }
  0x54   : >> { %v635_v15 = vunpack.c.l.b16 %v539_v14  ;;  %v636_v16 = vunpack.c.h.b16 %v539_v14  ;;  %v8001_v21 = vld [vmem:[%s536_s30 + $0x4] sm:$0xf]  ;;  %v7761_v22 = vld [vmem:[%s536_s30 + $0x8] sm:$0xf0]  ;;  %v7760_v25 = vor.u32 %v8002_v20, %v7759_v17  ;;  %v1478_v31 = vld [vmem:[%s8655_s10] sm:$0xf] }
  0x55   : >> { %v7764_v26 = vor.u32 %v8001_v21, %v7761_v22  ;;  %1492 = vst [vmem:[#allocation1] ss:$4 sm:$0xff] %v1478_v31  ;;  %v1479_v38 = vld [vmem:[%s8655_s10 + $0x4] sm:$0xf]  ;;  %v1480_v50 = vld [vmem:[%s8655_s10 + $0x8] sm:$0xf]  ;;  %vm1360_vm4 = vmand %vm363_vm0, %vm437_vm11 }
  0x56   : >> { %v639_v18 = vpack.c.b16 %v635_v15, %v635_v15  ;;  %v640_v19 = vpack.c.b16 %v636_v16, %v636_v16  ;;  %v8701_v52 = vperm.slane %v542_v47, 1  ;;  %v7992_v53 = vld [vmem:[%s8538_s21 + $0x40] sm:$0xff]  ;;  %vm1362_vm6 = vmand %vm364_vm1, %vm439_vm12  ;;  %v14166_v14 = vmov 0  ;;  %s9144_s14 = scalar_lea.vmem [#allocation9], %s8036_s11  ;;  %s1481_s18 = scalar_lea.vmem [#allocation8], %s7692_s13 }
  0x57   : >> { %vm8724_vm7 = vmor %vm1362_vm6, %vm1360_vm4  ;;  %v1364_v15 = vld [vmem:[#allocation2 + $0x18] sm:$0xff]  ;;  %vm1036_vm8 = vsmask.f32 4368  ;;  %vm1912_vm14 = vcmask 1045504   ;;  %vm7256_vm15 = vcmask 130048   ;;  %s12136_s20 = scalar_lea.vmem [#allocation11], %s8398_s25 }
  0x58   : >> { %v693_v23 = vsel %vm363_vm0, %v639_v18, 0  ;;  %v696_v24 = vsel %vm363_vm0, %v640_v19, 0  ;;  %v14167_v14 = vsel %vm8724_vm7, 4294967295, %v14166_v14  ;;  %vm8765_vm9 = vmor %vm377_vm5, %vm1036_vm8  ;;  %s8046_s19 = sshll.u32 %s8398_s25, 7  ;;  %s501_s25 = sadd.s32 1, %s8398_s25  }
  0x59   : >> { %704 = vmatpush.bf16.msra.mxu0 %v693_v23  ;;  %793 = vmatpush.bf16.msra.mxu1 %v696_v24  ;;  %14168 = vst [vmem:[#allocation17_spill] sm:$0xff] %v14167_v14  ;;  %s12674_s29 = scalar_lea.vmem %s8549_s28, %s8046_s19  ;;  %p498_p7 = scmp.ge.s32.totalorder %s501_s25, 30  }
  0x5c   : >> { %v8659_v33 = vld.sshfl [vmem:[#allocation1] sm:$0xff pattern:$0x73625140]  ;;  %v8661_v34 = vld.sshfl [vmem:[#allocation1 + $0x8] sm:$0xff pattern:$0x73625140] }
  0x5d   : >> { %705 = vmatpush.bf16.msra.mxu0 %v7760_v25  ;;  %794 = vmatpush.bf16.msra.mxu1 %v7764_v26  ;;  %1587 = vst [vmem:[#allocation1] ss:$4 sm:$0xff] %v1478_v31  ;;  %v1495_v3 = vpack.i.b16 %v8659_v33, %v8659_v33  ;;  %v1498_v4 = vpack.i.b16 %v8661_v34, %v8661_v34 }
  0x5f   : >> { %v1497_v16 = vperm.slane %v1495_v3, 0  ;;  %v1500_v17 = vperm.slane %v1498_v4, 0 }
  0x60   : >> { %7765 = vmatmul.msk.bf16.vlgmr.msra.gmra.mxu0 %vm643_vm3, %v7984_v27  ;;  %7781 = vmatmul.msk.bf16.vlgmr.msra.gmra.mxu1 %vm643_vm3, %v7984_v27 }
  0x61   : >> { %v8746_v33 = vunpack.c.l.bf16 %v1500_v17 }
  0x64   : >> { %v8665_v35 = vld.sshfl [vmem:[#allocation1] sm:$0xff pattern:$0x73625140]  ;;  %v8667_v36 = vld.sshfl [vmem:[#allocation1 + $0x8] sm:$0xff pattern:$0x73625140] }
  0x65   : >> { %1793 = vst [vmem:[#allocation1] ss:$4 sm:$0xff] %v1478_v31  ;;  %v1590_v18 = vshrl.u32 %v8665_v35, 16  ;;  %v1594_v20 = vshrl.u32 %v8667_v36, 16 }
  0x67   : >> { %v1591_v34 = vpack.i.b16 %v1590_v18, %v1590_v18 }
  0x6c   : >> { %v8671_v39 = vld.sshfl [vmem:[#allocation1] sm:$0xff pattern:$0x73625140]  ;;  %v8673_v40 = vld.sshfl [vmem:[#allocation1 + $0x8] sm:$0xff pattern:$0x73625140] }
  0x6d   : >> { %1994 = vst [vmem:[#allocation1] ss:$4 sm:$0xff] %v1479_v38 }
  0x70   : >> { %7766 = vmatmul.msk.bf16.gmra.mxu0 %vm643_vm3, %v7985_v28  ;;  %7782 = vmatmul.msk.bf16.gmra.mxu1 %vm643_vm3, %v7985_v28 }
  0x74   : >> { %v8677_v41 = vld.sshfl [vmem:[#allocation1] sm:$0xff pattern:$0x73625140]  ;;  %v8679_v42 = vld.sshfl [vmem:[#allocation1 + $0x8] sm:$0xff pattern:$0x73625140] }
  0x75   : >> { %2089 = vst [vmem:[#allocation1] ss:$4 sm:$0xff] %v1479_v38  ;;  %v1997_v35 = vpack.i.b16 %v8677_v41, %v8677_v41 }
  0x7c   : >> { %v8682_v44 = vld.sshfl [vmem:[#allocation1] sm:$0xff pattern:$0x73625140]  ;;  %v8684_v45 = vld.sshfl [vmem:[#allocation1 + $0x8] sm:$0xff pattern:$0x73625140] }
  0x7d   : >> { %2294 = vst [vmem:[#allocation1] ss:$4 sm:$0xff] %v1479_v38  ;;  %v2092_v26 = vshrl.u32 %v8682_v44, 16  ;;  %v2096_v27 = vshrl.u32 %v8684_v45, 16  ;;  %v1595_v45 = vpack.i.b16 %v1594_v20, %v1594_v20 }
  0x7f   : >> { %v2093_v47 = vpack.i.b16 %v2092_v26, %v2092_v26 }
  0x80   : >> { %7767 = vmatmul.msk.bf16.gmra.mxu0 %vm643_vm3, %v7986_v29  ;;  %7783 = vmatmul.msk.bf16.gmra.mxu1 %vm643_vm3, %v7986_v29  ;;  %v7993_v29 = vld [vmem:[%s8538_s21 + $0x48] sm:$0xff] }
  0x84   : >> { %v8694_v48 = vld.sshfl [vmem:[#allocation1] sm:$0xff pattern:$0x73625140]  ;;  %v8696_v49 = vld.sshfl [vmem:[#allocation1 + $0x8] sm:$0xff pattern:$0x73625140] }
  0x85   : >> { %2495 = vst [vmem:[#allocation1] ss:$4 sm:$0xff] %v1480_v50 }
  0x8c   : >> { %v8708_v62 = vld.sshfl [vmem:[#allocation1] sm:$0xff pattern:$0x73625140]  ;;  %v8710_v63 = vld.sshfl [vmem:[#allocation1 + $0x8] sm:$0xff pattern:$0x73625140] }
  0x8d   : >> { %2590 = vst [vmem:[#allocation1] ss:$4 sm:$0xff] %v1480_v50 }
  0x90   : >> { %7768 = vmatmul.msk.bf16.gmra.mxu0 %vm643_vm3, %v7987_v30  ;;  %7784 = vmatmul.msk.bf16.gmra.mxu1 %vm643_vm3, %v7987_v30 }
  0x94   : >> { %v8731_v23 = vld.sshfl [vmem:[#allocation1] sm:$0xff pattern:$0x73625140]  ;;  %v8733_v24 = vld.sshfl [vmem:[#allocation1 + $0x8] sm:$0xff pattern:$0x73625140] }
  0x95   : >> { %2795 = vst [vmem:[#allocation1] ss:$4 sm:$0xff] %v1480_v50  ;;  %v2097_v50 = vpack.i.b16 %v2096_v27, %v2096_v27 }
  0xa0   : >> { %7769 = vmatmul.msk.bf16.gmra.mxu0 %vm643_vm3, %v7988_v32  ;;  %7785 = vmatmul.msk.bf16.gmra.mxu1 %vm643_vm3, %v7988_v32  ;;  %v8744_v32 = vunpack.c.l.bf16 %v1497_v16 }
  0xb0   : >> { %7770 = vmatmul.msk.bf16.gmra.mxu0 %vm643_vm3, %v7989_v37  ;;  %7786 = vmatmul.msk.bf16.gmra.mxu1 %vm643_vm3, %v7989_v37 }
  0xc0   : >> { %7771 = vmatmul.msk.bf16.gmra.mxu0 %vm643_vm3, %v7990_v43  ;;  %7787 = vmatmul.msk.bf16.gmra.mxu1 %vm643_vm3, %v7990_v43 }
  0xd0   : >> { %7772 = vmatmul.msk.bf16.gmra.mxu0 %vm643_vm3, %v7991_v46  ;;  %7788 = vmatmul.msk.bf16.gmra.mxu1 %vm643_vm3, %v7991_v46  ;;  %v2000_v46 = vpack.i.b16 %v8679_v42, %v8679_v42  ;;  %v1796_v42 = vpack.i.b16 %v8671_v39, %v8671_v39  ;;  %v2297_v39 = vpack.i.b16 %v8694_v48, %v8694_v48 }
  0xd2   : >> { %v2299_v27 = vperm.slane %v2297_v39, 1 }
  0xdd   : >> { %v707_v54 = vpop.f32.mrf.mxu0  ;;  %v796_v55 = vpop.f32.mrf.mxu1 }
  0xde   : >> { %v708_v56 = vadd.f32 %v707_v54, %v8699_v51  ;;  %v797_v57 = vadd.f32 %v796_v55, %v8701_v52 }
  0xe0   : >> { %v876_v58 = vmax.f32 %v708_v56, 0.0  ;;  %v877_v59 = vmax.f32 %v797_v57, 0.0  ;;  %7773 = vmatmul.msk.bf16.gmra.mxu0 %vm643_vm3, %v7992_v53  ;;  %7789 = vmatmul.msk.bf16.gmra.mxu1 %vm643_vm3, %v7992_v53  ;;  %v1999_v56 = vperm.slane %v1997_v35, 0 }
  0xe2   : >> { %v940_v60 = vmin.f32 %v876_v58, 6.0  ;;  %v941_v61 = vmin.f32 %v877_v59, 6.0  ;;  %v1593_v58 = vperm.slane %v1591_v34, 0  ;;  %v1597_v59 = vperm.slane %v1595_v45, 0 }
  0xe4   : >> { %v1004_v1 = vpack.c.bf16 %v941_v61, %v940_v60  ;;  %v2002_v60 = vperm.slane %v2000_v46, 0  ;;  %v2095_v61 = vperm.slane %v2093_v47, 0  ;;  %v8784_v17 = vunpack.c.l.bf16 %v1593_v58 }
  0xe5   : >> { %v709_v5 = vpop.f32.mrf.mxu0  ;;  %v798_v6 = vpop.f32.mrf.mxu1  ;;  %v8786_v18 = vunpack.c.l.bf16 %v1597_v59  ;;  %v8810_v47 = vunpack.c.l.bf16 %v2299_v27 }
  0xe6   : >> { %v1039_v7 = vshrl.u32 %v1004_v1, 16  ;;  %v710_v8 = vadd.f32 %v709_v5, %v8699_v51  ;;  %v799_v9 = vadd.f32 %v798_v6, %v8701_v52  ;;  %v1042_v11 = vshll.u32 %v1004_v1, 16  ;;  %v1368_v5 = vld [vmem:[#allocation2 + $0x28] sm:$0x11] }
  0xe7   : >> { %v14170_v1 = vmov 0 }
  0xe8   : >> { %v8722_v10 = vrot.slane %v1039_v7, 7  ;;  %v878_v12 = vmax.f32 %v710_v8, 0.0  ;;  %v879_v13 = vmax.f32 %v799_v9, 0.0  ;;  %v14171_v1 = vsel %vm8765_vm9, 4294967295, %v14170_v1 }
  0xe9   : >> { %14172 = vst [vmem:[#allocation19_spill] sm:$0xff] %v14171_v1  ;;  %v2099_v7 = vperm.slane %v2097_v50, 0 }
  0xea   : >> { %v1044_v19 = vor.u32 %v1042_v11, %v8722_v10  ;;  %v942_v21 = vmin.f32 %v878_v12, 6.0  ;;  %v943_v22 = vmin.f32 %v879_v13, 6.0  ;;  %v1045_v6 = vrot.slane %v8722_v10, 4 }
  0xeb   : >> { %v1799_v11 = vpack.i.b16 %v8673_v40, %v8673_v40  ;;  %v8772_v12 = vunpack.c.l.bf16 %v1999_v56  ;;  %v8776_v13 = vunpack.c.l.bf16 %v2002_v60  ;;  %v1798_v40 = vperm.slane %v1796_v42, 1 }
  0xec   : >> { %v1365_v25 = vsel %vm8724_vm7, %v1044_v19, %v1364_v15  ;;  %v1005_v28 = vpack.c.bf16 %v943_v22, %v942_v21  ;;  %v2300_v15 = vpack.i.b16 %v8696_v49, %v8696_v49  ;;  %v8790_v19 = vunpack.c.l.bf16 %v2095_v61 }
  0xed   : >> { %1366 = vst [vmem:[#allocation2 + $0x18] sm:$0xff] %v1365_v25  ;;  %v8740_v30 = vunpack.c.l.bf16 %v1365_v25  ;;  %v8742_v31 = vunpack.c.h.bf16 %v1365_v25  ;;  %v712_v37 = vpop.f32.mrf.mxu0  ;;  %v801_v38 = vpop.f32.mrf.mxu1  ;;  %v8792_v20 = vunpack.c.l.bf16 %v2099_v7  ;;  %v1801_v26 = vperm.slane %v1799_v11, 1 }
  0xee   : >> { %v1047_v36 = vshrl.u32 %v1005_v28, 16  ;;  %v713_v54 = vadd.f32 %v712_v37, %v8699_v51  ;;  %v802_v55 = vadd.f32 %v801_v38, %v8701_v52  ;;  %v1050_v57 = vshll.u32 %v1005_v28, 16 }
  0xef   : >> { %v1523_v43 = vmul.f32 %v8744_v32, %v8740_v30  ;;  %v1524_v44 = vmul.f32 %v8746_v33, %v8742_v31  ;;  %v1630_v22 = vmul.f32 %v8784_v17, %v8740_v30  ;;  %v1631_v25 = vmul.f32 %v8786_v18, %v8742_v31 }
  0xf0   : >> { %7774 = vmatmul.msk.bf16.gmra.mxu0 %vm643_vm3, %v7993_v29  ;;  %v1049_v41 = vrot.slane %v1047_v36, 7  ;;  %7790 = vmatmul.msk.bf16.gmra.mxu1 %vm643_vm3, %v7993_v29  ;;  %v880_v8 = vmax.f32 %v713_v54, 0.0  ;;  %v881_v9 = vmax.f32 %v802_v55, 0.0  ;;  %v2021_v28 = vmul.f32 %v8772_v12, %v8740_v30 }
  0xf1   : >> { %v8757_v53 = vpack.c.bf16 %v1524_v44, %v1523_v43  ;;  %v2022_v29 = vmul.f32 %v8776_v13, %v8742_v31  ;;  %v2302_v34 = vperm.slane %v2300_v15, 1  ;;  %v2126_v37 = vmul.f32 %v8790_v19, %v8740_v30 }
  0xf2   : >> { %v1052_v3 = vor.u32 %v1050_v57, %v1049_v41  ;;  %v1054_v4 = vrot.slane %v1049_v41, 4  ;;  %v944_v49 = vmin.f32 %v880_v8, 6.0  ;;  %v945_v21 = vmin.f32 %v881_v9, 6.0 }
  0xf3   : >> { %14169 = vst [vmem:[#allocation18_spill] sm:$0xff] %v8757_v53  ;;  %v2127_v38 = vmul.f32 %v8792_v20, %v8742_v31  ;;  %v1651_v44 = vpack.c.bf16 %v1631_v25, %v1630_v22  ;;  %v8806_v45 = vunpack.c.l.bf16 %v1798_v40  ;;  %v8808_v46 = vunpack.c.l.bf16 %v1801_v26 }
  0xf4   : >> { %v1053_v16 = vsel %vm8765_vm9, %v1045_v6, %v1052_v3  ;;  %v1369_v10 = vsel %vm8542_vm10, %v1054_v4, %v1368_v5  ;;  %v1784_v48 = vld [vmem:[#allocation2 + $0x18] sm:$0xee]  ;;  %v1006_v43 = vpack.c.bf16 %v945_v21, %v944_v49  ;;  %v8812_v50 = vpack.c.bf16 %v2022_v29, %v2021_v28 }
  0xf5   : >> { %1367 = vst.msk [vmem:[#allocation2 + $0x20] sm:$0xff] %vm8519_vm2, %v1053_v16  ;;  %v1808_v35 = vunpack.c.l.bf16 %v1784_v48  ;;  %v1809_v36 = vunpack.c.h.bf16 %v1784_v48  ;;  %v8814_v41 = vunpack.c.l.bf16 %v2302_v34  ;;  %v2593_v55 = vshrl.u32 %v8731_v23, 16  ;;  %v2282_v57 = vld [vmem:[#allocation2 + $0x18] sm:$0xee] }
  0xf6   : >> { %1370 = vst [vmem:[#allocation2 + $0x28] sm:$0x11] %v1369_v10  ;;  %v2597_v30 = vshrl.u32 %v8733_v24, 16  ;;  %v2150_v42 = vpack.c.bf16 %v2127_v38, %v2126_v37  ;;  %v1056_v61 = vshrl.u32 %v1006_v43, 16  ;;  %v2498_v3 = vpack.i.b16 %v8708_v62, %v8708_v62 }
  0xf7   : >> { %14173 = vst [vmem:[#allocation20_spill] sm:$0xff] %v8812_v50  ;;  %v1834_v56 = vmul.f32 %v8806_v45, %v1808_v35  ;;  %v1835_v31 = vmul.f32 %v8808_v46, %v1809_v36  ;;  %v1666_v4 = vunpack.c.l.bf16 %v1651_v44  ;;  %v1667_v6 = vunpack.c.h.bf16 %v1651_v44  ;;  %v2796_v10 = vld.sshfl [vmem:[#allocation1] sm:$0xff pattern:$0x73625140] }
  0xf8   : >> { %v2303_v7 = vunpack.c.l.bf16 %v2282_v57  ;;  %v2304_v62 = vunpack.c.h.bf16 %v2282_v57  ;;  %v2501_v16 = vpack.i.b16 %v8710_v63, %v8710_v63  ;;  %v8842_v48 = vrot.slane %v1056_v61, 7 }
  0xf9   : >> { %v1855_v39 = vpack.c.bf16 %v1835_v31, %v1834_v56  ;;  %v2594_v49 = vpack.i.b16 %v2593_v55, %v2593_v55  ;;  %v2598_v21 = vpack.i.b16 %v2597_v30, %v2597_v30  ;;  %v2162_v22 = vunpack.c.l.bf16 %v2150_v42 }
  0xfa   : >> { %v2163_v25 = vunpack.c.h.bf16 %v2150_v42  ;;  %v8844_v28 = vrot.slane %v1666_v4, 1  ;;  %v2329_v29 = vmul.f32 %v8810_v47, %v2303_v7  ;;  %v1059_v34 = vshll.u32 %v1006_v43, 16 }
  0xfb   : >> { %v2798_v35 = vpack.i.b16 %v2796_v10, %v2796_v10  ;;  %v1870_v36 = vunpack.c.l.bf16 %v1855_v39  ;;  %v1871_v37 = vunpack.c.h.bf16 %v1855_v39  ;;  %v2330_v63 = vmul.f32 %v8814_v41, %v2304_v62  ;;  %v8865_v39 = vld.sshfl [vmem:[#allocation1 + $0x8] sm:$0xff pattern:$0x73625140]  ;;  %v714_v62 = vpop.f32.mrf.mxu0 }
  0xfc   : >> { %v1486_v54 = vld [vmem:[#allocation2 + $0x20] sm:$0xff]  ;;  %14175 = vst [vmem:[#allocation22_spill] sm:$0xff] %v8844_v28  ;;  %v2500_v38 = vperm.slane %v2498_v3, 0  ;;  %v2503_v55 = vperm.slane %v2501_v16, 0  ;;  %v2596_v30 = vperm.slane %v2594_v49, 0  ;;  %v2600_v56 = vperm.slane %v2598_v21, 0 }
  0xfd   : >> { %v8820_v58 = vunpack.c.l.bf16 %v1486_v54  ;;  %v8822_v59 = vunpack.c.h.bf16 %v1486_v54  ;;  %v1580_v8 = vld [vmem:[#allocation2 + $0x28] sm:$0x11]  ;;  %v1061_v54 = vor.u32 %v1059_v34, %v8842_v48  ;;  %v8855_v61 = vrot.slane %v1667_v6, 1 }
  0xfe   : >> { %v1608_v26 = vunpack.c.l.bf16 %v1580_v8  ;;  %v1609_v27 = vunpack.c.h.bf16 %v1580_v8  ;;  %v1786_v44 = vld [vmem:[#allocation2 + $0x28] sm:$0x11]  ;;  %v8857_v4 = vrot.slane %v2162_v22, 1  ;;  %v8859_v3 = vrot.slane %v2163_v25, 1  ;;  %v803_v22 = vpop.f32.mrf.mxu1 }
  0xff   : >> { %v1525_v24 = vmul.f32 %v8744_v32, %v8820_v58  ;;  %v1526_v5 = vmul.f32 %v8746_v33, %v8822_v59  ;;  %v1836_v9 = vmul.f32 %v8806_v45, %v8820_v58  ;;  %v1837_v11 = vmul.f32 %v8808_v46, %v8822_v59  ;;  %14176 = vst [vmem:[#allocation23_spill] sm:$0xff] %v8855_v61  ;;  %v2079_v6 = vld [vmem:[#allocation2 + $0x28] sm:$0x11] }
 0x100   : >> { %v1632_v31 = vmul.f32 %v8784_v17, %v8820_v58  ;;  %v1633_v57 = vmul.f32 %v8786_v18, %v8822_v59  ;;  %v1634_v43 = vmul.f32 %v8784_v17, %v1608_v26  ;;  %v1635_v42 = vmul.f32 %v8786_v18, %v1609_v27  ;;  %14177 = vst [vmem:[#allocation24_spill] sm:$0xff] %v8857_v4  ;;  %v2284_v60 = vld [vmem:[#allocation2 + $0x28] sm:$0x11] }
 0x101   : >> { %v8836_v15 = vpack.c.bf16 %v1526_v5, %v1525_v24  ;;  %v8840_v40 = vpack.c.bf16 %v1837_v11, %v1836_v9  ;;  %14178 = vst [vmem:[#allocation25_spill] sm:$0xff] %v8859_v3  ;;  %v1371_v24 = vld [vmem:[#allocation2 + $0x30] sm:$0xff]  ;;  %v2800_v5 = vperm.slane %v2798_v35, 1  ;;  %v8861_v7 = vpack.c.bf16 %v2330_v63, %v2329_v29 }
 0x102   : >> { %v1812_v8 = vunpack.c.l.bf16 %v1786_v44  ;;  %v1813_v9 = vunpack.c.h.bf16 %v1786_v44  ;;  %v8863_v11 = vunpack.c.l.bf16 %v2500_v38  ;;  %v8867_v16 = vrot.slane %v1870_v36, 2 }
 0x103   : >> { %14174 = vst [vmem:[#allocation21_spill] sm:$0xff] %v8836_v15  ;;  %v8869_v10 = vrot.slane %v1871_v37, 2  ;;  %v8871_v49 = vunpack.c.l.bf16 %v2503_v55  ;;  %v8873_v21 = vunpack.c.l.bf16 %v2596_v30  ;;  %v1652_v25 = vpack.c.bf16 %v1633_v57, %v1632_v31  ;;  %v717_v3 = vpop.f32.mrf.mxu0 }
 0x104   : >> { %14179 = vst [vmem:[#allocation26_spill] sm:$0xff] %v8861_v7  ;;  %v1653_v26 = vpack.c.bf16 %v1635_v42, %v1634_v43  ;;  %v1372_v27 = vsel %vm8724_vm7, %v1061_v54, %v1371_v24  ;;  %v8877_v29 = vunpack.c.l.bf16 %v2600_v56  ;;  %v8883_v36 = vunpack.c.l.bf16 %v2800_v5 }
 0x105   : >> { %14180 = vst [vmem:[#allocation27_spill] sm:$0xff] %v8863_v11  ;;  %v8879_v34 = vunpack.c.l.bf16 %v1372_v27  ;;  %v8886_v37 = vadd.f32 %v714_v62, %v8699_v51  ;;  %v1838_v63 = vmul.f32 %v8806_v45, %v1812_v8  ;;  %v1839_v38 = vmul.f32 %v8808_v46, %v1813_v9 }
 0x106   : >> { %14181 = vst [vmem:[#allocation28_spill] sm:$0xff] %v8867_v16  ;;  %v2104_v44 = vunpack.c.l.bf16 %v2079_v6  ;;  %v8890_v55 = vunpack.c.h.bf16 %v1372_v27  ;;  %v2023_v54 = vmul.f32 %v8772_v12, %v8820_v58  ;;  %v2105_v30 = vunpack.c.h.bf16 %v2079_v6 }
 0x107   : >> { %14182 = vst [vmem:[#allocation29_spill] sm:$0xff] %v8869_v10  ;;  %v1527_v56 = vmul.f32 %v8744_v32, %v8879_v34  ;;  %v1636_v31 = vmul.f32 %v8784_v17, %v8879_v34  ;;  %v1668_v57 = vunpack.c.l.bf16 %v1652_v25  ;;  %v1669_v43 = vunpack.c.h.bf16 %v1652_v25 }
 0x108   : >> { %14183 = vst [vmem:[#allocation30_spill] sm:$0xff] %v8871_v49  ;;  %v1670_v42 = vunpack.c.l.bf16 %v1653_v26  ;;  %v2024_v24 = vmul.f32 %v8776_v13, %v8822_v59  ;;  %v1528_v5 = vmul.f32 %v8746_v33, %v8890_v55  ;;  %v1637_v8 = vmul.f32 %v8786_v18, %v8890_v55 }
 0x109   : >> { %14184 = vst [vmem:[#allocation31_spill] sm:$0xff] %v8873_v21  ;;  %v2025_v9 = vmul.f32 %v8772_v12, %v8879_v34  ;;  %v2026_v62 = vmul.f32 %v8776_v13, %v8890_v55  ;;  %v1671_v6 = vunpack.c.h.bf16 %v1653_v26  ;;  %v2128_v25 = vmul.f32 %v8790_v19, %v8820_v58 }
 0x10a   : >> { %14185 = vst [vmem:[#allocation32_spill] sm:$0xff] %v8877_v29  ;;  %v2130_v23 = vmul.f32 %v8790_v19, %v2104_v44  ;;  %v2131_v35 = vmul.f32 %v8792_v20, %v2105_v30  ;;  %v8914_v10 = vpack.c.bf16 %v1528_v5, %v1527_v56  ;;  %v8916_v16 = vpack.c.bf16 %v1637_v8, %v1636_v31  ;;  %v806_v5 = vpop.f32.mrf.mxu1 }
 0x10b   : >> { %1373 = vst [vmem:[#allocation2 + $0x30] sm:$0xff] %v1372_v27  ;;  %v2129_v27 = vmul.f32 %v8792_v20, %v8822_v59  ;;  %v8918_v53 = vpack.c.bf16 %v2026_v62, %v2025_v9  ;;  %v1857_v26 = vpack.c.bf16 %v1839_v38, %v1838_v63  ;;  %v1872_v28 = vunpack.c.l.bf16 %v8840_v40 }
 0x10c   : >> { %14186 = vst [vmem:[#allocation33_spill] sm:$0xff] %v8883_v36  ;;  %v804_v7 = vadd.f32 %v803_v22, %v8701_v52  ;;  %v8924_v44 = vrot.slane %v1668_v57, 1  ;;  %v2307_v30 = vunpack.c.l.bf16 %v2284_v60  ;;  %v2308_v56 = vunpack.c.h.bf16 %v2284_v60 }
 0x10d   : >> { %14187 = vst [vmem:[#allocation34_spill] sm:$0xff] %v8914_v10  ;;  %v8926_v31 = vrot.slane %v1669_v43, 1  ;;  %v1873_v8 = vunpack.c.h.bf16 %v8840_v40  ;;  %v8929_v9 = vpack.c.bf16 %v2024_v24, %v2023_v54  ;;  %v2151_v63 = vpack.c.bf16 %v2129_v27, %v2128_v25  ;;  %v7994_v43 = vld [vmem:[%s8538_s21 + $0x50] sm:$0xff] }
 0x10e   : >> { %14188 = vst [vmem:[#allocation35_spill] sm:$0xff] %v8918_v53  ;;  %v8931_v38 = vrot.slane %v1670_v42, 1  ;;  %v8933_v62 = vrot.slane %v1671_v6, 1  ;;  %v2152_v22 = vpack.c.bf16 %v2131_v35, %v2130_v23  ;;  %v718_v4 = vadd.f32 %v717_v3, %v8699_v51  ;;  %7775 = vmatmul.msk.bf16.gmra.mxu0 %vm643_vm3, %v7994_v43  ;;  %7791 = vmatmul.msk.bf16.gmra.mxu1 %vm643_vm3, %v7994_v43 }
 0x10f   : >> { %14189 = vst [vmem:[#allocation36_spill] sm:$0xff] %v8924_v44  ;;  %v1874_v57 = vunpack.c.l.bf16 %v1857_v26  ;;  %v1875_v61 = vunpack.c.h.bf16 %v1857_v26  ;;  %v8936_v53 = vrot.slane %v1872_v28, 2  ;;  %v2331_v60 = vmul.f32 %v8810_v47, %v8820_v58 }
 0x110   : >> { %14190 = vst [vmem:[#allocation37_spill] sm:$0xff] %v8926_v31  ;;  %v2332_v40 = vmul.f32 %v8814_v41, %v8822_v59  ;;  %v2333_v54 = vmul.f32 %v8810_v47, %v2307_v30  ;;  %v2334_v42 = vmul.f32 %v8814_v41, %v2308_v56  ;;  %v807_v24 = vadd.f32 %v806_v5, %v8701_v52 }
 0x111   : >> { %14191 = vst [vmem:[#allocation38_spill] sm:$0xff] %v8929_v9  ;;  %v2164_v23 = vunpack.c.l.bf16 %v2151_v63  ;;  %v2165_v35 = vunpack.c.h.bf16 %v2151_v63  ;;  %v882_v3 = vmax.f32 %v8886_v37, 0.0  ;;  %v883_v6 = vmax.f32 %v804_v7, 0.0 }
 0x112   : >> { %14192 = vst [vmem:[#allocation39_spill] sm:$0xff] %v8931_v38  ;;  %v8949_v58 = vrot.slane %v1873_v8, 2  ;;  %v2166_v28 = vunpack.c.l.bf16 %v2152_v22  ;;  %v2167_v25 = vunpack.c.h.bf16 %v2152_v22  ;;  %v884_v59 = vmax.f32 %v718_v4, 0.0 }
 0x113   : >> { %14193 = vst [vmem:[#allocation40_spill] sm:$0xff] %v8933_v62  ;;  %v8951_v27 = vrot.slane %v1874_v57, 2  ;;  %v8953_v26 = vrot.slane %v1875_v61, 2  ;;  %v946_v30 = vmin.f32 %v882_v3, 6.0  ;;  %v947_v56 = vmin.f32 %v883_v6, 6.0  ;;  %v719_v3 = vpop.f32.mrf.mxu0 }
 0x114   : >> { %14194 = vst [vmem:[#allocation41_spill] sm:$0xff] %v8936_v53  ;;  %v8955_v5 = vpack.c.bf16 %v2334_v42, %v2333_v54  ;;  %v1062_v37 = vrot.slane %v8842_v48, 4  ;;  %v948_v7 = vmin.f32 %v884_v59, 6.0  ;;  %v885_v63 = vmax.f32 %v807_v24, 0.0  ;;  %v1787_v61 = vld [vmem:[#allocation2 + $0x30] sm:$0xee]  ;;  %v808_v48 = vpop.f32.mrf.mxu1 }
 0x115   : >> { %14195 = vst [vmem:[#allocation42_spill] sm:$0xff] %v8949_v58  ;;  %v8958_v53 = vrot.slane %v2164_v23, 1  ;;  %v8960_v43 = vrot.slane %v2165_v35, 1  ;;  %v8962_v8 = vpack.c.bf16 %v2332_v40, %v2331_v60  ;;  %v1007_v22 = vpack.c.bf16 %v947_v56, %v946_v30  ;;  %v2285_v30 = vld [vmem:[#allocation2 + $0x30] sm:$0xee] }
 0x116   : >> { %14196 = vst [vmem:[#allocation43_spill] sm:$0xff] %v8951_v27  ;;  %v8964_v4 = vrot.slane %v2166_v28, 1  ;;  %v8966_v57 = vrot.slane %v2167_v25, 1  ;;  %v2132_v54 = vmul.f32 %v8790_v19, %v8879_v34  ;;  %v949_v42 = vmin.f32 %v885_v63, 6.0  ;;  %v1375_v27 = vld [vmem:[#allocation2 + $0x40] sm:$0x11] }
 0x117   : >> { %14197 = vst [vmem:[#allocation44_spill] sm:$0xff] %v8953_v26  ;;  %v2133_v24 = vmul.f32 %v8792_v20, %v8890_v55  ;;  %v1064_v23 = vshrl.u32 %v1007_v22, 16  ;;  %v720_v35 = vadd.f32 %v719_v3, %v8699_v51  ;;  %v809_v60 = vadd.f32 %v808_v48, %v8701_v52 }
 0x118   : >> { %14198 = vst [vmem:[#allocation45_spill] sm:$0xff] %v8955_v5  ;;  %v8978_v28 = vmul.f32 %v8863_v11, %v8879_v34  ;;  %v1008_v25 = vpack.c.bf16 %v949_v42, %v948_v7  ;;  %v1814_v59 = vunpack.c.l.bf16 %v1787_v61  ;;  %v8982_v56 = vmul.f32 %v8871_v49, %v8890_v55 }
 0x119   : >> { %14199 = vst [vmem:[#allocation46_spill] sm:$0xff] %v8958_v53  ;;  %v1066_v63 = vrot.slane %v1064_v23, 7  ;;  %v1067_v26 = vshll.u32 %v1007_v22, 16  ;;  %v1815_v3 = vunpack.c.h.bf16 %v1787_v61  ;;  %v886_v58 = vmax.f32 %v720_v35, 0.0  ;;  %v1378_v35 = vld [vmem:[#allocation2 + $0x48] sm:$0xff] }
 0x11a   : >> { %14200 = vst [vmem:[#allocation47_spill] sm:$0xff] %v8960_v43  ;;  %v1073_v48 = vshrl.u32 %v1008_v25, 16  ;;  %v887_v40 = vmax.f32 %v809_v60, 0.0  ;;  %v1672_v6 = vunpack.c.l.bf16 %v8916_v16  ;;  %v2153_v15 = vpack.c.bf16 %v2133_v24, %v2132_v54 }
 0x11b   : >> { %14201 = vst [vmem:[#allocation48_spill] sm:$0xff] %v8962_v8  ;;  %v1069_v62 = vor.u32 %v1067_v26, %v1066_v63  ;;  %v1071_v38 = vrot.slane %v1066_v63, 4  ;;  %v1673_v7 = vunpack.c.h.bf16 %v8916_v16  ;;  %v2309_v42 = vunpack.c.l.bf16 %v2285_v30  ;;  %v722_v9 = vpop.f32.mrf.mxu0 }
 0x11c   : >> { %14202 = vst [vmem:[#allocation49_spill] sm:$0xff] %v8964_v4  ;;  %v8986_v31 = vrot.slane %v1073_v48, 7  ;;  %v1076_v44 = vshll.u32 %v1008_v25, 16  ;;  %v2310_v23 = vunpack.c.h.bf16 %v2285_v30  ;;  %v1841_v54 = vmul.f32 %v8808_v46, %v1815_v3 }
 0x11d   : >> { %14203 = vst [vmem:[#allocation50_spill] sm:$0xff] %v8966_v57  ;;  %v1070_v22 = vsel %vm8765_vm9, %v1062_v37, %v1069_v62  ;;  %v1376_v61 = vsel %vm8542_vm10, %v1071_v38, %v1375_v27  ;;  %v950_v26 = vmin.f32 %v886_v58, 6.0  ;;  %v951_v24 = vmin.f32 %v887_v40, 6.0  ;;  %v2783_v40 = vld [vmem:[#allocation2 + $0x30] sm:$0xee] }
 0x11e   : >> { %14204 = vst [vmem:[#allocation51_spill] sm:$0xff] %v8978_v28  ;;  %v1078_v16 = vor.u32 %v1076_v44, %v8986_v31  ;;  %v9001_v62 = vmul.f32 %v8873_v21, %v8879_v34  ;;  %v9005_v38 = vmul.f32 %v8877_v29, %v8890_v55  ;;  %v2168_v27 = vunpack.c.l.bf16 %v2153_v15 }
 0x11f   : >> { %14205 = vst [vmem:[#allocation52_spill] sm:$0xff] %v8982_v56  ;;  %v1840_v56 = vmul.f32 %v8806_v45, %v1814_v59  ;;  %v2169_v37 = vunpack.c.h.bf16 %v2153_v15  ;;  %v2335_v59 = vmul.f32 %v8810_v47, %v2309_v42  ;;  %v2336_v58 = vmul.f32 %v8814_v41, %v2310_v23 }
 0x120   : >> { %1374 = vst.msk [vmem:[#allocation2 + $0x38] sm:$0xff] %vm8519_vm2, %v1070_v22  ;;  %v1379_v44 = vsel %vm8724_vm7, %v1078_v16, %v1378_v35  ;;  %v14208_v30 = vpack.i.b16 %v8865_v39, %v8865_v39  ;;  %v9018_v3 = vrot.slane %v1672_v6, 1  ;;  %v9020_v15 = vrot.slane %v1673_v7, 1 }
 0x121   : >> { %14206 = vst [vmem:[#allocation53_spill] sm:$0xff] %v9001_v62  ;;  %v9014_v63 = vunpack.c.l.bf16 %v1379_v44  ;;  %v9016_v55 = vunpack.c.h.bf16 %v1379_v44  ;;  %v1858_v48 = vpack.c.bf16 %v1841_v54, %v1840_v56  ;;  %v9022_v42 = vpack.c.bf16 %v951_v24, %v950_v26 }
 0x122   : >> { %14207 = vst [vmem:[#allocation54_spill] sm:$0xff] %v9005_v38  ;;  %v2803_v34 = vperm.slane %v14208_v30, 1  ;;  %v9032_v35 = vrot.slane %v2168_v27, 1  ;;  %v9034_v6 = vrot.slane %v2169_v37, 1  ;;  %v2804_v7 = vunpack.c.l.bf16 %v2783_v40 }
 0x123   : >> { %1377 = vst [vmem:[#allocation2 + $0x40] sm:$0x11] %v1376_v61  ;;  %v1531_v23 = vmul.f32 %v8744_v32, %v9014_v63  ;;  %v1532_v22 = vmul.f32 %v8746_v33, %v9016_v55  ;;  %v1642_v39 = vmul.f32 %v8784_v17, %v9014_v63  ;;  %v1643_v61 = vmul.f32 %v8786_v18, %v9016_v55 }
 0x124   : >> { %1380 = vst [vmem:[#allocation2 + $0x48] sm:$0xff] %v1379_v44  ;;  %v2805_v56 = vunpack.c.h.bf16 %v2783_v40  ;;  %v9036_v54 = vpack.c.bf16 %v2336_v58, %v2335_v59  ;;  %v9038_v16 = vunpack.c.l.bf16 %v2803_v34  ;;  %v1876_v30 = vunpack.c.l.bf16 %v1858_v48 }
 0x125   : >> { %14209 = vst [vmem:[#allocation55_spill] sm:$0xff] %v9018_v3  ;;  %v9040_v24 = vpack.c.bf16 %v1532_v22, %v1531_v23  ;;  %v9042_v44 = vpack.c.bf16 %v1643_v61, %v1642_v39  ;;  %v1877_v25 = vunpack.c.h.bf16 %v1858_v48  ;;  %v2029_v59 = vmul.f32 %v8772_v12, %v9014_v63 }
 0x126   : >> { %14210 = vst [vmem:[#allocation56_spill] sm:$0xff] %v9020_v15  ;;  %v1081_v58 = vshrl.u32 %v9022_v42, 16  ;;  %v2139_v28 = vmul.f32 %v8792_v20, %v9016_v55 }
 0x127   : >> { %14211 = vst [vmem:[#allocation57_spill] sm:$0xff] %v9032_v35  ;;  %v1488_v26 = vld [vmem:[#allocation2 + $0x38] sm:$0xff]  ;;  %v2138_v35 = vmul.f32 %v8790_v19, %v9014_v63 }
 0x128   : >> { %14212 = vst [vmem:[#allocation58_spill] sm:$0xff] %v9034_v6  ;;  %v9044_v60 = vunpack.c.l.bf16 %v1488_v26  ;;  %v9046_v10 = vunpack.c.h.bf16 %v1488_v26  ;;  %v2030_v6 = vmul.f32 %v8776_v13, %v9016_v55 }
 0x129   : >> { %14213 = vst [vmem:[#allocation59_spill] sm:$0xff] %v9036_v54 }
 0x12a   : >> { %14214 = vst [vmem:[#allocation60_spill] sm:$0xff] %v9038_v16  ;;  %v1583_v27 = vld [vmem:[#allocation2 + $0x40] sm:$0x11]  ;;  %v1529_v40 = vmul.f32 %v8744_v32, %v9044_v60  ;;  %v1530_v34 = vmul.f32 %v8746_v33, %v9046_v10  ;;  %v1638_v48 = vmul.f32 %v8784_v17, %v9044_v60  ;;  %v1639_v23 = vmul.f32 %v8786_v18, %v9046_v10 }
 0x12b   : >> { %14215 = vst [vmem:[#allocation61_spill] sm:$0xff] %v9040_v24  ;;  %v1789_v37 = vld [vmem:[#allocation2 + $0x40] sm:$0x11]  ;;  %v1614_v15 = vunpack.c.l.bf16 %v1583_v27  ;;  %v1615_v3 = vunpack.c.h.bf16 %v1583_v27  ;;  %v1842_v61 = vmul.f32 %v8806_v45, %v9044_v60  ;;  %v1843_v26 = vmul.f32 %v8808_v46, %v9046_v10 }
 0x12c   : >> { %v1818_v22 = vunpack.c.l.bf16 %v1789_v37  ;;  %v1819_v39 = vunpack.c.h.bf16 %v1789_v37  ;;  %v9063_v27 = vpack.c.bf16 %v1530_v34, %v1529_v40  ;;  %v1655_v54 = vpack.c.bf16 %v1639_v23, %v1638_v48  ;;  %v2082_v8 = vld [vmem:[#allocation2 + $0x40] sm:$0x11] }
 0x12d   : >> { %v1859_v38 = vpack.c.bf16 %v1843_v26, %v1842_v61  ;;  %v2027_v62 = vmul.f32 %v8772_v12, %v9044_v60  ;;  %v2028_v37 = vmul.f32 %v8776_v13, %v9046_v10  ;;  %v9076_v40 = vmul.f32 %v8883_v36, %v2804_v7 }
 0x12e   : >> { %14216 = vst [vmem:[#allocation62_spill] sm:$0xff] %v9063_v27  ;;  %v9079_v34 = vmul.f32 %v9038_v16, %v2805_v56  ;;  %v1640_v48 = vmul.f32 %v8784_v17, %v1614_v15  ;;  %v1641_v23 = vmul.f32 %v8786_v18, %v1615_v3  ;;  %v9083_v61 = vrot.slane %v1876_v30, 2  ;;  %v2287_v15 = vld [vmem:[#allocation2 + $0x40] sm:$0x11] }
 0x12f   : >> { %14217 = vst [vmem:[#allocation63_spill] sm:$0xff] %v9076_v40  ;;  %v9085_v26 = vrot.slane %v1877_v25, 2  ;;  %v1844_v5 = vmul.f32 %v8806_v45, %v1818_v22  ;;  %v1845_v57 = vmul.f32 %v8808_v46, %v1819_v39  ;;  %v9089_v4 = vpack.c.bf16 %v2028_v37, %v2027_v62 }
 0x130   : >> { %14218 = vst [vmem:[#allocation64_spill] sm:$0xff] %v9079_v34  ;;  %v9092_v40 = vrot.slane %v1081_v58, 7  ;;  %v9095_v34 = vpack.c.bf16 %v2030_v6, %v2029_v59  ;;  %v9097_v3 = vpack.c.bf16 %v2139_v28, %v2138_v35  ;;  %v9101_v25 = vmul.f32 %v8863_v11, %v9014_v63 }
 0x131   : >> { %14219 = vst [vmem:[#allocation65_spill] sm:$0xff] %v9083_v61  ;;  %v9105_v62 = vmul.f32 %v8871_v49, %v9016_v55  ;;  %v1656_v58 = vpack.c.bf16 %v1641_v23, %v1640_v48  ;;  %v2110_v22 = vunpack.c.l.bf16 %v2082_v8  ;;  %v2111_v39 = vunpack.c.h.bf16 %v2082_v8 }
 0x132   : >> { %14220 = vst [vmem:[#allocation66_spill] sm:$0xff] %v9085_v26  ;;  %v1674_v37 = vunpack.c.l.bf16 %v1655_v54  ;;  %v1860_v7 = vpack.c.bf16 %v1845_v57, %v1844_v5  ;;  %v2134_v6 = vmul.f32 %v8790_v19, %v9044_v60  ;;  %v2135_v28 = vmul.f32 %v8792_v20, %v9046_v10 }
 0x133   : >> { %14221 = vst [vmem:[#allocation67_spill] sm:$0xff] %v9089_v4  ;;  %v2136_v35 = vmul.f32 %v8790_v19, %v2110_v22  ;;  %v2137_v59 = vmul.f32 %v8792_v20, %v2111_v39  ;;  %v2313_v56 = vunpack.c.l.bf16 %v2287_v15  ;;  %v1675_v26 = vunpack.c.h.bf16 %v1655_v54  ;;  %v9140_v54 = vld [vmem:[#allocation2 + $0x40] sm:$0x11] }
 0x134   : >> { %14222 = vst [vmem:[#allocation68_spill] sm:$0xff] %v9095_v34  ;;  %v2314_v34 = vunpack.c.h.bf16 %v2287_v15  ;;  %v2154_v30 = vpack.c.bf16 %v2135_v28, %v2134_v6  ;;  %v2337_v8 = vmul.f32 %v8810_v47, %v9044_v60  ;;  %v2338_v5 = vmul.f32 %v8814_v41, %v9046_v10 }
 0x135   : >> { %14223 = vst [vmem:[#allocation69_spill] sm:$0xff] %v9101_v25  ;;  %v1676_v57 = vunpack.c.l.bf16 %v1656_v58  ;;  %v1677_v48 = vunpack.c.h.bf16 %v1656_v58  ;;  %v1878_v23 = vunpack.c.l.bf16 %v1859_v38  ;;  %v1879_v61 = vunpack.c.h.bf16 %v1859_v38 }
 0x136   : >> { %14224 = vst [vmem:[#allocation70_spill] sm:$0xff] %v9105_v62  ;;  %v2580_v62 = vld [vmem:[#allocation2 + $0x40] sm:$0x11]  ;;  %v2155_v25 = vpack.c.bf16 %v2137_v59, %v2136_v35  ;;  %v2339_v22 = vmul.f32 %v8810_v47, %v2313_v56  ;;  %v2340_v39 = vmul.f32 %v8814_v41, %v2314_v34  ;;  %v9121_v15 = vpack.c.bf16 %v2338_v5, %v2337_v8  ;;  %v9128_v35 = vpop.f32.mrf.mxu1 }
 0x137   : >> { %v9124_v6 = vrot.slane %v1674_v37, 1  ;;  %v1880_v28 = vunpack.c.l.bf16 %v1860_v7  ;;  %v1881_v4 = vunpack.c.h.bf16 %v1860_v7  ;;  %v9126_v43 = vrot.slane %v1675_v26, 1 }
 0x138   : >> { %14225 = vst [vmem:[#allocation71_spill] sm:$0xff] %v9121_v15  ;;  %v2170_v58 = vunpack.c.l.bf16 %v2154_v30  ;;  %v2171_v53 = vunpack.c.h.bf16 %v2154_v30  ;;  %v2605_v38 = vunpack.c.l.bf16 %v2580_v62  ;;  %v9130_v56 = vrot.slane %v1676_v57, 1  ;;  %v1790_v30 = vld [vmem:[#allocation2 + $0x48] sm:$0xee]  ;;  %v8044_v57 = vld [vmem:[%s9144_s14 + $0x38] sm:$0xff] }
 0x139   : >> { %14226 = vst [vmem:[#allocation72_spill] sm:$0xff] %v9124_v6  ;;  %v9132_v34 = vrot.slane %v1677_v48, 1  ;;  %v9134_v59 = vrot.slane %v1878_v23, 2  ;;  %v2606_v37 = vunpack.c.h.bf16 %v2580_v62  ;;  %v9136_v8 = vrot.slane %v1879_v61, 2  ;;  %v7995_v62 = vld [vmem:[%s8538_s21 + $0x58] sm:$0xff]  ;;  %7305 = vmatpush.bf16.msra.mxu2 %v8044_v57 }
 0x13a   : >> { %14227 = vst [vmem:[#allocation73_spill] sm:$0xff] %v9126_v43  ;;  %v2172_v7 = vunpack.c.l.bf16 %v2155_v25  ;;  %v2173_v26 = vunpack.c.h.bf16 %v2155_v25  ;;  %v9138_v5 = vpack.c.bf16 %v2340_v39, %v2339_v22  ;;  %v9147_v27 = vrot.slane %v1880_v28, 2  ;;  %7776 = vmatmul.msk.bf16.gmra.mxu0 %vm643_vm3, %v7995_v62  ;;  %7792 = vmatmul.msk.bf16.gmra.mxu1 %vm643_vm3, %v7995_v62  ;;  %v2288_v57 = vld [vmem:[#allocation2 + $0x48] sm:$0xee]  ;;  %v1382_v6 = vld [vmem:[#allocation2 + $0x58] sm:$0x11] }
 0x13b   : >> { %14228 = vst [vmem:[#allocation74_spill] sm:$0xff] %v9130_v56  ;;  %v9149_v48 = vrot.slane %v1881_v4, 2  ;;  %v9153_v61 = vmul.f32 %v8863_v11, %v9044_v60  ;;  %v9157_v25 = vmul.f32 %v8871_v49, %v9046_v10  ;;  %v9160_v23 = vrot.slane %v2170_v58, 1 }
 0x13c   : >> { %14229 = vst [vmem:[#allocation75_spill] sm:$0xff] %v9132_v34  ;;  %v9162_v22 = vrot.slane %v2171_v53, 1  ;;  %v9166_v39 = vmul.f32 %v8873_v21, %v9044_v60  ;;  %v2631_v4 = vmul.f32 %v8873_v21, %v2605_v38  ;;  %v2632_v28 = vmul.f32 %v8877_v29, %v2606_v37  ;;  %v8043_v37 = vld [vmem:[%s9144_s14 + $0x30] sm:$0xff] }
 0x13d   : >> { %14230 = vst [vmem:[#allocation76_spill] sm:$0xff] %v9134_v59  ;;  %v9173_v58 = vrot.slane %v2172_v7, 1  ;;  %v9175_v53 = vrot.slane %v2173_v26, 1  ;;  %v9180_v38 = vmul.f32 %v8877_v29, %v9046_v10  ;;  %v9189_v7 = vmul.f32 %v8883_v36, %v9044_v60  ;;  %7306 = vmatpush.bf16.msra.mxu2 %v8043_v37  ;;  %v2786_v37 = vld [vmem:[#allocation2 + $0x48] sm:$0xee] }
 0x13e   : >> { %14231 = vst [vmem:[#allocation77_spill] sm:$0xff] %v9136_v8  ;;  %v1821_v8 = vunpack.c.h.bf16 %v1790_v30  ;;  %v9193_v26 = vmul.f32 %v9038_v16, %v9046_v10  ;;  %v9197_v34 = vpack.c.bf16 %v2632_v28, %v2631_v4  ;;  %v14247_v60 = vshll.u32 %v9022_v42, 16  ;;  %v813_v43 = vpop.f32.mrf.mxu1 }
 0x13f   : >> { %14232 = vst [vmem:[#allocation78_spill] sm:$0xff] %v9138_v5  ;;  %v1088_v10 = vrot.slane %v9092_v40, 4  ;;  %v723_v59 = vadd.f32 %v722_v9, %v8699_v51  ;;  %v1678_v4 = vunpack.c.l.bf16 %v9042_v44  ;;  %v1679_v28 = vunpack.c.h.bf16 %v9042_v44 }
 0x140   : >> { %14233 = vst [vmem:[#allocation79_spill] sm:$0xff] %v9147_v27  ;;  %v1820_v27 = vunpack.c.l.bf16 %v1790_v30  ;;  %v2809_v30 = vunpack.c.h.bf16 %v9140_v54  ;;  %v1847_v62 = vmul.f32 %v8808_v46, %v1821_v8  ;;  %v2316_v8 = vunpack.c.h.bf16 %v2288_v57 }
 0x141   : >> { %14234 = vst [vmem:[#allocation80_spill] sm:$0xff] %v9149_v48  ;;  %v2808_v48 = vunpack.c.l.bf16 %v9140_v54  ;;  %v1086_v15 = vor.u32 %v14247_v60, %v9092_v40  ;;  %v1383_v40 = vsel %vm8542_vm10, %v1088_v10, %v1382_v6  ;;  %v888_v9 = vmax.f32 %v723_v59, 0.0 }
 0x142   : >> { %14235 = vst [vmem:[#allocation81_spill] sm:$0xff] %v9153_v61  ;;  %v1846_v56 = vmul.f32 %v8806_v45, %v1820_v27  ;;  %v2315_v27 = vunpack.c.l.bf16 %v2288_v57  ;;  %v2175_v57 = vunpack.c.h.bf16 %v9097_v3  ;;  %v2342_v44 = vmul.f32 %v8814_v41, %v2316_v8 }
 0x143   : >> { %14236 = vst [vmem:[#allocation82_spill] sm:$0xff] %v9157_v25  ;;  %v9200_v54 = vmul.f32 %v8883_v36, %v2808_v48  ;;  %v2174_v48 = vunpack.c.l.bf16 %v9097_v3  ;;  %v9226_v59 = vmul.f32 %v9038_v16, %v2809_v30  ;;  %v952_v10 = vmin.f32 %v888_v9, 6.0 }
 0x144   : >> { %14237 = vst [vmem:[#allocation83_spill] sm:$0xff] %v9160_v23  ;;  %v1861_v5 = vpack.c.bf16 %v1847_v62, %v1846_v56  ;;  %v14248_v56 = vrot.slane %v8986_v31, 4  ;;  %v812_v62 = vadd.f32 %v9128_v35, %v8701_v52  ;;  %v2341_v60 = vmul.f32 %v8810_v47, %v2315_v27 }
 0x145   : >> { %14238 = vst [vmem:[#allocation84_spill] sm:$0xff] %v9162_v22  ;;  %v814_v31 = vadd.f32 %v813_v43, %v8701_v52  ;;  %v9228_v35 = vrot.slane %v1678_v4, 1  ;;  %v9230_v27 = vrot.slane %v1679_v28, 1  ;;  %v9232_v22 = vld [vmem:[#allocation2] sm:$0xff]  ;;  %v1484_v43 = vld [vmem:[#allocation2 + $0x8] sm:$0xff]  ;;  %v9234_v23 = vrot.slane %v2174_v48, 1 }
 0x146   : >> { %14239 = vst [vmem:[#allocation85_spill] sm:$0xff] %v9166_v39  ;;  %v1087_v42 = vsel %vm8765_vm9, %v14248_v56, %v1086_v15  ;;  %v1882_v24 = vunpack.c.l.bf16 %v1861_v5  ;;  %v2810_v15 = vunpack.c.l.bf16 %v2786_v37  ;;  %v2811_v56 = vunpack.c.h.bf16 %v2786_v37 }
 0x147   : >> { %14240 = vst [vmem:[#allocation86_spill] sm:$0xff] %v9173_v58  ;;  %v889_v6 = vmax.f32 %v812_v62, 0.0  ;;  %v1883_v8 = vunpack.c.h.bf16 %v1861_v5  ;;  %v9236_v37 = vrot.slane %v2175_v57, 1  ;;  %v9240_v30 = vmul.f32 %v8873_v21, %v9014_v63  ;;  %v8042_v5 = vld [vmem:[%s9144_s14 + $0x28] sm:$0xff] }
 0x148   : >> { %14241 = vst [vmem:[#allocation87_spill] sm:$0xff] %v9175_v53  ;;  %v724_v53 = vpop.f32.mrf.mxu0  ;;  %v9244_v4 = vmul.f32 %v8877_v29, %v9016_v55  ;;  %v9247_v28 = vrot.slane %v1882_v24, 2  ;;  %v9252_v9 = vmul.f32 %v8883_v36, %v2810_v15  ;;  %v9255_v48 = vmul.f32 %v9038_v16, %v2811_v56  ;;  %7307 = vmatpush.bf16.msra.mxu2 %v8042_v5 }
 0x149   : >> { %14242 = vst [vmem:[#allocation88_spill] sm:$0xff] %v9180_v38  ;;  %v725_v3 = vadd.f32 %v724_v53, %v8699_v51  ;;  %v891_v53 = vmax.f32 %v814_v31, 0.0  ;;  %v9257_v57 = vrot.slane %v1883_v8, 2  ;;  %v13911_v63 = vunpack.c.l.bf16 %v9232_v22 }
 0x14a   : >> { %14243 = vst [vmem:[#allocation89_spill] sm:$0xff] %v9189_v7  ;;  %v13912_v62 = vunpack.c.h.bf16 %v9232_v22  ;;  %v9261_v55 = vunpack.c.l.bf16 %v1484_v43  ;;  %v9265_v31 = vunpack.c.h.bf16 %v1484_v43 }
 0x14b   : >> { %14244 = vst [vmem:[#allocation90_spill] sm:$0xff] %v9193_v26  ;;  %v890_v58 = vmax.f32 %v725_v3, 0.0  ;;  %v1519_v5 = vmul.f32 %v8744_v32, %v13911_v63 }
 0x14c   : >> { %14245 = vst [vmem:[#allocation91_spill] sm:$0xff] %v9197_v34 }
 0x14d   : >> { %14246 = vst [vmem:[#allocation92_spill] sm:$0xff] %v9200_v54 }
 0x14e   : >> { %1381 = vst.msk [vmem:[#allocation2 + $0x50] sm:$0xff] %vm8519_vm2, %v1087_v42  ;;  %v953_v42 = vmin.f32 %v889_v6, 6.0 }
 0x14f   : >> { %1384 = vst [vmem:[#allocation2 + $0x58] sm:$0x11] %v1383_v40  ;;  %v9249_v40 = vpack.c.bf16 %v2342_v44, %v2341_v60  ;;  %v954_v60 = vmin.f32 %v890_v58, 6.0  ;;  %v955_v44 = vmin.f32 %v891_v53, 6.0 }
 0x150   : >> { %14249 = vst [vmem:[#allocation93_spill] sm:$0xff] %v9226_v59  ;;  %v9263_v24 = vpack.c.bf16 %v953_v42, %v952_v10  ;;  %v1520_v10 = vmul.f32 %v8746_v33, %v13912_v62 }
 0x151   : >> { %14250 = vst [vmem:[#allocation94_spill] sm:$0xff] %v9228_v35 }
 0x152   : >> { %14251 = vst [vmem:[#allocation95_spill] sm:$0xff] %v9230_v27  ;;  %v8041_v27 = vld [vmem:[%s9144_s14 + $0x20] sm:$0xff]  ;;  %v1090_v54 = vshrl.u32 %v9263_v24, 16 }
 0x153   : >> { %14252 = vst [vmem:[#allocation96_spill] sm:$0xff] %v9234_v23  ;;  %7308 = vmatpush.bf16.msra.mxu2 %v8041_v27 }
 0x154   : >> { %14253 = vst [vmem:[#allocation97_spill] sm:$0xff] %v9236_v37 }
 0x155   : >> { %14254 = vst [vmem:[#allocation98_spill] sm:$0xff] %v9240_v30  ;;  %v1490_v3 = vld [vmem:[#allocation2 + $0x50] sm:$0xff] }
 0x156   : >> { %14255 = vst [vmem:[#allocation99_spill] sm:$0xff] %v9244_v4  ;;  %v9267_v15 = vunpack.c.l.bf16 %v1490_v3  ;;  %v9269_v56 = vunpack.c.h.bf16 %v1490_v3  ;;  %v1586_v6 = vld [vmem:[#allocation2 + $0x58] sm:$0x11] }
 0x157   : >> { %14256 = vst [vmem:[#allocation100_spill] sm:$0xff] %v9247_v28  ;;  %v1792_v8 = vld [vmem:[#allocation2 + $0x58] sm:$0x11]  ;;  %v1620_v42 = vunpack.c.l.bf16 %v1586_v6  ;;  %v1621_v58 = vunpack.c.h.bf16 %v1586_v6 }
 0x158   : >> { %14257 = vst [vmem:[#allocation101_spill] sm:$0xff] %v9249_v40  ;;  %v1824_v53 = vunpack.c.l.bf16 %v1792_v8  ;;  %v1533_v43 = vmul.f32 %v8744_v32, %v9267_v15  ;;  %v1534_v3 = vmul.f32 %v8746_v33, %v9269_v56  ;;  %v1644_v28 = vmul.f32 %v8784_v17, %v9267_v15  ;;  %v2290_v26 = vld [vmem:[#allocation2 + $0x58] sm:$0x11] }
 0x159   : >> { %14258 = vst [vmem:[#allocation102_spill] sm:$0xff] %v9252_v9  ;;  %v1645_v63 = vmul.f32 %v8786_v18, %v9269_v56  ;;  %v1646_v35 = vmul.f32 %v8784_v17, %v1620_v42  ;;  %v1647_v62 = vmul.f32 %v8786_v18, %v1621_v58  ;;  %v1848_v6 = vmul.f32 %v8806_v45, %v9267_v15 }
 0x15a   : >> { %14259 = vst [vmem:[#allocation103_spill] sm:$0xff] %v9255_v48  ;;  %v9292_v40 = vpack.c.bf16 %v1534_v3, %v1533_v43  ;;  %v1850_v23 = vmul.f32 %v8806_v45, %v1824_v53  ;;  %v2031_v42 = vmul.f32 %v8772_v12, %v9267_v15  ;;  %v2032_v58 = vmul.f32 %v8776_v13, %v9269_v56  ;;  %v2085_v3 = vld [vmem:[#allocation2 + $0x58] sm:$0x11] }
 0x15b   : >> { %14260 = vst [vmem:[#allocation104_spill] sm:$0xff] %v9257_v57  ;;  %v1825_v57 = vunpack.c.h.bf16 %v1792_v8  ;;  %v1849_v8 = vmul.f32 %v8808_v46, %v9269_v56  ;;  %v1658_v37 = vpack.c.bf16 %v1645_v63, %v1644_v28  ;;  %v1659_v9 = vpack.c.bf16 %v1647_v62, %v1646_v35 }
 0x15c   : >> { %14261 = vst [vmem:[#allocation105_spill] sm:$0xff] %v9292_v40  ;;  %v9301_v43 = vpack.c.bf16 %v955_v44, %v954_v60  ;;  %v9306_v62 = vpack.c.bf16 %v2032_v58, %v2031_v42  ;;  %v2117_v27 = vunpack.c.h.bf16 %v2085_v3  ;;  %v2140_v42 = vmul.f32 %v8790_v19, %v9267_v15  ;;  %v2583_v58 = vld [vmem:[#allocation2 + $0x58] sm:$0x11] }
 0x15d   : >> { %v1851_v48 = vmul.f32 %v8808_v46, %v1825_v57  ;;  %v1862_v4 = vpack.c.bf16 %v1849_v8, %v1848_v6  ;;  %v1680_v30 = vunpack.c.l.bf16 %v1658_v37  ;;  %v1681_v59 = vunpack.c.h.bf16 %v1658_v37 }
 0x15e   : >> { %v1682_v28 = vunpack.c.l.bf16 %v1659_v9  ;;  %v1683_v63 = vunpack.c.h.bf16 %v1659_v9  ;;  %14262 = vst [vmem:[#allocation106_spill] sm:$0xff] %v9306_v62  ;;  %v9308_v6 = vpack.c.bf16 %v1520_v10, %v1519_v5  ;;  %v2143_v5 = vmul.f32 %v8792_v20, %v2117_v27 }
 0x15f   : >> { %v1863_v53 = vpack.c.bf16 %v1851_v48, %v1850_v23  ;;  %v9310_v8 = vrot.slane %v1680_v30, 1  ;;  %v9312_v37 = vrot.slane %v1681_v59, 1  ;;  %v1884_v60 = vunpack.c.l.bf16 %v1862_v4 }
 0x160   : >> { %v1885_v44 = vunpack.c.h.bf16 %v1862_v4  ;;  %v9314_v9 = vrot.slane %v1682_v28, 1  ;;  %v9316_v23 = vrot.slane %v1683_v63, 1  ;;  %v2116_v48 = vunpack.c.l.bf16 %v2085_v3 }
 0x161   : >> { %14263 = vst [vmem:[#allocation107_spill] sm:$0xff] %v9310_v8  ;;  %v1886_v35 = vunpack.c.l.bf16 %v1863_v53  ;;  %v1887_v7 = vunpack.c.h.bf16 %v1863_v53  ;;  %v2141_v30 = vmul.f32 %v8792_v20, %v9269_v56  ;;  %v2319_v4 = vunpack.c.l.bf16 %v2290_v26 }
 0x162   : >> { %14264 = vst [vmem:[#allocation108_spill] sm:$0xff] %v9312_v37  ;;  %v2142_v59 = vmul.f32 %v8790_v19, %v2116_v48  ;;  %v2320_v10 = vunpack.c.h.bf16 %v2290_v26  ;;  %v9324_v28 = vrot.slane %v1884_v60, 2  ;;  %v2343_v3 = vmul.f32 %v8810_v47, %v9267_v15 }
 0x163   : >> { %14265 = vst [vmem:[#allocation109_spill] sm:$0xff] %v9314_v9  ;;  %v2157_v63 = vpack.c.bf16 %v2141_v30, %v2140_v42  ;;  %v2344_v53 = vmul.f32 %v8814_v41, %v9269_v56  ;;  %v9330_v57 = vrot.slane %v1885_v44, 2  ;;  %v2611_v60 = vunpack.c.l.bf16 %v2583_v58 }
 0x164   : >> { %14266 = vst [vmem:[#allocation110_spill] sm:$0xff] %v9316_v23  ;;  %v2158_v40 = vpack.c.bf16 %v2143_v5, %v2142_v59  ;;  %v2345_v23 = vmul.f32 %v8810_v47, %v2319_v4  ;;  %v2346_v48 = vmul.f32 %v8814_v41, %v2320_v10  ;;  %v2612_v37 = vunpack.c.h.bf16 %v2583_v58 }
 0x165   : >> { %14267 = vst [vmem:[#allocation111_spill] sm:$0xff] %v9324_v28  ;;  %v2176_v27 = vunpack.c.l.bf16 %v2157_v63  ;;  %v2177_v9 = vunpack.c.h.bf16 %v2157_v63  ;;  %v9334_v26 = vpack.c.bf16 %v2344_v53, %v2343_v3  ;;  %v9338_v8 = vrot.slane %v1886_v35, 2  ;;  %v2788_v35 = vld [vmem:[#allocation2 + $0x58] sm:$0x11]  ;;  %v1385_v63 = vld [vmem:[#allocation2 + $0x60] sm:$0xff] }
 0x166   : >> { %14268 = vst [vmem:[#allocation112_spill] sm:$0xff] %v9330_v57  ;;  %v2178_v28 = vunpack.c.l.bf16 %v2158_v40  ;;  %v2179_v42 = vunpack.c.h.bf16 %v2158_v40  ;;  %v9336_v30 = vpack.c.bf16 %v2346_v48, %v2345_v23  ;;  %v9340_v62 = vrot.slane %v1887_v7, 2 }
 0x167   : >> { %14269 = vst [vmem:[#allocation113_spill] sm:$0xff] %v9334_v26  ;;  %v9344_v44 = vmul.f32 %v8863_v11, %v9267_v15  ;;  %v9348_v59 = vmul.f32 %v8871_v49, %v9269_v56  ;;  %v9350_v5 = vrot.slane %v2176_v27, 1  ;;  %v9352_v4 = vrot.slane %v2177_v9, 1  ;;  %v727_v9 = vpop.f32.mrf.mxu0 }
 0x168   : >> { %14270 = vst [vmem:[#allocation114_spill] sm:$0xff] %v9336_v30  ;;  %v9356_v40 = vmul.f32 %v8873_v21, %v9267_v15  ;;  %v9360_v7 = vmul.f32 %v8877_v29, %v9269_v56  ;;  %v9362_v23 = vrot.slane %v2178_v28, 1  ;;  %v9364_v10 = vrot.slane %v2179_v42, 1  ;;  %v7996_v30 = vld [vmem:[%s8538_s21 + $0x60] sm:$0xff] }
 0x169   : >> { %14271 = vst [vmem:[#allocation115_spill] sm:$0xff] %v9338_v8  ;;  %v2637_v3 = vmul.f32 %v8873_v21, %v2611_v60  ;;  %v2638_v53 = vmul.f32 %v8877_v29, %v2612_v37  ;;  %v1092_v48 = vrot.slane %v1090_v54, 7  ;;  %v1098_v27 = vshrl.u32 %v9301_v43, 16  ;;  %v8040_v8 = vld [vmem:[%s9144_s14 + $0x18] sm:$0xff]  ;;  %7777 = vmatmul.msk.bf16.gmra.mxu0 %vm643_vm3, %v7996_v30  ;;  %7793 = vmatmul.msk.bf16.gmra.mxu1 %vm643_vm3, %v7996_v30 }
 0x16a   : >> { %14272 = vst [vmem:[#allocation116_spill] sm:$0xff] %v9340_v62  ;;  %v816_v62 = vpop.f32.mrf.mxu1  ;;  %v2814_v57 = vunpack.c.l.bf16 %v2788_v35  ;;  %v2815_v28 = vunpack.c.h.bf16 %v2788_v35  ;;  %v9374_v42 = vmul.f32 %v8883_v36, %v9267_v15  ;;  %v9378_v58 = vmul.f32 %v9038_v16, %v9269_v56  ;;  %7309 = vmatpush.bf16.msra.mxu2 %v8040_v8 }
 0x16b   : >> { %14273 = vst [vmem:[#allocation117_spill] sm:$0xff] %v9344_v44  ;;  %v14283_v60 = vshll.u32 %v9263_v24, 16  ;;  %v1100_v54 = vrot.slane %v1098_v27, 7  ;;  %v1101_v26 = vshll.u32 %v9301_v43, 16  ;;  %v1096_v35 = vrot.slane %v1092_v48, 4 }
 0x16c   : >> { %14274 = vst [vmem:[#allocation118_spill] sm:$0xff] %v9348_v59  ;;  %v817_v15 = vadd.f32 %v816_v62, %v8701_v52  ;;  %v1521_v56 = vmul.f32 %v8744_v32, %v9261_v55  ;;  %v1522_v24 = vmul.f32 %v8746_v33, %v9265_v31  ;;  %v9398_v62 = vmul.f32 %v8883_v36, %v2814_v57 }
 0x16d   : >> { %14275 = vst [vmem:[#allocation119_spill] sm:$0xff] %v9350_v5  ;;  %v1095_v37 = vor.u32 %v14283_v60, %v1092_v48  ;;  %v1103_v27 = vor.u32 %v1101_v26, %v1100_v54  ;;  %v8039_v48 = vld [vmem:[%s9144_s14 + $0x10] sm:$0xff]  ;;  %v9395_v60 = vpack.c.bf16 %v2638_v53, %v2637_v3  ;;  %v9401_v5 = vmul.f32 %v9038_v16, %v2815_v28 }
 0x16e   : >> { %14276 = vst [vmem:[#allocation120_spill] sm:$0xff] %v9352_v4  ;;  %7310 = vmatpush.bf16.msra.mxu2 %v8039_v48 }
 0x16f   : >> { %14277 = vst [vmem:[#allocation121_spill] sm:$0xff] %v9356_v40  ;;  %v1386_v43 = vsel %vm8724_vm7, %v1095_v37, %v1385_v63  ;;  %v893_v63 = vmax.f32 %v817_v15, 0.0  ;;  %v9413_v37 = vpack.c.bf16 %v1522_v24, %v1521_v56 }
 0x170   : >> { %14278 = vst [vmem:[#allocation122_spill] sm:$0xff] %v9360_v7  ;;  %v2015_v30 = vunpack.c.l.bf16 %v1386_v43  ;;  %v2016_v4 = vunpack.c.h.bf16 %v1386_v43 }
 0x171   : >> { %14279 = vst [vmem:[#allocation123_spill] sm:$0xff] %v9362_v23  ;;  %v1389_v23 = vld [vmem:[#allocation2 + $0x70] sm:$0x11]  ;;  %v957_v24 = vmin.f32 %v893_v63, 6.0 }
 0x172   : >> { %14280 = vst [vmem:[#allocation124_spill] sm:$0xff] %v9364_v10  ;;  %v728_v10 = vadd.f32 %v727_v9, %v8699_v51  ;;  %v1105_v9 = vrot.slane %v1100_v54, 4  ;;  %v2034_v3 = vmul.f32 %v8776_v13, %v2016_v4  ;;  %v2144_v57 = vmul.f32 %v8790_v19, %v2015_v30 }
 0x173   : >> { %14281 = vst [vmem:[#allocation125_spill] sm:$0xff] %v9374_v42  ;;  %v2145_v53 = vmul.f32 %v8792_v20, %v2016_v4  ;;  %v9422_v48 = vmul.f32 %v8863_v11, %v2015_v30  ;;  %v3149_v56 = vmul.f32 %v2016_v4, %v8786_v18 }
 0x174   : >> { %14282 = vst [vmem:[#allocation126_spill] sm:$0xff] %v9378_v58  ;;  %v892_v8 = vmax.f32 %v728_v10, 0.0  ;;  %v1104_v58 = vsel %vm8765_vm9, %v1096_v35, %v1103_v27  ;;  %v1390_v26 = vsel %vm8542_vm10, %v1105_v9, %v1389_v23  ;;  %v2033_v10 = vmul.f32 %v8772_v12, %v2015_v30  ;;  %v729_v9 = vpop.f32.mrf.mxu0 }
 0x175   : >> { %14284 = vst [vmem:[#allocation127_spill] sm:$0xff] %v9395_v60  ;;  %v2159_v15 = vpack.c.bf16 %v2145_v53, %v2144_v57  ;;  %v3081_v27 = vmul.f32 %v2016_v4, %v8746_v33  ;;  %v9432_v53 = vmul.f32 %v8873_v21, %v2015_v30  ;;  %v9435_v23 = vmul.f32 %v8877_v29, %v2016_v4 }
 0x176   : >> { %14285 = vst [vmem:[#allocation128_spill] sm:$0xff] %v9398_v62  ;;  %v956_v28 = vmin.f32 %v892_v8, 6.0  ;;  %v9417_v35 = vpack.c.bf16 %v2034_v3, %v2033_v10  ;;  %v818_v8 = vpop.f32.mrf.mxu1  ;;  %v9427_v10 = vmul.f32 %v8871_v49, %v2016_v4 }
 0x177   : >> { %1387 = vst [vmem:[#allocation2 + $0x60] sm:$0xff] %v1386_v43  ;;  %v3080_v43 = vmul.f32 %v2015_v30, %v8744_v32  ;;  %v2181_v54 = vunpack.c.h.bf16 %v2159_v15 }
 0x178   : >> { %14286 = vst [vmem:[#allocation129_spill] sm:$0xff] %v9401_v5  ;;  %v9438_v5 = vadd.f32 %v729_v9, %v8699_v51  ;;  %v9440_v42 = vpack.c.bf16 %v957_v24, %v956_v28 }
 0x179   : >> { %1388 = vst.msk [vmem:[#allocation2 + $0x68] sm:$0xff] %vm8519_vm2, %v1104_v58  ;;  %v3148_v58 = vmul.f32 %v2015_v30, %v8784_v17  ;;  %v9429_v3 = vpack.c.bf16 %v3081_v27, %v3080_v43  ;;  %v9443_v43 = vadd.f32 %v818_v8, %v8701_v52 }
 0x17a   : >> { %1391 = vst [vmem:[#allocation2 + $0x70] sm:$0x11] %v1390_v26  ;;  %v2180_v26 = vunpack.c.l.bf16 %v2159_v15 }
 0x17b   : >> { %14287 = vst [vmem:[#allocation130_spill] sm:$0xff] %v9417_v35 }
 0x17c   : >> { %14288 = vst [vmem:[#allocation131_spill] sm:$0xff] %v9422_v48  ;;  %v3172_v48 = vpack.c.bf16 %v3149_v56, %v3148_v58  ;;  %v9445_v27 = vrot.slane %v2180_v26, 1  ;;  %v9449_v58 = vrot.slane %v2181_v54, 1 }
 0x17d   : >> { %14289 = vst [vmem:[#allocation132_spill] sm:$0xff] %v9427_v10 }
 0x17e   : >> { %14290 = vst [vmem:[#allocation133_spill] sm:$0xff] %v9429_v3  ;;  %v2291_v57 = vld [vmem:[#allocation2 + $0x60] sm:$0xee]  ;;  %v3184_v4 = vunpack.c.l.bf16 %v3172_v48 }
 0x17f   : >> { %14291 = vst [vmem:[#allocation134_spill] sm:$0xff] %v9432_v53  ;;  %v2789_v35 = vld [vmem:[#allocation2 + $0x60] sm:$0xee]  ;;  %v2321_v63 = vunpack.c.l.bf16 %v2291_v57  ;;  %v2322_v62 = vunpack.c.h.bf16 %v2291_v57 }
 0x180   : >> { %14292 = vst [vmem:[#allocation135_spill] sm:$0xff] %v9435_v23  ;;  %v3304_v15 = vld [vmem:[#allocation2 + $0x60] sm:$0xee]  ;;  %v2816_v30 = vunpack.c.l.bf16 %v2789_v35  ;;  %v1992_v53 = vld [vmem:[#allocation2 + $0x68] sm:$0xff]  ;;  %v2817_v9 = vunpack.c.h.bf16 %v2789_v35  ;;  %v3185_v23 = vunpack.c.h.bf16 %v3172_v48  ;;  %v9489_v50 = vrot.slane %v3184_v4, 1 }
 0x181   : >> { %14293 = vst [vmem:[#allocation136_spill] sm:$0xff] %v9445_v27  ;;  %v2088_v28 = vld [vmem:[#allocation2 + $0x70] sm:$0x11]  ;;  %v2347_v24 = vmul.f32 %v8810_v47, %v2321_v63  ;;  %v2348_v8 = vmul.f32 %v8814_v41, %v2322_v62  ;;  %v3308_v26 = vunpack.c.l.bf16 %v3304_v15  ;;  %v3309_v27 = vunpack.c.h.bf16 %v3304_v15 }
 0x182   : >> { %14294 = vst [vmem:[#allocation137_spill] sm:$0xff] %v9449_v58  ;;  %v2293_v10 = vld [vmem:[#allocation2 + $0x70] sm:$0x11]  ;;  %v9456_v60 = vmul.f32 %v8883_v36, %v2816_v30  ;;  %v9458_v54 = vunpack.c.l.bf16 %v1992_v53  ;;  %v9462_v57 = vunpack.c.h.bf16 %v1992_v53  ;;  %v2122_v3 = vunpack.c.l.bf16 %v2088_v28 }
 0x183   : >> { %v3316_v35 = vmul.f32 %v3308_v26, %v8806_v45  ;;  %v3317_v56 = vmul.f32 %v3309_v27, %v8808_v46  ;;  %v2123_v63 = vunpack.c.h.bf16 %v2088_v28  ;;  %v2325_v30 = vunpack.c.l.bf16 %v2293_v10  ;;  %14300 = vst [vmem:[#allocation143_spill] sm:$0xff] %v9489_v50  ;;  %v8045_v50 = vld [vmem:[%s9144_s14 + $0x40] sm:$0xff] }
 0x184   : >> { %14295 = vst [vmem:[#allocation138_spill] sm:$0xff] %v9456_v60  ;;  %v2035_v62 = vmul.f32 %v8772_v12, %v9458_v54  ;;  %v2146_v15 = vmul.f32 %v8790_v19, %v9458_v54  ;;  %v2036_v48 = vmul.f32 %v8776_v13, %v9462_v57  ;;  %v2147_v26 = vmul.f32 %v8792_v20, %v9462_v57 }
 0x185   : >> { %v3340_v58 = vpack.c.bf16 %v3317_v56, %v3316_v35  ;;  %v2148_v27 = vmul.f32 %v8790_v19, %v2122_v3  ;;  %v2149_v53 = vmul.f32 %v8792_v20, %v2123_v63  ;;  %v2326_v60 = vunpack.c.h.bf16 %v2293_v10  ;;  %v2586_v63 = vld [vmem:[#allocation2 + $0x70] sm:$0x11]  ;;  %7401 = vmatpush.bf16.msra.mxu3 %v8045_v50 }
 0x186   : >> { %v2349_v7 = vmul.f32 %v8810_v47, %v9458_v54  ;;  %v2350_v28 = vmul.f32 %v8814_v41, %v9462_v57  ;;  %v9478_v56 = vpack.c.bf16 %v2036_v48, %v2035_v62  ;;  %v2160_v35 = vpack.c.bf16 %v2147_v26, %v2146_v15 }
 0x187   : >> { %v3352_v40 = vunpack.c.l.bf16 %v3340_v58  ;;  %v3353_v59 = vunpack.c.h.bf16 %v3340_v58  ;;  %v2161_v44 = vpack.c.bf16 %v2149_v53, %v2148_v27  ;;  %v2351_v34 = vmul.f32 %v8810_v47, %v2325_v30 }
 0x188   : >> { %14296 = vst [vmem:[#allocation139_spill] sm:$0xff] %v9478_v56  ;;  %v2352_v38 = vmul.f32 %v8814_v41, %v2326_v60  ;;  %v9482_v3 = vpack.c.bf16 %v2350_v28, %v2349_v7  ;;  %v9484_v10 = vpack.c.bf16 %v2348_v8, %v2347_v24  ;;  %v9487_v39 = vmul.f32 %v9038_v16, %v2817_v9  ;;  %v2791_v8 = vld [vmem:[#allocation2 + $0x70] sm:$0x11] }
 0x189   : >> { %v2182_v25 = vunpack.c.l.bf16 %v2160_v35  ;;  %v2183_v61 = vunpack.c.h.bf16 %v2160_v35  ;;  %v2184_v58 = vunpack.c.l.bf16 %v2161_v44  ;;  %v2185_v62 = vunpack.c.h.bf16 %v2161_v44 }
 0x18a   : >> { %14297 = vst [vmem:[#allocation140_spill] sm:$0xff] %v9482_v3  ;;  %v9491_v15 = vpack.c.bf16 %v2352_v38, %v2351_v34  ;;  %v9493_v30 = vrot.slane %v3185_v23, 1  ;;  %v9495_v60 = vrot.slane %v3352_v40, 2  ;;  %v9497_v7 = vrot.slane %v3353_v59, 2  ;;  %v3136_v38 = vld [vmem:[#allocation2 + $0x70] sm:$0x11] }
 0x18b   : >> { %14298 = vst [vmem:[#allocation141_spill] sm:$0xff] %v9484_v10  ;;  %v2617_v24 = vunpack.c.l.bf16 %v2586_v63  ;;  %v9499_v48 = vrot.slane %v2182_v25, 1  ;;  %v9501_v9 = vrot.slane %v2183_v61, 1  ;;  %v9505_v4 = vmul.f32 %v8863_v11, %v9458_v54  ;;  %v8038_v25 = vld [vmem:[%s9144_s14 + $0x8] sm:$0xff] }
 0x18c   : >> { %14299 = vst [vmem:[#allocation142_spill] sm:$0xff] %v9487_v39  ;;  %v9509_v34 = vmul.f32 %v8871_v49, %v9462_v57  ;;  %v9511_v44 = vrot.slane %v2184_v58, 1  ;;  %v9513_v40 = vrot.slane %v2185_v62, 1  ;;  %v2618_v23 = vunpack.c.h.bf16 %v2586_v63  ;;  %7311 = vmatpush.bf16.msra.mxu2 %v8038_v25 }
 0x18d   : >> { %14301 = vst [vmem:[#allocation144_spill] sm:$0xff] %v9491_v15  ;;  %v9519_v61 = vmul.f32 %v8873_v21, %v9458_v54  ;;  %v9523_v26 = vmul.f32 %v8877_v29, %v9462_v57  ;;  %v2643_v27 = vmul.f32 %v8873_v21, %v2617_v24  ;;  %v2820_v53 = vunpack.c.l.bf16 %v2791_v8 }
 0x18e   : >> { %14302 = vst [vmem:[#allocation145_spill] sm:$0xff] %v9493_v30  ;;  %v2821_v28 = vunpack.c.h.bf16 %v2791_v8  ;;  %v3082_v35 = vmul.f32 %v9458_v54, %v8744_v32  ;;  %v3083_v63 = vmul.f32 %v9462_v57, %v8746_v33  ;;  %v3140_v58 = vunpack.c.l.bf16 %v3136_v38 }
 0x18f   : >> { %14303 = vst [vmem:[#allocation146_spill] sm:$0xff] %v9495_v60  ;;  %v2644_v62 = vmul.f32 %v8877_v29, %v2618_v23  ;;  %v9533_v59 = vmul.f32 %v8883_v36, %v9458_v54  ;;  %v3150_v24 = vmul.f32 %v9458_v54, %v8784_v17  ;;  %v9539_v8 = vmul.f32 %v9038_v16, %v9462_v57  ;;  %v8037_v23 = vld [vmem:[%s9144_s14] sm:$0xff] }
 0x190   : >> { %14304 = vst [vmem:[#allocation147_spill] sm:$0xff] %v9497_v7  ;;  %v3141_v7 = vunpack.c.h.bf16 %v3136_v38  ;;  %v9541_v60 = vpack.c.bf16 %v3083_v63, %v3082_v35  ;;  %v3151_v30 = vmul.f32 %v9462_v57, %v8786_v18  ;;  %v3152_v25 = vmul.f32 %v3140_v58, %v8784_v17  ;;  %7312 = vmatpush.bf16.msra.mxu2 %v8037_v23 }
 0x191   : >> { %14305 = vst [vmem:[#allocation148_spill] sm:$0xff] %v9499_v48  ;;  %v3318_v38 = vmul.f32 %v9458_v54, %v8806_v45  ;;  %v3319_v10 = vmul.f32 %v9462_v57, %v8808_v46  ;;  %v9556_v63 = vmul.f32 %v8883_v36, %v2820_v53  ;;  %v9559_v48 = vpack.c.bf16 %v2644_v62, %v2643_v27  ;;  %v732_v62 = vpop.f32.mrf.mxu0 }
 0x192   : >> { %14306 = vst [vmem:[#allocation149_spill] sm:$0xff] %v9501_v9  ;;  %v3153_v3 = vmul.f32 %v3141_v7, %v8786_v18  ;;  %v3321_v9 = vmul.f32 %v3141_v7, %v8808_v46  ;;  %v9562_v56 = vmul.f32 %v9038_v16, %v2821_v28  ;;  %v1107_v35 = vshrl.u32 %v9440_v42, 16 }
 0x193   : >> { %14307 = vst [vmem:[#allocation150_spill] sm:$0xff] %v9505_v4  ;;  %v1110_v28 = vshll.u32 %v9440_v42, 16  ;;  %v895_v42 = vmax.f32 %v9443_v43, 0.0 }
 0x194   : >> { %14308 = vst [vmem:[#allocation151_spill] sm:$0xff] %v9509_v34  ;;  %v3174_v54 = vpack.c.bf16 %v3153_v3, %v3152_v25  ;;  %v821_v3 = vpop.f32.mrf.mxu1 }
 0x195   : >> { %14309 = vst [vmem:[#allocation152_spill] sm:$0xff] %v9511_v44  ;;  %v3173_v44 = vpack.c.bf16 %v3151_v30, %v3150_v24  ;;  %v894_v30 = vmax.f32 %v9438_v5, 0.0  ;;  %v1577_v24 = vld [vmem:[#allocation2 + $0x10] sm:$0x11] }
 0x196   : >> { %14310 = vst [vmem:[#allocation153_spill] sm:$0xff] %v9513_v40  ;;  %v3320_v40 = vmul.f32 %v3140_v58, %v8806_v45  ;;  %v3188_v15 = vunpack.c.l.bf16 %v3174_v54  ;;  %v3189_v53 = vunpack.c.h.bf16 %v3174_v54  ;;  %v1603_v7 = vunpack.c.h.bf16 %v1577_v24 }
 0x197   : >> { %14311 = vst [vmem:[#allocation154_spill] sm:$0xff] %v9519_v61  ;;  %v3186_v57 = vunpack.c.l.bf16 %v3173_v44  ;;  %v958_v54 = vmin.f32 %v894_v30, 6.0 }
 0x198   : >> { %14312 = vst [vmem:[#allocation155_spill] sm:$0xff] %v9523_v26  ;;  %v3342_v58 = vpack.c.bf16 %v3321_v9, %v3320_v40  ;;  %v9573_v25 = vrot.slane %v3188_v15, 1  ;;  %v9575_v23 = vrot.slane %v3189_v53, 1  ;;  %v14324_v15 = vunpack.c.l.bf16 %v9232_v22 }
 0x199   : >> { %14313 = vst [vmem:[#allocation156_spill] sm:$0xff] %v9533_v59  ;;  %v3187_v59 = vunpack.c.h.bf16 %v3173_v44 }
 0x19a   : >> { %14314 = vst [vmem:[#allocation157_spill] sm:$0xff] %v9539_v8  ;;  %v3341_v8 = vpack.c.bf16 %v3319_v10, %v3318_v38  ;;  %v9569_v10 = vrot.slane %v3186_v57, 1  ;;  %v3356_v9 = vunpack.c.l.bf16 %v3342_v58  ;;  %v3357_v40 = vunpack.c.h.bf16 %v3342_v58 }
 0x19b   : >> { %14315 = vst [vmem:[#allocation158_spill] sm:$0xff] %v9541_v60  ;;  %v9571_v44 = vrot.slane %v3187_v59, 1  ;;  %v9579_v38 = vrot.slane %v1107_v35, 7  ;;  %v733_v57 = vadd.f32 %v732_v62, %v8699_v51  ;;  %v822_v59 = vadd.f32 %v821_v3, %v8701_v52  ;;  %v14555_v2 = vld [vmem:[#allocation151_spill] sm:$0xff] }
 0x19c   : >> { %14316 = vst [vmem:[#allocation159_spill] sm:$0xff] %v9556_v63  ;;  %v3354_v63 = vunpack.c.l.bf16 %v3341_v8  ;;  %v3355_v27 = vunpack.c.h.bf16 %v3341_v8  ;;  %v1392_v8 = vld [vmem:[#allocation2 + $0x78] sm:$0xff]  ;;  %v1602_v58 = vunpack.c.l.bf16 %v1577_v24  ;;  %v1624_v53 = vmul.f32 %v8784_v17, %v14324_v15 }
 0x19d   : >> { %14317 = vst [vmem:[#allocation160_spill] sm:$0xff] %v9559_v48  ;;  %v1112_v50 = vor.u32 %v1110_v28, %v9579_v38  ;;  %v897_v35 = vmax.f32 %v822_v59, 0.0  ;;  %v14325_v60 = vunpack.c.h.bf16 %v9232_v22  ;;  %v1626_v28 = vmul.f32 %v8784_v17, %v9261_v55 }
 0x19e   : >> { %14318 = vst [vmem:[#allocation161_spill] sm:$0xff] %v9562_v56  ;;  %v9577_v5 = vrot.slane %v3354_v63, 2  ;;  %v959_v63 = vmin.f32 %v895_v42, 6.0  ;;  %v9591_v43 = vrot.slane %v3355_v27, 2  ;;  %v1627_v3 = vmul.f32 %v8786_v18, %v9265_v31 }
 0x19f   : >> { %14319 = vst [vmem:[#allocation162_spill] sm:$0xff] %v9569_v10  ;;  %v1625_v30 = vmul.f32 %v8786_v18, %v14325_v60  ;;  %v1393_v62 = vsel %vm8724_vm7, %v1112_v50, %v1392_v8  ;;  %v9599_v24 = vrot.slane %v3356_v9, 2  ;;  %v9601_v42 = vrot.slane %v3357_v40, 2 }
 0x1a0   : >> { %14320 = vst [vmem:[#allocation163_spill] sm:$0xff] %v9571_v44  ;;  %v2517_v22 = vunpack.c.h.bf16 %v1393_v62  ;;  %v1013_v27 = vpack.c.bf16 %v959_v63, %v958_v54  ;;  %v1628_v15 = vmul.f32 %v8784_v17, %v1602_v58  ;;  %v961_v50 = vmin.f32 %v897_v35, 6.0 }
 0x1a1   : >> { %14321 = vst [vmem:[#allocation164_spill] sm:$0xff] %v9573_v25  ;;  %v1629_v8 = vmul.f32 %v8786_v18, %v1603_v7 }
 0x1a2   : >> { %14322 = vst [vmem:[#allocation165_spill] sm:$0xff] %v9575_v23  ;;  %v9608_v23 = vpack.c.bf16 %v1627_v3, %v1626_v28  ;;  %v3085_v40 = vmul.f32 %v2517_v22, %v8746_v33  ;;  %v3566_v7 = vmul.f32 %v2517_v22, %v8792_v20  ;;  %v9622_v63 = vmul.f32 %v8871_v49, %v2517_v22 }
 0x1a3   : >> { %14323 = vst [vmem:[#allocation166_spill] sm:$0xff] %v9577_v5  ;;  %v896_v5 = vmax.f32 %v733_v57, 0.0  ;;  %v2516_v57 = vunpack.c.l.bf16 %v1393_v62  ;;  %v9630_v3 = vmul.f32 %v8877_v29, %v2517_v22  ;;  %v1118_v39 = vshll.u32 %v1013_v27, 16 }
 0x1a4   : >> { %14326 = vst [vmem:[#allocation167_spill] sm:$0xff] %v9591_v43  ;;  %v9606_v43 = vpack.c.bf16 %v1625_v30, %v1624_v53 }
 0x1a5   : >> { %14327 = vst [vmem:[#allocation168_spill] sm:$0xff] %v9599_v24  ;;  %v960_v59 = vmin.f32 %v896_v5, 6.0  ;;  %v3084_v9 = vmul.f32 %v2516_v57, %v8744_v32  ;;  %v3497_v54 = vmul.f32 %v2516_v57, %v8772_v12  ;;  %v3498_v5 = vmul.f32 %v2517_v22, %v8776_v13 }
 0x1a6   : >> { %14328 = vst [vmem:[#allocation169_spill] sm:$0xff] %v9601_v42  ;;  %v3154_v42 = vmul.f32 %v2516_v57, %v8784_v17  ;;  %v3565_v58 = vmul.f32 %v2516_v57, %v8790_v19  ;;  %v9619_v53 = vmul.f32 %v8863_v11, %v2516_v57  ;;  %v9627_v28 = vmul.f32 %v8873_v21, %v2516_v57 }
 0x1a7   : >> { %1394 = vst [vmem:[#allocation2 + $0x78] sm:$0xff] %v1393_v62  ;;  %v3155_v62 = vmul.f32 %v2517_v22, %v8786_v18  ;;  %v9624_v35 = vpack.c.bf16 %v3085_v40, %v3084_v9  ;;  %v9632_v60 = vpack.c.bf16 %v3498_v5, %v3497_v54  ;;  %v1115_v24 = vshrl.u32 %v1013_v27, 16 }
 0x1a8   : >> { %14329 = vst [vmem:[#allocation170_spill] sm:$0xff] %v9619_v53  ;;  %v3589_v53 = vpack.c.bf16 %v3566_v7, %v3565_v58 }
 0x1a9   : >> { %14330 = vst [vmem:[#allocation171_spill] sm:$0xff] %v9622_v63  ;;  %v3175_v30 = vpack.c.bf16 %v3155_v62, %v3154_v42  ;;  %v1014_v42 = vpack.c.bf16 %v961_v50, %v960_v59  ;;  %v1117_v50 = vrot.slane %v1115_v24, 7  ;;  %v1662_v24 = vunpack.c.l.bf16 %v9608_v23 }
 0x1aa   : >> { %14331 = vst [vmem:[#allocation172_spill] sm:$0xff] %v9624_v35  ;;  %v3601_v27 = vunpack.c.l.bf16 %v3589_v53  ;;  %v3602_v7 = vunpack.c.h.bf16 %v3589_v53  ;;  %v1660_v53 = vunpack.c.l.bf16 %v9606_v43 }
 0x1ab   : >> { %14332 = vst [vmem:[#allocation173_spill] sm:$0xff] %v9627_v28  ;;  %v3190_v44 = vunpack.c.l.bf16 %v3175_v30  ;;  %v3191_v10 = vunpack.c.h.bf16 %v3175_v30  ;;  %v1124_v57 = vshrl.u32 %v1014_v42, 16  ;;  %v1122_v22 = vrot.slane %v1117_v50, 4 }
 0x1ac   : >> { %14333 = vst [vmem:[#allocation174_spill] sm:$0xff] %v9630_v3  ;;  %v1650_v3 = vpack.c.bf16 %v1629_v8, %v1628_v15  ;;  %v1396_v8 = vld [vmem:[#allocation2 + $0x88] sm:$0x11] }
 0x1ad   : >> { %14334 = vst [vmem:[#allocation175_spill] sm:$0xff] %v9632_v60  ;;  %v9636_v54 = vrot.slane %v3190_v44, 1  ;;  %v9638_v5 = vrot.slane %v3191_v10, 1 }
 0x1ae   : >> { %v2792_v25 = vld [vmem:[#allocation2 + $0x78] sm:$0xee] }
 0x1af   : >> { %v3305_v56 = vld [vmem:[#allocation2 + $0x78] sm:$0xee]  ;;  %v2822_v48 = vunpack.c.l.bf16 %v2792_v25  ;;  %v2823_v62 = vunpack.c.h.bf16 %v2792_v25  ;;  %14335 = vst [vmem:[#allocation176_spill] sm:$0xff] %v9636_v54 }
 0x1b0   : >> { %v3310_v63 = vunpack.c.l.bf16 %v3305_v56  ;;  %v3311_v9 = vunpack.c.h.bf16 %v3305_v56  ;;  %v3721_v40 = vld [vmem:[#allocation2 + $0x78] sm:$0xee]  ;;  %14336 = vst [vmem:[#allocation177_spill] sm:$0xff] %v9638_v5 }
 0x1b1   : >> { %v3725_v60 = vunpack.c.l.bf16 %v3721_v40  ;;  %v3726_v56 = vunpack.c.h.bf16 %v3721_v40  ;;  %v9643_v59 = vmul.f32 %v8883_v36, %v2822_v48  ;;  %v9646_v15 = vmul.f32 %v9038_v16, %v2823_v62 }
 0x1b2   : >> { %v3322_v30 = vmul.f32 %v3310_v63, %v8806_v45  ;;  %v3323_v58 = vmul.f32 %v3311_v9, %v8808_v46  ;;  %v1127_v63 = vshll.u32 %v1014_v42, 16  ;;  %v1120_v9 = vor.u32 %v1118_v39, %v1117_v50  ;;  %v1399_v42 = vld [vmem:[#allocation2 + $0x90] sm:$0xff]  ;;  %v9669_v50 = vld [vmem:[#allocation2] sm:$0xee] }
 0x1b3   : >> { %14337 = vst [vmem:[#allocation178_spill] sm:$0xff] %v9643_v59  ;;  %v3733_v10 = vmul.f32 %v3725_v60, %v8810_v47  ;;  %v3734_v44 = vmul.f32 %v3726_v56, %v8814_v41  ;;  %v1661_v40 = vunpack.c.h.bf16 %v9606_v43  ;;  %v9655_v62 = vrot.slane %v3601_v27, 1 }
 0x1b4   : >> { %v3343_v25 = vpack.c.bf16 %v3323_v58, %v3322_v30  ;;  %14338 = vst [vmem:[#allocation179_spill] sm:$0xff] %v9646_v15  ;;  %v9652_v30 = vrot.slane %v1124_v57, 7  ;;  %v14340_v60 = vrot.slane %v9579_v38, 4  ;;  %v1397_v39 = vsel %vm8542_vm10, %v1122_v22, %v1396_v8 }
 0x1b5   : >> { %14339 = vst [vmem:[#allocation180_spill] sm:$0xff] %v9655_v62  ;;  %v1663_v56 = vunpack.c.h.bf16 %v9608_v23  ;;  %v9664_v43 = vrot.slane %v3602_v7, 1  ;;  %v1664_v27 = vunpack.c.l.bf16 %v1650_v3  ;;  %v9671_v38 = vpack.c.bf16 %v3734_v44, %v3733_v10 }
 0x1b6   : >> { %v3358_v48 = vunpack.c.l.bf16 %v3343_v25  ;;  %v3359_v35 = vunpack.c.h.bf16 %v3343_v25  ;;  %v1121_v58 = vsel %vm8765_vm9, %v14340_v60, %v1120_v9  ;;  %v1129_v57 = vor.u32 %v1127_v63, %v9652_v30  ;;  %1398 = vst [vmem:[#allocation2 + $0x88] sm:$0x11] %v1397_v39 }
 0x1b7   : >> { %14341 = vst [vmem:[#allocation181_spill] sm:$0xff] %v9664_v43  ;;  %v1665_v25 = vunpack.c.h.bf16 %v1650_v3  ;;  %v1709_v9 = vrot.slane %v1660_v53, 1  ;;  %v1710_v22 = vrot.slane %v1662_v24, 1  ;;  %v1712_v60 = vrot.slane %v1661_v40, 1 }
 0x1b8   : >> { %1395 = vst.msk [vmem:[#allocation2 + $0x80] sm:$0xff] %vm8519_vm2, %v1121_v58  ;;  %v9673_v8 = vrot.slane %v3358_v48, 2  ;;  %v9675_v23 = vrot.slane %v3359_v35, 2  ;;  %v1400_v7 = vsel %vm8724_vm7, %v1129_v57, %v1399_v42  ;;  %v1713_v58 = vrot.slane %v1663_v56, 1 }
 0x1b9   : >> { %14342 = vst [vmem:[#allocation182_spill] sm:$0xff] %v9671_v38  ;;  %v9679_v63 = vunpack.c.l.bf16 %v1400_v7  ;;  %v9681_v3 = vunpack.c.h.bf16 %v1400_v7  ;;  %v1715_v10 = vrot.slane %v1664_v27, 1  ;;  %v1711_v53 = vsel %vm1708_vm13, %v1709_v9, %v1710_v22 }
 0x1ba   : >> { %14343 = vst [vmem:[#allocation183_spill] sm:$0xff] %v9673_v8  ;;  %v1717_v24 = vrot.slane %v1665_v25, 1  ;;  %v9707_v48 = vsel %vm1708_vm13, %v1712_v60, %v1713_v58 }
 0x1bb   : >> { %14344 = vst [vmem:[#allocation184_spill] sm:$0xff] %v9675_v23  ;;  %v3088_v35 = vmul.f32 %v9679_v63, %v8744_v32  ;;  %v3089_v40 = vmul.f32 %v9681_v3, %v8746_v33  ;;  %v3160_v39 = vmul.f32 %v9679_v63, %v8784_v17  ;;  %v3161_v42 = vmul.f32 %v9681_v3, %v8786_v18 }
 0x1bc   : >> { %1401 = vst [vmem:[#allocation2 + $0x90] sm:$0xff] %v1400_v7  ;;  %v3501_v56 = vmul.f32 %v9679_v63, %v8772_v12  ;;  %v3502_v57 = vmul.f32 %v9681_v3, %v8776_v13  ;;  %v3571_v27 = vmul.f32 %v9679_v63, %v8790_v19  ;;  %v3572_v25 = vmul.f32 %v9681_v3, %v8792_v20 }
 0x1bd   : >> { %v9702_v7 = vpack.c.bf16 %v3089_v40, %v3088_v35  ;;  %v9704_v44 = vpack.c.bf16 %v3161_v42, %v3160_v39  ;;  %v9710_v23 = vsel %vm1708_vm13, %v1710_v22, %v1715_v10  ;;  %v2589_v54 = vld [vmem:[#allocation2 + $0x88] sm:$0x11]  ;;  %v9719_v62 = vsel %vm1708_vm13, %v1713_v58, %v1717_v24 }
 0x1be   : >> { %v2794_v38 = vld [vmem:[#allocation2 + $0x88] sm:$0x11]  ;;  %v9716_v43 = vpack.c.bf16 %v3502_v57, %v3501_v56  ;;  %v2623_v35 = vunpack.c.l.bf16 %v2589_v54  ;;  %v2624_v40 = vunpack.c.h.bf16 %v2589_v54  ;;  %v9723_v60 = vmul.f32 %v9679_v63, %v8863_v11 }
 0x1bf   : >> { %v2493_v9 = vld [vmem:[#allocation2 + $0x80] sm:$0xff]  ;;  %14345 = vst [vmem:[#allocation185_spill] sm:$0xff] %v9702_v7  ;;  %v14348_v22 = vunpack.c.l.bf16 %v9308_v6  ;;  %v2826_v39 = vunpack.c.l.bf16 %v2794_v38  ;;  %v2827_v42 = vunpack.c.h.bf16 %v2794_v38  ;;  %v9729_v15 = vpack.c.bf16 %v3572_v25, %v3571_v27 }
 0x1c0   : >> { %v9712_v8 = vunpack.c.l.bf16 %v2493_v9  ;;  %v9714_v5 = vunpack.c.h.bf16 %v2493_v9  ;;  %14346 = vst [vmem:[#allocation186_spill] sm:$0xff] %v9716_v43  ;;  %v3137_v9 = vld [vmem:[#allocation2 + $0x88] sm:$0x11]  ;;  %v9733_v56 = vmul.f32 %v9681_v3, %v8871_v49  ;;  %v2649_v24 = vmul.f32 %v8873_v21, %v2623_v35 }
 0x1c1   : >> { %14347 = vst [vmem:[#allocation187_spill] sm:$0xff] %v9723_v60  ;;  %v9727_v10 = vadd.f32 %v1711_v53, %v14348_v22  ;;  %v2650_v57 = vmul.f32 %v8877_v29, %v2624_v40  ;;  %v3143_v60 = vunpack.c.h.bf16 %v3137_v9  ;;  %v9780_v14 = vmul.f32 %v8883_v36, %v2826_v39 }
 0x1c2   : >> { %14349 = vst [vmem:[#allocation188_spill] sm:$0xff] %v9733_v56  ;;  %v9737_v54 = vmul.f32 %v8863_v11, %v9712_v8  ;;  %v9741_v58 = vmul.f32 %v8871_v49, %v9714_v5  ;;  %v2647_v53 = vmul.f32 %v8873_v21, %v9712_v8  ;;  %v2648_v38 = vmul.f32 %v8877_v29, %v9714_v5 }
 0x1c3   : >> { %v9751_v27 = vmul.f32 %v8883_v36, %v9712_v8  ;;  %v3086_v25 = vmul.f32 %v9712_v8, %v8744_v32  ;;  %v9757_v22 = vmul.f32 %v9038_v16, %v9714_v5  ;;  %v3087_v43 = vmul.f32 %v9714_v5, %v8746_v33  ;;  %14356 = vst [vmem:[#allocation195_spill] sm:$0xff] %v9780_v14 }
 0x1c4   : >> { %14350 = vst [vmem:[#allocation189_spill] sm:$0xff] %v9737_v54  ;;  %v3142_v56 = vunpack.c.l.bf16 %v3137_v9  ;;  %v3156_v35 = vmul.f32 %v9712_v8, %v8784_v17  ;;  %v3157_v40 = vmul.f32 %v9714_v5, %v8786_v18  ;;  %v3325_v59 = vmul.f32 %v9714_v5, %v8808_v46 }
 0x1c5   : >> { %14351 = vst [vmem:[#allocation190_spill] sm:$0xff] %v9741_v58  ;;  %v9769_v58 = vpack.c.bf16 %v3087_v43, %v3086_v25  ;;  %v3159_v54 = vmul.f32 %v3143_v60, %v8786_v18  ;;  %v3327_v26 = vmul.f32 %v3143_v60, %v8808_v46  ;;  %v3499_v34 = vmul.f32 %v9712_v8, %v8772_v12 }
 0x1c6   : >> { %14352 = vst [vmem:[#allocation191_spill] sm:$0xff] %v9751_v27  ;;  %v3324_v27 = vmul.f32 %v9712_v8, %v8806_v45  ;;  %v3326_v9 = vmul.f32 %v3142_v56, %v8806_v45  ;;  %v3176_v28 = vpack.c.bf16 %v3157_v40, %v3156_v35  ;;  %v9777_v4 = vpack.c.bf16 %v2648_v38, %v2647_v53  ;;  %v3553_v53 = vld [vmem:[#allocation2 + $0x88] sm:$0x11] }
 0x1c7   : >> { %14353 = vst [vmem:[#allocation192_spill] sm:$0xff] %v9757_v22  ;;  %v3158_v22 = vmul.f32 %v3142_v56, %v8784_v17  ;;  %v3500_v25 = vmul.f32 %v9714_v5, %v8776_v13  ;;  %v9785_v49 = vmul.f32 %v9038_v16, %v2827_v42  ;;  %v9787_v60 = vpack.c.bf16 %v2650_v57, %v2649_v24 }
 0x1c8   : >> { %14354 = vst [vmem:[#allocation193_spill] sm:$0xff] %v9769_v58  ;;  %v3344_v61 = vpack.c.bf16 %v3325_v59, %v3324_v27  ;;  %v3192_v56 = vunpack.c.l.bf16 %v3176_v28  ;;  %v3193_v35 = vunpack.c.h.bf16 %v3176_v28  ;;  %v3345_v40 = vpack.c.bf16 %v3327_v26, %v3326_v9 }
 0x1c9   : >> { %14355 = vst [vmem:[#allocation194_spill] sm:$0xff] %v9777_v4  ;;  %v3177_v43 = vpack.c.bf16 %v3159_v54, %v3158_v22  ;;  %v9789_v11 = vpack.c.bf16 %v3500_v25, %v3499_v34  ;;  %v3557_v57 = vunpack.c.l.bf16 %v3553_v53  ;;  %v3558_v34 = vunpack.c.h.bf16 %v3553_v53 }
 0x1ca   : >> { %14357 = vst [vmem:[#allocation196_spill] sm:$0xff] %v9785_v49  ;;  %v3360_v38 = vunpack.c.l.bf16 %v3344_v61  ;;  %v3361_v22 = vunpack.c.h.bf16 %v3344_v61  ;;  %v9793_v14 = vrot.slane %v3192_v56, 1  ;;  %v9795_v42 = vrot.slane %v3193_v35, 1 }
 0x1cb   : >> { %14358 = vst [vmem:[#allocation197_spill] sm:$0xff] %v9787_v60  ;;  %v3194_v59 = vunpack.c.l.bf16 %v3177_v43  ;;  %v3195_v27 = vunpack.c.h.bf16 %v3177_v43  ;;  %v3362_v49 = vunpack.c.l.bf16 %v3345_v40  ;;  %v3363_v28 = vunpack.c.h.bf16 %v3345_v40 }
 0x1cc   : >> { %14359 = vst [vmem:[#allocation198_spill] sm:$0xff] %v9789_v11  ;;  %v3567_v9 = vmul.f32 %v9712_v8, %v8790_v19  ;;  %v3568_v43 = vmul.f32 %v9714_v5, %v8792_v20  ;;  %v3735_v61 = vmul.f32 %v9712_v8, %v8810_v47  ;;  %v3736_v25 = vmul.f32 %v9714_v5, %v8814_v41 }
 0x1cd   : >> { %14360 = vst [vmem:[#allocation199_spill] sm:$0xff] %v9793_v14  ;;  %v9797_v26 = vrot.slane %v3194_v59, 1  ;;  %v9799_v24 = vrot.slane %v3195_v27, 1  ;;  %v3569_v56 = vmul.f32 %v3557_v57, %v8790_v19  ;;  %v3570_v35 = vmul.f32 %v3558_v34, %v8792_v20  ;;  %v3306_v27 = vld [vmem:[#allocation2 + $0x90] sm:$0xee] }
 0x1ce   : >> { %14361 = vst [vmem:[#allocation200_spill] sm:$0xff] %v9795_v42  ;;  %v3737_v40 = vmul.f32 %v3557_v57, %v8810_v47  ;;  %v3738_v59 = vmul.f32 %v3558_v34, %v8814_v41  ;;  %v9813_v53 = vrot.slane %v3360_v38, 2  ;;  %v9815_v54 = vrot.slane %v3361_v22, 2 }
 0x1cf   : >> { %14362 = vst [vmem:[#allocation201_spill] sm:$0xff] %v9797_v26  ;;  %v9817_v39 = vpack.c.bf16 %v3568_v43, %v3567_v9  ;;  %v9819_v58 = vpack.c.bf16 %v3736_v25, %v3735_v61  ;;  %v3591_v8 = vpack.c.bf16 %v3570_v35, %v3569_v56  ;;  %v3196_v5 = vunpack.c.l.bf16 %v9704_v44  ;;  %v3722_v43 = vld [vmem:[#allocation2 + $0x90] sm:$0xee] }
 0x1d0   : >> { %14363 = vst [vmem:[#allocation202_spill] sm:$0xff] %v9799_v24  ;;  %v3759_v24 = vpack.c.bf16 %v3738_v59, %v3737_v40  ;;  %v3197_v26 = vunpack.c.h.bf16 %v9704_v44  ;;  %v9823_v42 = vrot.slane %v3362_v49, 2  ;;  %v9825_v57 = vrot.slane %v3363_v28, 2  ;;  %v9831_v44 = vld [vmem:[#allocation2 + $0x90] sm:$0xee] }
 0x1d1   : >> { %14364 = vst [vmem:[#allocation203_spill] sm:$0xff] %v9813_v53  ;;  %v3312_v34 = vunpack.c.l.bf16 %v3306_v27  ;;  %v3313_v14 = vunpack.c.h.bf16 %v3306_v27  ;;  %v3605_v38 = vunpack.c.l.bf16 %v3591_v8  ;;  %v3606_v53 = vunpack.c.h.bf16 %v3591_v8 }
 0x1d2   : >> { %14365 = vst [vmem:[#allocation204_spill] sm:$0xff] %v9815_v54  ;;  %v3773_v61 = vunpack.c.l.bf16 %v3759_v24  ;;  %v3774_v25 = vunpack.c.h.bf16 %v3759_v24  ;;  %v9835_v40 = vrot.slane %v3196_v5, 1  ;;  %v9837_v59 = vrot.slane %v3197_v26, 1  ;;  %v14391_v54 = vld [vmem:[#allocation25_spill] sm:$0xff] }
 0x1d3   : >> { %14366 = vst [vmem:[#allocation205_spill] sm:$0xff] %v9817_v39  ;;  %v3328_v56 = vmul.f32 %v3312_v34, %v8806_v45  ;;  %v3329_v35 = vmul.f32 %v3313_v14, %v8808_v46  ;;  %v3607_v8 = vunpack.c.l.bf16 %v9729_v15  ;;  %v3608_v24 = vunpack.c.h.bf16 %v9729_v15 }
 0x1d4   : >> { %14367 = vst [vmem:[#allocation206_spill] sm:$0xff] %v9819_v58  ;;  %v3727_v9 = vunpack.c.l.bf16 %v3722_v43  ;;  %v9843_v34 = vrot.slane %v3605_v38, 1  ;;  %v9845_v14 = vrot.slane %v3606_v53, 1  ;;  %v3728_v22 = vunpack.c.h.bf16 %v3722_v43  ;;  %v1783_v43 = vld [vmem:[#allocation2 + $0x10] sm:$0x11] }
 0x1d5   : >> { %14368 = vst [vmem:[#allocation207_spill] sm:$0xff] %v9823_v42  ;;  %v9839_v27 = vpack.c.bf16 %v3329_v35, %v3328_v56  ;;  %v4142_v49 = vunpack.c.l.bf16 %v9831_v44  ;;  %v9848_v7 = vrot.slane %v3773_v61, 2  ;;  %v9850_v5 = vrot.slane %v3774_v25, 2  ;;  %v14390_v42 = vld [vmem:[#allocation47_spill] sm:$0xff] }
 0x1d6   : >> { %14369 = vst [vmem:[#allocation208_spill] sm:$0xff] %v9825_v57  ;;  %v9855_v56 = vmul.f32 %v9679_v63, %v8873_v21  ;;  %v9858_v35 = vrot.slane %v3607_v8, 1  ;;  %v9860_v38 = vrot.slane %v3608_v24, 1  ;;  %v9864_v53 = vmul.f32 %v9681_v3, %v8877_v29  ;;  %v14389_v57 = vld [vmem:[#allocation24_spill] sm:$0xff] }
 0x1d7   : >> { %14370 = vst [vmem:[#allocation209_spill] sm:$0xff] %v9835_v40  ;;  %v3364_v26 = vunpack.c.l.bf16 %v9839_v27  ;;  %v9867_v61 = vmul.f32 %v3727_v9, %v8810_v47  ;;  %v9870_v25 = vmul.f32 %v3728_v22, %v8814_v41  ;;  %v9874_v28 = vmul.f32 %v4142_v49, %v8883_v36 }
 0x1d8   : >> { %14371 = vst [vmem:[#allocation210_spill] sm:$0xff] %v9837_v59  ;;  %v14382_v24 = vunpack.c.h.bf16 %v9308_v6  ;;  %v14383_v3 = vunpack.c.l.bf16 %v9413_v37  ;;  %v1803_v9 = vunpack.c.h.bf16 %v9669_v50  ;;  %v1806_v40 = vunpack.c.l.bf16 %v1783_v43 }
 0x1d9   : >> { %14372 = vst [vmem:[#allocation211_spill] sm:$0xff] %v9843_v34  ;;  %v9876_v8 = vrot.slane %v3364_v26, 2  ;;  %v1807_v22 = vunpack.c.h.bf16 %v1783_v43  ;;  %v1830_v49 = vmul.f32 %v8806_v45, %v9261_v55  ;;  %v14385_v26 = vunpack.c.h.bf16 %v9413_v37 }
 0x1da   : >> { %14373 = vst [vmem:[#allocation212_spill] sm:$0xff] %v9845_v14  ;;  %v1766_v15 = vadd.f32 %v9707_v48, %v14382_v24  ;;  %v1767_v59 = vadd.f32 %v9710_v23, %v14383_v3  ;;  %v1829_v48 = vmul.f32 %v8808_v46, %v1803_v9  ;;  %v1831_v23 = vmul.f32 %v8808_v46, %v9265_v31  ;;  %v14388_v9 = vld [vmem:[#allocation46_spill] sm:$0xff]  ;;  %v14394_v14 = vld [vmem:[#allocation48_spill] sm:$0xff] }
 0x1db   : >> { %14374 = vst [vmem:[#allocation213_spill] sm:$0xff] %v9848_v7  ;;  %v1768_v6 = vadd.f32 %v9719_v62, %v14385_v26  ;;  %v1832_v24 = vmul.f32 %v8806_v45, %v1806_v40  ;;  %v1833_v43 = vmul.f32 %v8808_v46, %v1807_v22  ;;  %v2212_v31 = vsel %vm1708_vm13, %v14389_v57, %v14388_v9  ;;  %v14392_v22 = vld [vmem:[#allocation49_spill] sm:$0xff] }
 0x1dc   : >> { %14375 = vst [vmem:[#allocation214_spill] sm:$0xff] %v9850_v5  ;;  %v1853_v55 = vpack.c.bf16 %v1831_v23, %v1830_v49  ;;  %v2215_v40 = vsel %vm1708_vm13, %v14391_v54, %v14390_v42  ;;  %v2367_v34 = vunpack.c.l.bf16 %v14394_v14 }
 0x1dd   : >> { %14376 = vst [vmem:[#allocation215_spill] sm:$0xff] %v9855_v56  ;;  %v1854_v26 = vpack.c.bf16 %v1833_v43, %v1832_v24 }
 0x1de   : >> { %14377 = vst [vmem:[#allocation216_spill] sm:$0xff] %v9858_v35  ;;  %v14387_v35 = vld [vmem:[#allocation38_spill] sm:$0xff]  ;;  %v1866_v49 = vunpack.c.l.bf16 %v1853_v55 }
 0x1df   : >> { %14378 = vst [vmem:[#allocation217_spill] sm:$0xff] %v9860_v38  ;;  %v14384_v38 = vunpack.c.l.bf16 %v9669_v50  ;;  %v14386_v50 = vld [vmem:[#allocation20_spill] sm:$0xff]  ;;  %v2047_v37 = vunpack.c.l.bf16 %v14387_v35  ;;  %v2048_v62 = vunpack.c.h.bf16 %v14387_v35  ;;  %v1868_v23 = vunpack.c.l.bf16 %v1854_v26  ;;  %v14393_v35 = vld [vmem:[#allocation26_spill] sm:$0xff] }
 0x1e0   : >> { %14379 = vst [vmem:[#allocation218_spill] sm:$0xff] %v9864_v53  ;;  %v2045_v3 = vunpack.c.l.bf16 %v14386_v50  ;;  %v1869_v53 = vunpack.c.h.bf16 %v1854_v26  ;;  %v2365_v24 = vunpack.c.l.bf16 %v14393_v35  ;;  %v2366_v43 = vunpack.c.h.bf16 %v14393_v35 }
 0x1e1   : >> { %14380 = vst [vmem:[#allocation219_spill] sm:$0xff] %v9874_v28  ;;  %v1828_v63 = vmul.f32 %v8806_v45, %v14384_v38  ;;  %v2046_v38 = vunpack.c.h.bf16 %v14386_v50  ;;  %v2217_v28 = vsel %vm1708_vm13, %v14388_v9, %v14392_v22  ;;  %v1914_v57 = vrot.slane %v1866_v49, 2  ;;  %v14395_v22 = vld [vmem:[#allocation50_spill] sm:$0xff] }
 0x1e2   : >> { %14381 = vst [vmem:[#allocation220_spill] sm:$0xff] %v9876_v8  ;;  %v1919_v58 = vrot.slane %v1868_v23, 2  ;;  %v1921_v54 = vrot.slane %v1869_v53, 2  ;;  %v2368_v9 = vunpack.c.h.bf16 %v14394_v14  ;;  %v2219_v26 = vsel %vm1708_vm13, %v14390_v42, %v14395_v22  ;;  %v14405_v22 = vld [vmem:[#allocation85_spill] sm:$0xff] }
 0x1e3   : >> { %v1852_v8 = vpack.c.bf16 %v1829_v48, %v1828_v63  ;;  %v1867_v48 = vunpack.c.h.bf16 %v1853_v55  ;;  %v2413_v39 = vrot.slane %v2365_v24, 2  ;;  %v2414_v35 = vrot.slane %v2367_v34, 2 }
 0x1e4   : >> { %v2417_v14 = vrot.slane %v2368_v9, 2  ;;  %v2416_v60 = vrot.slane %v2366_v43, 2 }
 0x1e5   : >> { %v1864_v50 = vunpack.c.l.bf16 %v1852_v8  ;;  %v1865_v63 = vunpack.c.h.bf16 %v1852_v8  ;;  %v1917_v7 = vrot.slane %v1867_v48, 2  ;;  %v2415_v24 = vsel %vm1912_vm14, %v2413_v39, %v2414_v35  ;;  %v14403_v39 = vld [vmem:[#allocation53_spill] sm:$0xff] }
 0x1e7   : >> { %v1913_v56 = vrot.slane %v1864_v50, 2  ;;  %v1916_v5 = vrot.slane %v1865_v63, 2  ;;  %v1920_v50 = vsel %vm1912_vm14, %v1914_v57, %v1919_v58  ;;  %v1922_v63 = vsel %vm1912_vm14, %v1917_v7, %v1921_v54  ;;  %v14401_v54 = vld [vmem:[#allocation81_spill] sm:$0xff] }
 0x1e8   : >> { %v1971_v48 = vadd.f32 %v1920_v50, %v1767_v59  ;;  %v1972_v23 = vadd.f32 %v1922_v63, %v1768_v6  ;;  %v2418_v59 = vsel %vm1912_vm14, %v2416_v60, %v2417_v14 }
 0x1e9   : >> { %v1915_v8 = vsel %vm1912_vm14, %v1913_v56, %v1914_v57  ;;  %v1918_v55 = vsel %vm1912_vm14, %v1916_v5, %v1917_v7  ;;  %v14396_v5 = vld [vmem:[#allocation45_spill] sm:$0xff] }
 0x1ea   : >> { %v1969_v49 = vadd.f32 %v1915_v8, %v9727_v10  ;;  %v1970_v53 = vadd.f32 %v1918_v55, %v1766_v15  ;;  %v14397_v4 = vunpack.c.l.bf16 %v14396_v5  ;;  %v2063_v29 = vadd.f32 %v2047_v37, %v1971_v48  ;;  %v14404_v8 = vld [vmem:[#allocation54_spill] sm:$0xff] }
 0x1eb   : >> { %v2064_v42 = vadd.f32 %v2048_v62, %v1972_v23  ;;  %v14398_v58 = vunpack.c.h.bf16 %v14396_v5  ;;  %v2651_v55 = vpack.c.bf16 %v14404_v8, %v14403_v39  ;;  %v14407_v5 = vld [vmem:[#allocation91_spill] sm:$0xff]  ;;  %v14412_v39 = vld [vmem:[#allocation92_spill] sm:$0xff]  ;;  %v14413_v8 = vld [vmem:[#allocation93_spill] sm:$0xff] }
 0x1ec   : >> { %v2061_v11 = vadd.f32 %v2045_v3, %v1969_v49  ;;  %v2062_v56 = vadd.f32 %v2046_v38, %v1970_v53  ;;  %v2419_v36 = vrot.slane %v14397_v4, 2  ;;  %v2268_v15 = vadd.f32 %v2217_v28, %v2063_v29  ;;  %v14399_v3 = vld [vmem:[#allocation51_spill] sm:$0xff]  ;;  %v14400_v38 = vld [vmem:[#allocation52_spill] sm:$0xff]  ;;  %v14402_v4 = vld [vmem:[#allocation82_spill] sm:$0xff] }
 0x1ed   : >> { %v2421_v7 = vrot.slane %v14398_v58, 2  ;;  %v2269_v6 = vadd.f32 %v2219_v26, %v2064_v42  ;;  %v2538_v43 = vpack.c.bf16 %v14400_v38, %v14399_v3  ;;  %v2539_v37 = vpack.c.bf16 %v14402_v4, %v14401_v54  ;;  %v14408_v3 = vld [vmem:[#allocation63_spill] sm:$0xff]  ;;  %v14409_v38 = vld [vmem:[#allocation64_spill] sm:$0xff]  ;;  %v14410_v54 = vld [vmem:[#allocation89_spill] sm:$0xff] }
 0x1ee   : >> { %v2266_v57 = vadd.f32 %v2212_v31, %v2061_v11  ;;  %v2267_v10 = vadd.f32 %v2215_v40, %v2062_v56  ;;  %v2420_v34 = vsel %vm1912_vm14, %v2414_v35, %v2419_v36  ;;  %v14406_v11 = vld [vmem:[#allocation88_spill] sm:$0xff]  ;;  %v2663_v50 = vunpack.c.l.bf16 %v2651_v55 }
 0x1ef   : >> { %v2652_v31 = vpack.c.bf16 %v14406_v11, %v14405_v22  ;;  %v2422_v60 = vsel %vm1912_vm14, %v2417_v14, %v2421_v7  ;;  %v2471_v36 = vadd.f32 %v2420_v34, %v2268_v15  ;;  %v2546_v29 = vunpack.c.l.bf16 %v2538_v43  ;;  %v7997_v14 = vld [vmem:[%s8538_s21 + $0x68] sm:$0xff] }
 0x1f0   : >> { %v2469_v62 = vadd.f32 %v2415_v24, %v2266_v57  ;;  %v2470_v9 = vadd.f32 %v2418_v59, %v2267_v10  ;;  %v2547_v28 = vunpack.c.h.bf16 %v2538_v43  ;;  %v2548_v40 = vunpack.c.l.bf16 %v2539_v37  ;;  %v1482_v59 = vld [vmem:[%s1481_s18] sm:$0x3]  ;;  %7778 = vmatmul.msk.bf16.gmra.mxu0 %vm643_vm3, %v7997_v14  ;;  %7794 = vmatmul.msk.bf16.gmra.mxu1 %vm643_vm3, %v7997_v14 }
 0x1f1   : >> { %v2549_v26 = vunpack.c.h.bf16 %v2539_v37  ;;  %v2664_v63 = vunpack.c.h.bf16 %v2651_v55  ;;  %v2665_v48 = vunpack.c.l.bf16 %v2652_v31  ;;  %v2666_v23 = vunpack.c.h.bf16 %v2652_v31 }
 0x1f2   : >> { %v2562_v49 = vadd.f32 %v2546_v29, %v2469_v62  ;;  %v2563_v53 = vadd.f32 %v2547_v28, %v2470_v9  ;;  %v2472_v35 = vadd.f32 %v2422_v60, %v2269_v6  ;;  %v2564_v56 = vadd.f32 %v2548_v40, %v2471_v36  ;;  %v14411_v6 = vld [vmem:[#allocation90_spill] sm:$0xff] }
 0x1f3   : >> { %v2667_v42 = vunpack.c.l.bf16 %v14407_v5  ;;  %v2668_v24 = vunpack.c.h.bf16 %v14407_v5  ;;  %v2711_v58 = vrot.slane %v2663_v50, 1  ;;  %v2712_v7 = vrot.slane %v2665_v48, 1 }
 0x1f4   : >> { %v2714_v57 = vrot.slane %v2664_v63, 1  ;;  %v2715_v10 = vrot.slane %v2666_v23, 1  ;;  %v2854_v43 = vpack.c.bf16 %v14409_v38, %v14408_v3  ;;  %v2855_v4 = vpack.c.bf16 %v14411_v6, %v14410_v54  ;;  %v734_v23 = vpop.f32.mrf.mxu0  ;;  %v14417_v3 = vld [vmem:[#allocation37_spill] sm:$0xff]  ;;  %v14418_v38 = vld [vmem:[#allocation23_spill] sm:$0xff] }
 0x1f5   : >> { %v2717_v34 = vrot.slane %v2667_v42, 1  ;;  %v2719_v15 = vrot.slane %v2668_v24, 1  ;;  %v2565_v37 = vadd.f32 %v2549_v26, %v2472_v35  ;;  %v2713_v62 = vsel %vm1708_vm13, %v2711_v58, %v2712_v7  ;;  %v823_v35 = vpop.f32.mrf.mxu1 }
 0x1f6   : >> { %v2716_v9 = vsel %vm1708_vm13, %v2714_v57, %v2715_v10  ;;  %v2856_v55 = vpack.c.bf16 %v14413_v8, %v14412_v39  ;;  %v2767_v31 = vadd.f32 %v2713_v62, %v2562_v49  ;;  %v2866_v29 = vunpack.c.l.bf16 %v2854_v43 }
 0x1f7   : >> { %v2718_v22 = vsel %vm1708_vm13, %v2712_v7, %v2717_v34  ;;  %v2720_v11 = vsel %vm1708_vm13, %v2715_v10, %v2719_v15  ;;  %v2768_v60 = vadd.f32 %v2716_v9, %v2563_v53  ;;  %v2867_v28 = vunpack.c.h.bf16 %v2854_v43  ;;  %v14415_v10 = vld [vmem:[#allocation36_spill] sm:$0xff]  ;;  %v14416_v34 = vld [vmem:[#allocation22_spill] sm:$0xff] }
 0x1f8   : >> { %v2769_v36 = vadd.f32 %v2718_v22, %v2564_v56  ;;  %v9956_v40 = vperm.slane %v1482_v59, 0  ;;  %v2868_v50 = vunpack.c.l.bf16 %v2855_v4  ;;  %v2869_v26 = vunpack.c.h.bf16 %v2855_v4  ;;  %v14419_v22 = vld [vmem:[#allocation39_spill] sm:$0xff] }
 0x1f9   : >> { %v2870_v63 = vunpack.c.l.bf16 %v2856_v55  ;;  %v2871_v48 = vunpack.c.h.bf16 %v2856_v55  ;;  %v2770_v5 = vadd.f32 %v2720_v11, %v2565_v37  ;;  %v2914_v42 = vrot.slane %v2866_v29, 2  ;;  %v14420_v29 = vld [vmem:[#allocation40_spill] sm:$0xff] }
 0x1fa   : >> { %v2917_v24 = vrot.slane %v2867_v28, 2  ;;  %v9958_v14 = vperm.slane %v1482_v59, 1  ;;  %v2915_v58 = vrot.slane %v2868_v50, 2  ;;  %v2918_v7 = vrot.slane %v2869_v26, 2 }
 0x1fb   : >> { %v2920_v49 = vrot.slane %v2870_v63, 2  ;;  %v2922_v53 = vrot.slane %v2871_v48, 2  ;;  %v735_v56 = vadd.f32 %v734_v23, %v8699_v51  ;;  %v824_v57 = vadd.f32 %v823_v35, %v8701_v52  ;;  %v14421_v48 = vld [vmem:[#allocation18_spill] sm:$0xff] }
 0x1fc   : >> { %14414 = vst [vmem:[#allocation20_spill] sm:$0xff] %v9958_v14  ;;  %v1721_v15 = vsel %vm1708_vm13, %v14416_v34, %v14415_v10  ;;  %v1724_v43 = vsel %vm1708_vm13, %v14418_v38, %v14417_v3  ;;  %v2916_v54 = vsel %vm1912_vm14, %v2914_v42, %v2915_v58  ;;  %v2919_v59 = vsel %vm1912_vm14, %v2917_v24, %v2918_v7  ;;  %v14427_v38 = vld [vmem:[#allocation41_spill] sm:$0xff] }
 0x1fd   : >> { %v2921_v6 = vsel %vm1912_vm14, %v2915_v58, %v2920_v49  ;;  %v2923_v4 = vsel %vm1912_vm14, %v2918_v7, %v2922_v53  ;;  %v2970_v37 = vadd.f32 %v2916_v54, %v2767_v31  ;;  %v2971_v62 = vadd.f32 %v2919_v59, %v2768_v60  ;;  %v14428_v54 = vld [vmem:[#allocation28_spill] sm:$0xff] }
 0x1fe   : >> { %v2972_v9 = vadd.f32 %v2921_v6, %v2769_v36  ;;  %v2973_v39 = vadd.f32 %v2923_v4, %v2770_v5  ;;  %v898_v8 = vmax.f32 %v735_v56, 0.0  ;;  %v899_v55 = vmax.f32 %v824_v57, 0.0  ;;  %v14424_v56 = vld [vmem:[#allocation21_spill] sm:$0xff] }
 0x1ff   : >> { %v1726_v11 = vsel %vm1708_vm13, %v14415_v10, %v14419_v22  ;;  %v1728_v28 = vsel %vm1708_vm13, %v14417_v3, %v14420_v29  ;;  %v2991_v50 = vadd.f32 %v9956_v40, %v2970_v37  ;;  %v2992_v26 = vadd.f32 %v9958_v14, %v2971_v62 }
 0x200   : >> { %v2993_v63 = vadd.f32 %v9956_v40, %v2972_v9  ;;  %v2994_v31 = vadd.f32 %v9958_v14, %v2973_v39  ;;  %v962_v60 = vmin.f32 %v898_v8, 6.0  ;;  %v963_v36 = vmin.f32 %v899_v55, 6.0  ;;  %v14429_v9 = vld [vmem:[#allocation42_spill] sm:$0xff]  ;;  %v14430_v39 = vld [vmem:[#allocation29_spill] sm:$0xff]  ;;  %v14431_v55 = vld [vmem:[#allocation43_spill] sm:$0xff] }
 0x201   : >> { %v14422_v23 = vunpack.c.l.bf16 %v14421_v48  ;;  %v14423_v5 = vunpack.c.h.bf16 %v14421_v48  ;;  %v3007_v24 = vmax.f32 %v2991_v50, 0.0  ;;  %v3008_v58 = vmax.f32 %v2992_v26, 0.0  ;;  %v1403_v48 = vld [vmem:[#allocation2 + $0xa0] sm:$0x11] }
 0x202   : >> { %v3009_v7 = vmax.f32 %v2993_v63, 0.0  ;;  %v3010_v49 = vmax.f32 %v2994_v31, 0.0  ;;  %v1015_v53 = vpack.c.bf16 %v963_v36, %v962_v60  ;;  %v14425_v57 = vunpack.c.l.bf16 %v14424_v56 }
 0x203   : >> { %v1769_v35 = vadd.f32 %v1721_v15, %v14422_v23  ;;  %v1770_v42 = vadd.f32 %v1724_v43, %v14423_v5  ;;  %v14426_v34 = vunpack.c.h.bf16 %v14424_v56  ;;  %v1925_v59 = vsel %vm1912_vm14, %v14428_v54, %v14427_v38  ;;  %v737_v23 = vpop.f32.mrf.mxu0  ;;  %v826_v5 = vpop.f32.mrf.mxu1 }
 0x204   : >> { %v1771_v10 = vadd.f32 %v1726_v11, %v14425_v57  ;;  %v3023_v6 = vmin.f32 %v3007_v24, 6.0  ;;  %v3024_v15 = vmin.f32 %v3008_v58, 6.0  ;;  %v3025_v4 = vmin.f32 %v3009_v7, 6.0  ;;  %v14433_v24 = vld [vmem:[#allocation35_spill] sm:$0xff] }
 0x205   : >> { %v1772_v3 = vadd.f32 %v1728_v28, %v14426_v34  ;;  %v3026_v37 = vmin.f32 %v3010_v49, 6.0  ;;  %v1132_v43 = vshrl.u32 %v1015_v53, 16  ;;  %v1135_v62 = vshll.u32 %v1015_v53, 16  ;;  %v14432_v28 = vld [vmem:[#allocation44_spill] sm:$0xff]  ;;  %v14434_v49 = vld [vmem:[#allocation67_spill] sm:$0xff] }
 0x206   : >> { %v1928_v8 = vsel %vm1912_vm14, %v14430_v39, %v14429_v9  ;;  %v1930_v22 = vsel %vm1912_vm14, %v14427_v38, %v14431_v55  ;;  %v3039_v11 = vpack.c.bf16 %v3024_v15, %v3023_v6  ;;  %v1932_v50 = vsel %vm1912_vm14, %v14429_v9, %v14432_v28  ;;  %v14438_v39 = vld [vmem:[#allocation84_spill] sm:$0xff] }
 0x207   : >> { %v3040_v29 = vpack.c.bf16 %v3026_v37, %v3025_v4  ;;  %v1973_v26 = vadd.f32 %v1925_v59, %v1769_v35  ;;  %v1134_v63 = vrot.slane %v1132_v43, 7  ;;  %v1974_v31 = vadd.f32 %v1928_v8, %v1770_v42  ;;  %v14436_v43 = vld [vmem:[#allocation83_spill] sm:$0xff]  ;;  %v14439_v8 = vld [vmem:[#allocation58_spill] sm:$0xff] }
 0x208   : >> { %v1975_v60 = vadd.f32 %v1930_v22, %v1771_v10  ;;  %v1976_v36 = vadd.f32 %v1932_v50, %v1772_v3  ;;  %3047 = vst.msk [vmem:[#allocation3] sm:$0xff] %vm8519_vm2, %v3039_v11  ;;  %v2049_v58 = vunpack.c.l.bf16 %v14433_v24  ;;  %v2050_v7 = vunpack.c.h.bf16 %v14433_v24  ;;  %v14441_v11 = vld [vmem:[#allocation87_spill] sm:$0xff] }
 0x209   : >> { %v2051_v53 = vunpack.c.l.bf16 %v14434_v49  ;;  %v2052_v56 = vunpack.c.h.bf16 %v14434_v49  ;;  %3048 = vst.msk [vmem:[#allocation3 + $0x8] sm:$0xff] %vm8519_vm2, %v3040_v29  ;;  %v1137_v35 = vor.u32 %v1135_v62, %v1134_v63  ;;  %v1139_v42 = vrot.slane %v1134_v63, 4  ;;  %v14437_v62 = vld [vmem:[#allocation57_spill] sm:$0xff] }
 0x20a   : >> { %v738_v57 = vadd.f32 %v737_v23, %v8699_v51  ;;  %v827_v10 = vadd.f32 %v826_v5, %v8701_v52  ;;  %v2065_v34 = vadd.f32 %v2049_v58, %v1973_v26  ;;  %v2066_v3 = vadd.f32 %v2050_v7, %v1974_v31 }
 0x20b   : >> { %v2067_v38 = vadd.f32 %v2051_v53, %v1975_v60  ;;  %v2068_v54 = vadd.f32 %v2052_v56, %v1976_v36  ;;  %v14435_v59 = vrot.slane %v9652_v30, 4  ;;  %v1404_v15 = vsel %vm8542_vm10, %v1139_v42, %v1403_v48  ;;  %v14440_v30 = vld [vmem:[#allocation86_spill] sm:$0xff]  ;;  %v14445_v48 = vld [vmem:[#allocation59_spill] sm:$0xff] }
 0x20c   : >> { %v900_v4 = vmax.f32 %v738_v57, 0.0  ;;  %v901_v37 = vmax.f32 %v827_v10, 0.0  ;;  %v2222_v9 = vsel %vm1708_vm13, %v14437_v62, %v14436_v43  ;;  %v2225_v55 = vsel %vm1708_vm13, %v14439_v8, %v14438_v39  ;;  %1405 = vst [vmem:[#allocation2 + $0xa0] sm:$0x11] %v1404_v15  ;;  %v14449_v10 = vld [vmem:[#allocation69_spill] sm:$0xff]  ;;  %v14451_v15 = vld [vmem:[#allocation78_spill] sm:$0xff] }
 0x20d   : >> { %v1138_v6 = vsel %vm8765_vm9, %v14435_v59, %v1137_v35  ;;  %v2227_v22 = vsel %vm1708_vm13, %v14436_v43, %v14440_v30  ;;  %v2229_v29 = vsel %vm1708_vm13, %v14438_v39, %v14441_v11  ;;  %v10032_v26 = vadd.f32 %v2222_v9, %v2065_v34  ;;  %v14450_v34 = vld [vmem:[#allocation70_spill] sm:$0xff]  ;;  %v14454_v39 = vld [vmem:[#allocation99_spill] sm:$0xff] }
 0x20e   : >> { %1402 = vst.msk [vmem:[#allocation2 + $0x98] sm:$0xff] %vm8519_vm2, %v1138_v6  ;;  %v964_v28 = vmin.f32 %v900_v4, 6.0  ;;  %v965_v50 = vmin.f32 %v901_v37, 6.0  ;;  %v10034_v63 = vadd.f32 %v2225_v55, %v2066_v3  ;;  %v14442_v31 = vunpack.c.h.bf16 %v9839_v27  ;;  %v14448_v27 = vld [vmem:[#allocation71_spill] sm:$0xff] }
 0x20f   : >> { %v10042_v36 = vpack.c.bf16 %v9870_v25, %v9867_v61  ;;  %v2371_v23 = vunpack.c.l.bf16 %v14445_v48  ;;  %v2372_v5 = vunpack.c.h.bf16 %v14445_v48  ;;  %v14446_v24 = vunpack.c.h.bf16 %v9831_v44  ;;  %v7801_v7 = vld [vmem:[#allocation3] sm:$0xf]  ;;  %v8004_v49 = vld [vmem:[#allocation3 + $0x4] sm:$0xf] }
 0x210   : >> { %v10038_v60 = vrot.slane %v14442_v31, 2  ;;  %v10051_v53 = vpack.c.bf16 %v965_v50, %v964_v28  ;;  %v2373_v56 = vunpack.c.l.bf16 %v14448_v27  ;;  %v2374_v35 = vunpack.c.h.bf16 %v14448_v27  ;;  %v8005_v42 = vld [vmem:[#allocation3 + $0x4] sm:$0xf0]  ;;  %v7803_v61 = vld [vmem:[#allocation3 + $0x8] sm:$0xf0] }
 0x211   : >> { %14444 = vst [vmem:[#allocation46_spill] sm:$0xff] %v10042_v36  ;;  %v10049_v58 = vmul.f32 %v14446_v24, %v9038_v16  ;;  %v10055_v25 = vadd.f32 %v2227_v22, %v2067_v38  ;;  %v10057_v57 = vadd.f32 %v2229_v29, %v2068_v54  ;;  %v10061_v44 = vpack.c.bf16 %v14450_v34, %v14449_v10  ;;  %v14453_v38 = vld [vmem:[#allocation98_spill] sm:$0xff]  ;;  %v14456_v29 = vld [vmem:[#allocation117_spill] sm:$0xff] }
 0x212   : >> { %14443 = vst [vmem:[#allocation38_spill] sm:$0xff] %v10038_v60  ;;  %v7802_v3 = vor.u32 %v8005_v42, %v7801_v7  ;;  %v7806_v59 = vor.u32 %v8004_v49, %v7803_v61  ;;  %v1141_v6 = vshrl.u32 %v10051_v53, 16  ;;  %v14452_v4 = vunpack.c.l.bf16 %v14451_v15  ;;  %v14457_v28 = vld [vmem:[#allocation118_spill] sm:$0xff] }
 0x213   : >> { %14447 = vst [vmem:[#allocation24_spill] sm:$0xff] %v10049_v58  ;;  %v2423_v62 = vrot.slane %v2371_v23, 2  ;;  %v2426_v9 = vrot.slane %v2372_v5, 2  ;;  %v10071_v54 = vpack.c.bf16 %v14454_v39, %v14453_v38  ;;  %v10074_v55 = vrot.slane %v2373_v56, 2  ;;  %v3138_v23 = vld [vmem:[#allocation2 + $0xa0] sm:$0x11] }
 0x214   : >> { %v10066_v37 = vrot.slane %v14452_v4, 2  ;;  %7313 = vmatmul.bf16.vlgmr.msra.gmra.mxu2 %v7802_v3  ;;  %7963 = vmatmul.msk.bf16.vlgmr.msra.gmra.mxu3 %vm7256_vm15, %v7806_v59  ;;  %v10076_v30 = vrot.slane %v2374_v35, 2  ;;  %v14455_v22 = vunpack.c.h.bf16 %v14451_v15  ;;  %v10084_v50 = vpack.c.bf16 %v14457_v28, %v14456_v29  ;;  %v14458_v56 = vld [vmem:[#allocation121_spill] sm:$0xff]  ;;  %v14459_v35 = vld [vmem:[#allocation122_spill] sm:$0xff] }
 0x215   : >> { %v3061_v8 = vld [vmem:[#allocation2 + $0x98] sm:$0xff]  ;;  %v10090_v5 = vrot.slane %v1141_v6, 7  ;;  %v3144_v7 = vunpack.c.l.bf16 %v3138_v23  ;;  %v3145_v49 = vunpack.c.h.bf16 %v3138_v23  ;;  %v10096_v42 = vpack.c.bf16 %v14459_v35, %v14458_v56  ;;  %v3554_v38 = vld [vmem:[#allocation2 + $0xa0] sm:$0x11] }
 0x216   : >> { %v10080_v11 = vrot.slane %v14455_v22, 2  ;;  %v10086_v31 = vunpack.c.l.bf16 %v3061_v8  ;;  %v10088_v48 = vunpack.c.h.bf16 %v3061_v8  ;;  %v3559_v43 = vunpack.c.l.bf16 %v3554_v38 }
 0x217   : >> { %v3164_v59 = vmul.f32 %v3144_v7, %v8784_v17  ;;  %v3165_v6 = vmul.f32 %v3145_v49, %v8786_v18  ;;  %v3332_v22 = vmul.f32 %v3144_v7, %v8806_v45  ;;  %v3333_v29 = vmul.f32 %v3145_v49, %v8808_v46 }
 0x218   : >> { %v3090_v61 = vmul.f32 %v10086_v31, %v8744_v32  ;;  %v3091_v10 = vmul.f32 %v10088_v48, %v8746_v33  ;;  %v3162_v34 = vmul.f32 %v10086_v31, %v8784_v17  ;;  %v3163_v3 = vmul.f32 %v10088_v48, %v8786_v18 }
 0x219   : >> { %v3330_v15 = vmul.f32 %v10086_v31, %v8806_v45  ;;  %v3331_v4 = vmul.f32 %v10088_v48, %v8808_v46  ;;  %v3180_v28 = vpack.c.bf16 %v3165_v6, %v3164_v59  ;;  %v3503_v56 = vmul.f32 %v10086_v31, %v8772_v12 }
 0x21a   : >> { %v10112_v39 = vpack.c.bf16 %v3091_v10, %v3090_v61  ;;  %v3179_v8 = vpack.c.bf16 %v3163_v3, %v3162_v34  ;;  %v3504_v35 = vmul.f32 %v10088_v48, %v8776_v13  ;;  %v2425_v61 = vsel %vm1912_vm14, %v2423_v62, %v10074_v55 }
 0x21b   : >> { %v3347_v23 = vpack.c.bf16 %v3331_v4, %v3330_v15  ;;  %v3200_v10 = vunpack.c.l.bf16 %v3180_v28  ;;  %v3201_v34 = vunpack.c.h.bf16 %v3180_v28  ;;  %v3348_v3 = vpack.c.bf16 %v3333_v29, %v3332_v22 }
 0x21c   : >> { %14460 = vst [vmem:[#allocation47_spill] sm:$0xff] %v10112_v39  ;;  %v3198_v27 = vunpack.c.l.bf16 %v3179_v8  ;;  %v3199_v24 = vunpack.c.h.bf16 %v3179_v8  ;;  %v3560_v7 = vunpack.c.h.bf16 %v3554_v38  ;;  %v10124_v6 = vpack.c.bf16 %v3504_v35, %v3503_v56 }
 0x21d   : >> { %v2428_v15 = vsel %vm1912_vm14, %v2426_v9, %v10076_v30  ;;  %v3366_v60 = vunpack.c.l.bf16 %v3347_v23  ;;  %v3367_v36 = vunpack.c.h.bf16 %v3347_v23  ;;  %v3368_v62 = vunpack.c.l.bf16 %v3348_v3 }
 0x21e   : >> { %14461 = vst [vmem:[#allocation25_spill] sm:$0xff] %v10124_v6  ;;  %v10128_v4 = vrot.slane %v3198_v27, 1  ;;  %v10130_v8 = vrot.slane %v3199_v24, 1  ;;  %v3369_v58 = vunpack.c.h.bf16 %v3348_v3  ;;  %v3573_v38 = vmul.f32 %v10086_v31, %v8790_v19  ;;  %v3970_v24 = vld [vmem:[#allocation2 + $0xa0] sm:$0x11] }
 0x21f   : >> { %v3574_v22 = vmul.f32 %v10088_v48, %v8792_v20  ;;  %v10136_v29 = vrot.slane %v3200_v10, 1  ;;  %v10138_v28 = vrot.slane %v3201_v34, 1  ;;  %v3575_v9 = vmul.f32 %v3559_v43, %v8790_v19 }
 0x220   : >> { %14462 = vst [vmem:[#allocation49_spill] sm:$0xff] %v10128_v4  ;;  %v3576_v27 = vmul.f32 %v3560_v7, %v8792_v20  ;;  %v3741_v23 = vmul.f32 %v10086_v31, %v8810_v47  ;;  %v3742_v35 = vmul.f32 %v10088_v48, %v8814_v41  ;;  %v3743_v3 = vmul.f32 %v3559_v43, %v8810_v47 }
 0x221   : >> { %14463 = vst [vmem:[#allocation26_spill] sm:$0xff] %v10130_v8  ;;  %v10142_v56 = vpack.c.bf16 %v3574_v22, %v3573_v38  ;;  %v10149_v59 = vrot.slane %v3366_v60, 2  ;;  %v10151_v10 = vrot.slane %v3367_v36, 2  ;;  %v3744_v49 = vmul.f32 %v3560_v7, %v8814_v41  ;;  %v14472_v36 = vld [vmem:[#allocation27_spill] sm:$0xff]  ;;  %v14474_v7 = vld [vmem:[#allocation30_spill] sm:$0xff] }
 0x222   : >> { %14464 = vst [vmem:[#allocation48_spill] sm:$0xff] %v10136_v29  ;;  %v3594_v34 = vpack.c.bf16 %v3576_v27, %v3575_v9  ;;  %v10154_v39 = vrot.slane %v3368_v62, 2  ;;  %v10158_v38 = vpack.c.bf16 %v3742_v35, %v3741_v23  ;;  %v3974_v22 = vunpack.c.l.bf16 %v3970_v24  ;;  %v14477_v27 = vld [vmem:[#allocation32_spill] sm:$0xff]  ;;  %v14479_v23 = vld [vmem:[#allocation33_spill] sm:$0xff] }
 0x223   : >> { %14465 = vst [vmem:[#allocation50_spill] sm:$0xff] %v10138_v28  ;;  %v10156_v28 = vrot.slane %v3369_v58, 2  ;;  %v3762_v4 = vpack.c.bf16 %v3744_v49, %v3743_v3  ;;  %v3975_v6 = vunpack.c.h.bf16 %v3970_v24  ;;  %v10164_v9 = vmul.f32 %v10086_v31, %v14472_v36 }
 0x224   : >> { %14466 = vst [vmem:[#allocation45_spill] sm:$0xff] %v10142_v56  ;;  %v3611_v29 = vunpack.c.l.bf16 %v3594_v34  ;;  %v3612_v8 = vunpack.c.h.bf16 %v3594_v34  ;;  %v10168_v62 = vmul.f32 %v10088_v48, %v14474_v7  ;;  %v10172_v58 = vmul.f32 %v10086_v31, %v8873_v21 }
 0x225   : >> { %14467 = vst [vmem:[#allocation51_spill] sm:$0xff] %v10149_v59  ;;  %v10176_v49 = vmul.f32 %v10088_v48, %v14477_v27  ;;  %v3986_v24 = vmul.f32 %v3974_v22, %v8873_v21  ;;  %v10181_v35 = vmul.f32 %v10086_v31, %v14479_v23  ;;  %v3779_v60 = vunpack.c.l.bf16 %v3762_v4 }
 0x226   : >> { %14468 = vst [vmem:[#allocation52_spill] sm:$0xff] %v10151_v10  ;;  %v10183_v3 = vrot.slane %v3611_v29, 1  ;;  %v10185_v34 = vrot.slane %v3612_v8, 1  ;;  %v3780_v43 = vunpack.c.h.bf16 %v3762_v4  ;;  %v10190_v10 = vmul.f32 %v10088_v48, %v9038_v16 }
 0x227   : >> { %14469 = vst [vmem:[#allocation81_spill] sm:$0xff] %v10154_v39  ;;  %v3987_v39 = vmul.f32 %v3975_v6, %v14477_v27  ;;  %v10193_v59 = vmul.f32 %v3974_v22, %v14479_v23  ;;  %v14485_v31 = vshll.u32 %v10051_v53, 16  ;;  %v10199_v29 = vmul.f32 %v3975_v6, %v9038_v16 }
 0x228   : >> { %14470 = vst [vmem:[#allocation82_spill] sm:$0xff] %v10156_v28  ;;  %v1406_v28 = vld [vmem:[#allocation2 + $0xa8] sm:$0xff]  ;;  %v2430_v4 = vsel %vm1912_vm14, %v10074_v55, %v10066_v37  ;;  %v2432_v8 = vsel %vm1912_vm14, %v10076_v30, %v10080_v11  ;;  %v2473_v48 = vadd.f32 %v2425_v61, %v10032_v26  ;;  %v10215_v56 = vrot.slane %v3780_v43, 2 }
 0x229   : >> { %14471 = vst [vmem:[#allocation53_spill] sm:$0xff] %v10158_v38  ;;  %v1146_v38 = vor.u32 %v14485_v31, %v10090_v5  ;;  %v2475_v53 = vadd.f32 %v2430_v4, %v10055_v25  ;;  %v2476_v6 = vadd.f32 %v2432_v8, %v10057_v57  ;;  %v10213_v31 = vrot.slane %v3779_v60, 2 }
 0x22a   : >> { %14473 = vst [vmem:[#allocation54_spill] sm:$0xff] %v10164_v9  ;;  %v14491_v30 = vunpack.c.l.bf16 %v10061_v44  ;;  %v2553_v4 = vunpack.c.h.bf16 %v10084_v50  ;;  %v14554_v9 = vld [vmem:[#allocation150_spill] sm:$0xff] }
 0x22b   : >> { %14475 = vst [vmem:[#allocation85_spill] sm:$0xff] %v10168_v62  ;;  %v1407_v22 = vsel %vm8724_vm7, %v1146_v38, %v1406_v28 }
 0x22c   : >> { %14476 = vst [vmem:[#allocation88_spill] sm:$0xff] %v10172_v58  ;;  %v3076_v37 = vunpack.c.l.bf16 %v1407_v22  ;;  %v3077_v55 = vunpack.c.h.bf16 %v1407_v22  ;;  %v10222_v11 = vadd.f32 %v14491_v30, %v2473_v48  ;;  %v2670_v30 = vunpack.c.h.bf16 %v10071_v54 }
 0x22d   : >> { %14478 = vst [vmem:[#allocation91_spill] sm:$0xff] %v10176_v49 }
 0x22e   : >> { %14480 = vst [vmem:[#allocation63_spill] sm:$0xff] %v10181_v35  ;;  %v3092_v57 = vmul.f32 %v3076_v37, %v8744_v32  ;;  %v3093_v61 = vmul.f32 %v3077_v55, %v8746_v33  ;;  %v3167_v28 = vmul.f32 %v3077_v55, %v8786_v18  ;;  %v3506_v38 = vmul.f32 %v3077_v55, %v8776_v13 }
 0x22f   : >> { %14481 = vst [vmem:[#allocation64_spill] sm:$0xff] %v10183_v3  ;;  %v2474_v3 = vadd.f32 %v2428_v15, %v10034_v63  ;;  %v14492_v63 = vunpack.c.h.bf16 %v10061_v44  ;;  %v3166_v15 = vmul.f32 %v3076_v37, %v8784_v17  ;;  %v3577_v43 = vmul.f32 %v3076_v37, %v8790_v19 }
 0x230   : >> { %14482 = vst [vmem:[#allocation89_spill] sm:$0xff] %v10185_v34  ;;  %v3578_v60 = vmul.f32 %v3077_v55, %v8792_v20  ;;  %v10241_v48 = vmul.f32 %v3076_v37, %v14472_v36 }
 0x231   : >> { %14483 = vst [vmem:[#allocation90_spill] sm:$0xff] %v10190_v10  ;;  %v10226_v25 = vadd.f32 %v14492_v63, %v2474_v3  ;;  %v3181_v44 = vpack.c.bf16 %v3167_v28, %v3166_v15  ;;  %v2552_v3 = vunpack.c.l.bf16 %v10084_v50 }
 0x232   : >> { %14484 = vst [vmem:[#allocation92_spill] sm:$0xff] %v10193_v59  ;;  %v3595_v8 = vpack.c.bf16 %v3578_v60, %v3577_v43  ;;  %v10255_v60 = vmul.f32 %v3077_v55, %v14477_v27 }
 0x233   : >> { %14486 = vst [vmem:[#allocation93_spill] sm:$0xff] %v10199_v29  ;;  %v10217_v29 = vpack.c.bf16 %v3987_v39, %v3986_v24  ;;  %v3505_v39 = vmul.f32 %v3076_v37, %v8772_v12  ;;  %v10236_v24 = vpack.c.bf16 %v3093_v61, %v3092_v57  ;;  %v3202_v63 = vunpack.c.l.bf16 %v3181_v44 }
 0x234   : >> { %14488 = vst [vmem:[#allocation36_spill] sm:$0xff] %v10213_v31  ;;  %v10251_v57 = vmul.f32 %v3076_v37, %v8873_v21  ;;  %v3203_v50 = vunpack.c.h.bf16 %v3181_v44  ;;  %v3613_v28 = vunpack.c.l.bf16 %v3595_v8 }
 0x235   : >> { %14489 = vst [vmem:[#allocation22_spill] sm:$0xff] %v10215_v56  ;;  %v10245_v26 = vpack.c.bf16 %v3506_v38, %v3505_v39  ;;  %v10248_v56 = vmul.f32 %v3077_v55, %v14474_v7 }
 0x236   : >> { %1408 = vst [vmem:[#allocation2 + $0xa8] sm:$0xff] %v1407_v22  ;;  %v2669_v22 = vunpack.c.l.bf16 %v10071_v54  ;;  %v10267_v10 = vrot.slane %v3613_v28, 1 }
 0x237   : >> { %14490 = vst [vmem:[#allocation37_spill] sm:$0xff] %v10217_v29  ;;  %v14515_v29 = vld [vmem:[#allocation74_spill] sm:$0xff] }
 0x238   : >> { %14493 = vst [vmem:[#allocation23_spill] sm:$0xff] %v10236_v24 }
 0x239   : >> { %14494 = vst [vmem:[#allocation39_spill] sm:$0xff] %v10241_v48  ;;  %v2569_v48 = vadd.f32 %v2553_v4, %v2476_v6 }
 0x23a   : >> { %14495 = vst [vmem:[#allocation40_spill] sm:$0xff] %v10245_v26  ;;  %v3614_v26 = vunpack.c.h.bf16 %v3595_v8  ;;  %v2672_v8 = vunpack.c.h.bf16 %v10096_v42 }
 0x23b   : >> { %14496 = vst [vmem:[#allocation18_spill] sm:$0xff] %v10248_v56  ;;  %v10260_v56 = vrot.slane %v3202_v63, 1 }
 0x23c   : >> { %14497 = vst [vmem:[#allocation21_spill] sm:$0xff] %v10251_v57  ;;  %v2568_v57 = vadd.f32 %v2552_v3, %v2475_v53  ;;  %v10273_v53 = vrot.slane %v3614_v26, 1  ;;  %v14503_v3 = vld [vmem:[#allocation127_spill] sm:$0xff]  ;;  %v2724_v26 = vrot.slane %v2670_v30, 1 }
 0x23d   : >> { %v3307_v15 = vld [vmem:[#allocation2 + $0xa8] sm:$0xee]  ;;  %14498 = vst [vmem:[#allocation41_spill] sm:$0xff] %v10255_v60  ;;  %v10265_v60 = vrot.slane %v3203_v50, 1  ;;  %v2673_v4 = vunpack.c.l.bf16 %v14503_v3  ;;  %v2674_v50 = vunpack.c.h.bf16 %v14503_v3 }
 0x23e   : >> { %v3723_v43 = vld [vmem:[#allocation2 + $0xa8] sm:$0xee]  ;;  %v3314_v39 = vunpack.c.l.bf16 %v3307_v15  ;;  %v3315_v38 = vunpack.c.h.bf16 %v3307_v15  ;;  %14499 = vst [vmem:[#allocation28_spill] sm:$0xff] %v10260_v56  ;;  %v2671_v15 = vunpack.c.l.bf16 %v10096_v42 }
 0x23f   : >> { %v10257_v31 = vld [vmem:[#allocation2 + $0xa8] sm:$0xee]  ;;  %v3729_v37 = vunpack.c.l.bf16 %v3723_v43  ;;  %v3730_v59 = vunpack.c.h.bf16 %v3723_v43  ;;  %14500 = vst [vmem:[#allocation42_spill] sm:$0xff] %v10265_v60  ;;  %v2727_v6 = vrot.slane %v2673_v4, 1  ;;  %v2729_v24 = vrot.slane %v2674_v50, 1  ;;  %v14505_v60 = vld [vmem:[#allocation102_spill] sm:$0xff] }
 0x240   : >> { %v3334_v44 = vmul.f32 %v3314_v39, %v8806_v45  ;;  %v3335_v61 = vmul.f32 %v3315_v38, %v8808_v46  ;;  %v4144_v55 = vunpack.c.l.bf16 %v10257_v31  ;;  %14501 = vst [vmem:[#allocation29_spill] sm:$0xff] %v10267_v10  ;;  %v2721_v39 = vrot.slane %v2669_v22, 1  ;;  %v7998_v38 = vld [vmem:[%s8538_s21 + $0x70] sm:$0xff]  ;;  %v14508_v50 = vld [vmem:[#allocation126_spill] sm:$0xff]  ;;  %v14510_v10 = vld [vmem:[#allocation129_spill] sm:$0xff] }
 0x241   : >> { %14502 = vst [vmem:[#allocation43_spill] sm:$0xff] %v10273_v53  ;;  %v10278_v43 = vmul.f32 %v3729_v37, %v8810_v47  ;;  %v2722_v28 = vrot.slane %v2671_v15, 1  ;;  %v10283_v54 = vmul.f32 %v3730_v59, %v8814_v41  ;;  %v14506_v37 = vld [vmem:[#allocation103_spill] sm:$0xff]  ;;  %7779 = vmatmul.msk.bf16.gmra.mxu0 %vm643_vm3, %v7998_v38  ;;  %7795 = vmatmul.msk.bf16.gmra.mxu1 %vm643_vm3, %v7998_v38  ;;  %v739_v15 = vpop.f32.mrf.mxu0  ;;  %v14509_v22 = vld [vmem:[#allocation128_spill] sm:$0xff] }
 0x242   : >> { %v10271_v63 = vpack.c.bf16 %v3335_v61, %v3334_v44  ;;  %v10286_v42 = vmul.f32 %v4144_v55, %v14479_v23  ;;  %v2725_v61 = vrot.slane %v2672_v8, 1  ;;  %v2857_v56 = vpack.c.bf16 %v14506_v37, %v14505_v60  ;;  %v14507_v60 = vld [vmem:[#allocation125_spill] sm:$0xff]  ;;  %v828_v37 = vpop.f32.mrf.mxu1 }
 0x243   : >> { %v2723_v44 = vsel %vm1708_vm13, %v2721_v39, %v2722_v28  ;;  %v2728_v8 = vsel %vm1708_vm13, %v2722_v28, %v2727_v6  ;;  %v2858_v39 = vpack.c.bf16 %v14508_v50, %v14507_v60  ;;  %v2859_v59 = vpack.c.bf16 %v14510_v10, %v14509_v22  ;;  %v14512_v10 = vld [vmem:[#allocation55_spill] sm:$0xff] }
 0x244   : >> { %14504 = vst [vmem:[#allocation44_spill] sm:$0xff] %v10286_v42  ;;  %v2726_v55 = vsel %vm1708_vm13, %v2724_v26, %v2725_v61  ;;  %v2771_v30 = vadd.f32 %v2723_v44, %v10222_v11  ;;  %v2730_v3 = vsel %vm1708_vm13, %v2725_v61, %v2729_v24  ;;  %v2773_v38 = vadd.f32 %v2728_v8, %v2568_v57 }
 0x245   : >> { %v2772_v4 = vadd.f32 %v2726_v55, %v10226_v25  ;;  %v2774_v53 = vadd.f32 %v2730_v3, %v2569_v48  ;;  %v2872_v42 = vunpack.c.l.bf16 %v2857_v56  ;;  %v2873_v26 = vunpack.c.h.bf16 %v2857_v56  ;;  %v14511_v3 = vld [vmem:[#allocation72_spill] sm:$0xff] }
 0x246   : >> { %v2874_v35 = vunpack.c.l.bf16 %v2858_v39  ;;  %v2875_v11 = vunpack.c.h.bf16 %v2858_v39  ;;  %v740_v44 = vadd.f32 %v739_v15, %v8699_v51  ;;  %v2876_v6 = vunpack.c.l.bf16 %v2859_v59 }
 0x247   : >> { %v2877_v28 = vunpack.c.h.bf16 %v2859_v59  ;;  %v2924_v24 = vrot.slane %v2872_v42, 2  ;;  %v829_v25 = vadd.f32 %v828_v37, %v8701_v52  ;;  %v2927_v55 = vrot.slane %v2873_v26, 2  ;;  %v14513_v59 = vld [vmem:[#allocation73_spill] sm:$0xff]  ;;  %v14514_v42 = vld [vmem:[#allocation56_spill] sm:$0xff] }
 0x248   : >> { %v2925_v61 = vrot.slane %v2874_v35, 2  ;;  %v2928_v60 = vrot.slane %v2875_v11, 2  ;;  %v902_v50 = vmax.f32 %v740_v44, 0.0  ;;  %v2930_v57 = vrot.slane %v2876_v6, 2 }
 0x249   : >> { %v2932_v48 = vrot.slane %v2877_v28, 2  ;;  %v903_v8 = vmax.f32 %v829_v25, 0.0  ;;  %v1731_v56 = vsel %vm1708_vm13, %v14512_v10, %v14511_v3  ;;  %v1734_v37 = vsel %vm1708_vm13, %v14514_v42, %v14513_v59  ;;  %v14516_v10 = vld [vmem:[#allocation75_spill] sm:$0xff] }
 0x24a   : >> { %v2926_v22 = vsel %vm1912_vm14, %v2924_v24, %v2925_v61  ;;  %v2929_v15 = vsel %vm1912_vm14, %v2927_v55, %v2928_v60  ;;  %v966_v39 = vmin.f32 %v902_v50, 6.0  ;;  %v2931_v35 = vsel %vm1912_vm14, %v2925_v61, %v2930_v57  ;;  %v14517_v61 = vld [vmem:[#allocation34_spill] sm:$0xff] }
 0x24b   : >> { %v2933_v26 = vsel %vm1912_vm14, %v2928_v60, %v2932_v48  ;;  %v2974_v11 = vadd.f32 %v2926_v22, %v2771_v30  ;;  %v2975_v44 = vadd.f32 %v2929_v15, %v2772_v4  ;;  %v2976_v6 = vadd.f32 %v2931_v35, %v2773_v38 }
 0x24c   : >> { %v2977_v28 = vadd.f32 %v2933_v26, %v2774_v53  ;;  %v967_v25 = vmin.f32 %v903_v8, 6.0  ;;  %v1736_v24 = vsel %vm1708_vm13, %v14511_v3, %v14515_v29  ;;  %v1738_v42 = vsel %vm1708_vm13, %v14513_v59, %v14516_v10  ;;  %v14520_v3 = vld [vmem:[#allocation62_spill] sm:$0xff] }
 0x24d   : >> { %v2995_v55 = vadd.f32 %v9956_v40, %v2974_v11  ;;  %v2996_v50 = vadd.f32 %v9958_v14, %v2975_v44  ;;  %v14518_v57 = vunpack.c.l.bf16 %v14517_v61  ;;  %v2997_v30 = vadd.f32 %v9956_v40, %v2976_v6 }
 0x24e   : >> { %v2998_v53 = vadd.f32 %v9958_v14, %v2977_v28  ;;  %v1017_v4 = vpack.c.bf16 %v967_v25, %v966_v39  ;;  %v14519_v38 = vunpack.c.h.bf16 %v14517_v61  ;;  %v14521_v22 = vunpack.c.l.bf16 %v14520_v3  ;;  %v14524_v28 = vld [vmem:[#allocation65_spill] sm:$0xff] }
 0x24f   : >> { %v1773_v60 = vadd.f32 %v1731_v56, %v14518_v57  ;;  %v3011_v29 = vmax.f32 %v2995_v55, 0.0  ;;  %v3012_v8 = vmax.f32 %v2996_v50, 0.0  ;;  %v14522_v35 = vunpack.c.h.bf16 %v14520_v3  ;;  %v14523_v57 = vld [vmem:[#allocation76_spill] sm:$0xff]  ;;  %v14525_v25 = vld [vmem:[#allocation77_spill] sm:$0xff] }
 0x250   : >> { %v1774_v48 = vadd.f32 %v1734_v37, %v14519_v38  ;;  %v1775_v15 = vadd.f32 %v1736_v24, %v14521_v22  ;;  %v3013_v59 = vmax.f32 %v2997_v30, 0.0  ;;  %v3014_v11 = vmax.f32 %v2998_v53, 0.0  ;;  %v14526_v37 = vld [vmem:[#allocation66_spill] sm:$0xff]  ;;  %v14527_v38 = vld [vmem:[#allocation79_spill] sm:$0xff]  ;;  %v1410_v53 = vld [vmem:[#allocation2 + $0xb8] sm:$0x11] }
 0x251   : >> { %v1776_v26 = vadd.f32 %v1738_v42, %v14522_v35  ;;  %v1149_v44 = vshrl.u32 %v1017_v4, 16  ;;  %v1152_v56 = vshll.u32 %v1017_v4, 16  ;;  %v3027_v10 = vmin.f32 %v3011_v29, 6.0  ;;  %v742_v4 = vpop.f32.mrf.mxu0  ;;  %v831_v29 = vpop.f32.mrf.mxu1 }
 0x252   : >> { %v3028_v6 = vmin.f32 %v3012_v8, 6.0  ;;  %v1935_v39 = vsel %vm1912_vm14, %v14524_v28, %v14523_v57  ;;  %v1938_v55 = vsel %vm1912_vm14, %v14526_v37, %v14525_v25  ;;  %v3029_v50 = vmin.f32 %v3013_v59, 6.0  ;;  %v14528_v8 = vld [vmem:[#allocation80_spill] sm:$0xff] }
 0x253   : >> { %v3030_v61 = vmin.f32 %v3014_v11, 6.0  ;;  %v1151_v24 = vrot.slane %v1149_v44, 7  ;;  %v1940_v42 = vsel %vm1912_vm14, %v14523_v57, %v14527_v38  ;;  %v1942_v3 = vsel %vm1912_vm14, %v14525_v25, %v14528_v8  ;;  %v14532_v38 = vld [vmem:[#allocation119_spill] sm:$0xff] }
 0x254   : >> { %v3041_v30 = vpack.c.bf16 %v3028_v6, %v3027_v10  ;;  %v1977_v22 = vadd.f32 %v1935_v39, %v1773_v60  ;;  %v1978_v35 = vadd.f32 %v1938_v55, %v1774_v48  ;;  %v743_v59 = vadd.f32 %v742_v4, %v8699_v51  ;;  %v14529_v6 = vld [vmem:[#allocation68_spill] sm:$0xff] }
 0x255   : >> { %v3042_v28 = vpack.c.bf16 %v3030_v61, %v3029_v50  ;;  %v1154_v49 = vor.u32 %v1152_v56, %v1151_v24  ;;  %v1156_v37 = vrot.slane %v1151_v24, 4  ;;  %v832_v11 = vadd.f32 %v831_v29, %v8701_v52 }
 0x256   : >> { %3049 = vst.msk [vmem:[#allocation3 + $0x10] sm:$0xff] %vm8519_vm2, %v3041_v30  ;;  %v1979_v44 = vadd.f32 %v1940_v42, %v1775_v15  ;;  %v1980_v10 = vadd.f32 %v1942_v3, %v1776_v26  ;;  %v2053_v57 = vunpack.c.l.bf16 %v14529_v6  ;;  %v14530_v60 = vrot.slane %v10090_v5, 4  ;;  %v14531_v26 = vld [vmem:[#allocation106_spill] sm:$0xff]  ;;  %v14534_v30 = vld [vmem:[#allocation120_spill] sm:$0xff] }
 0x257   : >> { %3050 = vst.msk [vmem:[#allocation3 + $0x18] sm:$0xff] %vm8519_vm2, %v3042_v28  ;;  %v1411_v56 = vsel %vm8542_vm10, %v1156_v37, %v1410_v53  ;;  %v904_v39 = vmax.f32 %v743_v59, 0.0  ;;  %v2054_v25 = vunpack.c.h.bf16 %v14529_v6  ;;  %v905_v15 = vmax.f32 %v832_v11, 0.0  ;;  %v14535_v53 = vld [vmem:[#allocation97_spill] sm:$0xff]  ;;  %v14536_v28 = vld [vmem:[#allocation123_spill] sm:$0xff]  ;;  %v14537_v59 = vld [vmem:[#allocation124_spill] sm:$0xff] }
 0x258   : >> { %v1155_v48 = vsel %vm8765_vm9, %v14530_v60, %v1154_v49  ;;  %v2055_v55 = vunpack.c.l.bf16 %v14531_v26  ;;  %v2056_v50 = vunpack.c.h.bf16 %v14531_v26  ;;  %v2069_v61 = vadd.f32 %v2053_v57, %v1977_v22  ;;  %1412 = vst [vmem:[#allocation2 + $0xb8] sm:$0x11] %v1411_v56  ;;  %v14533_v49 = vld [vmem:[#allocation96_spill] sm:$0xff]  ;;  %v14538_v6 = vld [vmem:[#allocation101_spill] sm:$0xff] }
 0x259   : >> { %1409 = vst.msk [vmem:[#allocation2 + $0xb0] sm:$0xff] %vm8519_vm2, %v1155_v48  ;;  %v968_v5 = vmin.f32 %v904_v39, 6.0  ;;  %v2070_v24 = vadd.f32 %v2054_v25, %v1978_v35  ;;  %v2232_v42 = vsel %vm1708_vm13, %v14533_v49, %v14532_v38  ;;  %v2235_v4 = vsel %vm1708_vm13, %v14535_v53, %v14534_v30 }
 0x25a   : >> { %v969_v29 = vmin.f32 %v905_v15, 6.0  ;;  %v2071_v8 = vadd.f32 %v2055_v55, %v1979_v44  ;;  %v2072_v3 = vadd.f32 %v2056_v50, %v1980_v10  ;;  %v2237_v37 = vsel %vm1708_vm13, %v14532_v38, %v14536_v28 }
 0x25b   : >> { %v2239_v22 = vsel %vm1708_vm13, %v14534_v30, %v14537_v59  ;;  %v10376_v35 = vadd.f32 %v2232_v42, %v2069_v61  ;;  %v10378_v11 = vadd.f32 %v2235_v4, %v2070_v24  ;;  %v2377_v57 = vunpack.c.l.bf16 %v14538_v6  ;;  %v14546_v24 = vld [vmem:[#allocation113_spill] sm:$0xff]  ;;  %v14547_v42 = vld [vmem:[#allocation114_spill] sm:$0xff] }
 0x25c   : >> { %v14539_v60 = vunpack.c.l.bf16 %v10271_v63  ;;  %v10387_v44 = vpack.c.bf16 %v10283_v54, %v10278_v43  ;;  %v14542_v10 = vunpack.c.h.bf16 %v10257_v31  ;;  %v10394_v39 = vpack.c.bf16 %v969_v29, %v968_v5 }
 0x25d   : >> { %v14544_v25 = vunpack.c.h.bf16 %v10271_v63  ;;  %v7809_v26 = vld [vmem:[#allocation3 + $0x10] sm:$0xf]  ;;  %v8006_v55 = vld [vmem:[#allocation3 + $0x14] sm:$0xf]  ;;  %v10400_v50 = vadd.f32 %v2237_v37, %v2071_v8  ;;  %v2378_v61 = vunpack.c.h.bf16 %v14538_v6  ;;  %v2379_v54 = vunpack.c.l.bf16 %v14546_v24  ;;  %v14550_v6 = vld [vmem:[#allocation132_spill] sm:$0xff] }
 0x25e   : >> { %v10383_v48 = vrot.slane %v14539_v60, 2  ;;  %14541 = vst [vmem:[#allocation67_spill] sm:$0xff] %v10387_v44  ;;  %v10392_v56 = vmul.f32 %v14542_v10, %v9038_v16  ;;  %v8007_v43 = vld [vmem:[#allocation3 + $0x14] sm:$0xf0]  ;;  %v7811_v38 = vld [vmem:[#allocation3 + $0x18] sm:$0xf0]  ;;  %v10404_v49 = vadd.f32 %v2239_v22, %v2072_v3  ;;  %v14548_v63 = vunpack.c.l.bf16 %v14547_v42 }
 0x25f   : >> { %v10398_v15 = vrot.slane %v14544_v25, 2  ;;  %v10407_v5 = vrot.slane %v2377_v57, 2  ;;  %v7810_v53 = vor.u32 %v8007_v43, %v7809_v26  ;;  %v7814_v4 = vor.u32 %v8006_v55, %v7811_v38  ;;  %v3139_v3 = vld [vmem:[#allocation2 + $0xb8] sm:$0x11]  ;;  %v14549_v22 = vld [vmem:[#allocation131_spill] sm:$0xff]  ;;  %v14551_v60 = vld [vmem:[#allocation134_spill] sm:$0xff] }
 0x260   : >> { %14540 = vst [vmem:[#allocation35_spill] sm:$0xff] %v10383_v48  ;;  %v10411_v30 = vrot.slane %v14548_v63, 2  ;;  %v3063_v29 = vld [vmem:[#allocation2 + $0xb0] sm:$0xff]  ;;  %v10421_v57 = vpack.c.bf16 %v14550_v6, %v14549_v22  ;;  %v14552_v10 = vld [vmem:[#allocation135_spill] sm:$0xff]  ;;  %v3146_v26 = vunpack.c.l.bf16 %v3139_v3  ;;  %v3147_v55 = vunpack.c.h.bf16 %v3139_v3  ;;  %v3555_v6 = vld [vmem:[#allocation2 + $0xb8] sm:$0x11] }
 0x261   : >> { %14543 = vst [vmem:[#allocation83_spill] sm:$0xff] %v10392_v56  ;;  %v10415_v37 = vunpack.c.l.bf16 %v3063_v29  ;;  %v10417_v59 = vunpack.c.h.bf16 %v3063_v29  ;;  %v10425_v25 = vpack.c.bf16 %v14552_v10, %v14551_v60  ;;  %7318 = vmatmul.bf16.gmra.mxu2 %v7810_v53  ;;  %7964 = vmatmul.msk.bf16.gmra.mxu3 %vm7256_vm15, %v7814_v4  ;;  %v10428_v43 = vrot.slane %v2379_v54, 2 }
 0x262   : >> { %14545 = vst [vmem:[#allocation57_spill] sm:$0xff] %v10398_v15  ;;  %v10430_v38 = vrot.slane %v2378_v61, 2  ;;  %v3170_v4 = vmul.f32 %v3146_v26, %v8784_v17  ;;  %v3171_v3 = vmul.f32 %v3147_v55, %v8786_v18  ;;  %v3338_v28 = vmul.f32 %v3146_v26, %v8806_v45 }
 0x263   : >> { %v3094_v63 = vmul.f32 %v10415_v37, %v8744_v32  ;;  %v3095_v29 = vmul.f32 %v10417_v59, %v8746_v33  ;;  %v3168_v22 = vmul.f32 %v10415_v37, %v8784_v17  ;;  %v3169_v53 = vmul.f32 %v10417_v59, %v8786_v18 }
 0x264   : >> { %v3336_v61 = vmul.f32 %v10415_v37, %v8806_v45  ;;  %v3337_v54 = vmul.f32 %v10417_v59, %v8808_v46  ;;  %v3339_v31 = vmul.f32 %v3147_v55, %v8808_v46  ;;  %v3183_v8 = vpack.c.bf16 %v3171_v3, %v3170_v4 }
 0x265   : >> { %v10446_v60 = vpack.c.bf16 %v3095_v29, %v3094_v63  ;;  %v3182_v10 = vpack.c.bf16 %v3169_v53, %v3168_v22  ;;  %v3507_v48 = vmul.f32 %v10415_v37, %v8772_v12  ;;  %v3508_v44 = vmul.f32 %v10417_v59, %v8776_v13 }
 0x266   : >> { %v3350_v15 = vpack.c.bf16 %v3337_v54, %v3336_v61  ;;  %v3561_v62 = vunpack.c.l.bf16 %v3555_v6  ;;  %v10456_v63 = vpack.c.bf16 %v14555_v2, %v14554_v9  ;;  %v3206_v29 = vunpack.c.l.bf16 %v3183_v8 }
 0x267   : >> { %14553 = vst [vmem:[#allocation84_spill] sm:$0xff] %v10446_v60  ;;  %v3204_v56 = vunpack.c.l.bf16 %v3182_v10  ;;  %v3205_v58 = vunpack.c.h.bf16 %v3182_v10  ;;  %v3207_v22 = vunpack.c.h.bf16 %v3183_v8  ;;  %v3351_v26 = vpack.c.bf16 %v3339_v31, %v3338_v28 }
 0x268   : >> { %v3562_v53 = vunpack.c.h.bf16 %v3555_v6  ;;  %v10460_v3 = vpack.c.bf16 %v3508_v44, %v3507_v48  ;;  %v3372_v1 = vunpack.c.l.bf16 %v3350_v15  ;;  %v3373_v0 = vunpack.c.h.bf16 %v3350_v15 }
 0x269   : >> { %v10463_v54 = vrot.slane %v3204_v56, 1  ;;  %v10465_v10 = vrot.slane %v3205_v58, 1  ;;  %v3374_v2 = vunpack.c.l.bf16 %v3351_v26  ;;  %v3375_v9 = vunpack.c.h.bf16 %v3351_v26  ;;  %v3971_v58 = vld [vmem:[#allocation2 + $0xb8] sm:$0x11] }
 0x26a   : >> { %14556 = vst [vmem:[#allocation58_spill] sm:$0xff] %v10460_v3  ;;  %v3579_v31 = vmul.f32 %v10415_v37, %v8790_v19  ;;  %v3580_v8 = vmul.f32 %v10417_v59, %v8792_v20  ;;  %v10471_v28 = vrot.slane %v3206_v29, 1  ;;  %v10473_v48 = vrot.slane %v3207_v22, 1 }
 0x26b   : >> { %14557 = vst [vmem:[#allocation86_spill] sm:$0xff] %v10463_v54  ;;  %v3581_v44 = vmul.f32 %v3561_v62, %v8790_v19  ;;  %v3582_v56 = vmul.f32 %v3562_v53, %v8792_v20  ;;  %v3747_v15 = vmul.f32 %v10415_v37, %v8810_v47  ;;  %v3748_v26 = vmul.f32 %v10417_v59, %v8814_v41 }
 0x26c   : >> { %14558 = vst [vmem:[#allocation87_spill] sm:$0xff] %v10465_v10  ;;  %v10477_v6 = vpack.c.bf16 %v3580_v8, %v3579_v31  ;;  %v3749_v4 = vmul.f32 %v3561_v62, %v8810_v47  ;;  %v10484_v55 = vrot.slane %v3372_v1, 2  ;;  %v10486_v29 = vrot.slane %v3373_v0, 2 }
 0x26d   : >> { %14559 = vst [vmem:[#allocation59_spill] sm:$0xff] %v10471_v28  ;;  %v3597_v22 = vpack.c.bf16 %v3582_v56, %v3581_v44  ;;  %v3750_v61 = vmul.f32 %v3562_v53, %v8814_v41  ;;  %v10489_v60 = vrot.slane %v3374_v2, 2  ;;  %v10493_v31 = vpack.c.bf16 %v3748_v26, %v3747_v15 }
 0x26e   : >> { %14560 = vst [vmem:[#allocation71_spill] sm:$0xff] %v10473_v48  ;;  %v10491_v48 = vrot.slane %v3375_v9, 2  ;;  %v3976_v8 = vunpack.c.l.bf16 %v3971_v58  ;;  %v3977_v3 = vunpack.c.h.bf16 %v3971_v58  ;;  %v10499_v0 = vmul.f32 %v10415_v37, %v14472_v36 }
 0x26f   : >> { %14561 = vst [vmem:[#allocation69_spill] sm:$0xff] %v10477_v6  ;;  %v3617_v28 = vunpack.c.l.bf16 %v3597_v22  ;;  %v3618_v10 = vunpack.c.h.bf16 %v3597_v22  ;;  %v3765_v54 = vpack.c.bf16 %v3750_v61, %v3749_v4  ;;  %v10503_v53 = vmul.f32 %v10417_v59, %v14474_v7 }
 0x270   : >> { %14562 = vst [vmem:[#allocation70_spill] sm:$0xff] %v10484_v55  ;;  %v10507_v2 = vmul.f32 %v10415_v37, %v8873_v21  ;;  %v10511_v4 = vmul.f32 %v10417_v59, %v14477_v27  ;;  %v3992_v61 = vmul.f32 %v3976_v8, %v8873_v21  ;;  %v10516_v9 = vmul.f32 %v10415_v37, %v14479_v23  ;;  %v1413_v37 = vld [vmem:[#allocation2 + $0xc0] sm:$0xff] }
 0x271   : >> { %14563 = vst [vmem:[#allocation78_spill] sm:$0xff] %v10486_v29  ;;  %v10518_v44 = vrot.slane %v3617_v28, 1  ;;  %v10520_v56 = vrot.slane %v3618_v10, 1  ;;  %v3785_v58 = vunpack.c.l.bf16 %v3765_v54  ;;  %v3786_v15 = vunpack.c.h.bf16 %v3765_v54 }
 0x272   : >> { %14564 = vst [vmem:[#allocation98_spill] sm:$0xff] %v10489_v60  ;;  %v3993_v26 = vmul.f32 %v3977_v3, %v14477_v27  ;;  %v10525_v22 = vmul.f32 %v10417_v59, %v9038_v16  ;;  %v10528_v1 = vmul.f32 %v3976_v8, %v14479_v23  ;;  %v14576_v62 = vshrl.u32 %v10394_v39, 16 }
 0x273   : >> { %14565 = vst [vmem:[#allocation99_spill] sm:$0xff] %v10491_v48  ;;  %v2435_v10 = vsel %vm1912_vm14, %v10407_v5, %v10428_v43  ;;  %v14577_v54 = vunpack.c.h.bf16 %v14546_v24  ;;  %v2440_v59 = vsel %vm1912_vm14, %v10428_v43, %v10411_v30  ;;  %v14578_v60 = vunpack.c.h.bf16 %v14547_v42 }
 0x274   : >> { %14566 = vst [vmem:[#allocation117_spill] sm:$0xff] %v10493_v31  ;;  %v10532_v48 = vrot.slane %v14576_v62, 7  ;;  %v10545_v29 = vmul.f32 %v3977_v3, %v9038_v16  ;;  %v14580_v62 = vshll.u32 %v10394_v39, 16  ;;  %v2477_v31 = vadd.f32 %v2435_v10, %v10376_v35 }
 0x275   : >> { %14567 = vst [vmem:[#allocation118_spill] sm:$0xff] %v10499_v0  ;;  %v2437_v28 = vrot.slane %v14577_v54, 2  ;;  %v2441_v8 = vrot.slane %v14578_v60, 2  ;;  %v2479_v5 = vadd.f32 %v2440_v59, %v10400_v50  ;;  %v2555_v30 = vunpack.c.h.bf16 %v10421_v57 }
 0x276   : >> { %14568 = vst [vmem:[#allocation121_spill] sm:$0xff] %v10503_v53  ;;  %v1163_v55 = vor.u32 %v14580_v62, %v10532_v48  ;;  %v2556_v42 = vunpack.c.l.bf16 %v10456_v63  ;;  %v2557_v35 = vunpack.c.h.bf16 %v10456_v63  ;;  %v10562_v3 = vrot.slane %v3785_v58, 2 }
 0x277   : >> { %14569 = vst [vmem:[#allocation122_spill] sm:$0xff] %v10507_v2  ;;  %v2438_v24 = vsel %vm1912_vm14, %v10430_v38, %v2437_v28  ;;  %v2442_v54 = vsel %vm1912_vm14, %v2437_v28, %v2441_v8  ;;  %v14582_v10 = vunpack.c.l.bf16 %v10421_v57  ;;  %v10568_v59 = vrot.slane %v3786_v15, 2  ;;  %v14586_v15 = vld [vmem:[#allocation155_spill] sm:$0xff]  ;;  %v14654_v2 = vld [vmem:[#allocation174_spill] sm:$0xff] }
 0x278   : >> { %14570 = vst [vmem:[#allocation17_spill] sm:$0xff] %v10511_v4  ;;  %v1414_v43 = vsel %vm8724_vm7, %v1163_v55, %v1413_v37  ;;  %v2478_v60 = vadd.f32 %v2438_v24, %v10378_v11  ;;  %v2480_v39 = vadd.f32 %v2442_v54, %v10404_v49  ;;  %v10570_v8 = vpack.c.bf16 %v3993_v26, %v3992_v61  ;;  %v14653_v4 = vld [vmem:[#allocation173_spill] sm:$0xff] }
 0x279   : >> { %14571 = vst [vmem:[#allocation127_spill] sm:$0xff] %v10516_v9  ;;  %v3493_v50 = vunpack.c.l.bf16 %v1414_v43  ;;  %v3494_v38 = vunpack.c.h.bf16 %v1414_v43  ;;  %v10566_v28 = vadd.f32 %v14582_v10, %v2477_v31  ;;  %v10579_v62 = vadd.f32 %v2556_v42, %v2479_v5  ;;  %v14585_v31 = vld [vmem:[#allocation154_spill] sm:$0xff] }
 0x27a   : >> { %14572 = vst [vmem:[#allocation102_spill] sm:$0xff] %v10518_v44  ;;  %v10573_v11 = vadd.f32 %v2555_v30, %v2478_v60  ;;  %v10581_v57 = vadd.f32 %v2557_v35, %v2480_v39  ;;  %v2658_v61 = vpack.c.bf16 %v14586_v15, %v14585_v31  ;;  %v2675_v26 = vunpack.c.l.bf16 %v10425_v25 }
 0x27b   : >> { %14573 = vst [vmem:[#allocation103_spill] sm:$0xff] %v10520_v56  ;;  %v3509_v49 = vmul.f32 %v3493_v50, %v8772_v12  ;;  %v3510_v63 = vmul.f32 %v3494_v38, %v8776_v13  ;;  %v3583_v58 = vmul.f32 %v3493_v50, %v8790_v19  ;;  %v3584_v37 = vmul.f32 %v3494_v38, %v8792_v20 }
 0x27c   : >> { %14574 = vst [vmem:[#allocation125_spill] sm:$0xff] %v10525_v22  ;;  %v4395_v30 = vmul.f32 %v3493_v50, %v8744_v32  ;;  %v10591_v60 = vmul.f32 %v3493_v50, %v14472_v36  ;;  %v10594_v5 = vmul.f32 %v3494_v38, %v14474_v7  ;;  %v4463_v42 = vmul.f32 %v3493_v50, %v8784_v17 }
 0x27d   : >> { %14575 = vst [vmem:[#allocation126_spill] sm:$0xff] %v10528_v1  ;;  %v10586_v24 = vpack.c.bf16 %v3510_v63, %v3509_v49  ;;  %v3598_v54 = vpack.c.bf16 %v3584_v37, %v3583_v58  ;;  %v4464_v39 = vmul.f32 %v3494_v38, %v8786_v18  ;;  %v10599_v49 = vmul.f32 %v3493_v50, %v8873_v21 }
 0x27e   : >> { %14579 = vst [vmem:[#allocation128_spill] sm:$0xff] %v10545_v29  ;;  %v10604_v37 = vmul.f32 %v3494_v38, %v14477_v27  ;;  %v2676_v55 = vunpack.c.h.bf16 %v10425_v25  ;;  %v14599_v29 = vld [vmem:[#allocation156_spill] sm:$0xff]  ;;  %v10799_v53 = vpack.c.bf16 %v14654_v2, %v14653_v4 }
 0x27f   : >> { %14581 = vst [vmem:[#allocation129_spill] sm:$0xff] %v10562_v3  ;;  %v3619_v35 = vunpack.c.l.bf16 %v3598_v54  ;;  %v3620_v10 = vunpack.c.h.bf16 %v3598_v54  ;;  %v10606_v15 = vpack.c.bf16 %v4464_v39, %v4463_v42  ;;  %v14593_v54 = vld [vmem:[#allocation160_spill] sm:$0xff] }
 0x280   : >> { %1415 = vst [vmem:[#allocation2 + $0xc0] sm:$0xff] %v1414_v43  ;;  %v4396_v43 = vmul.f32 %v3494_v38, %v8746_v33  ;;  %v2679_v56 = vunpack.c.l.bf16 %v14593_v54  ;;  %v14595_v38 = vld [vmem:[#allocation138_spill] sm:$0xff] }
 0x281   : >> { %14583 = vst [vmem:[#allocation72_spill] sm:$0xff] %v10568_v59  ;;  %v10610_v50 = vrot.slane %v3619_v35, 1  ;;  %v10615_v42 = vrot.slane %v3620_v10, 1  ;;  %v2731_v10 = vrot.slane %v2675_v26, 1 }
 0x282   : >> { %14584 = vst [vmem:[#allocation55_spill] sm:$0xff] %v10570_v8  ;;  %v10601_v63 = vpack.c.bf16 %v4396_v43, %v4395_v30  ;;  %v2680_v43 = vunpack.c.h.bf16 %v14593_v54 }
 0x283   : >> { %14587 = vst [vmem:[#allocation73_spill] sm:$0xff] %v10586_v24  ;;  %v2677_v24 = vunpack.c.l.bf16 %v2658_v61 }
 0x284   : >> { %14588 = vst [vmem:[#allocation56_spill] sm:$0xff] %v10591_v60  ;;  %v2678_v60 = vunpack.c.h.bf16 %v2658_v61 }
 0x285   : >> { %14589 = vst [vmem:[#allocation74_spill] sm:$0xff] %v10594_v5 }
 0x286   : >> { %14590 = vst [vmem:[#allocation75_spill] sm:$0xff] %v10599_v49 }
 0x287   : >> { %14591 = vst [vmem:[#allocation34_spill] sm:$0xff] %v10601_v63  ;;  %v3724_v58 = vld [vmem:[#allocation2 + $0xc0] sm:$0xee]  ;;  %v2734_v63 = vrot.slane %v2676_v55, 1 }
 0x288   : >> { %14592 = vst [vmem:[#allocation62_spill] sm:$0xff] %v10604_v37  ;;  %v4140_v31 = vld [vmem:[#allocation2 + $0xc0] sm:$0xee]  ;;  %v3731_v59 = vunpack.c.l.bf16 %v3724_v58  ;;  %v3732_v3 = vunpack.c.h.bf16 %v3724_v58  ;;  %v2732_v58 = vrot.slane %v2677_v24, 1 }
 0x289   : >> { %v4619_v5 = vld [vmem:[#allocation2 + $0xc0] sm:$0xee]  ;;  %14594 = vst [vmem:[#allocation76_spill] sm:$0xff] %v10610_v50  ;;  %v4146_v30 = vunpack.c.l.bf16 %v4140_v31  ;;  %v4147_v39 = vunpack.c.h.bf16 %v4140_v31 }
 0x28a   : >> { %v14596_v37 = vld [vmem:[#allocation142_spill] sm:$0xff]  ;;  %14597 = vst [vmem:[#allocation65_spill] sm:$0xff] %v10615_v42  ;;  %v3751_v61 = vmul.f32 %v3731_v59, %v8810_v47  ;;  %v3752_v44 = vmul.f32 %v3732_v3, %v8814_v41  ;;  %v4623_v35 = vunpack.c.l.bf16 %v4619_v5  ;;  %v4624_v50 = vunpack.c.h.bf16 %v4619_v5  ;;  %v14600_v5 = vld [vmem:[#allocation157_spill] sm:$0xff] }
 0x28b   : >> { %v2860_v49 = vpack.c.bf16 %v14596_v37, %v14595_v38  ;;  %v10622_v6 = vmul.f32 %v4146_v30, %v14479_v23  ;;  %v7999_v38 = vld [vmem:[%s8538_s21 + $0x78] sm:$0xff]  ;;  %v2735_v59 = vrot.slane %v2678_v60, 1  ;;  %v2737_v42 = vrot.slane %v2679_v56, 1  ;;  %v14601_v37 = vld [vmem:[#allocation159_spill] sm:$0xff] }
 0x28c   : >> { %v4631_v31 = vmul.f32 %v4623_v35, %v8806_v45  ;;  %v4632_v25 = vmul.f32 %v4624_v50, %v8808_v46  ;;  %v2739_v3 = vrot.slane %v2680_v43, 1  ;;  %v2861_v1 = vpack.c.bf16 %v14600_v5, %v14599_v29  ;;  %7780 = vmatmul.msk.bf16.gmra.mxu0 %vm643_vm3, %v7999_v38  ;;  %7796 = vmatmul.msk.bf16.gmra.mxu1 %vm643_vm3, %v7999_v38  ;;  %v14602_v35 = vld [vmem:[#allocation161_spill] sm:$0xff]  ;;  %v744_v5 = vpop.f32.mrf.mxu0 }
 0x28d   : >> { %14598 = vst [vmem:[#allocation77_spill] sm:$0xff] %v10622_v6  ;;  %v2733_v26 = vsel %vm1708_vm13, %v2731_v10, %v2732_v58  ;;  %v2862_v54 = vpack.c.bf16 %v14602_v35, %v14601_v37  ;;  %v2878_v50 = vunpack.c.l.bf16 %v2860_v49  ;;  %v2736_v55 = vsel %vm1708_vm13, %v2734_v63, %v2735_v59  ;;  %v14605_v37 = vld [vmem:[#allocation107_spill] sm:$0xff] }
 0x28e   : >> { %v10633_v30 = vpack.c.bf16 %v4632_v25, %v4631_v31  ;;  %v2738_v56 = vsel %vm1708_vm13, %v2732_v58, %v2737_v42  ;;  %v2740_v24 = vsel %vm1708_vm13, %v2735_v59, %v2739_v3  ;;  %v2775_v29 = vadd.f32 %v2733_v26, %v10566_v28  ;;  %v833_v42 = vpop.f32.mrf.mxu1 }
 0x28f   : >> { %v10642_v60 = vpack.c.bf16 %v3752_v44, %v3751_v61  ;;  %v10645_v43 = vmul.f32 %v4147_v39, %v9038_v16  ;;  %v2776_v10 = vadd.f32 %v2736_v55, %v10573_v11  ;;  %v2879_v38 = vunpack.c.h.bf16 %v2860_v49 }
 0x290   : >> { %v2880_v31 = vunpack.c.l.bf16 %v2861_v1  ;;  %v2881_v63 = vunpack.c.h.bf16 %v2861_v1  ;;  %v2777_v58 = vadd.f32 %v2738_v56, %v10579_v62  ;;  %v2778_v28 = vadd.f32 %v2740_v24, %v10581_v57  ;;  %v14606_v62 = vld [vmem:[#allocation94_spill] sm:$0xff]  ;;  %v14607_v56 = vld [vmem:[#allocation108_spill] sm:$0xff] }
 0x291   : >> { %14603 = vst [vmem:[#allocation66_spill] sm:$0xff] %v10642_v60  ;;  %v2882_v44 = vunpack.c.l.bf16 %v2862_v54  ;;  %v2883_v61 = vunpack.c.h.bf16 %v2862_v54  ;;  %v2934_v59 = vrot.slane %v2878_v50, 2  ;;  %v2937_v3 = vrot.slane %v2879_v38, 2  ;;  %v14608_v54 = vld [vmem:[#allocation95_spill] sm:$0xff]  ;;  %v14609_v60 = vld [vmem:[#allocation109_spill] sm:$0xff] }
 0x292   : >> { %14604 = vst [vmem:[#allocation79_spill] sm:$0xff] %v10645_v43  ;;  %v2935_v39 = vrot.slane %v2880_v31, 2  ;;  %v2938_v26 = vrot.slane %v2881_v63, 2  ;;  %v745_v11 = vadd.f32 %v744_v5, %v8699_v51  ;;  %v834_v49 = vadd.f32 %v833_v42, %v8701_v52  ;;  %v14610_v43 = vld [vmem:[#allocation110_spill] sm:$0xff] }
 0x293   : >> { %v2940_v35 = vrot.slane %v2882_v44, 2  ;;  %v2942_v25 = vrot.slane %v2883_v61, 2  ;;  %v1741_v57 = vsel %vm1708_vm13, %v14606_v62, %v14605_v37  ;;  %v1744_v50 = vsel %vm1708_vm13, %v14608_v54, %v14607_v56 }
 0x294   : >> { %v2936_v1 = vsel %vm1912_vm14, %v2934_v59, %v2935_v39  ;;  %v2939_v55 = vsel %vm1912_vm14, %v2937_v3, %v2938_v26  ;;  %v906_v44 = vmax.f32 %v745_v11, 0.0  ;;  %v907_v61 = vmax.f32 %v834_v49, 0.0 }
 0x295   : >> { %v2941_v24 = vsel %vm1912_vm14, %v2935_v39, %v2940_v35  ;;  %v2943_v38 = vsel %vm1912_vm14, %v2938_v26, %v2942_v25  ;;  %v2978_v31 = vadd.f32 %v2936_v1, %v2775_v29  ;;  %v2979_v63 = vadd.f32 %v2939_v55, %v2776_v10  ;;  %v14611_v35 = vld [vmem:[#allocation61_spill] sm:$0xff] }
 0x296   : >> { %v2980_v5 = vadd.f32 %v2941_v24, %v2777_v58  ;;  %v2981_v42 = vadd.f32 %v2943_v38, %v2778_v28  ;;  %v1746_v62 = vsel %vm1708_vm13, %v14605_v37, %v14609_v60  ;;  %v1748_v39 = vsel %vm1708_vm13, %v14607_v56, %v14610_v43  ;;  %v14614_v24 = vld [vmem:[#allocation105_spill] sm:$0xff] }
 0x297   : >> { %v2999_v59 = vadd.f32 %v9956_v40, %v2978_v31  ;;  %v3000_v3 = vadd.f32 %v9958_v14, %v2979_v63  ;;  %v970_v10 = vmin.f32 %v906_v44, 6.0  ;;  %v971_v58 = vmin.f32 %v907_v61, 6.0  ;;  %v14618_v44 = vld [vmem:[#allocation100_spill] sm:$0xff] }
 0x298   : >> { %v3001_v25 = vadd.f32 %v9956_v40, %v2980_v5  ;;  %v3002_v29 = vadd.f32 %v9958_v14, %v2981_v42  ;;  %v14612_v11 = vunpack.c.l.bf16 %v14611_v35  ;;  %v14613_v1 = vunpack.c.h.bf16 %v14611_v35  ;;  %v14617_v42 = vld [vmem:[#allocation111_spill] sm:$0xff] }
 0x299   : >> { %v3015_v28 = vmax.f32 %v2999_v59, 0.0  ;;  %v3016_v26 = vmax.f32 %v3000_v3, 0.0  ;;  %v1019_v37 = vpack.c.bf16 %v971_v58, %v970_v10  ;;  %v14615_v38 = vunpack.c.l.bf16 %v14614_v24  ;;  %v14621_v58 = vld [vmem:[#allocation115_spill] sm:$0xff] }
 0x29a   : >> { %v1777_v49 = vadd.f32 %v1741_v57, %v14612_v11  ;;  %v1778_v55 = vadd.f32 %v1744_v50, %v14613_v1  ;;  %v3017_v54 = vmax.f32 %v3001_v25, 0.0  ;;  %v3018_v60 = vmax.f32 %v3002_v29, 0.0  ;;  %v14619_v25 = vld [vmem:[#allocation112_spill] sm:$0xff] }
 0x29b   : >> { %v1779_v43 = vadd.f32 %v1746_v62, %v14615_v38  ;;  %v3031_v56 = vmin.f32 %v3015_v28, 6.0  ;;  %v3032_v31 = vmin.f32 %v3016_v26, 6.0  ;;  %v14616_v63 = vunpack.c.h.bf16 %v14614_v24  ;;  %v14620_v29 = vld [vmem:[#allocation104_spill] sm:$0xff]  ;;  %v747_v24 = vpop.f32.mrf.mxu0  ;;  %v836_v38 = vpop.f32.mrf.mxu1 }
 0x29c   : >> { %v1945_v61 = vsel %vm1912_vm14, %v14618_v44, %v14617_v42  ;;  %v3033_v59 = vmin.f32 %v3017_v54, 6.0  ;;  %v3034_v57 = vmin.f32 %v3018_v60, 6.0  ;;  %v1166_v3 = vshrl.u32 %v1019_v37, 16  ;;  %v14622_v28 = vld [vmem:[#allocation116_spill] sm:$0xff] }
 0x29d   : >> { %v1780_v5 = vadd.f32 %v1748_v39, %v14616_v63  ;;  %v1169_v35 = vshll.u32 %v1019_v37, 16  ;;  %v3043_v50 = vpack.c.bf16 %v3032_v31, %v3031_v56  ;;  %v1948_v10 = vsel %vm1912_vm14, %v14620_v29, %v14619_v25  ;;  %v1417_v37 = vld [vmem:[#allocation2 + $0xd0] sm:$0x11]  ;;  %v14624_v63 = vld [vmem:[#allocation130_spill] sm:$0xff] }
 0x29e   : >> { %v1950_v62 = vsel %vm1912_vm14, %v14617_v42, %v14621_v58  ;;  %v1952_v39 = vsel %vm1912_vm14, %v14619_v25, %v14622_v28  ;;  %v3044_v26 = vpack.c.bf16 %v3034_v57, %v3033_v59  ;;  %v1168_v11 = vrot.slane %v1166_v3, 7 }
 0x29f   : >> { %v1981_v1 = vadd.f32 %v1945_v61, %v1777_v49  ;;  %v1982_v54 = vadd.f32 %v1948_v10, %v1778_v55  ;;  %3051 = vst.msk [vmem:[#allocation3 + $0x20] sm:$0xff] %vm8519_vm2, %v3043_v50  ;;  %v1983_v56 = vadd.f32 %v1950_v62, %v1779_v43  ;;  %v1984_v31 = vadd.f32 %v1952_v39, %v1780_v5  ;;  %v14625_v61 = vld [vmem:[#allocation139_spill] sm:$0xff] }
 0x2a0   : >> { %v2057_v44 = vunpack.c.l.bf16 %v14624_v63  ;;  %v2058_v42 = vunpack.c.h.bf16 %v14624_v63  ;;  %3052 = vst.msk [vmem:[#allocation3 + $0x28] sm:$0xff] %vm8519_vm2, %v3044_v26  ;;  %v1171_v25 = vor.u32 %v1169_v35, %v1168_v11  ;;  %v1173_v59 = vrot.slane %v1168_v11, 4  ;;  %v14629_v11 = vld [vmem:[#allocation148_spill] sm:$0xff] }
 0x2a1   : >> { %v748_v49 = vadd.f32 %v747_v24, %v8699_v51  ;;  %v837_v55 = vadd.f32 %v836_v38, %v8701_v52  ;;  %v2059_v57 = vunpack.c.l.bf16 %v14625_v61  ;;  %v2060_v3 = vunpack.c.h.bf16 %v14625_v61  ;;  %v14630_v24 = vld [vmem:[#allocation136_spill] sm:$0xff]  ;;  %v14632_v38 = vld [vmem:[#allocation137_spill] sm:$0xff] }
 0x2a2   : >> { %v2073_v50 = vadd.f32 %v2057_v44, %v1981_v1  ;;  %v2074_v43 = vadd.f32 %v2058_v42, %v1982_v54  ;;  %v14626_v5 = vrot.slane %v10532_v48, 4  ;;  %v1418_v62 = vsel %vm8542_vm10, %v1173_v59, %v1417_v37  ;;  %v14631_v54 = vld [vmem:[#allocation149_spill] sm:$0xff] }
 0x2a3   : >> { %v908_v35 = vmax.f32 %v748_v49, 0.0  ;;  %v909_v28 = vmax.f32 %v837_v55, 0.0  ;;  %v2075_v39 = vadd.f32 %v2059_v57, %v1983_v56  ;;  %v2076_v26 = vadd.f32 %v2060_v3, %v1984_v31  ;;  %1419 = vst [vmem:[#allocation2 + $0xd0] sm:$0x11] %v1418_v62  ;;  %v14637_v31 = vld [vmem:[#allocation152_spill] sm:$0xff]  ;;  %v14638_v49 = vld [vmem:[#allocation153_spill] sm:$0xff] }
 0x2a4   : >> { %v1172_v10 = vsel %vm8765_vm9, %v14626_v5, %v1171_v25  ;;  %v2242_v1 = vsel %vm1708_vm13, %v14630_v24, %v14629_v11  ;;  %v2245_v48 = vsel %vm1708_vm13, %v14632_v38, %v14631_v54  ;;  %v14633_v63 = vunpack.c.l.bf16 %v10606_v15 }
 0x2a5   : >> { %1416 = vst.msk [vmem:[#allocation2 + $0xc8] sm:$0xff] %vm8519_vm2, %v1172_v10  ;;  %v14635_v37 = vunpack.c.h.bf16 %v10606_v15  ;;  %v972_v25 = vmin.f32 %v908_v35, 6.0  ;;  %v973_v56 = vmin.f32 %v909_v28, 6.0  ;;  %v2247_v59 = vsel %vm1708_vm13, %v14629_v11, %v14637_v31  ;;  %v14639_v10 = vld [vmem:[#allocation141_spill] sm:$0xff]  ;;  %v14640_v28 = vld [vmem:[#allocation140_spill] sm:$0xff] }
 0x2a6   : >> { %v10720_v44 = vrot.slane %v14633_v63, 1  ;;  %v2249_v55 = vsel %vm1708_vm13, %v14631_v54, %v14638_v49  ;;  %v10732_v61 = vadd.f32 %v2242_v1, %v2073_v50  ;;  %v10734_v57 = vadd.f32 %v2245_v48, %v2074_v43  ;;  %v7817_v3 = vld [vmem:[#allocation3 + $0x20] sm:$0xf]  ;;  %v8008_v5 = vld [vmem:[#allocation3 + $0x24] sm:$0xf]  ;;  %v14645_v63 = vld [vmem:[#allocation170_spill] sm:$0xff] }
 0x2a7   : >> { %v10724_v42 = vrot.slane %v14635_v37, 1  ;;  %v10736_v15 = vpack.c.bf16 %v973_v56, %v972_v25  ;;  %v2383_v62 = vunpack.c.l.bf16 %v14639_v10  ;;  %v2384_v35 = vunpack.c.h.bf16 %v14639_v10  ;;  %v8009_v43 = vld [vmem:[#allocation3 + $0x24] sm:$0xf0]  ;;  %v7819_v1 = vld [vmem:[#allocation3 + $0x28] sm:$0xf0]  ;;  %v14646_v37 = vld [vmem:[#allocation171_spill] sm:$0xff] }
 0x2a8   : >> { %14634 = vst [vmem:[#allocation80_spill] sm:$0xff] %v10720_v44  ;;  %v2385_v24 = vunpack.c.l.bf16 %v14640_v28  ;;  %v14641_v11 = vunpack.c.l.bf16 %v10633_v30  ;;  %v14643_v54 = vunpack.c.h.bf16 %v10633_v30  ;;  %v2386_v48 = vunpack.c.h.bf16 %v14640_v28  ;;  %v14647_v30 = vld [vmem:[#allocation144_spill] sm:$0xff] }
 0x2a9   : >> { %14636 = vst [vmem:[#allocation68_spill] sm:$0xff] %v10724_v42  ;;  %v10752_v25 = vpack.c.bf16 %v14646_v37, %v14645_v63  ;;  %v7818_v56 = vor.u32 %v8009_v43, %v7817_v3  ;;  %v7822_v31 = vor.u32 %v8008_v5, %v7819_v1  ;;  %v1175_v49 = vshrl.u32 %v10736_v15, 16 }
 0x2aa   : >> { %v10743_v38 = vrot.slane %v14641_v11, 2  ;;  %v10747_v50 = vrot.slane %v14643_v54, 2  ;;  %v10755_v10 = vadd.f32 %v2247_v59, %v2075_v39  ;;  %v14648_v54 = vunpack.c.l.bf16 %v14647_v30  ;;  %v3556_v1 = vld [vmem:[#allocation2 + $0xd0] sm:$0x11] }
 0x2ab   : >> { %v14649_v28 = vunpack.c.h.bf16 %v14647_v30  ;;  %7323 = vmatmul.bf16.gmra.mxu2 %v7818_v56  ;;  %7965 = vmatmul.msk.bf16.gmra.mxu3 %vm7256_vm15, %v7822_v31  ;;  %v2443_v5 = vrot.slane %v2383_v62, 2  ;;  %v10769_v43 = vrot.slane %v2385_v24, 2  ;;  %v2446_v39 = vrot.slane %v2384_v35, 2  ;;  %v10773_v63 = vld [vmem:[#allocation2 + $0xd0] sm:$0x11] }
 0x2ac   : >> { %14642 = vst [vmem:[#allocation106_spill] sm:$0xff] %v10743_v38  ;;  %v10758_v38 = vadd.f32 %v2249_v55, %v2076_v26  ;;  %v3480_v3 = vld [vmem:[#allocation2 + $0xc8] sm:$0xff]  ;;  %v10771_v59 = vrot.slane %v2386_v48, 2  ;;  %v10775_v37 = vrot.slane %v1175_v49, 7  ;;  %v3564_v56 = vunpack.c.h.bf16 %v3556_v1 }
 0x2ad   : >> { %14644 = vst [vmem:[#allocation119_spill] sm:$0xff] %v10747_v50  ;;  %v10762_v50 = vrot.slane %v14648_v54, 2  ;;  %v10766_v42 = vrot.slane %v14649_v28, 2  ;;  %v3495_v26 = vunpack.c.l.bf16 %v3480_v3  ;;  %v3496_v55 = vunpack.c.h.bf16 %v3480_v3 }
 0x2ae   : >> { %v3563_v54 = vunpack.c.l.bf16 %v3556_v1  ;;  %v3978_v31 = vunpack.c.l.bf16 %v10773_v63  ;;  %v3588_v49 = vmul.f32 %v3564_v56, %v8792_v20  ;;  %v3756_v6 = vmul.f32 %v3564_v56, %v8814_v41 }
 0x2af   : >> { %v3511_v24 = vmul.f32 %v3495_v26, %v8772_v12  ;;  %v3512_v35 = vmul.f32 %v3496_v55, %v8776_v13  ;;  %v3585_v48 = vmul.f32 %v3495_v26, %v8790_v19  ;;  %v3586_v28 = vmul.f32 %v3496_v55, %v8792_v20 }
 0x2b0   : >> { %v3587_v3 = vmul.f32 %v3563_v54, %v8790_v19  ;;  %v3753_v30 = vmul.f32 %v3495_v26, %v8810_v47  ;;  %v3754_v1 = vmul.f32 %v3496_v55, %v8814_v41  ;;  %v3755_v62 = vmul.f32 %v3563_v54, %v8810_v47 }
 0x2b1   : >> { %v10788_v11 = vpack.c.bf16 %v3512_v35, %v3511_v24  ;;  %v10790_v44 = vpack.c.bf16 %v3586_v28, %v3585_v48  ;;  %v3979_v8 = vunpack.c.h.bf16 %v10773_v63  ;;  %v10802_v58 = vmul.f32 %v3495_v26, %v14472_v36 }
 0x2b2   : >> { %v3600_v22 = vpack.c.bf16 %v3588_v49, %v3587_v3  ;;  %v10794_v9 = vpack.c.bf16 %v3754_v1, %v3753_v30  ;;  %v3768_v0 = vpack.c.bf16 %v3756_v6, %v3755_v62  ;;  %v10806_v24 = vsel %vm1912_vm14, %v2443_v5, %v10769_v43  ;;  %v4451_v62 = vld [vmem:[#allocation2 + $0xd0] sm:$0x11] }
 0x2b3   : >> { %14650 = vst [vmem:[#allocation96_spill] sm:$0xff] %v10788_v11  ;;  %v10810_v54 = vsel %vm1912_vm14, %v2446_v39, %v10771_v59  ;;  %v10814_v35 = vmul.f32 %v3496_v55, %v14474_v7  ;;  %v10818_v2 = vmul.f32 %v3495_v26, %v8873_v21  ;;  %v10821_v4 = vmul.f32 %v3496_v55, %v14477_v27 }
 0x2b4   : >> { %14651 = vst [vmem:[#allocation120_spill] sm:$0xff] %v10790_v44  ;;  %v3623_v56 = vunpack.c.l.bf16 %v3600_v22  ;;  %v3624_v63 = vunpack.c.h.bf16 %v3600_v22  ;;  %v3998_v5 = vmul.f32 %v3978_v31, %v8873_v21  ;;  %v3791_v39 = vunpack.c.l.bf16 %v3768_v0 }
 0x2b5   : >> { %14652 = vst [vmem:[#allocation97_spill] sm:$0xff] %v10794_v9  ;;  %v3792_v48 = vunpack.c.h.bf16 %v3768_v0  ;;  %v3999_v28 = vmul.f32 %v3979_v8, %v14477_v27  ;;  %v10826_v22 = vmul.f32 %v3495_v26, %v14479_v23  ;;  %v10833_v1 = vmul.f32 %v3496_v55, %v9038_v16 }
 0x2b6   : >> { %14655 = vst [vmem:[#allocation123_spill] sm:$0xff] %v10802_v58  ;;  %v10828_v3 = vrot.slane %v3623_v56, 1  ;;  %v10830_v49 = vrot.slane %v3624_v63, 1  ;;  %v10836_v6 = vmul.f32 %v3978_v31, %v14479_v23  ;;  %v4397_v30 = vmul.f32 %v3495_v26, %v8744_v32  ;;  %v1420_v58 = vld [vmem:[#allocation2 + $0xd8] sm:$0xff] }
 0x2b7   : >> { %14656 = vst [vmem:[#allocation124_spill] sm:$0xff] %v10814_v35  ;;  %v4398_v9 = vmul.f32 %v3496_v55, %v8746_v33  ;;  %v4455_v0 = vunpack.c.l.bf16 %v4451_v62  ;;  %v4456_v44 = vunpack.c.h.bf16 %v4451_v62  ;;  %v4465_v11 = vmul.f32 %v3495_v26, %v8784_v17 }
 0x2b8   : >> { %14657 = vst [vmem:[#allocation101_spill] sm:$0xff] %v10818_v2  ;;  %v4633_v56 = vmul.f32 %v3495_v26, %v8806_v45  ;;  %v4634_v63 = vmul.f32 %v3496_v55, %v8808_v46  ;;  %v14665_v2 = vshll.u32 %v10736_v15, 16  ;;  %v10853_v26 = vrot.slane %v3791_v39, 2 }
 0x2b9   : >> { %14658 = vst [vmem:[#allocation113_spill] sm:$0xff] %v10821_v4  ;;  %v4468_v31 = vmul.f32 %v4456_v44, %v8786_v18  ;;  %v4636_v4 = vmul.f32 %v4456_v44, %v8808_v46  ;;  %v10862_v15 = vmul.f32 %v3979_v8, %v9038_v16 }
 0x2ba   : >> { %14659 = vst [vmem:[#allocation114_spill] sm:$0xff] %v10826_v22  ;;  %v4466_v22 = vmul.f32 %v3496_v55, %v8786_v18  ;;  %v4656_v62 = vpack.c.bf16 %v4634_v63, %v4633_v56  ;;  %v1180_v35 = vor.u32 %v14665_v2, %v10775_v37  ;;  %v10855_v55 = vrot.slane %v3792_v48, 2 }
 0x2bb   : >> { %14660 = vst [vmem:[#allocation131_spill] sm:$0xff] %v10828_v3  ;;  %v4467_v3 = vmul.f32 %v4455_v0, %v8784_v17 }
 0x2bc   : >> { %14661 = vst [vmem:[#allocation132_spill] sm:$0xff] %v10830_v49  ;;  %v10844_v49 = vpack.c.bf16 %v4398_v9, %v4397_v30  ;;  %v10857_v9 = vpack.c.bf16 %v3999_v28, %v3998_v5  ;;  %v4670_v44 = vunpack.c.h.bf16 %v4656_v62  ;;  %v1421_v56 = vsel %vm8724_vm7, %v1180_v35, %v1420_v58 }
 0x2bd   : >> { %14662 = vst [vmem:[#allocation134_spill] sm:$0xff] %v10833_v1  ;;  %v4488_v1 = vpack.c.bf16 %v4466_v22, %v4465_v11  ;;  %v4489_v30 = vpack.c.bf16 %v4468_v31, %v4467_v3  ;;  %v3910_v58 = vunpack.c.l.bf16 %v1421_v56  ;;  %v3911_v8 = vunpack.c.h.bf16 %v1421_v56 }
 0x2be   : >> { %14663 = vst [vmem:[#allocation135_spill] sm:$0xff] %v10836_v6  ;;  %v4635_v6 = vmul.f32 %v4455_v0, %v8806_v45  ;;  %v4669_v0 = vunpack.c.l.bf16 %v4656_v62  ;;  %v10877_v63 = vrot.slane %v4670_v44, 2  ;;  %v2450_v62 = vsel %vm1912_vm14, %v10769_v43, %v10762_v50 }
 0x2bf   : >> { %14664 = vst [vmem:[#allocation150_spill] sm:$0xff] %v10844_v49  ;;  %v4501_v29 = vunpack.c.l.bf16 %v4488_v1  ;;  %v4502_v60 = vunpack.c.h.bf16 %v4488_v1  ;;  %v4503_v11 = vunpack.c.l.bf16 %v4489_v30  ;;  %v4504_v22 = vunpack.c.h.bf16 %v4489_v30 }
 0x2c0   : >> { %14666 = vst [vmem:[#allocation151_spill] sm:$0xff] %v10853_v26  ;;  %v4657_v14 = vpack.c.bf16 %v4636_v4, %v4635_v6  ;;  %v10875_v35 = vrot.slane %v4669_v0, 2  ;;  %v2452_v30 = vsel %vm1912_vm14, %v10771_v59, %v10766_v42  ;;  %v4399_v0 = vmul.f32 %v3910_v58, %v8744_v32 }
 0x2c1   : >> { %14667 = vst [vmem:[#allocation154_spill] sm:$0xff] %v10855_v55  ;;  %v10866_v28 = vrot.slane %v4501_v29, 1  ;;  %v10868_v6 = vrot.slane %v4502_v60, 1  ;;  %v10871_v3 = vrot.slane %v4503_v11, 1  ;;  %v10873_v1 = vrot.slane %v4504_v22, 1 }
 0x2c2   : >> { %14668 = vst [vmem:[#allocation155_spill] sm:$0xff] %v10857_v9  ;;  %v4671_v39 = vunpack.c.l.bf16 %v4657_v14  ;;  %v4672_v48 = vunpack.c.h.bf16 %v4657_v14  ;;  %v2481_v14 = vadd.f32 %v10806_v24, %v10732_v61  ;;  %v2482_v29 = vadd.f32 %v10810_v54, %v10734_v57 }
 0x2c3   : >> { %14669 = vst [vmem:[#allocation160_spill] sm:$0xff] %v10862_v15  ;;  %v4400_v11 = vmul.f32 %v3911_v8, %v8746_v33  ;;  %v4469_v61 = vmul.f32 %v3910_v58, %v8784_v17  ;;  %v4470_v57 = vmul.f32 %v3911_v8, %v8786_v18  ;;  %v4812_v24 = vmul.f32 %v3910_v58, %v8772_v12 }
 0x2c4   : >> { %1422 = vst [vmem:[#allocation2 + $0xd8] sm:$0xff] %v1421_v56  ;;  %v10883_v60 = vrot.slane %v4671_v39, 2  ;;  %v10885_v31 = vrot.slane %v4672_v48, 2  ;;  %v4813_v54 = vmul.f32 %v3911_v8, %v8776_v13  ;;  %v4880_v22 = vmul.f32 %v3910_v58, %v8790_v19 }
 0x2c5   : >> { %14670 = vst [vmem:[#allocation138_spill] sm:$0xff] %v10866_v28  ;;  %v4881_v50 = vmul.f32 %v3911_v8, %v8792_v20  ;;  %v10901_v44 = vpack.c.bf16 %v4400_v11, %v4399_v0  ;;  %v4490_v42 = vpack.c.bf16 %v4470_v57, %v4469_v61  ;;  %v2483_v56 = vadd.f32 %v2450_v62, %v10755_v10 }
 0x2c6   : >> { %14671 = vst [vmem:[#allocation142_spill] sm:$0xff] %v10868_v6  ;;  %v2484_v39 = vadd.f32 %v2452_v30, %v10758_v38  ;;  %v10906_v48 = vmul.f32 %v3910_v58, %v14472_v36  ;;  %v10909_v5 = vmul.f32 %v3911_v8, %v14474_v7  ;;  %v10915_v0 = vmul.f32 %v3911_v8, %v14477_v27  ;;  %v14700_v6 = vld [vmem:[#allocation196_spill] sm:$0xff] }
 0x2c7   : >> { %14672 = vst [vmem:[#allocation156_spill] sm:$0xff] %v10871_v3  ;;  %v4505_v10 = vunpack.c.l.bf16 %v4490_v42  ;;  %v4506_v62 = vunpack.c.h.bf16 %v4490_v42 }
 0x2c8   : >> { %14673 = vst [vmem:[#allocation157_spill] sm:$0xff] %v10873_v1  ;;  %v14685_v1 = vld [vmem:[#allocation190_spill] sm:$0xff] }
 0x2c9   : >> { %14674 = vst [vmem:[#allocation159_spill] sm:$0xff] %v10875_v35 }
 0x2ca   : >> { %14675 = vst [vmem:[#allocation161_spill] sm:$0xff] %v10877_v63 }
 0x2cb   : >> { %14676 = vst [vmem:[#allocation107_spill] sm:$0xff] %v10883_v60  ;;  %v4141_v43 = vld [vmem:[#allocation2 + $0xd8] sm:$0xee] }
 0x2cc   : >> { %14677 = vst [vmem:[#allocation94_spill] sm:$0xff] %v10885_v31  ;;  %v4620_v59 = vld [vmem:[#allocation2 + $0xd8] sm:$0xee]  ;;  %v10912_v31 = vmul.f32 %v3910_v58, %v8873_v21  ;;  %v4148_v11 = vunpack.c.l.bf16 %v4141_v43  ;;  %v4149_v61 = vunpack.c.h.bf16 %v4141_v43  ;;  %v10923_v58 = vpack.c.bf16 %v4881_v50, %v4880_v22 }
 0x2cd   : >> { %14678 = vst [vmem:[#allocation108_spill] sm:$0xff] %v10901_v44  ;;  %v4625_v2 = vunpack.c.l.bf16 %v4620_v59  ;;  %v4626_v4 = vunpack.c.h.bf16 %v4620_v59  ;;  %v5036_v57 = vld [vmem:[#allocation2 + $0xd8] sm:$0xee]  ;;  %v10921_v59 = vpack.c.bf16 %v4813_v54, %v4812_v24  ;;  %v14688_v24 = vunpack.c.h.bf16 %v10752_v25 }
 0x2ce   : >> { %14679 = vst [vmem:[#allocation95_spill] sm:$0xff] %v10906_v48  ;;  %v5040_v8 = vunpack.c.l.bf16 %v5036_v57  ;;  %v5041_v49 = vunpack.c.h.bf16 %v5036_v57  ;;  %v14684_v43 = vld [vmem:[#allocation189_spill] sm:$0xff]  ;;  %v10930_v42 = vmul.f32 %v4148_v11, %v14479_v23  ;;  %v10938_v22 = vmul.f32 %v4149_v61, %v9038_v16 }
 0x2cf   : >> { %14680 = vst [vmem:[#allocation109_spill] sm:$0xff] %v10909_v5  ;;  %v4637_v38 = vmul.f32 %v4625_v2, %v8806_v45  ;;  %v4638_v30 = vmul.f32 %v4626_v4, %v8808_v46  ;;  %v2545_v3 = vpack.c.bf16 %v14685_v1, %v14684_v43  ;;  %v4916_v2 = vunpack.c.l.bf16 %v10923_v58  ;;  %v14694_v11 = vld [vmem:[#allocation197_spill] sm:$0xff] }
 0x2d0   : >> { %14681 = vst [vmem:[#allocation110_spill] sm:$0xff] %v10912_v31  ;;  %v14687_v4 = vunpack.c.l.bf16 %v10752_v25  ;;  %v2575_v54 = vadd.f32 %v14688_v24, %v2482_v29  ;;  %v10940_v50 = vrot.slane %v4505_v10, 1  ;;  %v10942_v57 = vrot.slane %v4506_v62, 1 }
 0x2d1   : >> { %14682 = vst [vmem:[#allocation61_spill] sm:$0xff] %v10915_v0  ;;  %v10925_v35 = vpack.c.bf16 %v4638_v30, %v4637_v38  ;;  %v2560_v30 = vunpack.c.l.bf16 %v2545_v3  ;;  %v2561_v43 = vunpack.c.h.bf16 %v2545_v3  ;;  %v10947_v63 = vrot.slane %v4916_v2, 1 }
 0x2d2   : >> { %14683 = vst [vmem:[#allocation105_spill] sm:$0xff] %v10921_v59  ;;  %v2574_v60 = vadd.f32 %v14687_v4, %v2481_v14  ;;  %v10950_v25 = vmul.f32 %v5040_v8, %v8810_v47  ;;  %v10953_v14 = vmul.f32 %v5041_v49, %v8814_v41  ;;  %v2681_v29 = vunpack.c.l.bf16 %v10799_v53  ;;  %v14693_v4 = vld [vmem:[#allocation194_spill] sm:$0xff]  ;;  %v14696_v49 = vld [vmem:[#allocation179_spill] sm:$0xff]  ;;  %v14698_v59 = vld [vmem:[#allocation192_spill] sm:$0xff] }
 0x2d3   : >> { %14686 = vst [vmem:[#allocation111_spill] sm:$0xff] %v10930_v42  ;;  %v2576_v61 = vadd.f32 %v2560_v30, %v2483_v56  ;;  %v2577_v10 = vadd.f32 %v2561_v43, %v2484_v39  ;;  %v2682_v62 = vunpack.c.h.bf16 %v10799_v53  ;;  %v2683_v24 = vunpack.c.l.bf16 %v14693_v4  ;;  %v14699_v43 = vld [vmem:[#allocation195_spill] sm:$0xff] }
 0x2d4   : >> { %14689 = vst [vmem:[#allocation100_spill] sm:$0xff] %v10938_v22  ;;  %v2684_v38 = vunpack.c.h.bf16 %v14693_v4  ;;  %v2685_v3 = vunpack.c.l.bf16 %v14694_v11  ;;  %v2686_v2 = vunpack.c.h.bf16 %v14694_v11  ;;  %v2741_v1 = vrot.slane %v2681_v29, 1 }
 0x2d5   : >> { %14690 = vst [vmem:[#allocation112_spill] sm:$0xff] %v10940_v50  ;;  %v2742_v8 = vrot.slane %v2683_v24, 1  ;;  %v2744_v44 = vrot.slane %v2682_v62, 1  ;;  %v2865_v28 = vpack.c.bf16 %v14700_v6, %v14699_v43 }
 0x2d6   : >> { %14691 = vst [vmem:[#allocation104_spill] sm:$0xff] %v10942_v57  ;;  %v14695_v57 = vld [vmem:[#allocation178_spill] sm:$0xff]  ;;  %v2745_v39 = vrot.slane %v2684_v38, 1  ;;  %v2747_v30 = vrot.slane %v2685_v3, 1  ;;  %v2749_v53 = vrot.slane %v2686_v2, 1 }
 0x2d7   : >> { %14692 = vst [vmem:[#allocation115_spill] sm:$0xff] %v10947_v63  ;;  %v2863_v50 = vpack.c.bf16 %v14696_v49, %v14695_v57  ;;  %v14697_v63 = vld [vmem:[#allocation191_spill] sm:$0xff]  ;;  %v2743_v4 = vsel %vm1708_vm13, %v2741_v1, %v2742_v8  ;;  %v749_v49 = vpop.f32.mrf.mxu0  ;;  %v2888_v55 = vunpack.c.l.bf16 %v2865_v28  ;;  %v2889_v6 = vunpack.c.h.bf16 %v2865_v28 }
 0x2d8   : >> { %v2864_v56 = vpack.c.bf16 %v14698_v59, %v14697_v63  ;;  %v2746_v29 = vsel %vm1708_vm13, %v2744_v44, %v2745_v39  ;;  %v2748_v62 = vsel %vm1708_vm13, %v2742_v8, %v2747_v30  ;;  %v2750_v57 = vsel %vm1708_vm13, %v2745_v39, %v2749_v53  ;;  %v838_v63 = vpop.f32.mrf.mxu1  ;;  %v14701_v30 = vld [vmem:[#allocation162_spill] sm:$0xff]  ;;  %v14702_v53 = vld [vmem:[#allocation143_spill] sm:$0xff] }
 0x2d9   : >> { %v2884_v22 = vunpack.c.l.bf16 %v2863_v50  ;;  %v2885_v42 = vunpack.c.h.bf16 %v2863_v50  ;;  %v2779_v24 = vadd.f32 %v2743_v4, %v2574_v60  ;;  %v2780_v59 = vadd.f32 %v2746_v29, %v2575_v54  ;;  %v14704_v29 = vld [vmem:[#allocation145_spill] sm:$0xff] }
 0x2da   : >> { %v2886_v11 = vunpack.c.l.bf16 %v2864_v56  ;;  %v2781_v38 = vadd.f32 %v2748_v62, %v2576_v61  ;;  %v2782_v3 = vadd.f32 %v2750_v57, %v2577_v10  ;;  %v2887_v2 = vunpack.c.h.bf16 %v2864_v56 }
 0x2db   : >> { %v2944_v43 = vrot.slane %v2884_v22, 2  ;;  %v2947_v26 = vrot.slane %v2885_v42, 2  ;;  %v750_v0 = vadd.f32 %v749_v49, %v8699_v51  ;;  %v839_v44 = vadd.f32 %v838_v63, %v8701_v52 }
 0x2dc   : >> { %v2945_v1 = vrot.slane %v2886_v11, 2  ;;  %v2948_v50 = vrot.slane %v2887_v2, 2  ;;  %v2950_v39 = vrot.slane %v2888_v55, 2  ;;  %v2952_v60 = vrot.slane %v2889_v6, 2  ;;  %v14703_v11 = vld [vmem:[#allocation163_spill] sm:$0xff]  ;;  %v14705_v2 = vld [vmem:[#allocation20_spill] sm:$0xff] }
 0x2dd   : >> { %v3234_v54 = vsel %vm1708_vm13, %v14702_v53, %v14701_v30  ;;  %v910_v28 = vmax.f32 %v750_v0, 0.0  ;;  %v911_v22 = vmax.f32 %v839_v44, 0.0  ;;  %v3237_v62 = vsel %vm1708_vm13, %v14704_v29, %v14703_v11 }
 0x2de   : >> { %v2946_v8 = vsel %vm1912_vm14, %v2944_v43, %v2945_v1  ;;  %v2949_v61 = vsel %vm1912_vm14, %v2947_v26, %v2948_v50  ;;  %v2951_v42 = vsel %vm1912_vm14, %v2945_v1, %v2950_v39  ;;  %v2953_v56 = vsel %vm1912_vm14, %v2948_v50, %v2952_v60  ;;  %v14707_v43 = vld [vmem:[#allocation165_spill] sm:$0xff] }
 0x2df   : >> { %v2982_v10 = vadd.f32 %v2946_v8, %v2779_v24  ;;  %v2983_v4 = vadd.f32 %v2949_v61, %v2780_v59  ;;  %v2984_v55 = vadd.f32 %v2951_v42, %v2781_v38  ;;  %v2985_v57 = vadd.f32 %v2953_v56, %v2782_v3  ;;  %v14706_v24 = vld [vmem:[#allocation164_spill] sm:$0xff]  ;;  %v14708_v3 = vld [vmem:[#allocation133_spill] sm:$0xff] }
 0x2e0   : >> { %v974_v63 = vmin.f32 %v910_v28, 6.0  ;;  %v975_v26 = vmin.f32 %v911_v22, 6.0  ;;  %v3239_v0 = vsel %vm1708_vm13, %v14701_v30, %v14706_v24  ;;  %v3241_v59 = vsel %vm1708_vm13, %v14703_v11, %v14707_v43  ;;  %v14715_v24 = vld [vmem:[#allocation146_spill] sm:$0xff] }
 0x2e1   : >> { %v3003_v49 = vadd.f32 %v9956_v40, %v2982_v10  ;;  %v3004_v6 = vadd.f32 %v14705_v2, %v2983_v4  ;;  %v3005_v1 = vadd.f32 %v9956_v40, %v2984_v55  ;;  %v3006_v50 = vadd.f32 %v14705_v2, %v2985_v57  ;;  %v14711_v10 = vld [vmem:[#allocation158_spill] sm:$0xff] }
 0x2e2   : >> { %v14709_v44 = vunpack.c.l.bf16 %v14708_v3  ;;  %v1021_v60 = vpack.c.bf16 %v975_v26, %v974_v63  ;;  %v14710_v53 = vunpack.c.h.bf16 %v14708_v3  ;;  %v14712_v28 = vunpack.c.l.bf16 %v14711_v10  ;;  %v14716_v26 = vld [vmem:[#allocation167_spill] sm:$0xff] }
 0x2e3   : >> { %v3019_v38 = vmax.f32 %v3003_v49, 0.0  ;;  %v3020_v39 = vmax.f32 %v3004_v6, 0.0  ;;  %v3021_v22 = vmax.f32 %v3005_v1, 0.0  ;;  %v3022_v42 = vmax.f32 %v3006_v50, 0.0  ;;  %v14714_v49 = vld [vmem:[#allocation166_spill] sm:$0xff] }
 0x2e4   : >> { %v3288_v8 = vadd.f32 %v3234_v54, %v14709_v44  ;;  %v3289_v61 = vadd.f32 %v3237_v62, %v14710_v53  ;;  %v3290_v30 = vadd.f32 %v3239_v0, %v14712_v28  ;;  %v14713_v4 = vunpack.c.h.bf16 %v14711_v10  ;;  %v14717_v62 = vld [vmem:[#allocation147_spill] sm:$0xff]  ;;  %v14718_v0 = vld [vmem:[#allocation168_spill] sm:$0xff] }
 0x2e5   : >> { %v3035_v56 = vmin.f32 %v3019_v38, 6.0  ;;  %v3036_v29 = vmin.f32 %v3020_v39, 6.0  ;;  %v1183_v55 = vshrl.u32 %v1021_v60, 16  ;;  %v1186_v57 = vshll.u32 %v1021_v60, 16  ;;  %v1424_v60 = vld [vmem:[#allocation2 + $0xe8] sm:$0x11] }
 0x2e6   : >> { %v3291_v11 = vadd.f32 %v3241_v59, %v14713_v4  ;;  %v3402_v54 = vsel %vm1912_vm14, %v14715_v24, %v14714_v49  ;;  %v3037_v63 = vmin.f32 %v3021_v22, 6.0  ;;  %v3038_v6 = vmin.f32 %v3022_v42, 6.0  ;;  %v14719_v59 = vld [vmem:[#allocation169_spill] sm:$0xff]  ;;  %v14721_v24 = vld [vmem:[#allocation175_spill] sm:$0xff] }
 0x2e7   : >> { %v3405_v43 = vsel %vm1912_vm14, %v14717_v62, %v14716_v26  ;;  %v3407_v1 = vsel %vm1912_vm14, %v14714_v49, %v14718_v0  ;;  %v3045_v50 = vpack.c.bf16 %v3036_v29, %v3035_v56  ;;  %v1185_v38 = vrot.slane %v1183_v55, 7  ;;  %v752_v29 = vpop.f32.mrf.mxu0  ;;  %v841_v55 = vpop.f32.mrf.mxu1 }
 0x2e8   : >> { %v3409_v3 = vsel %vm1912_vm14, %v14716_v26, %v14719_v59  ;;  %v3456_v44 = vadd.f32 %v3402_v54, %v3288_v8  ;;  %v3046_v39 = vpack.c.bf16 %v3038_v6, %v3037_v63  ;;  %v3457_v53 = vadd.f32 %v3405_v43, %v3289_v61  ;;  %v14722_v8 = vld [vmem:[#allocation198_spill] sm:$0xff] }
 0x2e9   : >> { %v3458_v10 = vadd.f32 %v3407_v1, %v3290_v30  ;;  %v3459_v28 = vadd.f32 %v3409_v3, %v3291_v11  ;;  %3053 = vst.msk [vmem:[#allocation3 + $0x30] sm:$0xff] %vm8519_vm2, %v3045_v50  ;;  %v1188_v42 = vor.u32 %v1186_v57, %v1185_v38  ;;  %v1190_v4 = vrot.slane %v1185_v38, 4  ;;  %v14723_v30 = vld [vmem:[#allocation205_spill] sm:$0xff] }
 0x2ea   : >> { %v3521_v62 = vunpack.c.l.bf16 %v14721_v24  ;;  %v3522_v56 = vunpack.c.h.bf16 %v14721_v24  ;;  %3054 = vst.msk [vmem:[#allocation3 + $0x38] sm:$0xff] %vm8519_vm2, %v3046_v39  ;;  %v3523_v49 = vunpack.c.l.bf16 %v14722_v8  ;;  %v3524_v61 = vunpack.c.h.bf16 %v14722_v8 }
 0x2eb   : >> { %v14724_v11 = vunpack.c.l.bf16 %v14723_v30  ;;  %v14725_v63 = vunpack.c.h.bf16 %v14723_v30  ;;  %v14726_v6 = vrot.slane %v10775_v37, 4  ;;  %v1425_v1 = vsel %vm8542_vm10, %v1190_v4, %v1424_v60  ;;  %v14729_v30 = vld [vmem:[#allocation180_spill] sm:$0xff] }
 0x2ec   : >> { %v753_v50 = vadd.f32 %v752_v29, %v8699_v51  ;;  %v842_v38 = vadd.f32 %v841_v55, %v8701_v52  ;;  %v3537_v59 = vadd.f32 %v3521_v62, %v3456_v44  ;;  %v3538_v3 = vadd.f32 %v3522_v56, %v3457_v53  ;;  %1426 = vst [vmem:[#allocation2 + $0xe8] sm:$0x11] %v1425_v1  ;;  %v14733_v55 = vld [vmem:[#allocation211_spill] sm:$0xff] }
 0x2ed   : >> { %v3650_v54 = vrot.slane %v14724_v11, 1  ;;  %v3653_v57 = vrot.slane %v14725_v63, 1  ;;  %v1189_v43 = vsel %vm8765_vm9, %v14726_v6, %v1188_v42  ;;  %v3539_v39 = vadd.f32 %v3523_v49, %v3458_v10  ;;  %v14730_v11 = vld [vmem:[#allocation181_spill] sm:$0xff]  ;;  %v14736_v49 = vld [vmem:[#allocation212_spill] sm:$0xff] }
 0x2ee   : >> { %1423 = vst.msk [vmem:[#allocation2 + $0xe0] sm:$0xff] %vm8519_vm2, %v1189_v43  ;;  %v3540_v24 = vadd.f32 %v3524_v61, %v3459_v28  ;;  %v912_v8 = vmax.f32 %v753_v50, 0.0  ;;  %v913_v37 = vmax.f32 %v842_v38, 0.0  ;;  %v14731_v4 = vunpack.c.h.bf16 %v10923_v58 }
 0x2ef   : >> { %v3651_v42 = vsel %vm1708_vm13, %v14729_v30, %v3650_v54  ;;  %v3654_v60 = vsel %vm1708_vm13, %v14730_v11, %v3653_v57  ;;  %v3656_v63 = vsel %vm1708_vm13, %v3650_v54, %v14733_v55  ;;  %v14734_v10 = vunpack.c.l.bf16 %v10925_v35  ;;  %v14739_v54 = vld [vmem:[#allocation182_spill] sm:$0xff] }
 0x2f0   : >> { %v11041_v29 = vrot.slane %v14731_v4, 1  ;;  %v11045_v44 = vadd.f32 %v3651_v42, %v3537_v59  ;;  %v11047_v53 = vadd.f32 %v3654_v60, %v3538_v3  ;;  %v976_v62 = vmin.f32 %v912_v8, 6.0  ;;  %v7825_v43 = vld [vmem:[#allocation3 + $0x30] sm:$0xf]  ;;  %v8010_v1 = vld [vmem:[#allocation3 + $0x34] sm:$0xf] }
 0x2f1   : >> { %v11051_v28 = vrot.slane %v14734_v10, 2  ;;  %v977_v56 = vmin.f32 %v913_v37, 6.0  ;;  %v3658_v61 = vsel %vm1708_vm13, %v3653_v57, %v14736_v49  ;;  %v14737_v58 = vunpack.c.h.bf16 %v10925_v35  ;;  %v14740_v59 = vld [vmem:[#allocation206_spill] sm:$0xff]  ;;  %v8011_v8 = vld [vmem:[#allocation3 + $0x34] sm:$0xf0] }
 0x2f2   : >> { %14732 = vst [vmem:[#allocation116_spill] sm:$0xff] %v11041_v29  ;;  %v3769_v50 = vunpack.c.l.bf16 %v14739_v54  ;;  %v3770_v38 = vunpack.c.h.bf16 %v14739_v54  ;;  %v3771_v3 = vunpack.c.l.bf16 %v14740_v59  ;;  %v11064_v30 = vpack.c.bf16 %v10953_v14, %v10950_v25  ;;  %v7827_v37 = vld [vmem:[#allocation3 + $0x38] sm:$0xf0] }
 0x2f3   : >> { %14735 = vst [vmem:[#allocation130_spill] sm:$0xff] %v11051_v28  ;;  %v11057_v6 = vrot.slane %v14737_v58, 2  ;;  %v11066_v42 = vpack.c.bf16 %v977_v56, %v976_v62  ;;  %v11068_v57 = vadd.f32 %v3656_v63, %v3539_v39  ;;  %v3772_v35 = vunpack.c.h.bf16 %v14740_v59  ;;  %v14742_v54 = vld [vmem:[#allocation187_spill] sm:$0xff]  ;;  %v14743_v25 = vld [vmem:[#allocation188_spill] sm:$0xff]  ;;  %v14745_v62 = vld [vmem:[#allocation85_spill] sm:$0xff] }
 0x2f4   : >> { %14741 = vst [vmem:[#allocation148_spill] sm:$0xff] %v11064_v30  ;;  %v7826_v11 = vor.u32 %v8011_v8, %v7825_v43  ;;  %v7830_v60 = vor.u32 %v8010_v1, %v7827_v37  ;;  %v11071_v4 = vadd.f32 %v3658_v61, %v3540_v24  ;;  %v3818_v55 = vrot.slane %v3771_v3, 2  ;;  %v3973_v24 = vld [vmem:[#allocation2 + $0xe8] sm:$0x11] }
 0x2f5   : >> { %14738 = vst [vmem:[#allocation139_spill] sm:$0xff] %v11057_v6  ;;  %v3897_v10 = vld [vmem:[#allocation2 + $0xe0] sm:$0xff]  ;;  %v3817_v58 = vrot.slane %v3769_v50, 2  ;;  %v11076_v14 = vpack.c.bf16 %v14743_v25, %v14742_v54  ;;  %v4452_v61 = vld [vmem:[#allocation2 + $0xe8] sm:$0x11]  ;;  %v11086_v1 = vrot.slane %v3770_v38, 2  ;;  %v3980_v50 = vunpack.c.l.bf16 %v3973_v24 }
 0x2f6   : >> { %v14744_v6 = vld [vmem:[#allocation54_spill] sm:$0xff]  ;;  %7328 = vmatmul.bf16.gmra.mxu2 %v7826_v11  ;;  %7966 = vmatmul.msk.bf16.gmra.mxu3 %vm7256_vm15, %v7830_v60  ;;  %v3912_v39 = vunpack.c.l.bf16 %v3897_v10  ;;  %v11083_v63 = vunpack.c.h.bf16 %v3897_v10  ;;  %v3981_v59 = vunpack.c.h.bf16 %v3973_v24  ;;  %v4457_v3 = vunpack.c.l.bf16 %v4452_v61  ;;  %v14747_v60 = vld [vmem:[#allocation213_spill] sm:$0xff] }
 0x2f7   : >> { %v11080_v56 = vpack.c.bf16 %v14745_v62, %v14744_v6  ;;  %v11088_v8 = vrot.slane %v3772_v35, 2  ;;  %v4458_v37 = vunpack.c.h.bf16 %v4452_v61  ;;  %v11094_v11 = vsel %vm1912_vm14, %v3817_v58, %v3818_v55 }
 0x2f8   : >> { %v11091_v6 = vmul.f32 %v3912_v39, %v14472_v36  ;;  %v11098_v10 = vsel %vm1912_vm14, %v3818_v55, %v14747_v60  ;;  %v11102_v38 = vmul.f32 %v11083_v63, %v14474_v7  ;;  %v11105_v54 = vmul.f32 %v3912_v39, %v8873_v21 }
 0x2f9   : >> { %v11109_v35 = vmul.f32 %v11083_v63, %v14477_v27  ;;  %v4004_v25 = vmul.f32 %v3980_v50, %v8873_v21  ;;  %v4005_v58 = vmul.f32 %v3981_v59, %v14477_v27  ;;  %v11114_v62 = vmul.f32 %v3912_v39, %v14479_v23 }
 0x2fa   : >> { %14746 = vst [vmem:[#allocation136_spill] sm:$0xff] %v11091_v6  ;;  %v4401_v55 = vmul.f32 %v3912_v39, %v8744_v32  ;;  %v4402_v24 = vmul.f32 %v11083_v63, %v8746_v33  ;;  %v11121_v61 = vmul.f32 %v11083_v63, %v9038_v16  ;;  %v4471_v60 = vmul.f32 %v3912_v39, %v8784_v17 }
 0x2fb   : >> { %14748 = vst [vmem:[#allocation149_spill] sm:$0xff] %v11102_v38  ;;  %v4472_v43 = vmul.f32 %v11083_v63, %v8786_v18  ;;  %v4473_v49 = vmul.f32 %v4457_v3, %v8784_v17  ;;  %v4474_v30 = vmul.f32 %v4458_v37, %v8786_v18  ;;  %v4639_v29 = vmul.f32 %v3912_v39, %v8806_v45 }
 0x2fc   : >> { %14749 = vst [vmem:[#allocation137_spill] sm:$0xff] %v11105_v54  ;;  %v11127_v28 = vpack.c.bf16 %v4402_v24, %v4401_v55  ;;  %v4641_v54 = vmul.f32 %v4457_v3, %v8806_v45  ;;  %v4642_v38 = vmul.f32 %v4458_v37, %v8808_v46  ;;  %v11139_v6 = vmul.f32 %v3981_v59, %v9038_v16 }
 0x2fd   : >> { %14750 = vst [vmem:[#allocation152_spill] sm:$0xff] %v11109_v35  ;;  %v11134_v35 = vmul.f32 %v3980_v50, %v14479_v23  ;;  %v4492_v55 = vpack.c.bf16 %v4474_v30, %v4473_v49  ;;  %v4814_v31 = vmul.f32 %v3912_v39, %v8772_v12  ;;  %v4815_v9 = vmul.f32 %v11083_v63, %v8776_v13 }
 0x2fe   : >> { %14751 = vst [vmem:[#allocation153_spill] sm:$0xff] %v11114_v62  ;;  %v4640_v62 = vmul.f32 %v11083_v63, %v8808_v46  ;;  %v4660_v15 = vpack.c.bf16 %v4642_v38, %v4641_v54  ;;  %v11144_v50 = vpack.c.bf16 %v4005_v58, %v4004_v25  ;;  %v4882_v37 = vmul.f32 %v3912_v39, %v8790_v19 }
 0x2ff   : >> { %14752 = vst [vmem:[#allocation141_spill] sm:$0xff] %v11121_v61  ;;  %v4491_v61 = vpack.c.bf16 %v4472_v43, %v4471_v60  ;;  %v4509_v43 = vunpack.c.l.bf16 %v4492_v55  ;;  %v4510_v60 = vunpack.c.h.bf16 %v4492_v55  ;;  %v11158_v58 = vpack.c.bf16 %v4815_v9, %v4814_v31 }
 0x300   : >> { %14753 = vst [vmem:[#allocation140_spill] sm:$0xff] %v11127_v28  ;;  %v4659_v24 = vpack.c.bf16 %v4640_v62, %v4639_v29  ;;  %v4677_v38 = vunpack.c.l.bf16 %v4660_v15  ;;  %v4678_v54 = vunpack.c.h.bf16 %v4660_v15  ;;  %v5051_v15 = vmul.f32 %v11083_v63, %v8814_v41 }
 0x301   : >> { %14754 = vst [vmem:[#allocation170_spill] sm:$0xff] %v11134_v35  ;;  %v4507_v5 = vunpack.c.l.bf16 %v4491_v61  ;;  %v4508_v48 = vunpack.c.h.bf16 %v4491_v61  ;;  %v4868_v35 = vld [vmem:[#allocation2 + $0xe8] sm:$0x11]  ;;  %v11152_v62 = vrot.slane %v4509_v43, 1  ;;  %v11154_v61 = vrot.slane %v4510_v60, 1 }
 0x302   : >> { %14755 = vst [vmem:[#allocation171_spill] sm:$0xff] %v11139_v6  ;;  %v4675_v3 = vunpack.c.l.bf16 %v4659_v24  ;;  %v4676_v29 = vunpack.c.h.bf16 %v4659_v24  ;;  %v4872_v55 = vunpack.c.l.bf16 %v4868_v35  ;;  %v4873_v6 = vunpack.c.h.bf16 %v4868_v35 }
 0x303   : >> { %14756 = vst [vmem:[#allocation144_spill] sm:$0xff] %v11144_v50  ;;  %v11148_v30 = vrot.slane %v4507_v5, 1  ;;  %v11150_v49 = vrot.slane %v4508_v48, 1  ;;  %v4883_v5 = vmul.f32 %v11083_v63, %v8792_v20  ;;  %v5050_v48 = vmul.f32 %v3912_v39, %v8810_v47  ;;  %v1427_v39 = vld [vmem:[#allocation2 + $0xf0] sm:$0xff] }
 0x304   : >> { %14759 = vst [vmem:[#allocation189_spill] sm:$0xff] %v11152_v62  ;;  %v11156_v25 = vrot.slane %v4675_v3, 2  ;;  %v4884_v24 = vmul.f32 %v4872_v55, %v8790_v19  ;;  %v5052_v43 = vmul.f32 %v4872_v55, %v8810_v47  ;;  %v14763_v60 = vshrl.u32 %v11066_v42, 16 }
 0x305   : >> { %14757 = vst [vmem:[#allocation173_spill] sm:$0xff] %v11148_v30  ;;  %v11172_v31 = vrot.slane %v4676_v29, 2  ;;  %v4885_v35 = vmul.f32 %v4873_v6, %v8792_v20  ;;  %v11175_v3 = vpack.c.bf16 %v4883_v5, %v4882_v37  ;;  %v5053_v59 = vmul.f32 %v4873_v6, %v8814_v41 }
 0x306   : >> { %14758 = vst [vmem:[#allocation174_spill] sm:$0xff] %v11150_v49  ;;  %v11170_v9 = vrot.slane %v14763_v60, 7  ;;  %v11180_v28 = vrot.slane %v4678_v54, 2  ;;  %v11182_v63 = vpack.c.bf16 %v5051_v15, %v5050_v48  ;;  %v14769_v55 = vshll.u32 %v11066_v42, 16 }
 0x307   : >> { %14760 = vst [vmem:[#allocation190_spill] sm:$0xff] %v11154_v61  ;;  %v4906_v61 = vpack.c.bf16 %v4885_v35, %v4884_v24  ;;  %v5074_v29 = vpack.c.bf16 %v5053_v59, %v5052_v43  ;;  %v3822_v37 = vsel %vm1912_vm14, %v11086_v1, %v11088_v8  ;;  %v11200_v42 = vadd.f32 %v11098_v10, %v11068_v57  ;;  %v14770_v24 = vld [vmem:[#allocation214_spill] sm:$0xff] }
 0x308   : >> { %14761 = vst [vmem:[#allocation194_spill] sm:$0xff] %v11156_v25  ;;  %v11178_v25 = vrot.slane %v4677_v38, 2  ;;  %v1197_v60 = vor.u32 %v14769_v55, %v11170_v9  ;;  %v3873_v38 = vadd.f32 %v11094_v11, %v11045_v44  ;;  %v11196_v54 = vadd.f32 %v3822_v37, %v11047_v53 }
 0x309   : >> { %14762 = vst [vmem:[#allocation197_spill] sm:$0xff] %v11158_v58  ;;  %v4920_v5 = vunpack.c.l.bf16 %v4906_v61  ;;  %v4921_v48 = vunpack.c.h.bf16 %v4906_v61  ;;  %v3826_v1 = vsel %vm1912_vm14, %v11088_v8, %v14770_v24  ;;  %v5088_v15 = vunpack.c.l.bf16 %v5074_v29 }
 0x30a   : >> { %14764 = vst [vmem:[#allocation178_spill] sm:$0xff] %v11172_v31  ;;  %v1428_v6 = vsel %vm8724_vm7, %v1197_v60, %v1427_v39  ;;  %v3876_v44 = vadd.f32 %v3826_v1, %v11071_v4  ;;  %v5089_v57 = vunpack.c.h.bf16 %v5074_v29  ;;  %v3938_v10 = vunpack.c.l.bf16 %v11076_v14 }
 0x30b   : >> { %14765 = vst [vmem:[#allocation179_spill] sm:$0xff] %v11175_v3  ;;  %v4387_v43 = vunpack.c.l.bf16 %v1428_v6  ;;  %v4388_v35 = vunpack.c.h.bf16 %v1428_v6  ;;  %v11208_v11 = vrot.slane %v4920_v5, 1  ;;  %v11219_v5 = vrot.slane %v4921_v48, 1 }
 0x30c   : >> { %14766 = vst [vmem:[#allocation191_spill] sm:$0xff] %v11178_v25  ;;  %v11221_v29 = vrot.slane %v5088_v15, 2  ;;  %v11225_v53 = vrot.slane %v5089_v57, 2 }
 0x30d   : >> { %14767 = vst [vmem:[#allocation192_spill] sm:$0xff] %v11180_v28  ;;  %v4403_v39 = vmul.f32 %v4387_v43, %v8744_v32  ;;  %v4404_v61 = vmul.f32 %v4388_v35, %v8746_v33  ;;  %v4475_v55 = vmul.f32 %v4387_v43, %v8784_v17  ;;  %v4476_v8 = vmul.f32 %v4388_v35, %v8786_v18 }
 0x30e   : >> { %14768 = vst [vmem:[#allocation195_spill] sm:$0xff] %v11182_v63  ;;  %v4816_v60 = vmul.f32 %v4387_v43, %v8772_v12  ;;  %v4817_v37 = vmul.f32 %v4388_v35, %v8776_v13  ;;  %v4886_v4 = vmul.f32 %v4387_v43, %v8790_v19  ;;  %v11230_v28 = vmul.f32 %v4387_v43, %v14472_v36 }
 0x30f   : >> { %1429 = vst [vmem:[#allocation2 + $0xf0] sm:$0xff] %v1428_v6  ;;  %v4887_v6 = vmul.f32 %v4388_v35, %v8792_v20  ;;  %v11223_v24 = vpack.c.bf16 %v4404_v61, %v4403_v39  ;;  %v4493_v1 = vpack.c.bf16 %v4476_v8, %v4475_v55  ;;  %v11233_v48 = vmul.f32 %v4388_v35, %v14474_v7 }
 0x310   : >> { %14771 = vst [vmem:[#allocation196_spill] sm:$0xff] %v11208_v11  ;;  %v11227_v59 = vpack.c.bf16 %v4817_v37, %v4816_v60  ;;  %v11236_v15 = vmul.f32 %v4387_v43, %v8873_v21  ;;  %v11240_v55 = vmul.f32 %v4388_v35, %v14477_v27  ;;  %v14799_v11 = vld [vmem:[#allocation176_spill] sm:$0xff] }
 0x311   : >> { %14772 = vst [vmem:[#allocation162_spill] sm:$0xff] %v11219_v5  ;;  %v4907_v31 = vpack.c.bf16 %v4887_v6, %v4886_v4  ;;  %v4511_v25 = vunpack.c.l.bf16 %v4493_v1  ;;  %v4512_v62 = vunpack.c.h.bf16 %v4493_v1 }
 0x312   : >> { %14773 = vst [vmem:[#allocation143_spill] sm:$0xff] %v11221_v29 }
 0x313   : >> { %14774 = vst [vmem:[#allocation163_spill] sm:$0xff] %v11223_v24  ;;  %v4922_v60 = vunpack.c.l.bf16 %v4907_v31  ;;  %v4923_v37 = vunpack.c.h.bf16 %v4907_v31  ;;  %v11249_v39 = vrot.slane %v4512_v62, 1  ;;  %v3940_v31 = vunpack.c.l.bf16 %v11080_v56  ;;  %v14787_v24 = vld [vmem:[#allocation215_spill] sm:$0xff] }
 0x314   : >> { %14775 = vst [vmem:[#allocation145_spill] sm:$0xff] %v11225_v53 }
 0x315   : >> { %14776 = vst [vmem:[#allocation164_spill] sm:$0xff] %v11227_v59  ;;  %v11245_v59 = vrot.slane %v4511_v25, 1  ;;  %v3941_v25 = vunpack.c.h.bf16 %v11080_v56  ;;  %v11259_v1 = vrot.slane %v4922_v60, 1  ;;  %v14788_v56 = vld [vmem:[#allocation218_spill] sm:$0xff] }
 0x316   : >> { %14777 = vst [vmem:[#allocation165_spill] sm:$0xff] %v11230_v28  ;;  %v4621_v49 = vld [vmem:[#allocation2 + $0xf0] sm:$0xee]  ;;  %v4006_v60 = vpack.c.bf16 %v14788_v56, %v14787_v24  ;;  %v14794_v24 = vld [vmem:[#allocation63_spill] sm:$0xff]  ;;  %v14795_v56 = vld [vmem:[#allocation90_spill] sm:$0xff] }
 0x317   : >> { %v5037_v30 = vld [vmem:[#allocation2 + $0xf0] sm:$0xee]  ;;  %14778 = vst [vmem:[#allocation133_spill] sm:$0xff] %v11233_v48  ;;  %v4627_v57 = vunpack.c.l.bf16 %v4621_v49  ;;  %v4628_v61 = vunpack.c.h.bf16 %v4621_v49 }
 0x318   : >> { %14779 = vst [vmem:[#allocation158_spill] sm:$0xff] %v11236_v15  ;;  %v11242_v8 = vld [vmem:[#allocation2 + $0xf0] sm:$0xee]  ;;  %v5042_v4 = vunpack.c.l.bf16 %v5037_v30  ;;  %v5043_v6 = vunpack.c.h.bf16 %v5037_v30  ;;  %v3939_v30 = vunpack.c.h.bf16 %v11076_v14  ;;  %v4175_v15 = vpack.c.bf16 %v14795_v56, %v14794_v24  ;;  %v843_v24 = vpop.f32.mrf.mxu1 }
 0x319   : >> { %14780 = vst [vmem:[#allocation166_spill] sm:$0xff] %v11240_v55  ;;  %v4643_v43 = vmul.f32 %v4627_v57, %v8806_v45  ;;  %v4644_v53 = vmul.f32 %v4628_v61, %v8808_v46  ;;  %v5457_v29 = vunpack.c.l.bf16 %v11242_v8  ;;  %v11261_v57 = vrot.slane %v4923_v37, 1  ;;  %v14790_v37 = vld [vmem:[#allocation91_spill] sm:$0xff] }
 0x31a   : >> { %14781 = vst [vmem:[#allocation146_spill] sm:$0xff] %v11245_v59  ;;  %v5054_v49 = vmul.f32 %v5042_v4, %v8810_v47  ;;  %v5055_v35 = vmul.f32 %v5043_v6, %v8814_v41  ;;  %v3954_v61 = vadd.f32 %v3938_v10, %v3873_v38  ;;  %v3955_v14 = vadd.f32 %v3939_v30, %v11196_v54 }
 0x31b   : >> { %14782 = vst [vmem:[#allocation167_spill] sm:$0xff] %v11249_v39  ;;  %v11254_v55 = vpack.c.bf16 %v4644_v53, %v4643_v43  ;;  %v11268_v53 = vmul.f32 %v5457_v29, %v14479_v23  ;;  %v14789_v39 = vld [vmem:[#allocation88_spill] sm:$0xff]  ;;  %v3956_v38 = vadd.f32 %v3940_v31, %v11200_v42  ;;  %v3957_v10 = vadd.f32 %v3941_v25, %v3876_v44 }
 0x31c   : >> { %14783 = vst [vmem:[#allocation147_spill] sm:$0xff] %v11259_v1  ;;  %v11265_v6 = vpack.c.bf16 %v5055_v35, %v5054_v49  ;;  %v4007_v59 = vpack.c.bf16 %v14790_v37, %v14789_v39  ;;  %v14792_v35 = vld [vmem:[#allocation219_spill] sm:$0xff]  ;;  %v14793_v29 = vld [vmem:[#allocation24_spill] sm:$0xff]  ;;  %v4019_v54 = vunpack.c.h.bf16 %v4006_v60  ;;  %v14797_v37 = vld [vmem:[#allocation93_spill] sm:$0xff]  ;;  %v4188_v63 = vunpack.c.l.bf16 %v4175_v15 }
 0x31d   : >> { %14784 = vst [vmem:[#allocation168_spill] sm:$0xff] %v11261_v57  ;;  %v14791_v57 = vld [vmem:[#allocation37_spill] sm:$0xff]  ;;  %v4174_v4 = vpack.c.bf16 %v14793_v29, %v14792_v35  ;;  %v14796_v39 = vld [vmem:[#allocation92_spill] sm:$0xff]  ;;  %v4189_v35 = vunpack.c.h.bf16 %v4175_v15  ;;  %v754_v29 = vpop.f32.mrf.mxu0 }
 0x31e   : >> { %14785 = vst [vmem:[#allocation169_spill] sm:$0xff] %v11265_v6  ;;  %v4022_v62 = vunpack.c.l.bf16 %v14791_v57  ;;  %v4023_v49 = vunpack.c.h.bf16 %v14791_v57  ;;  %v4018_v6 = vunpack.c.l.bf16 %v4006_v60  ;;  %v4020_v30 = vunpack.c.l.bf16 %v4007_v59 }
 0x31f   : >> { %14786 = vst [vmem:[#allocation175_spill] sm:$0xff] %v11268_v53  ;;  %v4021_v43 = vunpack.c.h.bf16 %v4007_v59  ;;  %v4176_v48 = vpack.c.bf16 %v14797_v37, %v14796_v39  ;;  %v4069_v44 = vrot.slane %v4019_v54, 1  ;;  %v4186_v25 = vunpack.c.l.bf16 %v4174_v4 }
 0x320   : >> { %v4072_v1 = vrot.slane %v4022_v62, 1  ;;  %v4074_v53 = vrot.slane %v4023_v49, 1  ;;  %v4066_v28 = vrot.slane %v4018_v6, 1  ;;  %v4067_v42 = vrot.slane %v4020_v30, 1 }
 0x321   : >> { %v4070_v31 = vrot.slane %v4021_v43, 1  ;;  %v4187_v57 = vunpack.c.h.bf16 %v4174_v4  ;;  %v4190_v54 = vunpack.c.l.bf16 %v4176_v48  ;;  %v4191_v43 = vunpack.c.h.bf16 %v4176_v48 }
 0x322   : >> { %v4068_v60 = vsel %vm1708_vm13, %v4066_v28, %v4067_v42  ;;  %v4073_v62 = vsel %vm1708_vm13, %v4067_v42, %v4072_v1  ;;  %v4234_v37 = vrot.slane %v4186_v25, 2  ;;  %v4235_v4 = vrot.slane %v4188_v63, 2 }
 0x323   : >> { %v4071_v59 = vsel %vm1708_vm13, %v4069_v44, %v4070_v31  ;;  %v4075_v49 = vsel %vm1708_vm13, %v4070_v31, %v4074_v53  ;;  %v4122_v56 = vadd.f32 %v4068_v60, %v3954_v61  ;;  %v4124_v6 = vadd.f32 %v4073_v62, %v3956_v38  ;;  %v14798_v31 = vld [vmem:[#allocation199_spill] sm:$0xff]  ;;  %v14801_v60 = vld [vmem:[#allocation177_spill] sm:$0xff] }
 0x324   : >> { %v4123_v39 = vadd.f32 %v4071_v59, %v3955_v14  ;;  %v4125_v30 = vadd.f32 %v4075_v49, %v3957_v10  ;;  %v4237_v5 = vrot.slane %v4187_v57, 2  ;;  %v4238_v15 = vrot.slane %v4189_v35, 2  ;;  %v14800_v35 = vld [vmem:[#allocation200_spill] sm:$0xff] }
 0x325   : >> { %v755_v28 = vadd.f32 %v754_v29, %v8699_v51  ;;  %v844_v44 = vadd.f32 %v843_v24, %v8701_v52  ;;  %v4236_v1 = vsel %vm1912_vm14, %v4234_v37, %v4235_v4  ;;  %v4240_v42 = vrot.slane %v4190_v54, 2 }
 0x326   : >> { %v4242_v53 = vrot.slane %v4191_v43, 2  ;;  %v3244_v61 = vsel %vm1708_vm13, %v14799_v11, %v14798_v31  ;;  %v4239_v14 = vsel %vm1912_vm14, %v4237_v5, %v4238_v15  ;;  %v4290_v38 = vadd.f32 %v4236_v1, %v4122_v56  ;;  %v14802_v56 = vld [vmem:[#allocation201_spill] sm:$0xff]  ;;  %v14803_v43 = vld [vmem:[#allocation202_spill] sm:$0xff] }
 0x327   : >> { %v914_v48 = vmax.f32 %v755_v28, 0.0  ;;  %v915_v10 = vmax.f32 %v844_v44, 0.0  ;;  %v4241_v63 = vsel %vm1912_vm14, %v4235_v4, %v4240_v42  ;;  %v4291_v57 = vadd.f32 %v4239_v14, %v4123_v39  ;;  %v14807_v14 = vld [vmem:[#allocation193_spill] sm:$0xff] }
 0x328   : >> { %v4243_v25 = vsel %vm1912_vm14, %v4238_v15, %v4242_v53  ;;  %v3247_v59 = vsel %vm1708_vm13, %v14801_v60, %v14800_v35  ;;  %v4292_v62 = vadd.f32 %v4241_v63, %v4124_v6  ;;  %v4306_v29 = vadd.f32 %v4290_v38, %v9956_v40 }
 0x329   : >> { %v4293_v49 = vadd.f32 %v4243_v25, %v4125_v30  ;;  %v978_v24 = vmin.f32 %v914_v48, 6.0  ;;  %v4307_v11 = vadd.f32 %v4291_v57, %v14705_v2  ;;  %v979_v5 = vmin.f32 %v915_v10, 6.0  ;;  %v14804_v30 = vld [vmem:[#allocation172_spill] sm:$0xff] }
 0x32a   : >> { %v3249_v54 = vsel %vm1708_vm13, %v14798_v31, %v14802_v56  ;;  %v3251_v39 = vsel %vm1708_vm13, %v14800_v35, %v14803_v43  ;;  %v4308_v37 = vadd.f32 %v4292_v62, %v9956_v40  ;;  %v4322_v6 = vmax.f32 %v4306_v29, 0.0  ;;  %v14811_v29 = vld [vmem:[#allocation183_spill] sm:$0xff] }
 0x32b   : >> { %v4309_v4 = vadd.f32 %v4293_v49, %v14705_v2  ;;  %v14805_v15 = vunpack.c.l.bf16 %v14804_v30  ;;  %v4323_v44 = vmax.f32 %v4307_v11, 0.0  ;;  %v1023_v1 = vpack.c.bf16 %v979_v5, %v978_v24  ;;  %v14810_v49 = vld [vmem:[#allocation203_spill] sm:$0xff]  ;;  %v14812_v5 = vld [vmem:[#allocation204_spill] sm:$0xff] }
 0x32c   : >> { %v14806_v42 = vunpack.c.h.bf16 %v14804_v30  ;;  %v14808_v38 = vunpack.c.l.bf16 %v14807_v14  ;;  %v4324_v48 = vmax.f32 %v4308_v37, 0.0  ;;  %v4338_v63 = vmin.f32 %v4322_v6, 6.0 }
 0x32d   : >> { %v3292_v28 = vadd.f32 %v3244_v61, %v14805_v15  ;;  %v4325_v10 = vmax.f32 %v4309_v4, 0.0  ;;  %v14809_v25 = vunpack.c.h.bf16 %v14807_v14  ;;  %v4339_v35 = vmin.f32 %v4323_v44, 6.0  ;;  %v1431_v44 = vld [vmem:[#allocation2 + $0x100] sm:$0x11] }
 0x32e   : >> { %v3293_v53 = vadd.f32 %v3247_v59, %v14806_v42  ;;  %v3294_v31 = vadd.f32 %v3249_v54, %v14808_v38  ;;  %v1200_v60 = vshrl.u32 %v1023_v1, 16  ;;  %v1203_v62 = vshll.u32 %v1023_v1, 16  ;;  %v14813_v59 = vld [vmem:[#allocation184_spill] sm:$0xff]  ;;  %v14814_v54 = vld [vmem:[#allocation207_spill] sm:$0xff]  ;;  %v757_v1 = vpop.f32.mrf.mxu0  ;;  %v846_v42 = vpop.f32.mrf.mxu1 }
 0x32f   : >> { %v3295_v57 = vadd.f32 %v3251_v39, %v14809_v25  ;;  %v3412_v61 = vsel %vm1912_vm14, %v14811_v29, %v14810_v49  ;;  %v4340_v24 = vmin.f32 %v4324_v48, 6.0  ;;  %v4341_v11 = vmin.f32 %v4325_v10, 6.0  ;;  %v14815_v39 = vld [vmem:[#allocation208_spill] sm:$0xff]  ;;  %v14817_v29 = vld [vmem:[#allocation25_spill] sm:$0xff] }
 0x330   : >> { %v3415_v56 = vsel %vm1912_vm14, %v14813_v59, %v14812_v5  ;;  %v3417_v43 = vsel %vm1912_vm14, %v14810_v49, %v14814_v54  ;;  %v4354_v37 = vpack.c.bf16 %v4339_v35, %v4338_v63  ;;  %v1202_v4 = vrot.slane %v1200_v60, 7 }
 0x331   : >> { %v3419_v6 = vsel %vm1912_vm14, %v14812_v5, %v14815_v39  ;;  %v3460_v30 = vadd.f32 %v3412_v61, %v3292_v28  ;;  %v4355_v15 = vpack.c.bf16 %v4341_v11, %v4340_v24  ;;  %v3461_v14 = vadd.f32 %v3415_v56, %v3293_v53  ;;  %v14816_v28 = vld [vmem:[#allocation186_spill] sm:$0xff] }
 0x332   : >> { %v3462_v38 = vadd.f32 %v3417_v43, %v3294_v31  ;;  %v3463_v48 = vadd.f32 %v3419_v6, %v3295_v57  ;;  %4362 = vst.msk [vmem:[#allocation3 + $0x40] sm:$0xff] %vm8519_vm2, %v4354_v37  ;;  %v1205_v10 = vor.u32 %v1203_v62, %v1202_v4  ;;  %v1207_v25 = vrot.slane %v1202_v4, 4  ;;  %v14819_v4 = vld [vmem:[#allocation45_spill] sm:$0xff] }
 0x333   : >> { %v758_v63 = vadd.f32 %v757_v1, %v8699_v51  ;;  %v847_v35 = vadd.f32 %v846_v42, %v8701_v52  ;;  %4363 = vst.msk [vmem:[#allocation3 + $0x48] sm:$0xff] %vm8519_vm2, %v4355_v15  ;;  %v3525_v60 = vunpack.c.l.bf16 %v14816_v28  ;;  %v3526_v49 = vunpack.c.h.bf16 %v14816_v28  ;;  %v14824_v42 = vld [vmem:[#allocation46_spill] sm:$0xff] }
 0x334   : >> { %v3527_v53 = vunpack.c.l.bf16 %v14817_v29  ;;  %v3528_v31 = vunpack.c.h.bf16 %v14817_v29  ;;  %v14818_v57 = vrot.slane %v11170_v9, 4  ;;  %v1432_v61 = vsel %vm8542_vm10, %v1207_v25, %v1431_v44  ;;  %v14826_v25 = vld [vmem:[#allocation216_spill] sm:$0xff] }
 0x335   : >> { %v916_v24 = vmax.f32 %v758_v63, 0.0  ;;  %v917_v11 = vmax.f32 %v847_v35, 0.0  ;;  %v3541_v5 = vadd.f32 %v3525_v60, %v3460_v30  ;;  %v3542_v59 = vadd.f32 %v3526_v49, %v3461_v14  ;;  %1433 = vst [vmem:[#allocation2 + $0x100] sm:$0x11] %v1432_v61  ;;  %v14825_v14 = vld [vmem:[#allocation53_spill] sm:$0xff]  ;;  %v14828_v60 = vld [vmem:[#allocation64_spill] sm:$0xff] }
 0x336   : >> { %v1206_v62 = vsel %vm8765_vm9, %v14818_v57, %v1205_v10  ;;  %v3543_v56 = vadd.f32 %v3527_v53, %v3462_v38  ;;  %v3544_v54 = vadd.f32 %v3528_v31, %v3463_v48  ;;  %v14820_v9 = vunpack.c.l.bf16 %v14819_v4  ;;  %v14827_v35 = vld [vmem:[#allocation217_spill] sm:$0xff] }
 0x337   : >> { %1430 = vst.msk [vmem:[#allocation2 + $0xf8] sm:$0xff] %vm8519_vm2, %v1206_v62  ;;  %v980_v43 = vmin.f32 %v916_v24, 6.0  ;;  %v981_v37 = vmin.f32 %v917_v11, 6.0  ;;  %v14821_v6 = vunpack.c.h.bf16 %v14819_v4  ;;  %v14822_v44 = vunpack.c.l.bf16 %v11254_v55  ;;  %v14829_v31 = vld [vmem:[#allocation89_spill] sm:$0xff] }
 0x338   : >> { %v3660_v39 = vrot.slane %v14820_v9, 1  ;;  %v3775_v10 = vunpack.c.l.bf16 %v14824_v42  ;;  %v3776_v30 = vunpack.c.h.bf16 %v14824_v42  ;;  %v3777_v38 = vunpack.c.l.bf16 %v14825_v14 }
 0x339   : >> { %v3663_v15 = vrot.slane %v14821_v6, 1  ;;  %v11355_v1 = vrot.slane %v14822_v44, 2  ;;  %v11360_v48 = vpack.c.bf16 %v981_v37, %v980_v43  ;;  %v7833_v29 = vld [vmem:[#allocation3 + $0x40] sm:$0xf]  ;;  %v8012_v53 = vld [vmem:[#allocation3 + $0x44] sm:$0xf]  ;;  %v3778_v24 = vunpack.c.h.bf16 %v14825_v14 }
 0x33a   : >> { %v3661_v63 = vsel %vm1708_vm13, %v14826_v25, %v3660_v39  ;;  %v3666_v49 = vsel %vm1708_vm13, %v3660_v39, %v14828_v60  ;;  %v14830_v11 = vunpack.c.h.bf16 %v11254_v55  ;;  %v14832_v37 = vunpack.c.h.bf16 %v11242_v8  ;;  %v8013_v9 = vld [vmem:[#allocation3 + $0x44] sm:$0xf0]  ;;  %v7835_v39 = vld [vmem:[#allocation3 + $0x48] sm:$0xf0]  ;;  %v14834_v8 = vld [vmem:[#allocation39_spill] sm:$0xff] }
 0x33b   : >> { %14823 = vst [vmem:[#allocation198_spill] sm:$0xff] %v11355_v1  ;;  %v3664_v28 = vsel %vm1708_vm13, %v14827_v35, %v3663_v15  ;;  %v3668_v57 = vsel %vm1708_vm13, %v3663_v15, %v14829_v31  ;;  %v11370_v62 = vadd.f32 %v3661_v63, %v3541_v5  ;;  %v1209_v6 = vshrl.u32 %v11360_v48, 16  ;;  %v14835_v35 = vld [vmem:[#allocation18_spill] sm:$0xff] }
 0x33c   : >> { %v11372_v61 = vadd.f32 %v3664_v28, %v3542_v59  ;;  %v11377_v43 = vrot.slane %v14830_v11, 2  ;;  %v11382_v4 = vmul.f32 %v14832_v37, %v9038_v16  ;;  %v11385_v15 = vadd.f32 %v3666_v49, %v3543_v56  ;;  %v4453_v49 = vld [vmem:[#allocation2 + $0x100] sm:$0x11] }
 0x33d   : >> { %v7834_v5 = vor.u32 %v8013_v9, %v7833_v29  ;;  %v7838_v59 = vor.u32 %v8012_v53, %v7835_v39  ;;  %v3828_v42 = vrot.slane %v3777_v38, 2  ;;  %v11388_v55 = vrot.slane %v1209_v6, 7  ;;  %v14836_v31 = vld [vmem:[#allocation118_spill] sm:$0xff] }
 0x33e   : >> { %14831 = vst [vmem:[#allocation205_spill] sm:$0xff] %v11377_v43  ;;  %v4376_v14 = vld [vmem:[#allocation2 + $0xf8] sm:$0xff]  ;;  %v11390_v25 = vadd.f32 %v3668_v57, %v3544_v54  ;;  %v3827_v63 = vrot.slane %v3775_v10, 2  ;;  %v11394_v28 = vpack.c.bf16 %v14835_v35, %v14834_v8  ;;  %v11401_v29 = vrot.slane %v3776_v30, 2 }
 0x33f   : >> { %14833 = vst [vmem:[#allocation180_spill] sm:$0xff] %v11382_v4  ;;  %7333 = vmatmul.bf16.gmra.mxu2 %v7834_v5  ;;  %7967 = vmatmul.msk.bf16.gmra.mxu3 %vm7256_vm15, %v7838_v59  ;;  %v11397_v56 = vunpack.c.l.bf16 %v4376_v14  ;;  %v11399_v60 = vunpack.c.h.bf16 %v4376_v14  ;;  %v11403_v38 = vrot.slane %v3778_v24, 2  ;;  %v4459_v53 = vunpack.c.l.bf16 %v4453_v49  ;;  %v14837_v57 = vld [vmem:[#allocation121_spill] sm:$0xff]  ;;  %v4869_v14 = vld [vmem:[#allocation2 + $0x100] sm:$0x11] }
 0x340   : >> { %v4460_v54 = vunpack.c.h.bf16 %v4453_v49  ;;  %v11406_v10 = vsel %vm1912_vm14, %v3827_v63, %v3828_v42  ;;  %v11410_v11 = vpack.c.bf16 %v14837_v57, %v14836_v31  ;;  %v4874_v3 = vunpack.c.l.bf16 %v4869_v14 }
 0x341   : >> { %v4405_v37 = vmul.f32 %v11397_v56, %v8744_v32  ;;  %v4406_v9 = vmul.f32 %v11399_v60, %v8746_v33  ;;  %v4477_v30 = vmul.f32 %v11397_v56, %v8784_v17  ;;  %v4478_v24 = vmul.f32 %v11399_v60, %v8786_v18 }
 0x342   : >> { %v4479_v39 = vmul.f32 %v4459_v53, %v8784_v17  ;;  %v4480_v6 = vmul.f32 %v4460_v54, %v8786_v18  ;;  %v4645_v5 = vmul.f32 %v11397_v56, %v8806_v45  ;;  %v4646_v59 = vmul.f32 %v11399_v60, %v8808_v46 }
 0x343   : >> { %v11426_v63 = vpack.c.bf16 %v4406_v9, %v4405_v37  ;;  %v4494_v8 = vpack.c.bf16 %v4478_v24, %v4477_v30  ;;  %v4647_v35 = vmul.f32 %v4459_v53, %v8806_v45  ;;  %v4648_v49 = vmul.f32 %v4460_v54, %v8808_v46 }
 0x344   : >> { %v4495_v31 = vpack.c.bf16 %v4480_v6, %v4479_v39  ;;  %v4662_v57 = vpack.c.bf16 %v4646_v59, %v4645_v5  ;;  %v4818_v44 = vmul.f32 %v11397_v56, %v8772_v12  ;;  %v4819_v43 = vmul.f32 %v11399_v60, %v8776_v13  ;;  %v14840_v39 = vld [vmem:[#allocation36_spill] sm:$0xff] }
 0x345   : >> { %14838 = vst [vmem:[#allocation181_spill] sm:$0xff] %v11426_v63  ;;  %v4513_v1 = vunpack.c.l.bf16 %v4494_v8  ;;  %v4514_v4 = vunpack.c.h.bf16 %v4494_v8  ;;  %v4875_v58 = vunpack.c.h.bf16 %v4869_v14  ;;  %v4663_v9 = vpack.c.bf16 %v4648_v49, %v4647_v35 }
 0x346   : >> { %v4515_v50 = vunpack.c.l.bf16 %v4495_v31  ;;  %v4516_v37 = vunpack.c.h.bf16 %v4495_v31  ;;  %v4681_v30 = vunpack.c.l.bf16 %v4662_v57  ;;  %v11436_v24 = vpack.c.bf16 %v4819_v43, %v4818_v44 }
 0x347   : >> { %v3834_v6 = vsel %vm1912_vm14, %v3828_v42, %v14840_v39  ;;  %v11440_v5 = vrot.slane %v4513_v1, 1  ;;  %v11442_v59 = vrot.slane %v4514_v4, 1  ;;  %v4682_v8 = vunpack.c.h.bf16 %v4662_v57  ;;  %v5285_v42 = vld [vmem:[#allocation2 + $0x100] sm:$0x11] }
 0x348   : >> { %14839 = vst [vmem:[#allocation211_spill] sm:$0xff] %v11436_v24  ;;  %v4683_v0 = vunpack.c.l.bf16 %v4663_v9  ;;  %v11444_v14 = vrot.slane %v4515_v50, 1  ;;  %v4684_v31 = vunpack.c.h.bf16 %v4663_v9  ;;  %v4888_v35 = vmul.f32 %v11397_v56, %v8790_v19  ;;  %v14872_v24 = vld [vmem:[#allocation17_spill] sm:$0xff] }
 0x349   : >> { %14841 = vst [vmem:[#allocation212_spill] sm:$0xff] %v11440_v5  ;;  %v4889_v49 = vmul.f32 %v11399_v60, %v8792_v20  ;;  %v11450_v43 = vrot.slane %v4516_v37, 1  ;;  %v11452_v44 = vrot.slane %v4681_v30, 2  ;;  %v4890_v1 = vmul.f32 %v4874_v3, %v8790_v19 }
 0x34a   : >> { %14842 = vst [vmem:[#allocation182_spill] sm:$0xff] %v11442_v59  ;;  %v4891_v4 = vmul.f32 %v4875_v58, %v8792_v20  ;;  %v5056_v50 = vmul.f32 %v11397_v56, %v8810_v47  ;;  %v5057_v9 = vmul.f32 %v11399_v60, %v8814_v41  ;;  %v5058_v39 = vmul.f32 %v4874_v3, %v8810_v47 }
 0x34b   : >> { %14843 = vst [vmem:[#allocation206_spill] sm:$0xff] %v11444_v14  ;;  %v11456_v57 = vpack.c.bf16 %v4889_v49, %v4888_v35  ;;  %v11463_v54 = vrot.slane %v4682_v8, 2  ;;  %v11465_v37 = vrot.slane %v4683_v0, 2  ;;  %v5059_v53 = vmul.f32 %v4875_v58, %v8814_v41  ;;  %v1434_v0 = vld [vmem:[#allocation2 + $0x108] sm:$0xff] }
 0x34c   : >> { %14844 = vst [vmem:[#allocation187_spill] sm:$0xff] %v11450_v43  ;;  %v4909_v30 = vpack.c.bf16 %v4891_v4, %v4890_v1  ;;  %v11470_v63 = vpack.c.bf16 %v5057_v9, %v5056_v50  ;;  %v11474_v35 = vmul.f32 %v11397_v56, %v14472_v36  ;;  %v5289_v49 = vunpack.c.l.bf16 %v5285_v42 }
 0x34d   : >> { %14845 = vst [vmem:[#allocation188_spill] sm:$0xff] %v11452_v44  ;;  %v11468_v44 = vrot.slane %v4684_v31, 2  ;;  %v5077_v59 = vpack.c.bf16 %v5059_v53, %v5058_v39  ;;  %v5290_v3 = vunpack.c.h.bf16 %v5285_v42  ;;  %v11480_v58 = vmul.f32 %v11399_v60, %v14474_v7 }
 0x34e   : >> { %14846 = vst [vmem:[#allocation54_spill] sm:$0xff] %v11456_v57  ;;  %v4926_v43 = vunpack.c.l.bf16 %v4909_v30  ;;  %v4927_v14 = vunpack.c.h.bf16 %v4909_v30  ;;  %v11484_v31 = vmul.f32 %v11397_v56, %v8873_v21  ;;  %v11488_v4 = vmul.f32 %v11399_v60, %v14477_v27  ;;  %v14871_v57 = vld [vmem:[#allocation122_spill] sm:$0xff] }
 0x34f   : >> { %14847 = vst [vmem:[#allocation85_spill] sm:$0xff] %v11463_v54  ;;  %v5094_v1 = vunpack.c.l.bf16 %v5077_v59  ;;  %v5301_v53 = vmul.f32 %v5289_v49, %v8873_v21  ;;  %v11493_v42 = vmul.f32 %v11397_v56, %v14479_v23  ;;  %v5095_v39 = vunpack.c.h.bf16 %v5077_v59  ;;  %v14863_v54 = vld [vmem:[#allocation22_spill] sm:$0xff] }
 0x350   : >> { %14848 = vst [vmem:[#allocation213_spill] sm:$0xff] %v11465_v37  ;;  %v11495_v50 = vrot.slane %v4926_v43, 1  ;;  %v11497_v9 = vrot.slane %v4927_v14, 1  ;;  %v5302_v30 = vmul.f32 %v5290_v3, %v14477_v27  ;;  %v11502_v8 = vmul.f32 %v11399_v60, %v9038_v16 }
 0x351   : >> { %14849 = vst [vmem:[#allocation214_spill] sm:$0xff] %v11468_v44  ;;  %v11505_v44 = vmul.f32 %v5289_v49, %v14479_v23  ;;  %v11508_v37 = vmul.f32 %v5290_v3, %v9038_v16  ;;  %v14861_v56 = vshll.u32 %v11360_v48, 16  ;;  %v11513_v14 = vrot.slane %v5094_v1, 2 }
 0x352   : >> { %14850 = vst [vmem:[#allocation215_spill] sm:$0xff] %v11470_v63  ;;  %v3832_v59 = vsel %vm1912_vm14, %v11401_v29, %v11403_v38  ;;  %v3836_v60 = vsel %vm1912_vm14, %v11403_v38, %v14863_v54  ;;  %v3877_v49 = vadd.f32 %v11406_v10, %v11370_v62  ;;  %v3879_v48 = vadd.f32 %v3834_v6, %v11385_v15 }
 0x353   : >> { %14851 = vst [vmem:[#allocation218_spill] sm:$0xff] %v11474_v35  ;;  %v1214_v43 = vor.u32 %v14861_v56, %v11388_v55  ;;  %v3878_v5 = vadd.f32 %v3832_v59, %v11372_v61  ;;  %v3880_v1 = vadd.f32 %v3836_v60, %v11390_v25  ;;  %v11528_v56 = vrot.slane %v5095_v39, 2  ;;  %v14867_v60 = vld [vmem:[#allocation21_spill] sm:$0xff] }
 0x354   : >> { %14852 = vst [vmem:[#allocation88_spill] sm:$0xff] %v11480_v58  ;;  %v11531_v38 = vpack.c.bf16 %v5302_v30, %v5301_v53  ;;  %v3942_v62 = vunpack.c.l.bf16 %v11394_v28  ;;  %v3943_v10 = vunpack.c.h.bf16 %v11394_v28  ;;  %v3944_v54 = vunpack.c.l.bf16 %v11410_v11 }
 0x355   : >> { %14853 = vst [vmem:[#allocation91_spill] sm:$0xff] %v11484_v31  ;;  %v1435_v3 = vsel %vm8724_vm7, %v1214_v43, %v1434_v0  ;;  %v3945_v59 = vunpack.c.h.bf16 %v11410_v11 }
 0x356   : >> { %14854 = vst [vmem:[#allocation37_spill] sm:$0xff] %v11488_v4  ;;  %v4392_v63 = vunpack.c.h.bf16 %v1435_v3 }
 0x357   : >> { %14855 = vst [vmem:[#allocation219_spill] sm:$0xff] %v11493_v42 }
 0x358   : >> { %14856 = vst [vmem:[#allocation24_spill] sm:$0xff] %v11495_v50  ;;  %v4408_v15 = vmul.f32 %v4392_v63, %v8746_v33  ;;  %v4482_v6 = vmul.f32 %v4392_v63, %v8786_v18  ;;  %v4821_v39 = vmul.f32 %v4392_v63, %v8776_v13  ;;  %v4893_v30 = vmul.f32 %v4392_v63, %v8792_v20 }
 0x359   : >> { %14857 = vst [vmem:[#allocation63_spill] sm:$0xff] %v11497_v9 }
 0x35a   : >> { %14858 = vst [vmem:[#allocation90_spill] sm:$0xff] %v11502_v8 }
 0x35b   : >> { %14859 = vst [vmem:[#allocation92_spill] sm:$0xff] %v11505_v44 }
 0x35c   : >> { %14860 = vst [vmem:[#allocation93_spill] sm:$0xff] %v11508_v37  ;;  %v4010_v37 = vpack.c.bf16 %v14872_v24, %v14871_v57  ;;  %v11564_v24 = vmul.f32 %v4392_v63, %v14477_v27  ;;  %v3961_v57 = vadd.f32 %v3945_v59, %v3880_v1  ;;  %v14883_v59 = vld [vmem:[#allocation44_spill] sm:$0xff]  ;;  %v848_v1 = vpop.f32.mrf.mxu1 }
 0x35d   : >> { %14862 = vst [vmem:[#allocation199_spill] sm:$0xff] %v11513_v14  ;;  %v4391_v14 = vunpack.c.l.bf16 %v1435_v3 }
 0x35e   : >> { %14864 = vst [vmem:[#allocation176_spill] sm:$0xff] %v11528_v56 }
 0x35f   : >> { %1436 = vst [vmem:[#allocation2 + $0x108] sm:$0xff] %v1435_v3  ;;  %v4407_v61 = vmul.f32 %v4391_v14, %v8744_v32  ;;  %v4481_v25 = vmul.f32 %v4391_v14, %v8784_v17  ;;  %v4820_v0 = vmul.f32 %v4391_v14, %v8772_v12  ;;  %v4892_v53 = vmul.f32 %v4391_v14, %v8790_v19  ;;  %v14868_v3 = vld [vmem:[#allocation41_spill] sm:$0xff] }
 0x360   : >> { %14865 = vst [vmem:[#allocation200_spill] sm:$0xff] %v11531_v38  ;;  %v4009_v29 = vpack.c.bf16 %v14868_v3, %v14867_v60  ;;  %v11552_v50 = vmul.f32 %v4391_v14, %v14472_v36  ;;  %v4026_v60 = vunpack.c.l.bf16 %v4010_v37 }
 0x361   : >> { %v11544_v43 = vpack.c.bf16 %v4408_v15, %v4407_v61  ;;  %v4496_v28 = vpack.c.bf16 %v4482_v6, %v4481_v25  ;;  %v11549_v56 = vpack.c.bf16 %v4821_v39, %v4820_v0  ;;  %v4910_v9 = vpack.c.bf16 %v4893_v30, %v4892_v53  ;;  %14875 = vst [vmem:[#allocation203_spill] sm:$0xff] %v11564_v24 }
 0x362   : >> { %14870 = vst [vmem:[#allocation202_spill] sm:$0xff] %v11552_v50  ;;  %v11557_v61 = vmul.f32 %v4392_v63, %v14474_v7  ;;  %v11560_v15 = vmul.f32 %v4391_v14, %v8873_v21  ;;  %v3958_v53 = vadd.f32 %v3942_v62, %v3877_v49  ;;  %v3959_v30 = vadd.f32 %v3943_v10, %v3878_v5 }
 0x363   : >> { %14866 = vst [vmem:[#allocation177_spill] sm:$0xff] %v11544_v43  ;;  %v4517_v44 = vunpack.c.l.bf16 %v4496_v28  ;;  %v4518_v8 = vunpack.c.h.bf16 %v4496_v28  ;;  %v4928_v25 = vunpack.c.l.bf16 %v4910_v9  ;;  %v4929_v6 = vunpack.c.h.bf16 %v4910_v9 }
 0x364   : >> { %14869 = vst [vmem:[#allocation201_spill] sm:$0xff] %v11549_v56  ;;  %v4077_v43 = vrot.slane %v4026_v60, 1 }
 0x365   : >> { %14873 = vst [vmem:[#allocation172_spill] sm:$0xff] %v11557_v61  ;;  %v11567_v28 = vrot.slane %v4517_v44, 1  ;;  %v11571_v5 = vrot.slane %v4518_v8, 1  ;;  %v11573_v62 = vrot.slane %v4928_v25, 1  ;;  %v11575_v10 = vrot.slane %v4929_v6, 1  ;;  %v14882_v6 = vld [vmem:[#allocation55_spill] sm:$0xff] }
 0x366   : >> { %14874 = vst [vmem:[#allocation193_spill] sm:$0xff] %v11560_v15  ;;  %v4622_v11 = vld [vmem:[#allocation2 + $0x108] sm:$0xee] }
 0x367   : >> { %v5038_v0 = vld [vmem:[#allocation2 + $0x108] sm:$0xee]  ;;  %v4629_v3 = vunpack.c.l.bf16 %v4622_v11  ;;  %v4630_v56 = vunpack.c.h.bf16 %v4622_v11  ;;  %14876 = vst [vmem:[#allocation183_spill] sm:$0xff] %v11567_v28 }
 0x368   : >> { %v5454_v39 = vld [vmem:[#allocation2 + $0x108] sm:$0xee]  ;;  %v5044_v14 = vunpack.c.l.bf16 %v5038_v0  ;;  %v5045_v15 = vunpack.c.h.bf16 %v5038_v0  ;;  %14877 = vst [vmem:[#allocation204_spill] sm:$0xff] %v11571_v5  ;;  %v3960_v0 = vadd.f32 %v3944_v54, %v3879_v48 }
 0x369   : >> { %v4649_v61 = vmul.f32 %v4629_v3, %v8806_v45  ;;  %v4650_v9 = vmul.f32 %v4630_v56, %v8808_v46  ;;  %v5459_v50 = vunpack.c.l.bf16 %v5454_v39  ;;  %v5460_v49 = vunpack.c.h.bf16 %v5454_v39  ;;  %14878 = vst [vmem:[#allocation184_spill] sm:$0xff] %v11573_v62  ;;  %v14886_v62 = vld [vmem:[#allocation125_spill] sm:$0xff] }
 0x36a   : >> { %14879 = vst [vmem:[#allocation207_spill] sm:$0xff] %v11575_v10  ;;  %v11578_v63 = vmul.f32 %v5044_v14, %v8810_v47  ;;  %v11583_v44 = vmul.f32 %v5045_v15, %v8814_v41  ;;  %v4024_v3 = vunpack.c.l.bf16 %v4009_v29  ;;  %v4025_v56 = vunpack.c.h.bf16 %v4009_v29  ;;  %v14885_v10 = vld [vmem:[#allocation127_spill] sm:$0xff] }
 0x36b   : >> { %v11580_v11 = vpack.c.bf16 %v4650_v9, %v4649_v61  ;;  %v4027_v39 = vunpack.c.h.bf16 %v4010_v37  ;;  %v11586_v8 = vmul.f32 %v5459_v50, %v14479_v23  ;;  %v11589_v25 = vmul.f32 %v5460_v49, %v9038_v16  ;;  %v14884_v49 = vld [vmem:[#allocation83_spill] sm:$0xff] }
 0x36c   : >> { %v4028_v14 = vunpack.c.l.bf16 %v14882_v6  ;;  %v4029_v61 = vunpack.c.h.bf16 %v14882_v6  ;;  %v4076_v9 = vrot.slane %v4024_v3, 1  ;;  %v4079_v15 = vrot.slane %v4025_v56, 1  ;;  %v759_v3 = vpop.f32.mrf.mxu0 }
 0x36d   : >> { %14880 = vst [vmem:[#allocation208_spill] sm:$0xff] %v11586_v8  ;;  %v4080_v5 = vrot.slane %v4027_v39, 1  ;;  %v4177_v28 = vpack.c.bf16 %v14884_v49, %v14883_v59  ;;  %v4178_v6 = vpack.c.bf16 %v14886_v62, %v14885_v10  ;;  %v760_v49 = vadd.f32 %v759_v3, %v8699_v51 }
 0x36e   : >> { %14881 = vst [vmem:[#allocation186_spill] sm:$0xff] %v11589_v25  ;;  %v4082_v29 = vrot.slane %v4028_v14, 1  ;;  %v4084_v37 = vrot.slane %v4029_v61, 1  ;;  %v4078_v50 = vsel %vm1708_vm13, %v4076_v9, %v4077_v43  ;;  %v14887_v25 = vld [vmem:[#allocation126_spill] sm:$0xff]  ;;  %v14888_v9 = vld [vmem:[#allocation128_spill] sm:$0xff] }
 0x36f   : >> { %v4081_v54 = vsel %vm1708_vm13, %v4079_v15, %v4080_v5  ;;  %v4126_v39 = vadd.f32 %v4078_v50, %v3958_v53  ;;  %v4179_v8 = vpack.c.bf16 %v14888_v9, %v14887_v25  ;;  %v4192_v15 = vunpack.c.l.bf16 %v4177_v28  ;;  %v14889_v50 = vld [vmem:[#allocation49_spill] sm:$0xff] }
 0x370   : >> { %v4083_v60 = vsel %vm1708_vm13, %v4077_v43, %v4082_v29  ;;  %v4085_v56 = vsel %vm1708_vm13, %v4080_v5, %v4084_v37  ;;  %v4127_v48 = vadd.f32 %v4081_v54, %v3959_v30  ;;  %v4193_v24 = vunpack.c.h.bf16 %v4177_v28  ;;  %v14890_v25 = vld [vmem:[#allocation209_spill] sm:$0xff] }
 0x371   : >> { %v4128_v14 = vadd.f32 %v4083_v60, %v3960_v0  ;;  %v4129_v61 = vadd.f32 %v4085_v56, %v3961_v57  ;;  %v4194_v42 = vunpack.c.l.bf16 %v4178_v6  ;;  %v4195_v59 = vunpack.c.h.bf16 %v4178_v6  ;;  %v14892_v60 = vld [vmem:[#allocation210_spill] sm:$0xff] }
 0x372   : >> { %v4196_v62 = vunpack.c.l.bf16 %v4179_v8  ;;  %v4197_v10 = vunpack.c.h.bf16 %v4179_v8  ;;  %v4244_v38 = vrot.slane %v4192_v15, 2  ;;  %v849_v43 = vadd.f32 %v848_v1, %v8701_v52  ;;  %v14891_v8 = vld [vmem:[#allocation26_spill] sm:$0xff] }
 0x373   : >> { %v4245_v5 = vrot.slane %v4194_v42, 2  ;;  %v4247_v53 = vrot.slane %v4193_v24, 2  ;;  %v4248_v30 = vrot.slane %v4195_v59, 2  ;;  %v918_v29 = vmax.f32 %v760_v49, 0.0 }
 0x374   : >> { %v4250_v0 = vrot.slane %v4196_v62, 2  ;;  %v4252_v57 = vrot.slane %v4197_v10, 2  ;;  %v919_v37 = vmax.f32 %v849_v43, 0.0  ;;  %v3254_v28 = vsel %vm1708_vm13, %v14890_v25, %v14889_v50  ;;  %v14893_v62 = vld [vmem:[#allocation48_spill] sm:$0xff]  ;;  %v14898_v25 = vld [vmem:[#allocation47_spill] sm:$0xff] }
 0x375   : >> { %v4246_v54 = vsel %vm1912_vm14, %v4244_v38, %v4245_v5  ;;  %v4249_v6 = vsel %vm1912_vm14, %v4247_v53, %v4248_v30  ;;  %v982_v3 = vmin.f32 %v918_v29, 6.0  ;;  %v3257_v1 = vsel %vm1708_vm13, %v14892_v60, %v14891_v8  ;;  %v14894_v53 = vld [vmem:[#allocation50_spill] sm:$0xff] }
 0x376   : >> { %v4251_v42 = vsel %vm1912_vm14, %v4245_v5, %v4250_v0  ;;  %v4253_v24 = vsel %vm1912_vm14, %v4248_v30, %v4252_v57  ;;  %v4294_v56 = vadd.f32 %v4246_v54, %v4126_v39  ;;  %v4295_v9 = vadd.f32 %v4249_v6, %v4127_v48  ;;  %v14895_v5 = vld [vmem:[#allocation185_spill] sm:$0xff] }
 0x377   : >> { %v4296_v15 = vadd.f32 %v4251_v42, %v4128_v14  ;;  %v4297_v59 = vadd.f32 %v4253_v24, %v4129_v61  ;;  %v983_v49 = vmin.f32 %v919_v37, 6.0  ;;  %v3259_v38 = vsel %vm1708_vm13, %v14889_v50, %v14893_v62  ;;  %v14901_v62 = vld [vmem:[#allocation51_spill] sm:$0xff] }
 0x378   : >> { %v4310_v10 = vadd.f32 %v4294_v56, %v9956_v40  ;;  %v4311_v43 = vadd.f32 %v4295_v9, %v14705_v2  ;;  %v3261_v29 = vsel %vm1708_vm13, %v14891_v8, %v14894_v53  ;;  %v14896_v0 = vunpack.c.l.bf16 %v14895_v5 }
 0x379   : >> { %v4312_v48 = vadd.f32 %v4296_v15, %v9956_v40  ;;  %v4313_v39 = vadd.f32 %v4297_v59, %v14705_v2  ;;  %v1025_v14 = vpack.c.bf16 %v983_v49, %v982_v3  ;;  %v14897_v61 = vunpack.c.h.bf16 %v14895_v5  ;;  %v14902_v59 = vld [vmem:[#allocation220_spill] sm:$0xff]  ;;  %v14905_v5 = vld [vmem:[#allocation81_spill] sm:$0xff] }
 0x37a   : >> { %v3296_v30 = vadd.f32 %v3254_v28, %v14896_v0  ;;  %v4326_v37 = vmax.f32 %v4310_v10, 0.0  ;;  %v4327_v50 = vmax.f32 %v4311_v43, 0.0  ;;  %v14899_v54 = vunpack.c.l.bf16 %v14898_v25  ;;  %v14903_v49 = vld [vmem:[#allocation52_spill] sm:$0xff] }
 0x37b   : >> { %v3297_v57 = vadd.f32 %v3257_v1, %v14897_v61  ;;  %v14900_v60 = vunpack.c.h.bf16 %v14898_v25  ;;  %v4328_v8 = vmax.f32 %v4312_v48, 0.0  ;;  %v4329_v24 = vmax.f32 %v4313_v39, 0.0  ;;  %v14904_v1 = vld [vmem:[#allocation38_spill] sm:$0xff]  ;;  %v1438_v48 = vld [vmem:[#allocation2 + $0x118] sm:$0x11]  ;;  %v762_v39 = vpop.f32.mrf.mxu0 }
 0x37c   : >> { %v3298_v6 = vadd.f32 %v3259_v38, %v14899_v54  ;;  %v1217_v56 = vshrl.u32 %v1025_v14, 16  ;;  %v1220_v28 = vshll.u32 %v1025_v14, 16  ;;  %v4342_v9 = vmin.f32 %v4326_v37, 6.0  ;;  %v851_v14 = vpop.f32.mrf.mxu1  ;;  %v14906_v61 = vld [vmem:[#allocation82_spill] sm:$0xff] }
 0x37d   : >> { %v3299_v42 = vadd.f32 %v3261_v29, %v14900_v60  ;;  %v4343_v15 = vmin.f32 %v4327_v50, 6.0  ;;  %v3422_v3 = vsel %vm1912_vm14, %v14902_v59, %v14901_v62  ;;  %v3425_v10 = vsel %vm1912_vm14, %v14904_v1, %v14903_v49 }
 0x37e   : >> { %v4344_v43 = vmin.f32 %v4328_v8, 6.0  ;;  %v4345_v53 = vmin.f32 %v4329_v24, 6.0  ;;  %v1219_v38 = vrot.slane %v1217_v56, 7  ;;  %v3427_v29 = vsel %vm1912_vm14, %v14901_v62, %v14905_v5  ;;  %v14911_v5 = vld [vmem:[#allocation69_spill] sm:$0xff] }
 0x37f   : >> { %v4356_v0 = vpack.c.bf16 %v4343_v15, %v4342_v9  ;;  %v3429_v37 = vsel %vm1912_vm14, %v14903_v49, %v14906_v61  ;;  %v3464_v50 = vadd.f32 %v3422_v3, %v3296_v30  ;;  %v3465_v25 = vadd.f32 %v3425_v10, %v3297_v57  ;;  %v14907_v15 = vld [vmem:[#allocation40_spill] sm:$0xff] }
 0x380   : >> { %v4357_v54 = vpack.c.bf16 %v4345_v53, %v4344_v43  ;;  %v1222_v60 = vor.u32 %v1220_v28, %v1219_v38  ;;  %v1224_v59 = vrot.slane %v1219_v38, 4  ;;  %v763_v8 = vadd.f32 %v762_v39, %v8699_v51 }
 0x381   : >> { %4364 = vst.msk [vmem:[#allocation3 + $0x50] sm:$0xff] %vm8519_vm2, %v4356_v0  ;;  %v852_v24 = vadd.f32 %v851_v14, %v8701_v52  ;;  %v3466_v56 = vadd.f32 %v3427_v29, %v3298_v6  ;;  %v3467_v9 = vadd.f32 %v3429_v37, %v3299_v42  ;;  %v3529_v62 = vunpack.c.l.bf16 %v14907_v15  ;;  %v14910_v42 = vld [vmem:[#allocation58_spill] sm:$0xff] }
 0x382   : >> { %4365 = vst.msk [vmem:[#allocation3 + $0x58] sm:$0xff] %vm8519_vm2, %v4357_v54  ;;  %v14908_v30 = vrot.slane %v11388_v55, 4  ;;  %v1439_v3 = vsel %vm8542_vm10, %v1224_v59, %v1438_v48  ;;  %v920_v49 = vmax.f32 %v763_v8, 0.0  ;;  %v3530_v1 = vunpack.c.h.bf16 %v14907_v15  ;;  %v14918_v15 = vld [vmem:[#allocation103_spill] sm:$0xff] }
 0x383   : >> { %v921_v6 = vmax.f32 %v852_v24, 0.0  ;;  %v3531_v10 = vunpack.c.l.bf16 %v14910_v42  ;;  %v3532_v43 = vunpack.c.h.bf16 %v14910_v42  ;;  %v3545_v53 = vadd.f32 %v3529_v62, %v3464_v50  ;;  %1440 = vst [vmem:[#allocation2 + $0x118] sm:$0x11] %v1439_v3  ;;  %v14916_v50 = vld [vmem:[#allocation43_spill] sm:$0xff] }
 0x384   : >> { %v1223_v57 = vsel %vm8765_vm9, %v14908_v30, %v1222_v60  ;;  %v984_v55 = vmin.f32 %v920_v49, 6.0  ;;  %v3546_v38 = vadd.f32 %v3530_v1, %v3465_v25  ;;  %v14912_v29 = vunpack.c.l.bf16 %v14911_v5  ;;  %v14915_v60 = vld [vmem:[#allocation29_spill] sm:$0xff]  ;;  %v14917_v25 = vld [vmem:[#allocation102_spill] sm:$0xff] }
 0x385   : >> { %1437 = vst.msk [vmem:[#allocation2 + $0x110] sm:$0xff] %vm8519_vm2, %v1223_v57  ;;  %v14913_v48 = vunpack.c.h.bf16 %v14911_v5  ;;  %v11671_v14 = vpack.c.bf16 %v11583_v44, %v11578_v63  ;;  %v985_v61 = vmin.f32 %v921_v6, 6.0  ;;  %v3547_v37 = vadd.f32 %v3531_v10, %v3466_v56  ;;  %v14919_v44 = vld [vmem:[#allocation67_spill] sm:$0xff] }
 0x386   : >> { %v3670_v0 = vrot.slane %v14912_v29, 1  ;;  %v3548_v54 = vadd.f32 %v3532_v43, %v3467_v9  ;;  %v3781_v56 = vunpack.c.l.bf16 %v14919_v44  ;;  %v14920_v9 = vunpack.c.l.bf16 %v11580_v11  ;;  %v14924_v43 = vld [vmem:[#allocation117_spill] sm:$0xff] }
 0x387   : >> { %v3673_v39 = vrot.slane %v14913_v48, 1  ;;  %14914 = vst [vmem:[#allocation25_spill] sm:$0xff] %v11671_v14  ;;  %v11681_v30 = vpack.c.bf16 %v985_v61, %v984_v55  ;;  %v14922_v49 = vunpack.c.h.bf16 %v11580_v11  ;;  %v3783_v55 = vunpack.c.l.bf16 %v14924_v43  ;;  %v14925_v48 = vld [vmem:[#allocation56_spill] sm:$0xff] }
 0x388   : >> { %v3671_v59 = vsel %vm1708_vm13, %v14915_v60, %v3670_v0  ;;  %v3676_v24 = vsel %vm1708_vm13, %v3670_v0, %v14917_v25  ;;  %v11690_v3 = vrot.slane %v14920_v9, 2  ;;  %v7841_v6 = vld [vmem:[#allocation3 + $0x50] sm:$0xf]  ;;  %v8014_v42 = vld [vmem:[#allocation3 + $0x54] sm:$0xf] }
 0x389   : >> { %v3674_v8 = vsel %vm1708_vm13, %v14916_v50, %v3673_v39  ;;  %v3678_v62 = vsel %vm1708_vm13, %v3673_v39, %v14918_v15  ;;  %v11683_v57 = vadd.f32 %v3671_v59, %v3545_v53  ;;  %v11694_v1 = vrot.slane %v14922_v49, 2  ;;  %v8015_v53 = vld [vmem:[#allocation3 + $0x54] sm:$0xf0]  ;;  %v7843_v5 = vld [vmem:[#allocation3 + $0x58] sm:$0xf0]  ;;  %v14926_v39 = vld [vmem:[#allocation74_spill] sm:$0xff] }
 0x38a   : >> { %v11685_v63 = vadd.f32 %v3674_v8, %v3546_v38  ;;  %14921 = vst [vmem:[#allocation45_spill] sm:$0xff] %v11690_v3  ;;  %v11696_v10 = vadd.f32 %v3676_v24, %v3547_v37  ;;  %v11699_v38 = vadd.f32 %v3678_v62, %v3548_v54  ;;  %v11705_v61 = vpack.c.bf16 %v14926_v39, %v14925_v48  ;;  %v4454_v54 = vld [vmem:[#allocation2 + $0x118] sm:$0x11]  ;;  %v14927_v15 = vld [vmem:[#allocation75_spill] sm:$0xff]  ;;  %v14928_v62 = vld [vmem:[#allocation62_spill] sm:$0xff] }
 0x38b   : >> { %14923 = vst [vmem:[#allocation46_spill] sm:$0xff] %v11694_v1  ;;  %v7842_v11 = vor.u32 %v8015_v53, %v7841_v6  ;;  %v7846_v60 = vor.u32 %v8014_v42, %v7843_v5  ;;  %v11713_v24 = vrot.slane %v3781_v56, 2  ;;  %v11717_v9 = vpack.c.bf16 %v14928_v62, %v14927_v15 }
 0x38c   : >> { %v4378_v59 = vld [vmem:[#allocation2 + $0x110] sm:$0xff]  ;;  %v4461_v49 = vunpack.c.l.bf16 %v4454_v54  ;;  %v4462_v6 = vunpack.c.h.bf16 %v4454_v54  ;;  %v11720_v42 = vrot.slane %v3783_v55, 2  ;;  %v4870_v54 = vld [vmem:[#allocation2 + $0x118] sm:$0x11] }
 0x38d   : >> { %v11709_v8 = vunpack.c.l.bf16 %v4378_v59  ;;  %v11711_v25 = vunpack.c.h.bf16 %v4378_v59  ;;  %7338 = vmatmul.bf16.gmra.mxu2 %v7842_v11  ;;  %7968 = vmatmul.msk.bf16.gmra.mxu3 %vm7256_vm15, %v7846_v60  ;;  %v4876_v4 = vunpack.c.l.bf16 %v4870_v54  ;;  %v4877_v31 = vunpack.c.h.bf16 %v4870_v54 }
 0x38e   : >> { %v4485_v11 = vmul.f32 %v4461_v49, %v8784_v17  ;;  %v4486_v60 = vmul.f32 %v4462_v6, %v8786_v18  ;;  %v4653_v53 = vmul.f32 %v4461_v49, %v8806_v45  ;;  %v4654_v50 = vmul.f32 %v4462_v6, %v8808_v46 }
 0x38f   : >> { %v4409_v5 = vmul.f32 %v11709_v8, %v8744_v32  ;;  %v4410_v56 = vmul.f32 %v11711_v25, %v8746_v33  ;;  %v4483_v48 = vmul.f32 %v11709_v8, %v8784_v17  ;;  %v4484_v39 = vmul.f32 %v11711_v25, %v8786_v18 }
 0x390   : >> { %v4651_v55 = vmul.f32 %v11709_v8, %v8806_v45  ;;  %v4652_v59 = vmul.f32 %v11711_v25, %v8808_v46  ;;  %v4498_v0 = vpack.c.bf16 %v4486_v60, %v4485_v11  ;;  %v4822_v37 = vmul.f32 %v11709_v8, %v8772_v12 }
 0x391   : >> { %v11737_v15 = vpack.c.bf16 %v4410_v56, %v4409_v5  ;;  %v4497_v62 = vpack.c.bf16 %v4484_v39, %v4483_v48  ;;  %v4823_v1 = vmul.f32 %v11711_v25, %v8776_v13  ;;  %v4666_v56 = vpack.c.bf16 %v4654_v50, %v4653_v53 }
 0x392   : >> { %v4665_v29 = vpack.c.bf16 %v4652_v59, %v4651_v55  ;;  %v4521_v58 = vunpack.c.l.bf16 %v4498_v0  ;;  %v4522_v5 = vunpack.c.h.bf16 %v4498_v0  ;;  %v4894_v0 = vmul.f32 %v11709_v8, %v8790_v19 }
 0x393   : >> { %14929 = vst [vmem:[#allocation53_spill] sm:$0xff] %v11737_v15  ;;  %v4519_v3 = vunpack.c.l.bf16 %v4497_v62  ;;  %v4520_v14 = vunpack.c.h.bf16 %v4497_v62  ;;  %v11747_v39 = vpack.c.bf16 %v4823_v1, %v4822_v37  ;;  %v4689_v62 = vunpack.c.l.bf16 %v4666_v56  ;;  %v5286_v37 = vld [vmem:[#allocation2 + $0x118] sm:$0x11] }
 0x394   : >> { %v4687_v48 = vunpack.c.l.bf16 %v4665_v29  ;;  %v4688_v59 = vunpack.c.h.bf16 %v4665_v29  ;;  %v11754_v35 = vrot.slane %v4521_v58, 1  ;;  %v4690_v54 = vunpack.c.h.bf16 %v4666_v56 }
 0x395   : >> { %14930 = vst [vmem:[#allocation216_spill] sm:$0xff] %v11747_v39  ;;  %v11750_v60 = vrot.slane %v4519_v3, 1  ;;  %v11752_v55 = vrot.slane %v4520_v14, 1  ;;  %v4895_v50 = vmul.f32 %v11711_v25, %v8792_v20  ;;  %v11760_v53 = vrot.slane %v4522_v5, 1 }
 0x396   : >> { %14933 = vst [vmem:[#allocation89_spill] sm:$0xff] %v11754_v35  ;;  %v11762_v1 = vrot.slane %v4687_v48, 2  ;;  %v4896_v3 = vmul.f32 %v4876_v4, %v8790_v19  ;;  %v4897_v14 = vmul.f32 %v4877_v31, %v8792_v20  ;;  %v5062_v58 = vmul.f32 %v11709_v8, %v8810_v47 }
 0x397   : >> { %14931 = vst [vmem:[#allocation217_spill] sm:$0xff] %v11750_v60  ;;  %v11766_v29 = vpack.c.bf16 %v4895_v50, %v4894_v0  ;;  %v5063_v56 = vmul.f32 %v11711_v25, %v8814_v41  ;;  %v5064_v6 = vmul.f32 %v4876_v4, %v8810_v47  ;;  %v11773_v49 = vrot.slane %v4688_v59, 2 }
 0x398   : >> { %14932 = vst [vmem:[#allocation64_spill] sm:$0xff] %v11752_v55  ;;  %v11775_v5 = vrot.slane %v4689_v62, 2  ;;  %v4912_v48 = vpack.c.bf16 %v4897_v14, %v4896_v3  ;;  %v5065_v11 = vmul.f32 %v4877_v31, %v8814_v41  ;;  %v11784_v0 = vmul.f32 %v11709_v8, %v14472_v36 }
 0x399   : >> { %14934 = vst [vmem:[#allocation39_spill] sm:$0xff] %v11760_v53  ;;  %v11780_v15 = vpack.c.bf16 %v5063_v56, %v5062_v58  ;;  %v5291_v50 = vunpack.c.l.bf16 %v5286_v37  ;;  %v5292_v4 = vunpack.c.h.bf16 %v5286_v37  ;;  %v11790_v31 = vmul.f32 %v11711_v25, %v14474_v7 }
 0x39a   : >> { %14935 = vst [vmem:[#allocation18_spill] sm:$0xff] %v11762_v1  ;;  %v11778_v1 = vrot.slane %v4690_v54, 2  ;;  %v4932_v53 = vunpack.c.l.bf16 %v4912_v48  ;;  %v4933_v35 = vunpack.c.h.bf16 %v4912_v48  ;;  %v5080_v55 = vpack.c.bf16 %v5065_v11, %v5064_v6 }
 0x39b   : >> { %14936 = vst [vmem:[#allocation118_spill] sm:$0xff] %v11766_v29  ;;  %v11794_v54 = vmul.f32 %v11709_v8, %v8873_v21  ;;  %v11798_v14 = vmul.f32 %v11711_v25, %v14477_v27  ;;  %v5307_v6 = vmul.f32 %v5291_v50, %v8873_v21  ;;  %v11803_v11 = vmul.f32 %v11709_v8, %v14479_v23  ;;  %v14959_v29 = vld [vmem:[#allocation124_spill] sm:$0xff] }
 0x39c   : >> { %14937 = vst [vmem:[#allocation121_spill] sm:$0xff] %v11773_v49  ;;  %v5100_v3 = vunpack.c.l.bf16 %v5080_v55  ;;  %v11805_v37 = vrot.slane %v4932_v53, 1  ;;  %v11807_v58 = vrot.slane %v4933_v35, 1  ;;  %v5101_v56 = vunpack.c.h.bf16 %v5080_v55  ;;  %v1441_v53 = vld [vmem:[#allocation2 + $0x120] sm:$0xff] }
 0x39d   : >> { %14938 = vst [vmem:[#allocation36_spill] sm:$0xff] %v11775_v5  ;;  %v5308_v48 = vmul.f32 %v5292_v4, %v14477_v27  ;;  %v11812_v62 = vmul.f32 %v11711_v25, %v9038_v16  ;;  %v11815_v59 = vmul.f32 %v5291_v50, %v14479_v23  ;;  %v14951_v8 = vshrl.u32 %v11681_v30, 16  ;;  %v14954_v50 = vld [vmem:[#allocation129_spill] sm:$0xff] }
 0x39e   : >> { %14939 = vst [vmem:[#allocation22_spill] sm:$0xff] %v11778_v1  ;;  %v11818_v1 = vmul.f32 %v5292_v4, %v9038_v16  ;;  %v3839_v35 = vsel %vm1912_vm14, %v11713_v24, %v11720_v42  ;;  %v14952_v55 = vunpack.c.h.bf16 %v14919_v44  ;;  %v14953_v25 = vunpack.c.h.bf16 %v14924_v43 }
 0x39f   : >> { %14940 = vst [vmem:[#allocation21_spill] sm:$0xff] %v11780_v15  ;;  %v11822_v5 = vrot.slane %v14951_v8, 7  ;;  %v3844_v4 = vsel %vm1912_vm14, %v11720_v42, %v14954_v50  ;;  %v11834_v15 = vrot.slane %v5100_v3, 2  ;;  %v14956_v8 = vshll.u32 %v11681_v30, 16  ;;  %v14961_v42 = vld [vmem:[#allocation113_spill] sm:$0xff] }
 0x3a0   : >> { %14941 = vst [vmem:[#allocation41_spill] sm:$0xff] %v11784_v0  ;;  %v3840_v49 = vrot.slane %v14952_v55, 2  ;;  %v3841_v60 = vrot.slane %v14953_v25, 2  ;;  %v3883_v24 = vadd.f32 %v3844_v4, %v11696_v10  ;;  %v14957_v55 = vld [vmem:[#allocation72_spill] sm:$0xff]  ;;  %v14958_v25 = vld [vmem:[#allocation123_spill] sm:$0xff]  ;;  %v14962_v10 = vunpack.c.l.bf16 %v11705_v61 }
 0x3a1   : >> { %14942 = vst [vmem:[#allocation122_spill] sm:$0xff] %v11790_v31  ;;  %v3935_v39 = vpack.c.bf16 %v14959_v29, %v14958_v25 }
 0x3a2   : >> { %14943 = vst [vmem:[#allocation17_spill] sm:$0xff] %v11794_v54  ;;  %v3842_v44 = vsel %vm1912_vm14, %v3840_v49, %v3841_v60  ;;  %v3846_v43 = vsel %vm1912_vm14, %v3841_v60, %v14957_v55  ;;  %v11860_v60 = vpack.c.bf16 %v5308_v48, %v5307_v6 }
 0x3a3   : >> { %14944 = vst [vmem:[#allocation55_spill] sm:$0xff] %v11798_v14  ;;  %v3882_v50 = vadd.f32 %v3842_v44, %v11685_v63  ;;  %v3949_v55 = vunpack.c.h.bf16 %v3935_v39  ;;  %v4031_v44 = vunpack.c.h.bf16 %v11717_v9 }
 0x3a4   : >> { %14945 = vst [vmem:[#allocation44_spill] sm:$0xff] %v11803_v11 }
 0x3a5   : >> { %14946 = vst [vmem:[#allocation83_spill] sm:$0xff] %v11805_v37  ;;  %v3881_v37 = vadd.f32 %v3839_v35, %v11683_v57  ;;  %v3884_v57 = vadd.f32 %v3846_v43, %v11699_v38  ;;  %v11858_v35 = vrot.slane %v5101_v56, 2 }
 0x3a6   : >> { %14947 = vst [vmem:[#allocation127_spill] sm:$0xff] %v11807_v58  ;;  %v1231_v58 = vor.u32 %v14956_v8, %v11822_v5  ;;  %v3948_v8 = vunpack.c.l.bf16 %v3935_v39 }
 0x3a7   : >> { %14948 = vst [vmem:[#allocation125_spill] sm:$0xff] %v11812_v62  ;;  %v11856_v49 = vadd.f32 %v14962_v10, %v3881_v37 }
 0x3a8   : >> { %14949 = vst [vmem:[#allocation126_spill] sm:$0xff] %v11815_v59  ;;  %v1442_v30 = vsel %vm8724_vm7, %v1231_v58, %v1441_v53  ;;  %v14965_v58 = vunpack.c.h.bf16 %v11705_v61  ;;  %v4030_v53 = vunpack.c.l.bf16 %v11717_v9  ;;  %v3965_v59 = vadd.f32 %v3949_v55, %v3884_v57 }
 0x3a9   : >> { %14950 = vst [vmem:[#allocation128_spill] sm:$0xff] %v11818_v1  ;;  %v14960_v1 = vld [vmem:[#allocation101_spill] sm:$0xff]  ;;  %v4808_v29 = vunpack.c.l.bf16 %v1442_v30  ;;  %v4809_v4 = vunpack.c.h.bf16 %v1442_v30  ;;  %v4089_v57 = vrot.slane %v4031_v44, 1 }
 0x3aa   : >> { %14955 = vst [vmem:[#allocation49_spill] sm:$0xff] %v11834_v15  ;;  %v11848_v3 = vpack.c.bf16 %v14961_v42, %v14960_v1  ;;  %v11865_v63 = vadd.f32 %v14965_v58, %v3882_v50  ;;  %v3964_v15 = vadd.f32 %v3948_v8, %v3883_v24 }
 0x3ab   : >> { %14963 = vst [vmem:[#allocation209_spill] sm:$0xff] %v11858_v35  ;;  %v4824_v38 = vmul.f32 %v4808_v29, %v8772_v12  ;;  %v4825_v37 = vmul.f32 %v4809_v4, %v8776_v13  ;;  %v4898_v56 = vmul.f32 %v4808_v29, %v8790_v19  ;;  %v4899_v6 = vmul.f32 %v4809_v4, %v8792_v20 }
 0x3ac   : >> { %14964 = vst [vmem:[#allocation26_spill] sm:$0xff] %v11860_v60  ;;  %v11872_v48 = vmul.f32 %v4808_v29, %v14472_v36  ;;  %v4032_v39 = vunpack.c.l.bf16 %v11848_v3  ;;  %v11878_v43 = vmul.f32 %v4809_v4, %v14474_v7  ;;  %v5710_v25 = vmul.f32 %v4808_v29, %v8744_v32 }
 0x3ad   : >> { %1443 = vst [vmem:[#allocation2 + $0x120] sm:$0xff] %v1442_v30  ;;  %v4913_v61 = vpack.c.bf16 %v4899_v6, %v4898_v56  ;;  %v5711_v42 = vmul.f32 %v4809_v4, %v8746_v33  ;;  %v11883_v30 = vmul.f32 %v4808_v29, %v8873_v21  ;;  %v11886_v50 = vmul.f32 %v4809_v4, %v14477_v27 }
 0x3ae   : >> { %14966 = vst [vmem:[#allocation210_spill] sm:$0xff] %v11872_v48  ;;  %v5778_v10 = vmul.f32 %v4808_v29, %v8784_v17  ;;  %v5779_v9 = vmul.f32 %v4809_v4, %v8786_v18  ;;  %v11890_v58 = vpack.c.bf16 %v4825_v37, %v4824_v38  ;;  %v14972_v29 = vld [vmem:[#allocation155_spill] sm:$0xff] }
 0x3af   : >> { %14967 = vst [vmem:[#allocation48_spill] sm:$0xff] %v11878_v43  ;;  %v4934_v56 = vunpack.c.l.bf16 %v4913_v61  ;;  %v4935_v6 = vunpack.c.h.bf16 %v4913_v61  ;;  %v11892_v1 = vpack.c.bf16 %v5711_v42, %v5710_v25  ;;  %v4034_v60 = vunpack.c.l.bf16 %v14972_v29  ;;  %v14974_v25 = vld [vmem:[#allocation77_spill] sm:$0xff]  ;;  %v14975_v42 = vld [vmem:[#allocation79_spill] sm:$0xff] }
 0x3b0   : >> { %14968 = vst [vmem:[#allocation50_spill] sm:$0xff] %v11883_v30  ;;  %v11894_v48 = vpack.c.bf16 %v5779_v9, %v5778_v10  ;;  %v4033_v30 = vunpack.c.h.bf16 %v11848_v3  ;;  %v4035_v4 = vunpack.c.h.bf16 %v14972_v29  ;;  %v4086_v29 = vrot.slane %v4030_v53, 1 }
 0x3b1   : >> { %14969 = vst [vmem:[#allocation185_spill] sm:$0xff] %v11886_v50  ;;  %v11899_v38 = vrot.slane %v4934_v56, 1  ;;  %v11903_v10 = vrot.slane %v4935_v6, 1  ;;  %v4092_v3 = vrot.slane %v4034_v60, 1 }
 0x3b2   : >> { %14970 = vst [vmem:[#allocation47_spill] sm:$0xff] %v11890_v58  ;;  %v4180_v58 = vpack.c.bf16 %v14975_v42, %v14974_v25  ;;  %v5814_v8 = vunpack.c.l.bf16 %v11894_v48  ;;  %v4087_v42 = vrot.slane %v4032_v39, 1 }
 0x3b3   : >> { %14971 = vst [vmem:[#allocation51_spill] sm:$0xff] %v11892_v1  ;;  %v4094_v1 = vrot.slane %v4035_v4, 1 }
 0x3b4   : >> { %v5039_v35 = vld [vmem:[#allocation2 + $0x120] sm:$0xee]  ;;  %14973 = vst [vmem:[#allocation220_spill] sm:$0xff] %v11899_v38  ;;  %v4198_v53 = vunpack.c.l.bf16 %v4180_v58 }
 0x3b5   : >> { %v5455_v43 = vld [vmem:[#allocation2 + $0x120] sm:$0xee]  ;;  %v5046_v62 = vunpack.c.l.bf16 %v5039_v35  ;;  %v5047_v50 = vunpack.c.h.bf16 %v5039_v35  ;;  %14976 = vst [vmem:[#allocation52_spill] sm:$0xff] %v11903_v10 }
 0x3b6   : >> { %v5934_v11 = vld [vmem:[#allocation2 + $0x120] sm:$0xee]  ;;  %v5461_v37 = vunpack.c.l.bf16 %v5455_v43  ;;  %v5462_v61 = vunpack.c.h.bf16 %v5455_v43 }
 0x3b7   : >> { %v5066_v24 = vmul.f32 %v5046_v62, %v8810_v47  ;;  %v5067_v35 = vmul.f32 %v5047_v50, %v8814_v41  ;;  %v5938_v55 = vunpack.c.l.bf16 %v5934_v11  ;;  %v5939_v9 = vunpack.c.h.bf16 %v5934_v11  ;;  %v14979_v10 = vld [vmem:[#allocation114_spill] sm:$0xff] }
 0x3b8   : >> { %v11911_v56 = vmul.f32 %v5461_v37, %v14479_v23  ;;  %v11914_v43 = vmul.f32 %v5462_v61, %v9038_v16  ;;  %v4090_v50 = vrot.slane %v4033_v30, 1  ;;  %v14980_v11 = vld [vmem:[#allocation134_spill] sm:$0xff]  ;;  %v4088_v61 = vsel %vm1708_vm13, %v4086_v29, %v4087_v42  ;;  %v14986_v29 = vld [vmem:[#allocation28_spill] sm:$0xff] }
 0x3b9   : >> { %v5946_v62 = vmul.f32 %v5938_v55, %v8806_v45  ;;  %v5947_v25 = vmul.f32 %v5939_v9, %v8808_v46  ;;  %v4181_v38 = vpack.c.bf16 %v14980_v11, %v14979_v10  ;;  %v4093_v9 = vsel %vm1708_vm13, %v4087_v42, %v4092_v3 }
 0x3ba   : >> { %14977 = vst [vmem:[#allocation38_spill] sm:$0xff] %v11911_v56  ;;  %v14982_v56 = vld [vmem:[#allocation160_spill] sm:$0xff]  ;;  %v4091_v55 = vsel %vm1708_vm13, %v4089_v57, %v4090_v50  ;;  %v4095_v44 = vsel %vm1708_vm13, %v4090_v50, %v4094_v1  ;;  %v4130_v60 = vadd.f32 %v4088_v61, %v11856_v49  ;;  %v11930_v39 = vpack.c.bf16 %v5067_v35, %v5066_v24  ;;  %v764_v57 = vpop.f32.mrf.mxu0 }
 0x3bb   : >> { %14978 = vst [vmem:[#allocation81_spill] sm:$0xff] %v11914_v43  ;;  %v11921_v37 = vpack.c.bf16 %v5947_v25, %v5946_v62  ;;  %v14981_v43 = vld [vmem:[#allocation135_spill] sm:$0xff]  ;;  %v11932_v30 = vrot.slane %v5814_v8, 1  ;;  %v4131_v10 = vadd.f32 %v4091_v55, %v11865_v63  ;;  %v4201_v62 = vunpack.c.h.bf16 %v4181_v38  ;;  %v853_v25 = vpop.f32.mrf.mxu1  ;;  %v14985_v55 = vld [vmem:[#allocation86_spill] sm:$0xff] }
 0x3bc   : >> { %v4182_v6 = vpack.c.bf16 %v14982_v56, %v14981_v43  ;;  %14983 = vst [vmem:[#allocation82_spill] sm:$0xff] %v11930_v39  ;;  %v4199_v56 = vunpack.c.h.bf16 %v4180_v58  ;;  %v4200_v43 = vunpack.c.l.bf16 %v4181_v38  ;;  %v4132_v3 = vadd.f32 %v4093_v9, %v3964_v15 }
 0x3bd   : >> { %14984 = vst [vmem:[#allocation40_spill] sm:$0xff] %v11932_v30  ;;  %v4133_v42 = vadd.f32 %v4095_v44, %v3965_v59  ;;  %v4254_v49 = vrot.slane %v4198_v53, 2  ;;  %v4258_v8 = vrot.slane %v4201_v62, 2  ;;  %v765_v4 = vadd.f32 %v764_v57, %v8699_v51  ;;  %v14987_v59 = vld [vmem:[#allocation87_spill] sm:$0xff] }
 0x3be   : >> { %v4202_v1 = vunpack.c.l.bf16 %v4182_v6  ;;  %v4203_v50 = vunpack.c.h.bf16 %v4182_v6  ;;  %v4255_v24 = vrot.slane %v4200_v43, 2  ;;  %v4257_v35 = vrot.slane %v4199_v56, 2  ;;  %v14988_v6 = vld [vmem:[#allocation42_spill] sm:$0xff]  ;;  %v14990_v30 = vld [vmem:[#allocation71_spill] sm:$0xff] }
 0x3bf   : >> { %v854_v63 = vadd.f32 %v853_v25, %v8701_v52  ;;  %v3264_v15 = vsel %vm1708_vm13, %v14986_v29, %v14985_v55  ;;  %v3267_v53 = vsel %vm1708_vm13, %v14988_v6, %v14987_v59  ;;  %v922_v25 = vmax.f32 %v765_v4, 0.0 }
 0x3c0   : >> { %v4260_v11 = vrot.slane %v4202_v1, 2  ;;  %v4262_v61 = vrot.slane %v4203_v50, 2  ;;  %v4256_v58 = vsel %vm1912_vm14, %v4254_v49, %v4255_v24  ;;  %v4259_v38 = vsel %vm1912_vm14, %v4257_v35, %v4258_v8  ;;  %v14989_v35 = vld [vmem:[#allocation59_spill] sm:$0xff] }
 0x3c1   : >> { %v4298_v56 = vadd.f32 %v4256_v58, %v4130_v60  ;;  %v4299_v43 = vadd.f32 %v4259_v38, %v4131_v10  ;;  %v923_v1 = vmax.f32 %v854_v63, 0.0  ;;  %v3269_v29 = vsel %vm1708_vm13, %v14985_v55, %v14989_v35 }
 0x3c2   : >> { %v4261_v9 = vsel %vm1912_vm14, %v4255_v24, %v4260_v11  ;;  %v4263_v44 = vsel %vm1912_vm14, %v4258_v8, %v4262_v61  ;;  %v3271_v24 = vsel %vm1708_vm13, %v14987_v59, %v14990_v30  ;;  %v986_v10 = vmin.f32 %v922_v25, 6.0  ;;  %v14991_v11 = vld [vmem:[#allocation23_spill] sm:$0xff]  ;;  %v14997_v25 = vld [vmem:[#allocation70_spill] sm:$0xff] }
 0x3c3   : >> { %v4300_v62 = vadd.f32 %v4261_v9, %v4132_v3  ;;  %v4301_v57 = vadd.f32 %v4263_v44, %v4133_v42  ;;  %v4314_v50 = vadd.f32 %v4298_v56, %v9956_v40  ;;  %v4315_v49 = vadd.f32 %v4299_v43, %v14705_v2  ;;  %v14994_v44 = vld [vmem:[#allocation84_spill] sm:$0xff] }
 0x3c4   : >> { %v987_v3 = vmin.f32 %v923_v1, 6.0  ;;  %v14992_v61 = vunpack.c.l.bf16 %v14991_v11  ;;  %v14993_v58 = vunpack.c.h.bf16 %v14991_v11  ;;  %v14995_v56 = vunpack.c.l.bf16 %v14994_v44  ;;  %v14998_v1 = vld [vmem:[#allocation35_spill] sm:$0xff] }
 0x3c5   : >> { %v4316_v8 = vadd.f32 %v4300_v62, %v9956_v40  ;;  %v4317_v60 = vadd.f32 %v4301_v57, %v14705_v2  ;;  %v4330_v4 = vmax.f32 %v4314_v50, 0.0  ;;  %v4331_v42 = vmax.f32 %v4315_v49, 0.0 }
 0x3c6   : >> { %v3300_v63 = vadd.f32 %v3264_v15, %v14992_v61  ;;  %v3301_v38 = vadd.f32 %v3267_v53, %v14993_v58  ;;  %v1027_v9 = vpack.c.bf16 %v987_v3, %v986_v10  ;;  %v3302_v30 = vadd.f32 %v3269_v29, %v14995_v56  ;;  %v15001_v3 = vld [vmem:[#allocation98_spill] sm:$0xff]  ;;  %v15003_v56 = vld [vmem:[#allocation73_spill] sm:$0xff] }
 0x3c7   : >> { %v4332_v6 = vmax.f32 %v4316_v8, 0.0  ;;  %v4333_v55 = vmax.f32 %v4317_v60, 0.0  ;;  %v4346_v59 = vmin.f32 %v4330_v4, 6.0  ;;  %v4347_v43 = vmin.f32 %v4331_v42, 6.0  ;;  %v14999_v8 = vld [vmem:[#allocation78_spill] sm:$0xff]  ;;  %v15000_v60 = vld [vmem:[#allocation57_spill] sm:$0xff] }
 0x3c8   : >> { %v14996_v62 = vunpack.c.h.bf16 %v14994_v44  ;;  %v3432_v50 = vsel %vm1912_vm14, %v14998_v1, %v14997_v25  ;;  %v1234_v35 = vshrl.u32 %v1027_v9, 16  ;;  %v1237_v11 = vshll.u32 %v1027_v9, 16  ;;  %v15002_v4 = vld [vmem:[#allocation99_spill] sm:$0xff]  ;;  %v15004_v1 = vld [vmem:[#allocation96_spill] sm:$0xff] }
 0x3c9   : >> { %v4348_v49 = vmin.f32 %v4332_v6, 6.0  ;;  %v4349_v15 = vmin.f32 %v4333_v55, 6.0  ;;  %v4358_v53 = vpack.c.bf16 %v4347_v43, %v4346_v59  ;;  %v3435_v10 = vsel %vm1912_vm14, %v15000_v60, %v14999_v8  ;;  %v1445_v55 = vld [vmem:[#allocation2 + $0x130] sm:$0x11] }
 0x3ca   : >> { %v3303_v57 = vadd.f32 %v3271_v24, %v14996_v62  ;;  %v3437_v29 = vsel %vm1912_vm14, %v14997_v25, %v15001_v3  ;;  %v3439_v24 = vsel %vm1912_vm14, %v14999_v8, %v15002_v4  ;;  %v1236_v61 = vrot.slane %v1234_v35, 7 }
 0x3cb   : >> { %v4359_v42 = vpack.c.bf16 %v4349_v15, %v4348_v49  ;;  %v3468_v58 = vadd.f32 %v3432_v50, %v3300_v63  ;;  %v3469_v6 = vadd.f32 %v3435_v10, %v3301_v38  ;;  %4366 = vst.msk [vmem:[#allocation3 + $0x60] sm:$0xff] %vm8519_vm2, %v4358_v53  ;;  %v3470_v9 = vadd.f32 %v3437_v29, %v3302_v30  ;;  %v767_v38 = vpop.f32.mrf.mxu0  ;;  %v856_v50 = vpop.f32.mrf.mxu1  ;;  %v15005_v53 = vld [vmem:[#allocation120_spill] sm:$0xff] }
 0x3cc   : >> { %v3471_v44 = vadd.f32 %v3439_v24, %v3303_v57  ;;  %v3533_v59 = vunpack.c.l.bf16 %v15003_v56  ;;  %v3534_v43 = vunpack.c.h.bf16 %v15003_v56  ;;  %v1239_v62 = vor.u32 %v1237_v11, %v1236_v61 }
 0x3cd   : >> { %4367 = vst.msk [vmem:[#allocation3 + $0x68] sm:$0xff] %vm8519_vm2, %v4359_v42  ;;  %v1241_v25 = vrot.slane %v1236_v61, 4  ;;  %v3535_v49 = vunpack.c.l.bf16 %v15004_v1  ;;  %v3536_v63 = vunpack.c.h.bf16 %v15004_v1  ;;  %v15006_v30 = vunpack.c.l.bf16 %v15005_v53  ;;  %v15009_v61 = vld [vmem:[#allocation76_spill] sm:$0xff] }
 0x3ce   : >> { %v3549_v15 = vadd.f32 %v3533_v59, %v3468_v58  ;;  %v3550_v35 = vadd.f32 %v3534_v43, %v3469_v6  ;;  %v15007_v8 = vunpack.c.h.bf16 %v15005_v53  ;;  %v15008_v10 = vrot.slane %v11822_v5, 4  ;;  %v15010_v6 = vld [vmem:[#allocation65_spill] sm:$0xff]  ;;  %v15011_v43 = vld [vmem:[#allocation131_spill] sm:$0xff] }
 0x3cf   : >> { %v3680_v57 = vrot.slane %v15006_v30, 1  ;;  %v1446_v3 = vsel %vm8542_vm10, %v1241_v25, %v1445_v55  ;;  %v768_v29 = vadd.f32 %v767_v38, %v8699_v51  ;;  %v857_v4 = vadd.f32 %v856_v50, %v8701_v52  ;;  %v15013_v30 = vld [vmem:[#allocation66_spill] sm:$0xff] }
 0x3d0   : >> { %v3683_v60 = vrot.slane %v15007_v8, 1  ;;  %v1240_v11 = vsel %vm8765_vm9, %v15008_v10, %v1239_v62  ;;  %v3551_v24 = vadd.f32 %v3535_v49, %v3470_v9  ;;  %v3552_v42 = vadd.f32 %v3536_v63, %v3471_v44  ;;  %1447 = vst [vmem:[#allocation2 + $0x130] sm:$0x11] %v1446_v3  ;;  %v15012_v62 = vld [vmem:[#allocation132_spill] sm:$0xff] }
 0x3d1   : >> { %1444 = vst.msk [vmem:[#allocation2 + $0x128] sm:$0xff] %vm8519_vm2, %v1240_v11  ;;  %v3681_v58 = vsel %vm1708_vm13, %v15009_v61, %v3680_v57  ;;  %v924_v56 = vmax.f32 %v768_v29, 0.0  ;;  %v925_v59 = vmax.f32 %v857_v4, 0.0  ;;  %v3686_v55 = vsel %vm1708_vm13, %v3680_v57, %v15011_v43  ;;  %v15017_v4 = vld [vmem:[#allocation95_spill] sm:$0xff] }
 0x3d2   : >> { %v3684_v5 = vsel %vm1708_vm13, %v15010_v6, %v3683_v60  ;;  %v3688_v25 = vsel %vm1708_vm13, %v3683_v60, %v15012_v62  ;;  %v12009_v1 = vadd.f32 %v3681_v58, %v3549_v15  ;;  %v12013_v9 = vadd.f32 %v3686_v55, %v3551_v24  ;;  %v7849_v49 = vld [vmem:[#allocation3 + $0x60] sm:$0xf]  ;;  %v8016_v63 = vld [vmem:[#allocation3 + $0x64] sm:$0xf] }
 0x3d3   : >> { %v12011_v38 = vadd.f32 %v3684_v5, %v3550_v35  ;;  %v12015_v44 = vadd.f32 %v3688_v25, %v3552_v42  ;;  %v988_v50 = vmin.f32 %v924_v56, 6.0  ;;  %v989_v53 = vmin.f32 %v925_v59, 6.0  ;;  %v15016_v35 = vld [vmem:[#allocation97_spill] sm:$0xff]  ;;  %v15019_v5 = vld [vmem:[#allocation110_spill] sm:$0xff] }
 0x3d4   : >> { %v3787_v8 = vunpack.c.l.bf16 %v15013_v30  ;;  %v3788_v10 = vunpack.c.h.bf16 %v15013_v30  ;;  %v15014_v57 = vunpack.c.h.bf16 %v11894_v48  ;;  %v8017_v15 = vld [vmem:[#allocation3 + $0x64] sm:$0xf0]  ;;  %v7851_v60 = vld [vmem:[#allocation3 + $0x68] sm:$0xf0]  ;;  %v3789_v3 = vunpack.c.l.bf16 %v15016_v35 }
 0x3d5   : >> { %v3790_v29 = vunpack.c.h.bf16 %v15016_v35  ;;  %v15018_v24 = vld [vmem:[#allocation109_spill] sm:$0xff]  ;;  %v7850_v61 = vor.u32 %v8017_v15, %v7849_v49  ;;  %v7854_v58 = vor.u32 %v8016_v63, %v7851_v60  ;;  %v12029_v6 = vpack.c.bf16 %v989_v53, %v988_v50 }
 0x3d6   : >> { %v12021_v11 = vrot.slane %v15014_v57, 1  ;;  %v12027_v42 = vpack.c.bf16 %v15018_v24, %v15017_v4  ;;  %v15020_v56 = vld [vmem:[#allocation61_spill] sm:$0xff]  ;;  %v15021_v48 = vunpack.c.l.bf16 %v11921_v37  ;;  %v15023_v55 = vunpack.c.h.bf16 %v11921_v37 }
 0x3d7   : >> { %v12033_v59 = vpack.c.bf16 %v15020_v56, %v15019_v5  ;;  %v3847_v25 = vrot.slane %v3787_v8, 2  ;;  %v12043_v30 = vrot.slane %v3789_v3, 2  ;;  %7343 = vmatmul.bf16.gmra.mxu2 %v7850_v61  ;;  %7969 = vmatmul.msk.bf16.gmra.mxu3 %vm7256_vm15, %v7854_v58  ;;  %v3850_v50 = vrot.slane %v3788_v10, 2  ;;  %v4871_v35 = vld [vmem:[#allocation2 + $0x130] sm:$0x11] }
 0x3d8   : >> { %15015 = vst [vmem:[#allocation58_spill] sm:$0xff] %v12021_v11  ;;  %v12037_v43 = vrot.slane %v15021_v48, 2  ;;  %v12041_v62 = vrot.slane %v15023_v55, 2  ;;  %v4795_v49 = vld [vmem:[#allocation2 + $0x128] sm:$0xff]  ;;  %v12047_v53 = vrot.slane %v3790_v29, 2  ;;  %v4878_v3 = vunpack.c.l.bf16 %v4871_v35 }
 0x3d9   : >> { %v4810_v15 = vunpack.c.l.bf16 %v4795_v49  ;;  %v4811_v60 = vunpack.c.h.bf16 %v4795_v49  ;;  %v4879_v4 = vunpack.c.h.bf16 %v4871_v35  ;;  %v12052_v24 = vld [vmem:[#allocation2 + $0x130] sm:$0x11]  ;;  %v12056_v61 = vsel %vm1912_vm14, %v3847_v25, %v12043_v30 }
 0x3da   : >> { %15022 = vst [vmem:[#allocation69_spill] sm:$0xff] %v12037_v43  ;;  %v4902_v48 = vmul.f32 %v4878_v3, %v8790_v19  ;;  %v5070_v10 = vmul.f32 %v4878_v3, %v8810_v47  ;;  %v5293_v57 = vunpack.c.l.bf16 %v12052_v24  ;;  %v12077_v43 = vsel %vm1912_vm14, %v3850_v50, %v12047_v53 }
 0x3db   : >> { %15024 = vst [vmem:[#allocation29_spill] sm:$0xff] %v12041_v62  ;;  %v4826_v29 = vmul.f32 %v4810_v15, %v8772_v12  ;;  %v4827_v58 = vmul.f32 %v4811_v60, %v8776_v13  ;;  %v4900_v5 = vmul.f32 %v4810_v15, %v8790_v19  ;;  %v4901_v56 = vmul.f32 %v4811_v60, %v8792_v20 }
 0x3dc   : >> { %v4903_v55 = vmul.f32 %v4879_v4, %v8792_v20  ;;  %v5068_v49 = vmul.f32 %v4810_v15, %v8810_v47  ;;  %v5069_v35 = vmul.f32 %v4811_v60, %v8814_v41  ;;  %v5071_v8 = vmul.f32 %v4879_v4, %v8814_v41 }
 0x3dd   : >> { %v12067_v25 = vpack.c.bf16 %v4901_v56, %v4900_v5  ;;  %v12072_v37 = vpack.c.bf16 %v4827_v58, %v4826_v29  ;;  %v14082_v62 = vunpack.c.h.bf16 %v12052_v24  ;;  %v12082_v5 = vmul.f32 %v4810_v15, %v14472_v36 }
 0x3de   : >> { %v4915_v63 = vpack.c.bf16 %v4903_v55, %v4902_v48  ;;  %v12079_v11 = vpack.c.bf16 %v5069_v35, %v5068_v49  ;;  %v5083_v39 = vpack.c.bf16 %v5071_v8, %v5070_v10  ;;  %v12085_v3 = vmul.f32 %v4811_v60, %v14474_v7  ;;  %v5766_v10 = vld [vmem:[#allocation2 + $0x130] sm:$0x11] }
 0x3df   : >> { %15025 = vst [vmem:[#allocation43_spill] sm:$0xff] %v12067_v25  ;;  %v12090_v55 = vmul.f32 %v4810_v15, %v8873_v21  ;;  %v12093_v50 = vmul.f32 %v4811_v60, %v14477_v27  ;;  %v5313_v8 = vmul.f32 %v5293_v57, %v8873_v21  ;;  %v5314_v4 = vmul.f32 %v14082_v62, %v14477_v27 }
 0x3e0   : >> { %15026 = vst [vmem:[#allocation102_spill] sm:$0xff] %v12072_v37  ;;  %v4938_v58 = vunpack.c.l.bf16 %v4915_v63  ;;  %v4939_v56 = vunpack.c.h.bf16 %v4915_v63  ;;  %v5106_v48 = vunpack.c.l.bf16 %v5083_v39  ;;  %v5107_v35 = vunpack.c.h.bf16 %v5083_v39 }
 0x3e1   : >> { %15027 = vst [vmem:[#allocation103_spill] sm:$0xff] %v12079_v11  ;;  %v12102_v29 = vmul.f32 %v4810_v15, %v14479_v23  ;;  %v12109_v25 = vmul.f32 %v4811_v60, %v9038_v16  ;;  %v12112_v37 = vmul.f32 %v5293_v57, %v14479_v23  ;;  %v5713_v39 = vmul.f32 %v4811_v60, %v8746_v33 }
 0x3e2   : >> { %15028 = vst [vmem:[#allocation67_spill] sm:$0xff] %v12082_v5  ;;  %v12096_v49 = vrot.slane %v4938_v58, 1  ;;  %v12104_v63 = vrot.slane %v4939_v56, 1  ;;  %v12106_v11 = vrot.slane %v5106_v48, 2  ;;  %v5712_v58 = vmul.f32 %v4810_v15, %v8744_v32 }
 0x3e3   : >> { %15029 = vst [vmem:[#allocation117_spill] sm:$0xff] %v12085_v3  ;;  %v5780_v62 = vmul.f32 %v4810_v15, %v8784_v17  ;;  %v5948_v56 = vmul.f32 %v4810_v15, %v8806_v45  ;;  %v5949_v48 = vmul.f32 %v4811_v60, %v8808_v46  ;;  %v15038_v3 = vshrl.u32 %v12029_v6, 16 }
 0x3e4   : >> { %15030 = vst [vmem:[#allocation56_spill] sm:$0xff] %v12090_v55  ;;  %v12128_v14 = vrot.slane %v5107_v35, 2  ;;  %v12130_v15 = vpack.c.bf16 %v5314_v4, %v5313_v8 }
 0x3e5   : >> { %15031 = vst [vmem:[#allocation74_spill] sm:$0xff] %v12093_v50  ;;  %v5771_v50 = vunpack.c.h.bf16 %v5766_v10  ;;  %v12126_v5 = vrot.slane %v15038_v3, 7 }
 0x3e6   : >> { %15032 = vst [vmem:[#allocation75_spill] sm:$0xff] %v12096_v49  ;;  %v5770_v49 = vunpack.c.l.bf16 %v5766_v10  ;;  %v5971_v10 = vpack.c.bf16 %v5949_v48, %v5948_v56  ;;  %v1448_v48 = vld [vmem:[#allocation2 + $0x138] sm:$0xff] }
 0x3e7   : >> { %15033 = vst [vmem:[#allocation62_spill] sm:$0xff] %v12102_v29  ;;  %v5781_v29 = vmul.f32 %v4811_v60, %v8786_v18  ;;  %v5783_v57 = vmul.f32 %v5771_v50, %v8786_v18  ;;  %v5951_v55 = vmul.f32 %v5771_v50, %v8808_v46  ;;  %v15041_v50 = vshll.u32 %v12029_v6, 16 }
 0x3e8   : >> { %15034 = vst [vmem:[#allocation129_spill] sm:$0xff] %v12104_v63  ;;  %v5782_v63 = vmul.f32 %v5770_v49, %v8784_v17  ;;  %v5984_v0 = vunpack.c.l.bf16 %v5971_v10 }
 0x3e9   : >> { %15035 = vst [vmem:[#allocation72_spill] sm:$0xff] %v12106_v11  ;;  %v5727_v11 = vpack.c.bf16 %v5713_v39, %v5712_v58  ;;  %v1248_v56 = vor.u32 %v15041_v50, %v12126_v5  ;;  %v15050_v50 = vld [vmem:[#allocation151_spill] sm:$0xff] }
 0x3ea   : >> { %15036 = vst [vmem:[#allocation123_spill] sm:$0xff] %v12109_v25  ;;  %v5803_v25 = vpack.c.bf16 %v5781_v29, %v5780_v62  ;;  %v5804_v58 = vpack.c.bf16 %v5783_v57, %v5782_v63  ;;  %v5985_v29 = vunpack.c.h.bf16 %v5971_v10 }
 0x3eb   : >> { %15037 = vst [vmem:[#allocation124_spill] sm:$0xff] %v12112_v37  ;;  %v5950_v37 = vmul.f32 %v5770_v49, %v8806_v45  ;;  %v5736_v60 = vunpack.c.l.bf16 %v5727_v11  ;;  %v5737_v57 = vunpack.c.h.bf16 %v5727_v11  ;;  %v1449_v6 = vsel %vm8724_vm7, %v1248_v56, %v1448_v48 }
 0x3ec   : >> { %15039 = vst [vmem:[#allocation101_spill] sm:$0xff] %v12128_v14  ;;  %v5816_v39 = vunpack.c.l.bf16 %v5803_v25  ;;  %v5817_v54 = vunpack.c.h.bf16 %v5803_v25  ;;  %v5818_v49 = vunpack.c.l.bf16 %v5804_v58  ;;  %v5819_v62 = vunpack.c.h.bf16 %v5804_v58 }
 0x3ed   : >> { %15040 = vst [vmem:[#allocation113_spill] sm:$0xff] %v12130_v15  ;;  %v5972_v31 = vpack.c.bf16 %v5951_v55, %v5950_v37  ;;  %v12142_v37 = vrot.slane %v5984_v0, 2  ;;  %v12144_v55 = vrot.slane %v5985_v29, 2  ;;  %v15046_v0 = vunpack.c.h.bf16 %v12052_v24 }
 0x3ee   : >> { %v12138_v3 = vrot.slane %v5816_v39, 1  ;;  %v12140_v4 = vrot.slane %v5817_v54, 1  ;;  %v5868_v63 = vrot.slane %v5818_v49, 1  ;;  %v5870_v25 = vrot.slane %v5819_v62, 1  ;;  %1450 = vst [vmem:[#allocation2 + $0x138] sm:$0xff] %v1449_v6 }
 0x3ef   : >> { %v5986_v8 = vunpack.c.l.bf16 %v5972_v31  ;;  %v5987_v35 = vunpack.c.h.bf16 %v5972_v31  ;;  %15044 = vst [vmem:[#allocation79_spill] sm:$0xff] %v12142_v37  ;;  %v5225_v31 = vunpack.c.l.bf16 %v1449_v6  ;;  %v5226_v49 = vunpack.c.h.bf16 %v1449_v6 }
 0x3f0   : >> { %15042 = vst [vmem:[#allocation155_spill] sm:$0xff] %v12138_v3  ;;  %v5869_v39 = vsel %vm1708_vm13, %v12138_v3, %v5868_v63  ;;  %v5871_v54 = vsel %vm1708_vm13, %v12140_v4, %v5870_v25  ;;  %v12155_v62 = vmul.f32 %v15046_v0, %v9038_v16  ;;  %v3854_v56 = vsel %vm1912_vm14, %v12043_v30, %v15050_v50  ;;  %v15063_v3 = vld [vmem:[#allocation149_spill] sm:$0xff] }
 0x3f1   : >> { %15043 = vst [vmem:[#allocation77_spill] sm:$0xff] %v12140_v4  ;;  %v6036_v10 = vrot.slane %v5986_v8, 2  ;;  %v6038_v58 = vrot.slane %v5987_v35, 2  ;;  %v12157_v11 = vadd.f32 %v5869_v39, %v5736_v60  ;;  %v12159_v29 = vadd.f32 %v5871_v54, %v5737_v57 }
 0x3f2   : >> { %15045 = vst [vmem:[#allocation114_spill] sm:$0xff] %v12144_v55  ;;  %v12174_v35 = vmul.f32 %v5225_v31, %v14472_v36  ;;  %v5714_v60 = vmul.f32 %v5225_v31, %v8744_v32  ;;  %v5715_v63 = vmul.f32 %v5226_v49, %v8746_v33  ;;  %v5784_v25 = vmul.f32 %v5225_v31, %v8784_v17 }
 0x3f3   : >> { %15047 = vst [vmem:[#allocation134_spill] sm:$0xff] %v12155_v62  ;;  %v12166_v48 = vsel %vm1912_vm14, %v12142_v37, %v6036_v10  ;;  %v12170_v8 = vsel %vm1912_vm14, %v12144_v55, %v6038_v58  ;;  %v5785_v30 = vmul.f32 %v5226_v49, %v8786_v18  ;;  %v6127_v57 = vmul.f32 %v5225_v31, %v8772_v12 }
 0x3f4   : >> { %15048 = vst [vmem:[#allocation135_spill] sm:$0xff] %v12157_v11  ;;  %v6128_v10 = vmul.f32 %v5226_v49, %v8776_v13  ;;  %v6195_v58 = vmul.f32 %v5225_v31, %v8790_v19  ;;  %v6196_v6 = vmul.f32 %v5226_v49, %v8792_v20  ;;  %v12185_v39 = vmul.f32 %v5226_v49, %v14474_v7 }
 0x3f5   : >> { %15049 = vst [vmem:[#allocation160_spill] sm:$0xff] %v12159_v29  ;;  %v12187_v54 = vpack.c.bf16 %v5715_v63, %v5714_v60  ;;  %v5805_v0 = vpack.c.bf16 %v5785_v30, %v5784_v25  ;;  %v3885_v50 = vadd.f32 %v12056_v61, %v12009_v1  ;;  %v12192_v24 = vmul.f32 %v5225_v31, %v8873_v21  ;;  %v12202_v55 = vld [vmem:[#allocation2 + $0x138] sm:$0xee] }
 0x3f6   : >> { %15051 = vst [vmem:[#allocation86_spill] sm:$0xff] %v12166_v48  ;;  %v3886_v29 = vadd.f32 %v12077_v43, %v12011_v38  ;;  %v3887_v48 = vadd.f32 %v3854_v56, %v12013_v9  ;;  %v12200_v11 = vmul.f32 %v5226_v49, %v14477_v27  ;;  %v5935_v25 = vld [vmem:[#allocation2 + $0x138] sm:$0xee]  ;;  %v6219_v30 = vpack.c.bf16 %v6196_v6, %v6195_v58  ;;  %v15062_v43 = vld [vmem:[#allocation136_spill] sm:$0xff] }
 0x3f7   : >> { %15052 = vst [vmem:[#allocation28_spill] sm:$0xff] %v12170_v8  ;;  %v12194_v8 = vpack.c.bf16 %v6128_v10, %v6127_v57  ;;  %v5820_v60 = vunpack.c.l.bf16 %v5805_v0  ;;  %v5821_v63 = vunpack.c.h.bf16 %v5805_v0  ;;  %v5940_v61 = vunpack.c.l.bf16 %v5935_v25  ;;  %v6351_v57 = vld [vmem:[#allocation2 + $0x138] sm:$0xee] }
 0x3f8   : >> { %15053 = vst [vmem:[#allocation87_spill] sm:$0xff] %v12174_v35  ;;  %v5941_v31 = vunpack.c.h.bf16 %v5935_v25  ;;  %v15059_v10 = vld [vmem:[#allocation154_spill] sm:$0xff]  ;;  %v6231_v1 = vunpack.c.l.bf16 %v6219_v30  ;;  %v6232_v37 = vunpack.c.h.bf16 %v6219_v30  ;;  %v6355_v4 = vunpack.c.l.bf16 %v6351_v57 }
 0x3f9   : >> { %15054 = vst [vmem:[#allocation42_spill] sm:$0xff] %v12185_v39  ;;  %v3856_v38 = vsel %vm1912_vm14, %v12047_v53, %v15059_v10  ;;  %v12211_v56 = vrot.slane %v5820_v60, 1  ;;  %v12213_v0 = vrot.slane %v5821_v63, 1  ;;  %v5952_v58 = vmul.f32 %v5940_v61, %v8806_v45 }
 0x3fa   : >> { %15055 = vst [vmem:[#allocation59_spill] sm:$0xff] %v12187_v54  ;;  %v5953_v6 = vmul.f32 %v5941_v31, %v8808_v46  ;;  %v6356_v53 = vunpack.c.h.bf16 %v6351_v57  ;;  %v3888_v9 = vadd.f32 %v3856_v38, %v12015_v44  ;;  %v3937_v49 = vpack.c.bf16 %v15063_v3, %v15062_v43  ;;  %v15067_v38 = vld [vmem:[#allocation137_spill] sm:$0xff]  ;;  %v15068_v43 = vld [vmem:[#allocation152_spill] sm:$0xff] }
 0x3fb   : >> { %15056 = vst [vmem:[#allocation71_spill] sm:$0xff] %v12192_v24  ;;  %v15064_v60 = vunpack.c.l.bf16 %v12027_v42  ;;  %v12224_v61 = vrot.slane %v6231_v1, 1  ;;  %v6363_v31 = vmul.f32 %v6355_v4, %v8810_v47  ;;  %v15066_v44 = vunpack.c.h.bf16 %v12027_v42  ;;  %v15078_v42 = vld [vmem:[#allocation141_spill] sm:$0xff] }
 0x3fc   : >> { %15057 = vst [vmem:[#allocation23_spill] sm:$0xff] %v12194_v8  ;;  %v5973_v10 = vpack.c.bf16 %v5953_v6, %v5952_v58  ;;  %v6364_v25 = vmul.f32 %v6356_v53, %v8814_v41  ;;  %v3952_v57 = vunpack.c.l.bf16 %v3937_v49  ;;  %v3953_v58 = vunpack.c.h.bf16 %v3937_v49 }
 0x3fd   : >> { %15058 = vst [vmem:[#allocation84_spill] sm:$0xff] %v12200_v11  ;;  %v3966_v63 = vadd.f32 %v15064_v60, %v3885_v50  ;;  %v3967_v3 = vadd.f32 %v15066_v44, %v3886_v29  ;;  %v4016_v50 = vpack.c.bf16 %v15068_v43, %v15067_v38  ;;  %v4037_v60 = vunpack.c.h.bf16 %v12033_v59  ;;  %v15072_v29 = vld [vmem:[#allocation144_spill] sm:$0xff] }
 0x3fe   : >> { %15060 = vst [vmem:[#allocation70_spill] sm:$0xff] %v12211_v56  ;;  %v5988_v30 = vunpack.c.l.bf16 %v5973_v10  ;;  %v12228_v6 = vpack.c.bf16 %v6364_v25, %v6363_v31  ;;  %v12239_v4 = vrot.slane %v6232_v37, 1  ;;  %v3968_v53 = vadd.f32 %v3952_v57, %v3887_v48 }
 0x3ff   : >> { %15061 = vst [vmem:[#allocation35_spill] sm:$0xff] %v12213_v0  ;;  %v5989_v0 = vunpack.c.h.bf16 %v5973_v10  ;;  %v3969_v49 = vadd.f32 %v3953_v58, %v3888_v9  ;;  %v4038_v25 = vunpack.c.l.bf16 %v4016_v50  ;;  %v4039_v31 = vunpack.c.h.bf16 %v4016_v50  ;;  %v15075_v9 = vld [vmem:[#allocation111_spill] sm:$0xff]  ;;  %v15076_v58 = vld [vmem:[#allocation100_spill] sm:$0xff] }
 0x400   : >> { %15065 = vst [vmem:[#allocation78_spill] sm:$0xff] %v12224_v61  ;;  %v12235_v1 = vrot.slane %v5988_v30, 2  ;;  %v6399_v10 = vunpack.c.l.bf16 %v12228_v6  ;;  %v4040_v44 = vunpack.c.l.bf16 %v15072_v29  ;;  %v4041_v38 = vunpack.c.h.bf16 %v15072_v29 }
 0x401   : >> { %v12237_v54 = vrot.slane %v5989_v0, 2  ;;  %15071 = vst [vmem:[#allocation99_spill] sm:$0xff] %v12239_v4  ;;  %v15073_v43 = vunpack.c.l.bf16 %v12033_v59  ;;  %v4097_v37 = vrot.slane %v4038_v25, 1  ;;  %v4100_v48 = vrot.slane %v4039_v31, 1  ;;  %v15077_v4 = vld [vmem:[#allocation153_spill] sm:$0xff]  ;;  %v15079_v59 = vld [vmem:[#allocation170_spill] sm:$0xff] }
 0x402   : >> { %15069 = vst [vmem:[#allocation57_spill] sm:$0xff] %v12235_v1  ;;  %v769_v1 = vpop.f32.mrf.mxu0  ;;  %v12247_v0 = vrot.slane %v6399_v10, 2  ;;  %v4102_v57 = vrot.slane %v4040_v44, 1  ;;  %v4104_v56 = vrot.slane %v4041_v38, 1  ;;  %v4183_v50 = vpack.c.bf16 %v15076_v58, %v15075_v9  ;;  %v858_v38 = vpop.f32.mrf.mxu1 }
 0x403   : >> { %15070 = vst [vmem:[#allocation98_spill] sm:$0xff] %v12237_v54  ;;  %v4096_v30 = vrot.slane %v15073_v43, 1  ;;  %v4099_v54 = vrot.slane %v4037_v60, 1  ;;  %v4184_v61 = vpack.c.bf16 %v15078_v42, %v15077_v4  ;;  %v15080_v43 = vld [vmem:[#allocation171_spill] sm:$0xff]  ;;  %v770_v10 = vadd.f32 %v769_v1, %v8699_v51 }
 0x404   : >> { %15074 = vst [vmem:[#allocation73_spill] sm:$0xff] %v12247_v0  ;;  %v4185_v14 = vpack.c.bf16 %v15080_v43, %v15079_v59  ;;  %v4103_v60 = vsel %vm1708_vm13, %v4097_v37, %v4102_v57  ;;  %v4105_v25 = vsel %vm1708_vm13, %v4100_v48, %v4104_v56  ;;  %v4204_v0 = vunpack.c.l.bf16 %v4183_v50 }
 0x405   : >> { %v4098_v8 = vsel %vm1708_vm13, %v4096_v30, %v4097_v37  ;;  %v4101_v29 = vsel %vm1708_vm13, %v4099_v54, %v4100_v48  ;;  %v4136_v9 = vadd.f32 %v4103_v60, %v3968_v53  ;;  %v4137_v58 = vadd.f32 %v4105_v25, %v3969_v49  ;;  %v15082_v53 = vld [vmem:[#allocation80_spill] sm:$0xff]  ;;  %v15083_v48 = vld [vmem:[#allocation142_spill] sm:$0xff] }
 0x406   : >> { %v4134_v31 = vadd.f32 %v4098_v8, %v3966_v63  ;;  %v4135_v44 = vadd.f32 %v4101_v29, %v3967_v3  ;;  %v4205_v4 = vunpack.c.h.bf16 %v4183_v50  ;;  %v4206_v42 = vunpack.c.l.bf16 %v4184_v61  ;;  %v15081_v3 = vld [vmem:[#allocation138_spill] sm:$0xff]  ;;  %v15084_v50 = vld [vmem:[#allocation68_spill] sm:$0xff] }
 0x407   : >> { %v4207_v30 = vunpack.c.h.bf16 %v4184_v61  ;;  %v4208_v11 = vunpack.c.l.bf16 %v4185_v14  ;;  %v4209_v54 = vunpack.c.h.bf16 %v4185_v14  ;;  %v4264_v24 = vrot.slane %v4204_v0, 2 }
 0x408   : >> { %v4267_v39 = vrot.slane %v4205_v4, 2  ;;  %v926_v59 = vmax.f32 %v770_v10, 0.0  ;;  %v859_v1 = vadd.f32 %v858_v38, %v8701_v52  ;;  %v4265_v43 = vrot.slane %v4206_v42, 2  ;;  %v15085_v42 = vld [vmem:[#allocation156_spill] sm:$0xff] }
 0x409   : >> { %v4268_v37 = vrot.slane %v4207_v30, 2  ;;  %v4270_v57 = vrot.slane %v4208_v11, 2  ;;  %v4272_v56 = vrot.slane %v4209_v54, 2  ;;  %v4549_v49 = vsel %vm1708_vm13, %v15082_v53, %v15081_v3  ;;  %v15086_v54 = vld [vmem:[#allocation157_spill] sm:$0xff] }
 0x40a   : >> { %v990_v8 = vmin.f32 %v926_v59, 6.0  ;;  %v927_v63 = vmax.f32 %v859_v1, 0.0  ;;  %v4552_v61 = vsel %vm1708_vm13, %v15084_v50, %v15083_v48  ;;  %v4266_v14 = vsel %vm1912_vm14, %v4264_v24, %v4265_v43  ;;  %v15087_v24 = vld [vmem:[#allocation34_spill] sm:$0xff] }
 0x40b   : >> { %v4269_v0 = vsel %vm1912_vm14, %v4267_v39, %v4268_v37  ;;  %v4271_v29 = vsel %vm1912_vm14, %v4265_v43, %v4270_v57  ;;  %v4273_v10 = vsel %vm1912_vm14, %v4268_v37, %v4272_v56  ;;  %v4302_v11 = vadd.f32 %v4266_v14, %v4134_v31  ;;  %v15090_v56 = vld [vmem:[#allocation150_spill] sm:$0xff] }
 0x40c   : >> { %v4303_v60 = vadd.f32 %v4269_v0, %v4135_v44  ;;  %v4304_v25 = vadd.f32 %v4271_v29, %v4136_v9  ;;  %v4305_v38 = vadd.f32 %v4273_v10, %v4137_v58  ;;  %v991_v4 = vmin.f32 %v927_v63, 6.0 }
 0x40d   : >> { %v4554_v30 = vsel %vm1708_vm13, %v15081_v3, %v15085_v42  ;;  %v4556_v59 = vsel %vm1708_vm13, %v15083_v48, %v15086_v54  ;;  %v15088_v1 = vunpack.c.l.bf16 %v15087_v24  ;;  %v4318_v43 = vadd.f32 %v4302_v11, %v9956_v40  ;;  %v15093_v11 = vld [vmem:[#allocation159_spill] sm:$0xff] }
 0x40e   : >> { %v4319_v37 = vadd.f32 %v4303_v60, %v14705_v2  ;;  %v4320_v31 = vadd.f32 %v4304_v25, %v9956_v40  ;;  %v4321_v44 = vadd.f32 %v4305_v38, %v14705_v2  ;;  %v1029_v9 = vpack.c.bf16 %v991_v4, %v990_v8  ;;  %v15094_v60 = vld [vmem:[#allocation106_spill] sm:$0xff]  ;;  %v15095_v8 = vld [vmem:[#allocation161_spill] sm:$0xff]  ;;  %v15096_v38 = vld [vmem:[#allocation119_spill] sm:$0xff] }
 0x40f   : >> { %v4603_v39 = vadd.f32 %v4549_v49, %v15088_v1  ;;  %v15089_v58 = vunpack.c.h.bf16 %v15087_v24  ;;  %v15091_v63 = vunpack.c.l.bf16 %v15090_v56  ;;  %v15092_v53 = vunpack.c.h.bf16 %v15090_v56 }
 0x410   : >> { %v4334_v50 = vmax.f32 %v4318_v43, 0.0  ;;  %v4335_v49 = vmax.f32 %v4319_v37, 0.0  ;;  %v4336_v14 = vmax.f32 %v4320_v31, 0.0  ;;  %v4337_v0 = vmax.f32 %v4321_v44, 0.0  ;;  %v15098_v43 = vld [vmem:[#allocation94_spill] sm:$0xff] }
 0x411   : >> { %v4604_v57 = vadd.f32 %v4552_v61, %v15089_v58  ;;  %v4605_v3 = vadd.f32 %v4554_v30, %v15091_v63  ;;  %v4606_v48 = vadd.f32 %v4556_v59, %v15092_v53  ;;  %v1251_v29 = vshrl.u32 %v1029_v9, 16  ;;  %v15097_v59 = vld [vmem:[#allocation107_spill] sm:$0xff] }
 0x412   : >> { %v1254_v10 = vshll.u32 %v1029_v9, 16  ;;  %v4717_v25 = vsel %vm1912_vm14, %v15094_v60, %v15093_v11  ;;  %v4720_v61 = vsel %vm1912_vm14, %v15096_v38, %v15095_v8  ;;  %v4350_v4 = vmin.f32 %v4334_v50, 6.0  ;;  %v1452_v58 = vld [vmem:[#allocation2 + $0x148] sm:$0x11] }
 0x413   : >> { %v4351_v42 = vmin.f32 %v4335_v49, 6.0  ;;  %v4352_v30 = vmin.f32 %v4336_v14, 6.0  ;;  %v4353_v54 = vmin.f32 %v4337_v0, 6.0  ;;  %v1253_v24 = vrot.slane %v1251_v29, 7  ;;  %v15099_v14 = vld [vmem:[#allocation105_spill] sm:$0xff] }
 0x414   : >> { %v4722_v1 = vsel %vm1912_vm14, %v15093_v11, %v15097_v59  ;;  %v4724_v37 = vsel %vm1912_vm14, %v15095_v8, %v15098_v43  ;;  %v4771_v31 = vadd.f32 %v4717_v25, %v4603_v39  ;;  %v4772_v56 = vadd.f32 %v4720_v61, %v4604_v57  ;;  %v15100_v11 = vld [vmem:[#allocation197_spill] sm:$0xff]  ;;  %v15101_v39 = vld [vmem:[#allocation179_spill] sm:$0xff] }
 0x415   : >> { %v4360_v44 = vpack.c.bf16 %v4351_v42, %v4350_v4  ;;  %v4361_v9 = vpack.c.bf16 %v4353_v54, %v4352_v30  ;;  %v4773_v63 = vadd.f32 %v4722_v1, %v4605_v3  ;;  %v1256_v53 = vor.u32 %v1254_v10, %v1253_v24  ;;  %v772_v42 = vpop.f32.mrf.mxu0  ;;  %v861_v30 = vpop.f32.mrf.mxu1  ;;  %v15105_v1 = vld [vmem:[#allocation115_spill] sm:$0xff] }
 0x416   : >> { %v1258_v50 = vrot.slane %v1253_v24, 4  ;;  %v4774_v49 = vadd.f32 %v4724_v37, %v4606_v48  ;;  %v4836_v0 = vunpack.c.l.bf16 %v15099_v14  ;;  %v4837_v29 = vunpack.c.h.bf16 %v15099_v14 }
 0x417   : >> { %4368 = vst.msk [vmem:[#allocation3 + $0x70] sm:$0xff] %vm8519_vm2, %v4360_v44  ;;  %v4838_v60 = vunpack.c.l.bf16 %v15100_v11  ;;  %v4839_v8 = vunpack.c.h.bf16 %v15100_v11  ;;  %v15102_v25 = vunpack.c.l.bf16 %v15101_v39  ;;  %v15103_v57 = vrot.slane %v12126_v5, 4  ;;  %v15109_v11 = vld [vmem:[#allocation148_spill] sm:$0xff] }
 0x418   : >> { %4369 = vst.msk [vmem:[#allocation3 + $0x78] sm:$0xff] %vm8519_vm2, %v4361_v9  ;;  %v1453_v48 = vsel %vm8542_vm10, %v1258_v50, %v1452_v58  ;;  %v4852_v10 = vadd.f32 %v4836_v0, %v4771_v31  ;;  %v15104_v61 = vunpack.c.h.bf16 %v15101_v39  ;;  %v4853_v54 = vadd.f32 %v4837_v29, %v4772_v56  ;;  %v15106_v31 = vld [vmem:[#allocation116_spill] sm:$0xff] }
 0x419   : >> { %v4965_v38 = vrot.slane %v15102_v25, 1  ;;  %v1257_v3 = vsel %vm8765_vm9, %v15103_v57, %v1256_v53  ;;  %v4854_v24 = vadd.f32 %v4838_v60, %v4773_v63  ;;  %v4855_v59 = vadd.f32 %v4839_v8, %v4774_v49  ;;  %1454 = vst [vmem:[#allocation2 + $0x148] sm:$0x11] %v1453_v48  ;;  %v15107_v9 = vld [vmem:[#allocation196_spill] sm:$0xff]  ;;  %v15108_v53 = vld [vmem:[#allocation162_spill] sm:$0xff]  ;;  %v15114_v48 = vld [vmem:[#allocation133_spill] sm:$0xff] }
 0x41a   : >> { %v4968_v4 = vrot.slane %v15104_v61, 1  ;;  %1451 = vst.msk [vmem:[#allocation2 + $0x140] sm:$0xff] %vm8519_vm2, %v1257_v3  ;;  %v773_v43 = vadd.f32 %v772_v42, %v8699_v51  ;;  %v862_v37 = vadd.f32 %v861_v30, %v8701_v52  ;;  %v5084_v60 = vunpack.c.l.bf16 %v15109_v11  ;;  %v15113_v3 = vld [vmem:[#allocation165_spill] sm:$0xff] }
 0x41b   : >> { %v4966_v5 = vsel %vm1708_vm13, %v15105_v1, %v4965_v38  ;;  %v4971_v58 = vsel %vm1708_vm13, %v4965_v38, %v15107_v9  ;;  %v15110_v8 = vunpack.c.h.bf16 %v12228_v6  ;;  %v5085_v25 = vunpack.c.h.bf16 %v15109_v11  ;;  %v15112_v38 = vld [vmem:[#allocation195_spill] sm:$0xff]  ;;  %v15120_v9 = vld [vmem:[#allocation166_spill] sm:$0xff] }
 0x41c   : >> { %v4969_v44 = vsel %vm1708_vm13, %v15106_v31, %v4968_v4  ;;  %v4973_v50 = vsel %vm1708_vm13, %v4968_v4, %v15108_v53  ;;  %v12331_v56 = vadd.f32 %v4966_v5, %v4852_v10  ;;  %v12335_v49 = vadd.f32 %v4971_v58, %v4854_v24 }
 0x41d   : >> { %v12333_v63 = vadd.f32 %v4969_v44, %v4853_v54  ;;  %v928_v14 = vmax.f32 %v773_v43, 0.0  ;;  %v929_v0 = vmax.f32 %v862_v37, 0.0  ;;  %v12337_v29 = vadd.f32 %v4973_v50, %v4855_v59  ;;  %v15119_v44 = vld [vmem:[#allocation158_spill] sm:$0xff] }
 0x41e   : >> { %v12342_v39 = vrot.slane %v15110_v8, 2  ;;  %v5086_v57 = vunpack.c.l.bf16 %v15112_v38  ;;  %v12348_v10 = vpack.c.bf16 %v15114_v48, %v15113_v3  ;;  %v15115_v61 = vunpack.c.l.bf16 %v12202_v55  ;;  %v7857_v6 = vld [vmem:[#allocation3 + $0x70] sm:$0xf]  ;;  %v8018_v54 = vld [vmem:[#allocation3 + $0x74] sm:$0xf] }
 0x41f   : >> { %v15117_v42 = vunpack.c.h.bf16 %v12202_v55  ;;  %v992_v24 = vmin.f32 %v928_v14, 6.0  ;;  %v993_v59 = vmin.f32 %v929_v0, 6.0  ;;  %v8019_v1 = vld [vmem:[#allocation3 + $0x74] sm:$0xf0]  ;;  %v7859_v5 = vld [vmem:[#allocation3 + $0x78] sm:$0xf0]  ;;  %v12363_v58 = vpack.c.bf16 %v15120_v9, %v15119_v44 }
 0x420   : >> { %15111 = vst [vmem:[#allocation96_spill] sm:$0xff] %v12342_v39  ;;  %v12353_v4 = vmul.f32 %v15115_v61, %v14479_v23  ;;  %v5132_v37 = vrot.slane %v5084_v60, 2  ;;  %v5133_v31 = vrot.slane %v5086_v57, 2  ;;  %v7858_v53 = vor.u32 %v8019_v1, %v7857_v6  ;;  %v12371_v0 = vld [vmem:[#allocation2 + $0x148] sm:$0x11] }
 0x421   : >> { %v12358_v30 = vmul.f32 %v15117_v42, %v9038_v16  ;;  %v7862_v50 = vor.u32 %v8018_v54, %v7859_v5  ;;  %v5212_v11 = vld [vmem:[#allocation2 + $0x140] sm:$0xff]  ;;  %v5767_v48 = vld [vmem:[#allocation2 + $0x148] sm:$0x11]  ;;  %v12373_v60 = vpack.c.bf16 %v993_v59, %v992_v24  ;;  %v12375_v57 = vrot.slane %v5085_v25, 2 }
 0x422   : >> { %15116 = vst [vmem:[#allocation120_spill] sm:$0xff] %v12353_v4  ;;  %v12367_v3 = vunpack.c.l.bf16 %v5212_v11  ;;  %v12369_v14 = vunpack.c.h.bf16 %v5212_v11  ;;  %7348 = vmatmul.bf16.gmra.mxu2 %v7858_v53  ;;  %v5295_v61 = vunpack.c.l.bf16 %v12371_v0  ;;  %v5296_v42 = vunpack.c.h.bf16 %v12371_v0  ;;  %v15123_v59 = vld [vmem:[#allocation143_spill] sm:$0xff] }
 0x423   : >> { %15118 = vst [vmem:[#allocation76_spill] sm:$0xff] %v12358_v30  ;;  %7970 = vmatmul.msk.bf16.gmra.mxu3 %vm7256_vm15, %v7862_v50  ;;  %v5772_v6 = vunpack.c.l.bf16 %v5767_v48  ;;  %v12381_v54 = vsel %vm1912_vm14, %v5132_v37, %v5133_v31  ;;  %v5773_v25 = vunpack.c.h.bf16 %v5767_v48  ;;  %v12393_v5 = vsel %vm1912_vm14, %v5133_v31, %v15123_v59 }
 0x424   : >> { %v12385_v1 = vmul.f32 %v12367_v3, %v14472_v36  ;;  %v12389_v24 = vmul.f32 %v12369_v14, %v14474_v7  ;;  %v12397_v44 = vmul.f32 %v12367_v3, %v8873_v21  ;;  %v12401_v37 = vmul.f32 %v12369_v14, %v14477_v27 }
 0x425   : >> { %v5319_v9 = vmul.f32 %v5295_v61, %v8873_v21  ;;  %v5320_v53 = vmul.f32 %v5296_v42, %v14477_v27  ;;  %v12407_v50 = vmul.f32 %v12367_v3, %v14479_v23  ;;  %v12411_v31 = vmul.f32 %v12369_v14, %v9038_v16 }
 0x426   : >> { %15121 = vst [vmem:[#allocation65_spill] sm:$0xff] %v12385_v1  ;;  %v5716_v11 = vmul.f32 %v12367_v3, %v8744_v32  ;;  %v5717_v0 = vmul.f32 %v12369_v14, %v8746_v33  ;;  %v12418_v48 = vmul.f32 %v5295_v61, %v14479_v23  ;;  %v5786_v59 = vmul.f32 %v12367_v3, %v8784_v17 }
 0x427   : >> { %15122 = vst [vmem:[#allocation131_spill] sm:$0xff] %v12389_v24  ;;  %v5787_v8 = vmul.f32 %v12369_v14, %v8786_v18  ;;  %v5788_v55 = vmul.f32 %v5772_v6, %v8784_v17  ;;  %v5789_v39 = vmul.f32 %v5773_v25, %v8786_v18  ;;  %v5956_v61 = vmul.f32 %v5772_v6, %v8806_v45  ;;  %v6183_v6 = vld [vmem:[#allocation2 + $0x148] sm:$0x11] }
 0x428   : >> { %15124 = vst [vmem:[#allocation132_spill] sm:$0xff] %v12397_v44  ;;  %v5729_v43 = vpack.c.bf16 %v5717_v0, %v5716_v11  ;;  %v6129_v4 = vmul.f32 %v12367_v3, %v8772_v12  ;;  %v6130_v62 = vmul.f32 %v12369_v14, %v8776_v13 }
 0x429   : >> { %15125 = vst [vmem:[#allocation66_spill] sm:$0xff] %v12401_v37  ;;  %v5806_v30 = vpack.c.bf16 %v5787_v8, %v5786_v59  ;;  %v5807_v24 = vpack.c.bf16 %v5789_v39, %v5788_v55 }
 0x42a   : >> { %15126 = vst [vmem:[#allocation97_spill] sm:$0xff] %v12407_v50  ;;  %v5955_v50 = vmul.f32 %v12369_v14, %v8808_v46  ;;  %v5740_v37 = vunpack.c.l.bf16 %v5729_v43  ;;  %v5741_v44 = vunpack.c.h.bf16 %v5729_v43 }
 0x42b   : >> { %15127 = vst [vmem:[#allocation95_spill] sm:$0xff] %v12411_v31  ;;  %v5954_v31 = vmul.f32 %v12367_v3, %v8806_v45  ;;  %v5822_v0 = vunpack.c.l.bf16 %v5806_v30  ;;  %v5823_v1 = vunpack.c.h.bf16 %v5806_v30  ;;  %v5824_v15 = vunpack.c.l.bf16 %v5807_v24 }
 0x42c   : >> { %15128 = vst [vmem:[#allocation109_spill] sm:$0xff] %v12418_v48  ;;  %v5957_v48 = vmul.f32 %v5773_v25, %v8808_v46  ;;  %v5825_v28 = vunpack.c.h.bf16 %v5807_v24  ;;  %v6187_v24 = vunpack.c.l.bf16 %v6183_v6 }
 0x42d   : >> { %v5974_v11 = vpack.c.bf16 %v5955_v50, %v5954_v31  ;;  %v12436_v26 = vrot.slane %v5822_v0, 1  ;;  %v12438_v25 = vrot.slane %v5823_v1, 1  ;;  %v5878_v43 = vrot.slane %v5824_v15, 1 }
 0x42e   : >> { %v5975_v35 = vpack.c.bf16 %v5957_v48, %v5956_v61  ;;  %v5880_v39 = vrot.slane %v5825_v28, 1  ;;  %v12444_v48 = vpack.c.bf16 %v6130_v62, %v6129_v4  ;;  %v6197_v15 = vmul.f32 %v12367_v3, %v8790_v19 }
 0x42f   : >> { %v5990_v8 = vunpack.c.l.bf16 %v5974_v11  ;;  %v5991_v59 = vunpack.c.h.bf16 %v5974_v11  ;;  %15129 = vst [vmem:[#allocation110_spill] sm:$0xff] %v12436_v26  ;;  %v5879_v61 = vsel %vm1708_vm13, %v12436_v26, %v5878_v43  ;;  %v6188_v11 = vunpack.c.h.bf16 %v6183_v6 }
 0x430   : >> { %15130 = vst [vmem:[#allocation61_spill] sm:$0xff] %v12438_v25  ;;  %v5992_v22 = vunpack.c.l.bf16 %v5975_v35  ;;  %v5993_v2 = vunpack.c.h.bf16 %v5975_v35  ;;  %v5881_v1 = vsel %vm1708_vm13, %v12438_v25, %v5880_v39  ;;  %v12452_v28 = vpack.c.bf16 %v5320_v53, %v5319_v9 }
 0x431   : >> { %v12440_v55 = vrot.slane %v5990_v8, 2  ;;  %v12442_v30 = vrot.slane %v5991_v59, 2  ;;  %15133 = vst [vmem:[#allocation136_spill] sm:$0xff] %v12444_v48  ;;  %v12455_v35 = vmul.f32 %v5296_v42, %v9038_v16  ;;  %v6198_v0 = vmul.f32 %v12369_v14, %v8792_v20 }
 0x432   : >> { %v6046_v50 = vrot.slane %v5992_v22, 2  ;;  %v6048_v31 = vrot.slane %v5993_v2, 2  ;;  %15134 = vst [vmem:[#allocation149_spill] sm:$0xff] %v12452_v28  ;;  %v12457_v22 = vadd.f32 %v5879_v61, %v5740_v37  ;;  %v12459_v2 = vadd.f32 %v5881_v1, %v5741_v44 }
 0x433   : >> { %15131 = vst [vmem:[#allocation151_spill] sm:$0xff] %v12440_v55  ;;  %v6199_v9 = vmul.f32 %v6187_v24, %v8790_v19  ;;  %v6200_v42 = vmul.f32 %v6188_v11, %v8792_v20  ;;  %v6365_v37 = vmul.f32 %v12367_v3, %v8810_v47  ;;  %v6366_v44 = vmul.f32 %v12369_v14, %v8814_v41 }
 0x434   : >> { %15132 = vst [vmem:[#allocation154_spill] sm:$0xff] %v12442_v30  ;;  %v12463_v62 = vsel %vm1912_vm14, %v12440_v55, %v6046_v50  ;;  %v12467_v4 = vsel %vm1912_vm14, %v12442_v30, %v6048_v31  ;;  %v6367_v53 = vmul.f32 %v6187_v24, %v8810_v47  ;;  %v6220_v59 = vpack.c.bf16 %v6198_v0, %v6197_v15 }
 0x435   : >> { %15135 = vst [vmem:[#allocation137_spill] sm:$0xff] %v12455_v35  ;;  %v6368_v6 = vmul.f32 %v6188_v11, %v8814_v41  ;;  %v1260_v43 = vshrl.u32 %v12373_v60, 16  ;;  %v6221_v39 = vpack.c.bf16 %v6200_v42, %v6199_v9  ;;  %v12481_v50 = vpack.c.bf16 %v6366_v44, %v6365_v37  ;;  %v1455_v44 = vld [vmem:[#allocation2 + $0x150] sm:$0xff] }
 0x436   : >> { %15136 = vst [vmem:[#allocation152_spill] sm:$0xff] %v12457_v22  ;;  %v15141_v31 = vunpack.c.h.bf16 %v15112_v38  ;;  %v5188_v3 = vadd.f32 %v12381_v54, %v12331_v56  ;;  %v6233_v1 = vunpack.c.l.bf16 %v6220_v59  ;;  %v6234_v14 = vunpack.c.h.bf16 %v6220_v59 }
 0x437   : >> { %15137 = vst [vmem:[#allocation144_spill] sm:$0xff] %v12459_v2  ;;  %v12487_v24 = vrot.slane %v1260_v43, 7  ;;  %v6235_v0 = vunpack.c.l.bf16 %v6221_v39  ;;  %v6236_v11 = vunpack.c.h.bf16 %v6221_v39  ;;  %v1263_v8 = vshll.u32 %v12373_v60, 16  ;;  %v15146_v39 = vld [vmem:[#allocation145_spill] sm:$0xff] }
 0x438   : >> { %15138 = vst [vmem:[#allocation111_spill] sm:$0xff] %v12463_v62  ;;  %v5136_v61 = vrot.slane %v15141_v31, 2  ;;  %v12491_v9 = vrot.slane %v6233_v1, 1  ;;  %v12495_v56 = vrot.slane %v6234_v14, 1  ;;  %v15148_v38 = vunpack.c.l.bf16 %v12348_v10 }
 0x439   : >> { %15139 = vst [vmem:[#allocation100_spill] sm:$0xff] %v12467_v4  ;;  %v6389_v4 = vpack.c.bf16 %v6368_v6, %v6367_v53  ;;  %v12497_v54 = vrot.slane %v6235_v0, 1  ;;  %v1265_v59 = vor.u32 %v1263_v8, %v12487_v24  ;;  %v12500_v6 = vrot.slane %v6236_v11, 1 }
 0x43a   : >> { %15140 = vst [vmem:[#allocation153_spill] sm:$0xff] %v12481_v50  ;;  %v5137_v60 = vsel %vm1912_vm14, %v12375_v57, %v5136_v61  ;;  %v5141_v31 = vsel %vm1912_vm14, %v5136_v61, %v15146_v39  ;;  %v12521_v61 = vadd.f32 %v15148_v38, %v5188_v3 }
 0x43b   : >> { %15142 = vst [vmem:[#allocation141_spill] sm:$0xff] %v12491_v9  ;;  %v6403_v37 = vunpack.c.l.bf16 %v6389_v4  ;;  %v6404_v53 = vunpack.c.h.bf16 %v6389_v4  ;;  %v1456_v1 = vsel %vm8724_vm7, %v1265_v59, %v1455_v44  ;;  %v5189_v14 = vadd.f32 %v5137_v60, %v12333_v63  ;;  %v15150_v44 = vld [vmem:[#allocation218_spill] sm:$0xff]  ;;  %v15151_v63 = vld [vmem:[#allocation88_spill] sm:$0xff]  ;;  %v15154_v60 = vld [vmem:[#allocation37_spill] sm:$0xff] }
 0x43c   : >> { %15143 = vst [vmem:[#allocation170_spill] sm:$0xff] %v12495_v56  ;;  %v12512_v4 = vadd.f32 %v12393_v5, %v12335_v49  ;;  %v12515_v8 = vadd.f32 %v5141_v31, %v12337_v29  ;;  %v5702_v11 = vunpack.c.l.bf16 %v1456_v1  ;;  %v5703_v57 = vunpack.c.h.bf16 %v1456_v1  ;;  %v15153_v29 = vld [vmem:[#allocation91_spill] sm:$0xff] }
 0x43d   : >> { %15144 = vst [vmem:[#allocation171_spill] sm:$0xff] %v12497_v54  ;;  %v12517_v0 = vrot.slane %v6403_v37, 2  ;;  %v12523_v39 = vrot.slane %v6404_v53, 2  ;;  %v5246_v59 = vpack.c.bf16 %v15151_v63, %v15150_v44  ;;  %v15152_v49 = vunpack.c.h.bf16 %v12348_v10 }
 0x43e   : >> { %15145 = vst [vmem:[#allocation138_spill] sm:$0xff] %v12500_v6  ;;  %v12533_v37 = vpack.c.bf16 %v15154_v60, %v15153_v29  ;;  %v5718_v31 = vmul.f32 %v5702_v11, %v8744_v32  ;;  %v5790_v3 = vmul.f32 %v5702_v11, %v8784_v17  ;;  %v5791_v38 = vmul.f32 %v5703_v57, %v8786_v18 }
 0x43f   : >> { %15147 = vst [vmem:[#allocation80_spill] sm:$0xff] %v12517_v0  ;;  %v12529_v5 = vadd.f32 %v15152_v49, %v5189_v14  ;;  %v6131_v53 = vmul.f32 %v5702_v11, %v8772_v12  ;;  %v6132_v44 = vmul.f32 %v5703_v57, %v8776_v13  ;;  %v6201_v10 = vmul.f32 %v5702_v11, %v8790_v19 }
 0x440   : >> { %1457 = vst [vmem:[#allocation2 + $0x150] sm:$0xff] %v1456_v1  ;;  %v5719_v1 = vmul.f32 %v5703_v57, %v8746_v33  ;;  %v6202_v14 = vmul.f32 %v5703_v57, %v8792_v20  ;;  %v5808_v49 = vpack.c.bf16 %v5791_v38, %v5790_v3  ;;  %v5333_v29 = vunpack.c.l.bf16 %v12363_v58 }
 0x441   : >> { %15149 = vst [vmem:[#allocation142_spill] sm:$0xff] %v12523_v39  ;;  %v5334_v60 = vunpack.c.h.bf16 %v12363_v58  ;;  %v12547_v42 = vpack.c.bf16 %v6132_v44, %v6131_v53  ;;  %v6544_v43 = vmul.f32 %v5702_v11, %v14472_v36  ;;  %v6545_v2 = vmul.f32 %v5703_v57, %v14474_v7 }
 0x442   : >> { %v12543_v63 = vpack.c.bf16 %v5719_v1, %v5718_v31  ;;  %v6222_v15 = vpack.c.bf16 %v6202_v14, %v6201_v10  ;;  %v5826_v62 = vunpack.c.l.bf16 %v5808_v49  ;;  %v5827_v22 = vunpack.c.h.bf16 %v5808_v49 }
 0x443   : >> { %15156 = vst [vmem:[#allocation156_spill] sm:$0xff] %v12547_v42  ;;  %v6612_v30 = vmul.f32 %v5702_v11, %v8873_v21  ;;  %v6613_v55 = vmul.f32 %v5703_v57, %v14477_v27 }
 0x444   : >> { %15155 = vst [vmem:[#allocation68_spill] sm:$0xff] %v12543_v63  ;;  %v6237_v38 = vunpack.c.l.bf16 %v6222_v15  ;;  %v6238_v58 = vunpack.c.h.bf16 %v6222_v15  ;;  %v12557_v49 = vrot.slane %v5826_v62, 1  ;;  %v12559_v11 = vrot.slane %v5827_v22, 1 }
 0x445   : >> { %v5255_v22 = vunpack.c.l.bf16 %v5246_v59 }
 0x446   : >> { %15157 = vst [vmem:[#allocation157_spill] sm:$0xff] %v12557_v49  ;;  %v12563_v63 = vrot.slane %v6237_v38, 1  ;;  %v12565_v15 = vrot.slane %v6238_v58, 1  ;;  %v12569_v49 = vpack.c.bf16 %v6545_v2, %v6544_v43  ;;  %v5335_v58 = vunpack.c.l.bf16 %v12533_v37  ;;  %v15167_v2 = vld [vmem:[#allocation175_spill] sm:$0xff] }
 0x447   : >> { %v5936_v3 = vld [vmem:[#allocation2 + $0x150] sm:$0xee]  ;;  %15158 = vst [vmem:[#allocation34_spill] sm:$0xff] %v12559_v11  ;;  %v5256_v11 = vunpack.c.h.bf16 %v5246_v59  ;;  %v5271_v43 = vadd.f32 %v5255_v22, %v12512_v4  ;;  %v5384_v4 = vrot.slane %v5334_v60, 1 }
 0x448   : >> { %v6352_v53 = vld [vmem:[#allocation2 + $0x150] sm:$0xee]  ;;  %v5942_v44 = vunpack.c.l.bf16 %v5936_v3  ;;  %v5943_v10 = vunpack.c.h.bf16 %v5936_v3  ;;  %15159 = vst [vmem:[#allocation150_spill] sm:$0xff] %v12563_v63 }
 0x449   : >> { %v6768_v26 = vld [vmem:[#allocation2 + $0x150] sm:$0xee]  ;;  %v6357_v57 = vunpack.c.l.bf16 %v6352_v53  ;;  %v6358_v39 = vunpack.c.h.bf16 %v6352_v53  ;;  %15160 = vst [vmem:[#allocation159_spill] sm:$0xff] %v12565_v15  ;;  %v12576_v15 = vpack.c.bf16 %v6613_v55, %v6612_v30  ;;  %v12590_v55 = vld [vmem:[%s12136_s20] ss:$0 sm:$0xff]  ;;  %v7314_v30 = vpop.f32.mrf.mxu2 }
 0x44a   : >> { %v5958_v31 = vmul.f32 %v5942_v44, %v8806_v45  ;;  %v5959_v1 = vmul.f32 %v5943_v10, %v8808_v46  ;;  %v6772_v25 = vunpack.c.l.bf16 %v6768_v26  ;;  %v6773_v42 = vunpack.c.h.bf16 %v6768_v26  ;;  %15161 = vst [vmem:[#allocation106_spill] sm:$0xff] %v12569_v49  ;;  %v15163_v59 = vld [vmem:[#allocation200_spill] sm:$0xff] }
 0x44b   : >> { %v6369_v3 = vmul.f32 %v6357_v57, %v8810_v47  ;;  %v6370_v14 = vmul.f32 %v6358_v39, %v8814_v41  ;;  %15162 = vst [vmem:[#allocation161_spill] sm:$0xff] %v12576_v15  ;;  %v5336_v26 = vunpack.c.h.bf16 %v12533_v37  ;;  %v5272_v39 = vadd.f32 %v5256_v11, %v12515_v8 }
 0x44c   : >> { %v5976_v62 = vpack.c.bf16 %v5959_v1, %v5958_v31  ;;  %v6780_v44 = vmul.f32 %v6772_v25, %v14479_v23  ;;  %v6781_v38 = vmul.f32 %v6773_v42, %v9038_v16  ;;  %v5337_v31 = vunpack.c.l.bf16 %v15163_v59 }
 0x44d   : >> { %v12571_v53 = vpack.c.bf16 %v6370_v14, %v6369_v3  ;;  %v5338_v14 = vunpack.c.h.bf16 %v15163_v59  ;;  %v5381_v3 = vrot.slane %v5333_v29, 1  ;;  %v5385_v22 = vrot.slane %v5336_v26, 1  ;;  %v15171_v59 = vld [vmem:[#allocation92_spill] sm:$0xff] }
 0x44e   : >> { %v5994_v10 = vunpack.c.l.bf16 %v5976_v62  ;;  %v5995_v57 = vunpack.c.h.bf16 %v5976_v62  ;;  %v12586_v42 = vpack.c.bf16 %v6781_v38, %v6780_v44  ;;  %v5382_v62 = vrot.slane %v5335_v58, 1  ;;  %v15169_v44 = vld [vmem:[#allocation219_spill] sm:$0xff]  ;;  %v15170_v38 = vld [vmem:[#allocation90_spill] sm:$0xff] }
 0x44f   : >> { %v5387_v8 = vrot.slane %v5337_v31, 1  ;;  %v5389_v11 = vrot.slane %v5338_v14, 1  ;;  %v5490_v63 = vpack.c.bf16 %v15170_v38, %v15169_v44  ;;  %v5386_v29 = vsel %vm1708_vm13, %v5384_v4, %v5385_v22  ;;  %v774_v31 = vpop.f32.mrf.mxu0 }
 0x450   : >> { %v12583_v1 = vrot.slane %v5994_v10, 2  ;;  %15165 = vst [vmem:[#allocation107_spill] sm:$0xff] %v12586_v42  ;;  %v12592_v37 = vrot.slane %v5995_v57, 2  ;;  %v15168_v10 = vld [vmem:[#allocation180_spill] sm:$0xff]  ;;  %v5383_v25 = vsel %vm1708_vm13, %v5381_v3, %v5382_v62  ;;  %v15172_v42 = vld [vmem:[#allocation93_spill] sm:$0xff]  ;;  %v7315_v57 = vadd.f32 %v12590_v55, %v7314_v30  ;;  %v863_v30 = vpop.f32.mrf.mxu1 }
 0x451   : >> { %v5491_v0 = vpack.c.bf16 %v15172_v42, %v15171_v59  ;;  %v5388_v60 = vsel %vm1708_vm13, %v5382_v62, %v5387_v8  ;;  %v5390_v58 = vsel %vm1708_vm13, %v5385_v22, %v5389_v11  ;;  %v5437_v26 = vadd.f32 %v5383_v25, %v12521_v61  ;;  %v7403_v59 = vpop.f32.mrf.mxu3  ;;  %v15174_v11 = vld [vmem:[#allocation112_spill] sm:$0xff] }
 0x452   : >> { %15164 = vst [vmem:[#allocation119_spill] sm:$0xff] %v12583_v1  ;;  %v5489_v1 = vpack.c.bf16 %v15168_v10, %v15167_v2  ;;  %v5438_v2 = vadd.f32 %v5386_v29, %v12529_v5  ;;  %v5439_v14 = vadd.f32 %v5388_v60, %v5271_v43  ;;  %v5440_v3 = vadd.f32 %v5390_v58, %v5272_v39  ;;  %v15175_v60 = vld [vmem:[#allocation174_spill] sm:$0xff]  ;;  %v15176_v58 = vld [vmem:[#allocation104_spill] sm:$0xff] }
 0x453   : >> { %15166 = vst [vmem:[#allocation94_spill] sm:$0xff] %v12592_v37  ;;  %v5503_v38 = vunpack.c.l.bf16 %v5490_v63  ;;  %v5504_v37 = vunpack.c.h.bf16 %v5490_v63  ;;  %v5505_v42 = vunpack.c.l.bf16 %v5491_v0  ;;  %v5506_v15 = vunpack.c.h.bf16 %v5491_v0 }
 0x454   : >> { %v5501_v10 = vunpack.c.l.bf16 %v5489_v1  ;;  %v5502_v44 = vunpack.c.h.bf16 %v5489_v1  ;;  %v12607_v49 = vadd.f32 %v7403_v59, %v7315_v57  ;;  %v775_v62 = vadd.f32 %v774_v31, %v8699_v51  ;;  %v15173_v1 = vld [vmem:[#allocation173_spill] sm:$0xff] }
 0x455   : >> { %v5550_v22 = vrot.slane %v5503_v38, 2  ;;  %v5553_v25 = vrot.slane %v5504_v37, 2  ;;  %v5555_v8 = vrot.slane %v5505_v42, 2  ;;  %v5557_v5 = vrot.slane %v5506_v15, 2 }
 0x456   : >> { %v5549_v4 = vrot.slane %v5501_v10, 2  ;;  %v5552_v61 = vrot.slane %v5502_v44, 2  ;;  %v930_v43 = vmax.f32 %v775_v62, 0.0  ;;  %v864_v39 = vadd.f32 %v863_v30, %v8701_v52  ;;  %v15177_v30 = vld [vmem:[#allocation189_spill] sm:$0xff] }
 0x457   : >> { %v4559_v63 = vsel %vm1708_vm13, %v15174_v11, %v15173_v1  ;;  %v5556_v57 = vsel %vm1912_vm14, %v5550_v22, %v5555_v8  ;;  %v4562_v31 = vsel %vm1708_vm13, %v15176_v58, %v15175_v60  ;;  %v5558_v37 = vsel %vm1912_vm14, %v5553_v25, %v5557_v5  ;;  %v15179_v11 = vld [vmem:[#allocation190_spill] sm:$0xff] }
 0x458   : >> { %v5551_v29 = vsel %vm1912_vm14, %v5549_v4, %v5550_v22  ;;  %v5554_v0 = vsel %vm1912_vm14, %v5552_v61, %v5553_v25  ;;  %v5607_v44 = vadd.f32 %v5556_v57, %v5439_v14  ;;  %v5608_v38 = vadd.f32 %v5558_v37, %v5440_v3  ;;  %v15178_v61 = vld [vmem:[#allocation20_spill] sm:$0xff] }
 0x459   : >> { %v5605_v15 = vadd.f32 %v5551_v29, %v5437_v26  ;;  %v5606_v10 = vadd.f32 %v5554_v0, %v5438_v2  ;;  %v994_v42 = vmin.f32 %v930_v43, 6.0  ;;  %v931_v59 = vmax.f32 %v864_v39, 0.0  ;;  %v15180_v14 = vld [vmem:[#allocation108_spill] sm:$0xff] }
 0x45a   : >> { %v4564_v4 = vsel %vm1708_vm13, %v15173_v1, %v15177_v30  ;;  %v5623_v8 = vadd.f32 %v5607_v44, %v9956_v40  ;;  %v4566_v25 = vsel %vm1708_vm13, %v15175_v60, %v15179_v11  ;;  %v5624_v26 = vadd.f32 %v5608_v38, %v15178_v61  ;;  %v15183_v57 = vld [vmem:[#allocation140_spill] sm:$0xff]  ;;  %v15186_v30 = vld [vmem:[#allocation194_spill] sm:$0xff] }
 0x45b   : >> { %v5621_v62 = vadd.f32 %v5605_v15, %v9956_v40  ;;  %v5622_v22 = vadd.f32 %v5606_v10, %v15178_v61  ;;  %v995_v2 = vmin.f32 %v931_v59, 6.0  ;;  %v15181_v3 = vunpack.c.l.bf16 %v15180_v14  ;;  %v15187_v38 = vld [vmem:[#allocation130_spill] sm:$0xff] }
 0x45c   : >> { %v15182_v43 = vunpack.c.h.bf16 %v15180_v14  ;;  %v5639_v0 = vmax.f32 %v5623_v8, 0.0  ;;  %v15184_v58 = vunpack.c.l.bf16 %v15183_v57  ;;  %v5640_v15 = vmax.f32 %v5624_v26, 0.0  ;;  %v15188_v14 = vld [vmem:[#allocation178_spill] sm:$0xff] }
 0x45d   : >> { %v4607_v5 = vadd.f32 %v4559_v63, %v15181_v3  ;;  %v5637_v1 = vmax.f32 %v5621_v62, 0.0  ;;  %v5638_v29 = vmax.f32 %v5622_v22, 0.0  ;;  %v1031_v10 = vpack.c.bf16 %v995_v2, %v994_v42 }
 0x45e   : >> { %v4608_v39 = vadd.f32 %v4562_v31, %v15182_v43  ;;  %v4609_v37 = vadd.f32 %v4564_v4, %v15184_v58  ;;  %v15185_v44 = vunpack.c.h.bf16 %v15183_v57  ;;  %v4727_v59 = vsel %vm1912_vm14, %v15187_v38, %v15186_v30  ;;  %v15189_v31 = vld [vmem:[#allocation139_spill] sm:$0xff] }
 0x45f   : >> { %v5653_v11 = vmin.f32 %v5637_v1, 6.0  ;;  %v5654_v63 = vmin.f32 %v5638_v29, 6.0  ;;  %v5655_v3 = vmin.f32 %v5639_v0, 6.0  ;;  %v4730_v62 = vsel %vm1912_vm14, %v15189_v31, %v15188_v14  ;;  %v15190_v4 = vld [vmem:[#allocation191_spill] sm:$0xff]  ;;  %v15193_v31 = vld [vmem:[#allocation164_spill] sm:$0xff] }
 0x460   : >> { %v4610_v60 = vadd.f32 %v4566_v25, %v15185_v44  ;;  %v5656_v22 = vmin.f32 %v5640_v15, 6.0  ;;  %v1268_v8 = vshrl.u32 %v1031_v10, 16  ;;  %v1271_v43 = vshll.u32 %v1031_v10, 16  ;;  %v15191_v25 = vld [vmem:[#allocation192_spill] sm:$0xff]  ;;  %v1459_v15 = vld [vmem:[#allocation2 + $0x160] sm:$0x11]  ;;  %v7316_v10 = vpop.f32.mrf.mxu2 }
 0x461   : >> { %v4732_v42 = vsel %vm1912_vm14, %v15186_v30, %v15190_v4  ;;  %v5669_v26 = vpack.c.bf16 %v5654_v63, %v5653_v11  ;;  %v4734_v2 = vsel %vm1912_vm14, %v15188_v14, %v15191_v25  ;;  %v4775_v57 = vadd.f32 %v4727_v59, %v4607_v5  ;;  %v15194_v11 = vld [vmem:[#allocation211_spill] sm:$0xff] }
 0x462   : >> { %v4776_v1 = vadd.f32 %v4730_v62, %v4608_v39  ;;  %v5670_v29 = vpack.c.bf16 %v5656_v22, %v5655_v3  ;;  %v1270_v0 = vrot.slane %v1268_v8, 7  ;;  %v4777_v58 = vadd.f32 %v4732_v42, %v4609_v37  ;;  %v7405_v62 = vpop.f32.mrf.mxu3 }
 0x463   : >> { %v4778_v44 = vadd.f32 %v4734_v2, %v4610_v60  ;;  %5677 = vst.msk [vmem:[#allocation3 + $0x80] sm:$0xff] %vm8519_vm2, %v5669_v26  ;;  %v4840_v50 = vunpack.c.l.bf16 %v15193_v31  ;;  %v4841_v30 = vunpack.c.h.bf16 %v15193_v31  ;;  %v4842_v63 = vunpack.c.l.bf16 %v15194_v11  ;;  %v15195_v60 = vld [vmem:[#allocation54_spill] sm:$0xff]  ;;  %v15200_v31 = vld [vmem:[#allocation147_spill] sm:$0xff] }
 0x464   : >> { %v4843_v14 = vunpack.c.h.bf16 %v15194_v11  ;;  %5678 = vst.msk [vmem:[#allocation3 + $0x88] sm:$0xff] %vm8519_vm2, %v5670_v29  ;;  %v1273_v5 = vor.u32 %v1271_v43, %v1270_v0  ;;  %v1275_v39 = vrot.slane %v1270_v0, 4  ;;  %v7317_v37 = vadd.f32 %v12590_v55, %v7316_v10 }
 0x465   : >> { %v15196_v59 = vunpack.c.l.bf16 %v15195_v60  ;;  %v4856_v22 = vadd.f32 %v4840_v50, %v4775_v57  ;;  %v4857_v8 = vadd.f32 %v4841_v30, %v4776_v1  ;;  %v4858_v4 = vadd.f32 %v4842_v63, %v4777_v58  ;;  %v777_v50 = vpop.f32.mrf.mxu0  ;;  %v866_v57 = vpop.f32.mrf.mxu1  ;;  %v15202_v58 = vld [vmem:[#allocation24_spill] sm:$0xff] }
 0x466   : >> { %v4859_v42 = vadd.f32 %v4843_v14, %v4778_v44  ;;  %v15197_v26 = vrot.slane %v12487_v24, 4  ;;  %v1460_v43 = vsel %vm8542_vm10, %v1275_v39, %v1459_v15  ;;  %v7406_v0 = vadd.f32 %v7405_v62, %v7317_v37  ;;  %v15203_v15 = vld [vmem:[#allocation169_spill] sm:$0xff]  ;;  %v15204_v37 = vld [vmem:[#allocation168_spill] sm:$0xff] }
 0x467   : >> { %v4975_v3 = vrot.slane %v15196_v59, 1  ;;  %v15201_v1 = vunpack.c.h.bf16 %v15195_v60  ;;  %v5090_v11 = vunpack.c.l.bf16 %v15203_v15  ;;  %1461 = vst [vmem:[#allocation2 + $0x160] sm:$0x11] %v1460_v43  ;;  %v778_v14 = vadd.f32 %v777_v50, %v8699_v51  ;;  %v15205_v59 = vld [vmem:[#allocation63_spill] sm:$0xff] }
 0x468   : >> { %v1274_v2 = vsel %vm8765_vm9, %v15197_v26, %v1273_v5  ;;  %v8050_v63 = vpack.c.bf16 %v7406_v0, %v12607_v49  ;;  %v867_v5 = vadd.f32 %v866_v57, %v8701_v52 }
 0x469   : >> { %v4976_v10 = vsel %vm1708_vm13, %v15200_v31, %v4975_v3  ;;  %1458 = vst.msk [vmem:[#allocation2 + $0x158] sm:$0xff] %vm8519_vm2, %v1274_v2  ;;  %v4978_v24 = vrot.slane %v15201_v1, 1  ;;  %v4981_v44 = vsel %vm1708_vm13, %v4975_v3, %v15202_v58  ;;  %v5091_v3 = vunpack.c.h.bf16 %v15203_v15  ;;  %v15209_v58 = vld [vmem:[#allocation202_spill] sm:$0xff] }
 0x46a   : >> { %v12680_v30 = vadd.f32 %v4976_v10, %v4856_v22  ;;  %v12686_v39 = vadd.f32 %v4981_v44, %v4858_v4  ;;  %v15206_v22 = vld [vmem:[#allocation215_spill] sm:$0xff]  ;;  %v7865_v2 = vld [vmem:[#allocation3 + $0x80] sm:$0xf]  ;;  %v8020_v43 = vld [vmem:[#allocation3 + $0x84] sm:$0xf]  ;;  %8051 = vst [vmem:[%s12674_s29] sm:$0xff] %v8050_v63   ;;  %v932_v49 = vmax.f32 %v778_v14, 0.0  ;;  %v15207_v4 = vunpack.c.l.bf16 %v12571_v53 }
 0x46b   : >> { %v4979_v60 = vsel %vm1708_vm13, %v15204_v37, %v4978_v24  ;;  %v4983_v62 = vsel %vm1708_vm13, %v4978_v24, %v15205_v59  ;;  %v5092_v26 = vunpack.c.l.bf16 %v15206_v22  ;;  %v933_v0 = vmax.f32 %v867_v5, 0.0  ;;  %v8021_v57 = vld [vmem:[#allocation3 + $0x84] sm:$0xf0]  ;;  %v7867_v1 = vld [vmem:[#allocation3 + $0x88] sm:$0xf0]  ;;  %v15210_v44 = vld [vmem:[#allocation172_spill] sm:$0xff] }
 0x46c   : >> { %v12695_v31 = vadd.f32 %v4979_v60, %v4857_v8  ;;  %v12697_v10 = vadd.f32 %v4983_v62, %v4859_v42  ;;  %v12701_v50 = vrot.slane %v15207_v4, 2  ;;  %v5093_v24 = vunpack.c.h.bf16 %v15206_v22  ;;  %v15211_v37 = vld [vmem:[#allocation193_spill] sm:$0xff]  ;;  %v15212_v63 = vld [vmem:[#allocation203_spill] sm:$0xff] }
 0x46d   : >> { %v12706_v15 = vpack.c.bf16 %v15210_v44, %v15209_v58  ;;  %v12710_v14 = vpack.c.bf16 %v15212_v63, %v15211_v37  ;;  %v7866_v8 = vor.u32 %v8021_v57, %v7865_v2  ;;  %v7870_v5 = vor.u32 %v8020_v43, %v7867_v1 }
 0x46e   : >> { %15208 = vst [vmem:[#allocation105_spill] sm:$0xff] %v12701_v50  ;;  %v996_v42 = vmin.f32 %v932_v49, 6.0  ;;  %v997_v60 = vmin.f32 %v933_v0, 6.0  ;;  %v15213_v59 = vunpack.c.h.bf16 %v12571_v53  ;;  %v5142_v4 = vrot.slane %v5090_v11, 2  ;;  %v5768_v11 = vld [vmem:[#allocation2 + $0x160] sm:$0x11] }
 0x46f   : >> { %v12716_v50 = vrot.slane %v5092_v26, 2  ;;  %v12718_v22 = vrot.slane %v5093_v24, 2  ;;  %7353 = vmatmul.bf16.gmra.mxu2 %v7866_v8  ;;  %7971 = vmatmul.msk.bf16.gmra.mxu3 %vm7256_vm15, %v7870_v5  ;;  %v5145_v37 = vrot.slane %v5091_v3, 2  ;;  %v5774_v57 = vunpack.c.l.bf16 %v5768_v11  ;;  %v6184_v24 = vld [vmem:[#allocation2 + $0x160] sm:$0x11] }
 0x470   : >> { %v12714_v62 = vrot.slane %v15213_v59, 2  ;;  %v5691_v58 = vld [vmem:[#allocation2 + $0x158] sm:$0xff]  ;;  %v12721_v44 = vpack.c.bf16 %v997_v60, %v996_v42  ;;  %v5775_v1 = vunpack.c.h.bf16 %v5768_v11  ;;  %v6189_v43 = vunpack.c.l.bf16 %v6184_v24 }
 0x471   : >> { %v12725_v49 = vunpack.c.l.bf16 %v5691_v58  ;;  %v12727_v53 = vunpack.c.h.bf16 %v5691_v58  ;;  %v12733_v63 = vsel %vm1912_vm14, %v5142_v4, %v12716_v50  ;;  %v12737_v3 = vsel %vm1912_vm14, %v5145_v37, %v12718_v22 }
 0x472   : >> { %15214 = vst [vmem:[#allocation197_spill] sm:$0xff] %v12714_v62  ;;  %v5794_v59 = vmul.f32 %v5774_v57, %v8784_v17  ;;  %v5795_v4 = vmul.f32 %v5775_v1, %v8786_v18  ;;  %v5962_v0 = vmul.f32 %v5774_v57, %v8806_v45  ;;  %v5963_v26 = vmul.f32 %v5775_v1, %v8808_v46 }
 0x473   : >> { %v5720_v8 = vmul.f32 %v12725_v49, %v8744_v32  ;;  %v5721_v5 = vmul.f32 %v12727_v53, %v8746_v33  ;;  %v5792_v42 = vmul.f32 %v12725_v49, %v8784_v17  ;;  %v5793_v60 = vmul.f32 %v12727_v53, %v8786_v18 }
 0x474   : >> { %v5960_v58 = vmul.f32 %v12725_v49, %v8806_v45  ;;  %v5961_v37 = vmul.f32 %v12727_v53, %v8808_v46  ;;  %v5810_v2 = vpack.c.bf16 %v5795_v4, %v5794_v59  ;;  %v6133_v6 = vmul.f32 %v12725_v49, %v8772_v12 }
 0x475   : >> { %v5809_v11 = vpack.c.bf16 %v5793_v60, %v5792_v42  ;;  %v6134_v54 = vmul.f32 %v12727_v53, %v8776_v13  ;;  %v5731_v56 = vpack.c.bf16 %v5721_v5, %v5720_v8  ;;  %v6190_v35 = vunpack.c.h.bf16 %v6184_v24 }
 0x476   : >> { %v5977_v62 = vpack.c.bf16 %v5961_v37, %v5960_v58  ;;  %v5830_v28 = vunpack.c.l.bf16 %v5810_v2  ;;  %v5831_v29 = vunpack.c.h.bf16 %v5810_v2  ;;  %v5978_v42 = vpack.c.bf16 %v5963_v26, %v5962_v0 }
 0x477   : >> { %v5828_v9 = vunpack.c.l.bf16 %v5809_v11  ;;  %v5829_v48 = vunpack.c.h.bf16 %v5809_v11  ;;  %v12763_v4 = vpack.c.bf16 %v6134_v54, %v6133_v6  ;;  %v5744_v61 = vunpack.c.l.bf16 %v5731_v56 }
 0x478   : >> { %v5996_v60 = vunpack.c.l.bf16 %v5977_v62  ;;  %v5997_v59 = vunpack.c.h.bf16 %v5977_v62  ;;  %v5888_v58 = vrot.slane %v5830_v28, 1  ;;  %v5890_v37 = vrot.slane %v5831_v29, 1 }
 0x479   : >> { %v12759_v57 = vrot.slane %v5828_v9, 1  ;;  %v12761_v1 = vrot.slane %v5829_v48, 1  ;;  %15217 = vst [vmem:[#allocation116_spill] sm:$0xff] %v12763_v4  ;;  %v5998_v25 = vunpack.c.l.bf16 %v5978_v42  ;;  %v5999_v38 = vunpack.c.h.bf16 %v5978_v42 }
 0x47a   : >> { %v5745_v8 = vunpack.c.h.bf16 %v5731_v56  ;;  %v12765_v5 = vrot.slane %v5996_v60, 2  ;;  %v12767_v24 = vrot.slane %v5997_v59, 2  ;;  %v6203_v6 = vmul.f32 %v12725_v49, %v8790_v19 }
 0x47b   : >> { %15215 = vst [vmem:[#allocation179_spill] sm:$0xff] %v12759_v57  ;;  %v5889_v2 = vsel %vm1708_vm13, %v12759_v57, %v5888_v58  ;;  %v5891_v48 = vsel %vm1708_vm13, %v12761_v1, %v5890_v37  ;;  %v6056_v9 = vrot.slane %v5998_v25, 2  ;;  %v6058_v62 = vrot.slane %v5999_v38, 2  ;;  %v6600_v25 = vld [vmem:[#allocation2 + $0x160] sm:$0x11] }
 0x47c   : >> { %15216 = vst [vmem:[#allocation115_spill] sm:$0xff] %v12761_v1  ;;  %v6204_v56 = vmul.f32 %v12727_v53, %v8792_v20  ;;  %v12779_v29 = vadd.f32 %v5889_v2, %v5744_v61  ;;  %v12781_v26 = vadd.f32 %v5891_v48, %v5745_v8  ;;  %v6205_v0 = vmul.f32 %v6189_v43, %v8790_v19  ;;  %v15237_v1 = vld [vmem:[#allocation122_spill] sm:$0xff] }
 0x47d   : >> { %15218 = vst [vmem:[#allocation196_spill] sm:$0xff] %v12765_v5  ;;  %v6206_v11 = vmul.f32 %v6190_v35, %v8792_v20  ;;  %v6371_v42 = vmul.f32 %v12725_v49, %v8810_v47  ;;  %v6372_v60 = vmul.f32 %v12727_v53, %v8814_v41  ;;  %v6373_v59 = vmul.f32 %v6189_v43, %v8810_v47 }
 0x47e   : >> { %15219 = vst [vmem:[#allocation162_spill] sm:$0xff] %v12767_v24  ;;  %v6223_v38 = vpack.c.bf16 %v6204_v56, %v6203_v6  ;;  %v12792_v61 = vsel %vm1912_vm14, %v12765_v5, %v6056_v9  ;;  %v12796_v58 = vsel %vm1912_vm14, %v12767_v24, %v6058_v62  ;;  %v6374_v8 = vmul.f32 %v6190_v35, %v8814_v41  ;;  %v1462_v24 = vld [vmem:[#allocation2 + $0x168] sm:$0xff]  ;;  %v15236_v5 = vld [vmem:[#allocation41_spill] sm:$0xff] }
 0x47f   : >> { %15220 = vst [vmem:[#allocation148_spill] sm:$0xff] %v12779_v29  ;;  %v6224_v37 = vpack.c.bf16 %v6206_v11, %v6205_v0  ;;  %v12799_v6 = vpack.c.bf16 %v6372_v60, %v6371_v42  ;;  %v6604_v56 = vunpack.c.l.bf16 %v6600_v25  ;;  %v6605_v43 = vunpack.c.h.bf16 %v6600_v25 }
 0x480   : >> { %15221 = vst [vmem:[#allocation195_spill] sm:$0xff] %v12781_v26  ;;  %v6239_v2 = vunpack.c.l.bf16 %v6223_v38  ;;  %v6240_v48 = vunpack.c.h.bf16 %v6223_v38  ;;  %v6392_v26 = vpack.c.bf16 %v6374_v8, %v6373_v59  ;;  %v12807_v62 = vmul.f32 %v12725_v49, %v14472_v36 }
 0x481   : >> { %15222 = vst [vmem:[#allocation165_spill] sm:$0xff] %v12792_v61  ;;  %v6241_v28 = vunpack.c.l.bf16 %v6224_v37  ;;  %v6242_v54 = vunpack.c.h.bf16 %v6224_v37  ;;  %v12811_v35 = vmul.f32 %v12727_v53, %v14474_v7  ;;  %v6614_v25 = vmul.f32 %v12725_v49, %v8873_v21 }
 0x482   : >> { %15223 = vst [vmem:[#allocation133_spill] sm:$0xff] %v12796_v58  ;;  %v12801_v29 = vrot.slane %v6239_v2, 1  ;;  %v12803_v9 = vrot.slane %v6240_v48, 1  ;;  %v6409_v38 = vunpack.c.l.bf16 %v6392_v26  ;;  %v6410_v42 = vunpack.c.h.bf16 %v6392_v26 }
 0x483   : >> { %15224 = vst [vmem:[#allocation158_spill] sm:$0xff] %v12799_v6  ;;  %v6615_v60 = vmul.f32 %v12727_v53, %v14477_v27  ;;  %v6616_v59 = vmul.f32 %v6604_v56, %v8873_v21  ;;  %v6617_v37 = vmul.f32 %v6605_v43, %v14477_v27  ;;  %v12821_v8 = vrot.slane %v6241_v28, 1 }
 0x484   : >> { %15225 = vst [vmem:[#allocation166_spill] sm:$0xff] %v12801_v29  ;;  %v12823_v2 = vrot.slane %v6242_v54, 1  ;;  %v12825_v48 = vrot.slane %v6409_v38, 2  ;;  %v12827_v0 = vrot.slane %v6410_v42, 2  ;;  %v12835_v58 = vmul.f32 %v12725_v49, %v14479_v23  ;;  %v15235_v49 = vld [vmem:[#allocation176_spill] sm:$0xff] }
 0x485   : >> { %15226 = vst [vmem:[#allocation143_spill] sm:$0xff] %v12803_v9  ;;  %v12829_v11 = vpack.c.bf16 %v6615_v60, %v6614_v25  ;;  %v12831_v26 = vpack.c.bf16 %v6617_v37, %v6616_v59  ;;  %v12839_v61 = vmul.f32 %v12727_v53, %v9038_v16  ;;  %v6784_v28 = vmul.f32 %v6604_v56, %v14479_v23  ;;  %v15234_v60 = vld [vmem:[#allocation199_spill] sm:$0xff] }
 0x486   : >> { %15227 = vst [vmem:[#allocation145_spill] sm:$0xff] %v12821_v8  ;;  %v6785_v54 = vmul.f32 %v6605_v43, %v9038_v16  ;;  %v1277_v38 = vshrl.u32 %v12721_v44, 16  ;;  %v1280_v42 = vshll.u32 %v12721_v44, 16  ;;  %v5149_v59 = vsel %vm1912_vm14, %v12716_v50, %v15234_v60 }
 0x487   : >> { %15228 = vst [vmem:[#allocation218_spill] sm:$0xff] %v12823_v2  ;;  %v5151_v37 = vsel %vm1912_vm14, %v12718_v22, %v15235_v49  ;;  %v5192_v53 = vadd.f32 %v12733_v63, %v12680_v30  ;;  %v5193_v43 = vadd.f32 %v12737_v3, %v12695_v31  ;;  %v5194_v44 = vadd.f32 %v5149_v59, %v12686_v39  ;;  %v15239_v22 = vld [vmem:[#allocation17_spill] sm:$0xff]  ;;  %v15240_v49 = vld [vmem:[#allocation55_spill] sm:$0xff]  ;;  %v15241_v63 = vld [vmem:[#allocation26_spill] sm:$0xff] }
 0x488   : >> { %15229 = vst [vmem:[#allocation88_spill] sm:$0xff] %v12825_v48  ;;  %v12854_v56 = vrot.slane %v1277_v38, 7  ;;  %v5195_v25 = vadd.f32 %v5151_v37, %v12697_v10  ;;  %v5248_v50 = vpack.c.bf16 %v15237_v1, %v15236_v5  ;;  %v15238_v60 = vunpack.c.l.bf16 %v12706_v15 }
 0x489   : >> { %15230 = vst [vmem:[#allocation91_spill] sm:$0xff] %v12827_v0  ;;  %v5325_v30 = vpack.c.bf16 %v15240_v49, %v15239_v22  ;;  %v5343_v38 = vunpack.c.l.bf16 %v15241_v63  ;;  %v12870_v31 = vpack.c.bf16 %v6785_v54, %v6784_v28  ;;  %v15243_v10 = vunpack.c.h.bf16 %v12706_v15 }
 0x48a   : >> { %15231 = vst [vmem:[#allocation37_spill] sm:$0xff] %v12831_v26  ;;  %v12864_v57 = vadd.f32 %v15238_v60, %v5192_v53  ;;  %v1282_v39 = vor.u32 %v1280_v42, %v12854_v56  ;;  %v5259_v1 = vunpack.c.l.bf16 %v5248_v50  ;;  %v5260_v5 = vunpack.c.h.bf16 %v5248_v50 }
 0x48b   : >> { %15232 = vst [vmem:[#allocation200_spill] sm:$0xff] %v12835_v58  ;;  %v12875_v3 = vadd.f32 %v15243_v10, %v5193_v43  ;;  %v5341_v59 = vunpack.c.l.bf16 %v5325_v30  ;;  %v5342_v37 = vunpack.c.h.bf16 %v5325_v30  ;;  %v5344_v22 = vunpack.c.h.bf16 %v15241_v63 }
 0x48c   : >> { %15233 = vst [vmem:[#allocation175_spill] sm:$0xff] %v12839_v61  ;;  %v1463_v60 = vsel %vm8724_vm7, %v1282_v39, %v1462_v24  ;;  %v15244_v28 = vunpack.c.l.bf16 %v12710_v14  ;;  %v15245_v15 = vunpack.c.h.bf16 %v12710_v14  ;;  %v5397_v10 = vrot.slane %v5343_v38, 1 }
 0x48d   : >> { %15242 = vst [vmem:[#allocation180_spill] sm:$0xff] %v12870_v31  ;;  %v5706_v42 = vunpack.c.l.bf16 %v1463_v60  ;;  %v5707_v49 = vunpack.c.h.bf16 %v1463_v60  ;;  %v12885_v50 = vadd.f32 %v5259_v1, %v5194_v44  ;;  %v12887_v30 = vadd.f32 %v5260_v5, %v5195_v25 }
 0x48e   : >> { %v5391_v54 = vrot.slane %v15244_v28, 1  ;;  %1464 = vst [vmem:[#allocation2 + $0x168] sm:$0xff] %v1463_v60  ;;  %v5394_v43 = vrot.slane %v15245_v15, 1  ;;  %v5392_v0 = vrot.slane %v5341_v59, 1  ;;  %v5395_v53 = vrot.slane %v5342_v37, 1  ;;  %v15247_v59 = vld [vmem:[#allocation208_spill] sm:$0xff] }
 0x48f   : >> { %v5722_v24 = vmul.f32 %v5706_v42, %v8744_v32  ;;  %v5723_v63 = vmul.f32 %v5707_v49, %v8746_v33  ;;  %v5796_v39 = vmul.f32 %v5706_v42, %v8784_v17  ;;  %v5797_v28 = vmul.f32 %v5707_v49, %v8786_v18  ;;  %v15248_v37 = vld [vmem:[#allocation186_spill] sm:$0xff] }
 0x490   : >> { %v6135_v60 = vmul.f32 %v5706_v42, %v8772_v12  ;;  %v6136_v14 = vmul.f32 %v5707_v49, %v8776_v13  ;;  %v6207_v38 = vmul.f32 %v5706_v42, %v8790_v19  ;;  %v6208_v44 = vmul.f32 %v5707_v49, %v8792_v20 }
 0x491   : >> { %v12897_v25 = vpack.c.bf16 %v5723_v63, %v5722_v24  ;;  %v5811_v1 = vpack.c.bf16 %v5797_v28, %v5796_v39  ;;  %v5399_v5 = vrot.slane %v5344_v22, 1  ;;  %v12901_v15 = vpack.c.bf16 %v15248_v37, %v15247_v59 }
 0x492   : >> { %v12903_v48 = vpack.c.bf16 %v6136_v14, %v6135_v60  ;;  %v6225_v6 = vpack.c.bf16 %v6208_v44, %v6207_v38  ;;  %v6548_v2 = vmul.f32 %v5706_v42, %v14472_v36  ;;  %v6549_v8 = vmul.f32 %v5707_v49, %v14474_v7 }
 0x493   : >> { %15246 = vst [vmem:[#allocation219_spill] sm:$0xff] %v12897_v25  ;;  %v5832_v9 = vunpack.c.l.bf16 %v5811_v1  ;;  %v5833_v29 = vunpack.c.h.bf16 %v5811_v1  ;;  %v6618_v4 = vmul.f32 %v5706_v42, %v8873_v21  ;;  %v6619_v24 = vmul.f32 %v5707_v49, %v14477_v27 }
 0x494   : >> { %15249 = vst [vmem:[#allocation90_spill] sm:$0xff] %v12903_v48  ;;  %v6243_v28 = vunpack.c.l.bf16 %v6225_v6  ;;  %v6244_v59 = vunpack.c.h.bf16 %v6225_v6 }
 0x495   : >> { %v5937_v39 = vld [vmem:[#allocation2 + $0x168] sm:$0xee]  ;;  %v12913_v1 = vrot.slane %v5832_v9, 1  ;;  %v12915_v42 = vrot.slane %v5833_v29, 1  ;;  %v5393_v29 = vsel %vm1708_vm13, %v5391_v54, %v5392_v0 }
 0x496   : >> { %v6353_v60 = vld [vmem:[#allocation2 + $0x168] sm:$0xee]  ;;  %v5944_v14 = vunpack.c.l.bf16 %v5937_v39  ;;  %v5945_v38 = vunpack.c.h.bf16 %v5937_v39  ;;  %v12919_v25 = vrot.slane %v6243_v28, 1  ;;  %v12921_v6 = vrot.slane %v6244_v59, 1 }
 0x497   : >> { %v6769_v31 = vld [vmem:[#allocation2 + $0x168] sm:$0xee]  ;;  %15250 = vst [vmem:[#allocation92_spill] sm:$0xff] %v12913_v1  ;;  %v6359_v49 = vunpack.c.l.bf16 %v6353_v60  ;;  %v6360_v61 = vunpack.c.h.bf16 %v6353_v60  ;;  %v5398_v60 = vsel %vm1708_vm13, %v5392_v0, %v5397_v10  ;;  %v12939_v0 = vpack.c.bf16 %v6619_v24, %v6618_v4  ;;  %v7319_v10 = vpop.f32.mrf.mxu2 }
 0x498   : >> { %15251 = vst [vmem:[#allocation93_spill] sm:$0xff] %v12915_v42  ;;  %v5964_v63 = vmul.f32 %v5944_v14, %v8806_v45  ;;  %v5965_v22 = vmul.f32 %v5945_v38, %v8808_v46  ;;  %v6774_v37 = vunpack.c.l.bf16 %v6769_v31  ;;  %v6775_v48 = vunpack.c.h.bf16 %v6769_v31 }
 0x499   : >> { %15252 = vst [vmem:[#allocation173_spill] sm:$0xff] %v12919_v25  ;;  %v6375_v39 = vmul.f32 %v6359_v49, %v8810_v47  ;;  %v6376_v44 = vmul.f32 %v6360_v61, %v8814_v41  ;;  %v5396_v42 = vsel %vm1708_vm13, %v5394_v43, %v5395_v53  ;;  %v5400_v38 = vsel %vm1708_vm13, %v5395_v53, %v5399_v5  ;;  %v15258_v5 = vld [vmem:[#allocation44_spill] sm:$0xff]  ;;  %v15268_v25 = vld [vmem:[#allocation206_spill] sm:$0xff] }
 0x49a   : >> { %15253 = vst [vmem:[#allocation112_spill] sm:$0xff] %v12921_v6  ;;  %v5979_v9 = vpack.c.bf16 %v5965_v22, %v5964_v63  ;;  %v6786_v28 = vmul.f32 %v6774_v37, %v14479_v23  ;;  %v6787_v59 = vmul.f32 %v6775_v48, %v9038_v16  ;;  %v5441_v61 = vadd.f32 %v5393_v29, %v12864_v57  ;;  %v779_v37 = vpop.f32.mrf.mxu0 }
 0x49b   : >> { %v12928_v14 = vpack.c.bf16 %v6376_v44, %v6375_v39  ;;  %v5442_v31 = vadd.f32 %v5396_v42, %v12875_v3  ;;  %v12937_v63 = vpack.c.bf16 %v6549_v8, %v6548_v2  ;;  %15255 = vst [vmem:[#allocation104_spill] sm:$0xff] %v12939_v0  ;;  %v5443_v53 = vadd.f32 %v5398_v60, %v12885_v50  ;;  %v15259_v44 = vld [vmem:[#allocation125_spill] sm:$0xff]  ;;  %v15261_v39 = vld [vmem:[#allocation126_spill] sm:$0xff]  ;;  %v15262_v8 = vld [vmem:[#allocation128_spill] sm:$0xff]  ;;  %v868_v50 = vpop.f32.mrf.mxu1 }
 0x49c   : >> { %v6000_v49 = vunpack.c.l.bf16 %v5979_v9  ;;  %v6001_v1 = vunpack.c.h.bf16 %v5979_v9  ;;  %v12943_v48 = vpack.c.bf16 %v6787_v59, %v6786_v28  ;;  %v5493_v57 = vpack.c.bf16 %v15259_v44, %v15258_v5  ;;  %v7408_v5 = vpop.f32.mrf.mxu3 }
 0x49d   : >> { %15254 = vst [vmem:[#allocation174_spill] sm:$0xff] %v12937_v63  ;;  %v5444_v42 = vadd.f32 %v5400_v38, %v12887_v30  ;;  %v5494_v2 = vpack.c.bf16 %v15262_v8, %v15261_v39  ;;  %v5507_v4 = vunpack.c.l.bf16 %v12901_v15  ;;  %v5508_v24 = vunpack.c.h.bf16 %v12901_v15 }
 0x49e   : >> { %v12941_v22 = vrot.slane %v6000_v49, 2  ;;  %15257 = vst [vmem:[#allocation190_spill] sm:$0xff] %v12943_v48  ;;  %v12948_v3 = vrot.slane %v6001_v1, 2  ;;  %v5509_v9 = vunpack.c.l.bf16 %v5493_v57  ;;  %v5510_v29 = vunpack.c.h.bf16 %v5493_v57  ;;  %v15269_v48 = vld [vmem:[#allocation187_spill] sm:$0xff] }
 0x49f   : >> { %v7320_v28 = vadd.f32 %v12590_v55, %v7319_v10  ;;  %v5511_v60 = vunpack.c.l.bf16 %v5494_v2  ;;  %v5512_v59 = vunpack.c.h.bf16 %v5494_v2  ;;  %v5559_v49 = vrot.slane %v5507_v4, 2  ;;  %v15264_v2 = vld [vmem:[#allocation146_spill] sm:$0xff] }
 0x4a0   : >> { %15256 = vst [vmem:[#allocation189_spill] sm:$0xff] %v12941_v22  ;;  %v780_v1 = vadd.f32 %v779_v37, %v8699_v51  ;;  %v5560_v44 = vrot.slane %v5509_v9, 2  ;;  %v5562_v30 = vrot.slane %v5508_v24, 2  ;;  %v5563_v38 = vrot.slane %v5510_v29, 2  ;;  %v15265_v22 = vld [vmem:[#allocation182_spill] sm:$0xff]  ;;  %v15266_v37 = vld [vmem:[#allocation167_spill] sm:$0xff] }
 0x4a1   : >> { %15260 = vst [vmem:[#allocation108_spill] sm:$0xff] %v12948_v3  ;;  %v12957_v43 = vadd.f32 %v7408_v5, %v7320_v28  ;;  %v5565_v39 = vrot.slane %v5511_v60, 2  ;;  %v5567_v8 = vrot.slane %v5512_v59, 2  ;;  %v869_v15 = vadd.f32 %v868_v50, %v8701_v52  ;;  %v15263_v3 = vld [vmem:[#allocation212_spill] sm:$0xff] }
 0x4a2   : >> { %v934_v54 = vmax.f32 %v780_v1, 0.0  ;;  %v5561_v57 = vsel %vm1912_vm14, %v5559_v49, %v5560_v44  ;;  %v5564_v10 = vsel %vm1912_vm14, %v5562_v30, %v5563_v38  ;;  %v4569_v4 = vsel %vm1708_vm13, %v15264_v2, %v15263_v3  ;;  %v15267_v30 = vld [vmem:[#allocation20_spill] sm:$0xff] }
 0x4a3   : >> { %v4572_v24 = vsel %vm1708_vm13, %v15266_v37, %v15265_v22  ;;  %v5566_v9 = vsel %vm1912_vm14, %v5560_v44, %v5565_v39  ;;  %v5568_v29 = vsel %vm1912_vm14, %v5563_v38, %v5567_v8  ;;  %v5609_v28 = vadd.f32 %v5561_v57, %v5441_v61 }
 0x4a4   : >> { %v5610_v60 = vadd.f32 %v5564_v10, %v5442_v31  ;;  %v5611_v59 = vadd.f32 %v5566_v9, %v5443_v53  ;;  %v5612_v50 = vadd.f32 %v5568_v29, %v5444_v42  ;;  %v998_v5 = vmin.f32 %v934_v54, 6.0  ;;  %v15270_v53 = vld [vmem:[#allocation163_spill] sm:$0xff]  ;;  %v15273_v10 = vld [vmem:[#allocation181_spill] sm:$0xff] }
 0x4a5   : >> { %v935_v49 = vmax.f32 %v869_v15, 0.0  ;;  %v5625_v1 = vadd.f32 %v5609_v28, %v9956_v40  ;;  %v4574_v2 = vsel %vm1708_vm13, %v15263_v3, %v15268_v25  ;;  %v4576_v44 = vsel %vm1708_vm13, %v15265_v22, %v15269_v48 }
 0x4a6   : >> { %v5626_v6 = vadd.f32 %v5610_v60, %v15267_v30  ;;  %v5627_v38 = vadd.f32 %v5611_v59, %v9956_v40  ;;  %v5628_v61 = vadd.f32 %v5612_v50, %v15267_v30  ;;  %v15271_v54 = vunpack.c.l.bf16 %v15270_v53  ;;  %v15276_v59 = vld [vmem:[#allocation188_spill] sm:$0xff]  ;;  %v15277_v50 = vld [vmem:[#allocation198_spill] sm:$0xff] }
 0x4a7   : >> { %v999_v31 = vmin.f32 %v935_v49, 6.0  ;;  %v5641_v39 = vmax.f32 %v5625_v1, 0.0  ;;  %v15272_v15 = vunpack.c.h.bf16 %v15270_v53  ;;  %v15274_v37 = vunpack.c.l.bf16 %v15273_v10  ;;  %v15278_v49 = vld [vmem:[#allocation85_spill] sm:$0xff] }
 0x4a8   : >> { %v4611_v42 = vadd.f32 %v4569_v4, %v15271_v54  ;;  %v5642_v8 = vmax.f32 %v5626_v6, 0.0  ;;  %v5643_v3 = vmax.f32 %v5627_v38, 0.0  ;;  %v5644_v9 = vmax.f32 %v5628_v61, 0.0  ;;  %v15279_v6 = vld [vmem:[#allocation205_spill] sm:$0xff] }
 0x4a9   : >> { %v4612_v57 = vadd.f32 %v4572_v24, %v15272_v15  ;;  %v4613_v25 = vadd.f32 %v4574_v2, %v15274_v37  ;;  %v1033_v29 = vpack.c.bf16 %v999_v31, %v998_v5  ;;  %v15275_v22 = vunpack.c.h.bf16 %v15273_v10  ;;  %v15280_v61 = vld [vmem:[#allocation213_spill] sm:$0xff]  ;;  %v7321_v10 = vpop.f32.mrf.mxu2 }
 0x4aa   : >> { %v5657_v28 = vmin.f32 %v5641_v39, 6.0  ;;  %v5658_v60 = vmin.f32 %v5642_v8, 6.0  ;;  %v4737_v4 = vsel %vm1912_vm14, %v15277_v50, %v15276_v59  ;;  %v4740_v1 = vsel %vm1912_vm14, %v15279_v6, %v15278_v49  ;;  %v15284_v6 = vld [vmem:[#allocation216_spill] sm:$0xff] }
 0x4ab   : >> { %v4614_v48 = vadd.f32 %v4576_v44, %v15275_v22  ;;  %v5659_v24 = vmin.f32 %v5643_v3, 6.0  ;;  %v5660_v53 = vmin.f32 %v5644_v9, 6.0  ;;  %v1285_v54 = vshrl.u32 %v1033_v29, 16  ;;  %v15281_v44 = vld [vmem:[#allocation214_spill] sm:$0xff]  ;;  %v1466_v3 = vld [vmem:[#allocation2 + $0x178] sm:$0x11] }
 0x4ac   : >> { %v1288_v2 = vshll.u32 %v1033_v29, 16  ;;  %v5671_v38 = vpack.c.bf16 %v5658_v60, %v5657_v28  ;;  %v4742_v5 = vsel %vm1912_vm14, %v15276_v59, %v15280_v61  ;;  %v4744_v31 = vsel %vm1912_vm14, %v15278_v49, %v15281_v44  ;;  %v15283_v28 = vld [vmem:[#allocation201_spill] sm:$0xff]  ;;  %v7410_v49 = vpop.f32.mrf.mxu3  ;;  %v15367_v61 = vld [vmem:[#allocation82_spill] sm:$0xff] }
 0x4ad   : >> { %v4779_v39 = vadd.f32 %v4737_v4, %v4611_v42  ;;  %v5672_v8 = vpack.c.bf16 %v5660_v53, %v5659_v24  ;;  %v1287_v15 = vrot.slane %v1285_v54, 7  ;;  %v4780_v37 = vadd.f32 %v4740_v1, %v4612_v57  ;;  %v15285_v54 = vld [vmem:[#allocation118_spill] sm:$0xff] }
 0x4ae   : >> { %v4781_v22 = vadd.f32 %v4742_v5, %v4613_v25  ;;  %5679 = vst.msk [vmem:[#allocation3 + $0x90] sm:$0xff] %vm8519_vm2, %v5671_v38  ;;  %v7322_v9 = vadd.f32 %v12590_v55, %v7321_v10  ;;  %v4782_v29 = vadd.f32 %v4744_v31, %v4614_v48  ;;  %v4844_v60 = vunpack.c.l.bf16 %v15283_v28  ;;  %v782_v31 = vpop.f32.mrf.mxu0 }
 0x4af   : >> { %v4845_v59 = vunpack.c.h.bf16 %v15283_v28  ;;  %5680 = vst.msk [vmem:[#allocation3 + $0x98] sm:$0xff] %vm8519_vm2, %v5672_v8  ;;  %v1290_v42 = vor.u32 %v1288_v2, %v1287_v15  ;;  %v1292_v4 = vrot.slane %v1287_v15, 4  ;;  %v4846_v57 = vunpack.c.l.bf16 %v15284_v6  ;;  %v871_v8 = vpop.f32.mrf.mxu1 }
 0x4b0   : >> { %v4847_v25 = vunpack.c.h.bf16 %v15284_v6  ;;  %v7411_v1 = vadd.f32 %v7410_v49, %v7322_v9  ;;  %v4860_v24 = vadd.f32 %v4844_v60, %v4779_v39  ;;  %v15286_v55 = vunpack.c.l.bf16 %v15285_v54  ;;  %v15290_v9 = vld [vmem:[#allocation184_spill] sm:$0xff] }
 0x4b1   : >> { %v4861_v53 = vadd.f32 %v4845_v59, %v4780_v37  ;;  %v15287_v38 = vrot.slane %v12854_v56, 4  ;;  %v1467_v2 = vsel %vm8542_vm10, %v1292_v4, %v1466_v3  ;;  %v4862_v15 = vadd.f32 %v4846_v57, %v4781_v22  ;;  %v15292_v59 = vld [vmem:[#allocation83_spill] sm:$0xff] }
 0x4b2   : >> { %v4985_v48 = vrot.slane %v15286_v55, 1  ;;  %v4863_v10 = vadd.f32 %v4847_v25, %v4782_v29  ;;  %v8055_v39 = vpack.c.bf16 %v7411_v1, %v12957_v43  ;;  %v783_v37 = vadd.f32 %v782_v31, %v8699_v51  ;;  %1468 = vst [vmem:[#allocation2 + $0x178] sm:$0x11] %v1467_v2  ;;  %v15294_v55 = vld [vmem:[#allocation207_spill] sm:$0xff] }
 0x4b3   : >> { %v1291_v5 = vsel %vm8765_vm9, %v15287_v38, %v1290_v42  ;;  %v872_v56 = vadd.f32 %v871_v8, %v8701_v52  ;;  %v15291_v60 = vunpack.c.h.bf16 %v15285_v54  ;;  %v15293_v42 = vld [vmem:[#allocation25_spill] sm:$0xff]  ;;  %v15295_v38 = vld [vmem:[#allocation127_spill] sm:$0xff] }
 0x4b4   : >> { %1465 = vst.msk [vmem:[#allocation2 + $0x170] sm:$0xff] %vm8519_vm2, %v1291_v5  ;;  %v4986_v28 = vsel %vm1708_vm13, %v15290_v9, %v4985_v48  ;;  %v4991_v22 = vsel %vm1708_vm13, %v4985_v48, %v15292_v59  ;;  %v5096_v4 = vunpack.c.l.bf16 %v15293_v42  ;;  %v936_v43 = vmax.f32 %v783_v37, 0.0  ;;  %v15296_v48 = vld [vmem:[#allocation21_spill] sm:$0xff] }
 0x4b5   : >> { %v4988_v3 = vrot.slane %v15291_v60, 1  ;;  %v13028_v29 = vadd.f32 %v4986_v28, %v4860_v24  ;;  %8127 = vst [vmem:[%s12674_s29 + $0x8] sm:$0xff] %v8055_v39   ;;  %v937_v49 = vmax.f32 %v872_v56, 0.0  ;;  %v13032_v6 = vadd.f32 %v4991_v22, %v4862_v15  ;;  %v7873_v25 = vld [vmem:[#allocation3 + $0x90] sm:$0xf] }
 0x4b6   : >> { %v5097_v57 = vunpack.c.h.bf16 %v15293_v42  ;;  %v8022_v1 = vld [vmem:[#allocation3 + $0x94] sm:$0xf]  ;;  %v5098_v24 = vunpack.c.l.bf16 %v15296_v48  ;;  %v5099_v2 = vunpack.c.h.bf16 %v15296_v48  ;;  %v8023_v31 = vld [vmem:[#allocation3 + $0x94] sm:$0xf0]  ;;  %v7875_v8 = vld [vmem:[#allocation3 + $0x98] sm:$0xf0]  ;;  %v15297_v22 = vunpack.c.l.bf16 %v12928_v14 }
 0x4b7   : >> { %v4989_v54 = vsel %vm1708_vm13, %v15294_v55, %v4988_v3  ;;  %v4993_v5 = vsel %vm1708_vm13, %v4988_v3, %v15295_v38  ;;  %v1000_v39 = vmin.f32 %v936_v43, 6.0  ;;  %v1001_v37 = vmin.f32 %v937_v49, 6.0 }
 0x4b8   : >> { %v13041_v15 = vadd.f32 %v4989_v54, %v4861_v53  ;;  %v13043_v56 = vadd.f32 %v4993_v5, %v4863_v10  ;;  %v7874_v9 = vor.u32 %v8023_v31, %v7873_v25  ;;  %v7878_v28 = vor.u32 %v8022_v1, %v7875_v8  ;;  %v15302_v25 = vld [vmem:[#allocation210_spill] sm:$0xff]  ;;  %v15303_v1 = vld [vmem:[#allocation48_spill] sm:$0xff]  ;;  %v15305_v8 = vld [vmem:[#allocation185_spill] sm:$0xff] }
 0x4b9   : >> { %v5152_v60 = vrot.slane %v5096_v4, 2  ;;  %v5153_v59 = vrot.slane %v5098_v24, 2  ;;  %v13047_v42 = vrot.slane %v15297_v22, 2  ;;  %v13049_v3 = vpack.c.bf16 %v1001_v37, %v1000_v39  ;;  %v15301_v4 = vld [vmem:[#allocation49_spill] sm:$0xff]  ;;  %v15304_v31 = vld [vmem:[#allocation50_spill] sm:$0xff] }
 0x4ba   : >> { %v5155_v55 = vrot.slane %v5097_v57, 2  ;;  %v5156_v38 = vrot.slane %v5099_v2, 2  ;;  %v15299_v48 = vunpack.c.h.bf16 %v12928_v14  ;;  %7358 = vmatmul.bf16.gmra.mxu2 %v7874_v9  ;;  %7972 = vmatmul.msk.bf16.gmra.mxu3 %vm7256_vm15, %v7878_v28  ;;  %v13065_v54 = vpack.c.bf16 %v15303_v1, %v15302_v25  ;;  %v5769_v5 = vld [vmem:[#allocation2 + $0x178] sm:$0x11] }
 0x4bb   : >> { %15298 = vst [vmem:[#allocation140_spill] sm:$0xff] %v13047_v42  ;;  %v5693_v53 = vld [vmem:[#allocation2 + $0x170] sm:$0xff]  ;;  %v13057_v10 = vsel %vm1912_vm14, %v5152_v60, %v5153_v59  ;;  %v13061_v49 = vsel %vm1912_vm14, %v5153_v59, %v15301_v4  ;;  %v13071_v24 = vld [vmem:[#allocation2 + $0x178] sm:$0x11]  ;;  %v13078_v39 = vpack.c.bf16 %v15305_v8, %v15304_v31  ;;  %v5776_v37 = vunpack.c.l.bf16 %v5769_v5 }
 0x4bc   : >> { %v13053_v43 = vrot.slane %v15299_v48, 2  ;;  %v13067_v57 = vunpack.c.l.bf16 %v5693_v53  ;;  %v13069_v14 = vunpack.c.h.bf16 %v5693_v53  ;;  %v13074_v2 = vsel %vm1912_vm14, %v5155_v55, %v5156_v38  ;;  %v15306_v60 = vld [vmem:[#allocation209_spill] sm:$0xff] }
 0x4bd   : >> { %v5777_v9 = vunpack.c.h.bf16 %v5769_v5  ;;  %v6191_v28 = vunpack.c.l.bf16 %v13071_v24  ;;  %v13083_v59 = vsel %vm1912_vm14, %v5156_v38, %v15306_v60  ;;  %v5800_v4 = vmul.f32 %v5776_v37, %v8784_v17 }
 0x4be   : >> { %15300 = vst [vmem:[#allocation194_spill] sm:$0xff] %v13053_v43  ;;  %v5724_v22 = vmul.f32 %v13067_v57, %v8744_v32  ;;  %v5725_v48 = vmul.f32 %v13069_v14, %v8746_v33  ;;  %v5798_v55 = vmul.f32 %v13067_v57, %v8784_v17  ;;  %v5799_v53 = vmul.f32 %v13069_v14, %v8786_v18 }
 0x4bf   : >> { %v5801_v25 = vmul.f32 %v5777_v9, %v8786_v18  ;;  %v5966_v38 = vmul.f32 %v13067_v57, %v8806_v45  ;;  %v5967_v1 = vmul.f32 %v13069_v14, %v8808_v46  ;;  %v5968_v33 = vmul.f32 %v5776_v37, %v8806_v45 }
 0x4c0   : >> { %v5733_v32 = vpack.c.bf16 %v5725_v48, %v5724_v22  ;;  %v5812_v5 = vpack.c.bf16 %v5799_v53, %v5798_v55  ;;  %v5969_v31 = vmul.f32 %v5777_v9, %v8808_v46  ;;  %v6137_v43 = vmul.f32 %v13067_v57, %v8772_v12 }
 0x4c1   : >> { %v5813_v8 = vpack.c.bf16 %v5801_v25, %v5800_v4  ;;  %v5980_v60 = vpack.c.bf16 %v5967_v1, %v5966_v38  ;;  %v6138_v17 = vmul.f32 %v13069_v14, %v8776_v13  ;;  %v6192_v63 = vunpack.c.h.bf16 %v13071_v24 }
 0x4c2   : >> { %v5748_v18 = vunpack.c.l.bf16 %v5733_v32  ;;  %v5834_v42 = vunpack.c.l.bf16 %v5812_v5  ;;  %v5835_v0 = vunpack.c.h.bf16 %v5812_v5  ;;  %v5981_v48 = vpack.c.bf16 %v5969_v31, %v5968_v33 }
 0x4c3   : >> { %v5836_v58 = vunpack.c.l.bf16 %v5813_v8  ;;  %v5837_v22 = vunpack.c.h.bf16 %v5813_v8  ;;  %v6002_v55 = vunpack.c.l.bf16 %v5980_v60  ;;  %v6003_v37 = vunpack.c.h.bf16 %v5980_v60 }
 0x4c4   : >> { %v13106_v45 = vrot.slane %v5834_v42, 1  ;;  %v13108_v46 = vrot.slane %v5835_v0, 1  ;;  %v13110_v9 = vpack.c.bf16 %v6138_v17, %v6137_v43  ;;  %v6004_v25 = vunpack.c.l.bf16 %v5981_v48 }
 0x4c5   : >> { %v5898_v53 = vrot.slane %v5836_v58, 1  ;;  %v5900_v4 = vrot.slane %v5837_v22, 1  ;;  %v6005_v38 = vunpack.c.h.bf16 %v5981_v48  ;;  %v5749_v1 = vunpack.c.h.bf16 %v5733_v32 }
 0x4c6   : >> { %15307 = vst [vmem:[#allocation130_spill] sm:$0xff] %v13106_v45  ;;  %v13112_v26 = vrot.slane %v6002_v55, 2  ;;  %v13114_v5 = vrot.slane %v6003_v37, 2  ;;  %v6066_v33 = vrot.slane %v6004_v25, 2  ;;  %v6209_v32 = vmul.f32 %v13067_v57, %v8790_v19 }
 0x4c7   : >> { %15308 = vst [vmem:[#allocation178_spill] sm:$0xff] %v13108_v46  ;;  %v5899_v42 = vsel %vm1708_vm13, %v13106_v45, %v5898_v53  ;;  %v5901_v0 = vsel %vm1708_vm13, %v13108_v46, %v5900_v4  ;;  %v6068_v43 = vrot.slane %v6005_v38, 2  ;;  %v6210_v8 = vmul.f32 %v13069_v14, %v8792_v20 }
 0x4c8   : >> { %15309 = vst [vmem:[#allocation139_spill] sm:$0xff] %v13112_v26  ;;  %v13121_v31 = vadd.f32 %v5899_v42, %v5748_v18  ;;  %v13128_v60 = vadd.f32 %v5901_v0, %v5749_v1  ;;  %v13132_v17 = vsel %vm1912_vm14, %v13112_v26, %v6066_v33  ;;  %v6211_v22 = vmul.f32 %v6191_v28, %v8790_v19  ;;  %v6601_v18 = vld [vmem:[#allocation2 + $0x178] sm:$0x11] }
 0x4c9   : >> { %15310 = vst [vmem:[#allocation191_spill] sm:$0xff] %v13114_v5  ;;  %v6212_v48 = vmul.f32 %v6192_v63, %v8792_v20  ;;  %v6226_v55 = vpack.c.bf16 %v6210_v8, %v6209_v32  ;;  %v6377_v37 = vmul.f32 %v13067_v57, %v8810_v47  ;;  %v6378_v53 = vmul.f32 %v13069_v14, %v8814_v41 }
 0x4ca   : >> { %15311 = vst [vmem:[#allocation192_spill] sm:$0xff] %v13121_v31  ;;  %v6379_v4 = vmul.f32 %v6191_v28, %v8810_v47  ;;  %v13143_v25 = vsel %vm1912_vm14, %v13114_v5, %v6068_v43  ;;  %v6380_v1 = vmul.f32 %v6192_v63, %v8814_v41  ;;  %v13148_v42 = vmul.f32 %v13067_v57, %v14472_v36 }
 0x4cb   : >> { %15312 = vst [vmem:[#allocation164_spill] sm:$0xff] %v13128_v60  ;;  %v6227_v38 = vpack.c.bf16 %v6212_v48, %v6211_v22  ;;  %v6245_v0 = vunpack.c.l.bf16 %v6226_v55  ;;  %v6246_v33 = vunpack.c.h.bf16 %v6226_v55  ;;  %v13150_v32 = vpack.c.bf16 %v6378_v53, %v6377_v37 }
 0x4cc   : >> { %15313 = vst [vmem:[#allocation211_spill] sm:$0xff] %v13132_v17  ;;  %v6606_v8 = vunpack.c.l.bf16 %v6601_v18  ;;  %v6395_v60 = vpack.c.bf16 %v6380_v1, %v6379_v4  ;;  %v6607_v28 = vunpack.c.h.bf16 %v6601_v18  ;;  %v13159_v63 = vmul.f32 %v13069_v14, %v14474_v7 }
 0x4cd   : >> { %15314 = vst [vmem:[#allocation54_spill] sm:$0xff] %v13143_v25  ;;  %v6247_v58 = vunpack.c.l.bf16 %v6227_v38  ;;  %v6248_v24 = vunpack.c.h.bf16 %v6227_v38  ;;  %v13152_v17 = vrot.slane %v6245_v0, 1  ;;  %v13154_v43 = vrot.slane %v6246_v33, 1 }
 0x4ce   : >> { %15315 = vst [vmem:[#allocation147_spill] sm:$0xff] %v13150_v32  ;;  %v6415_v37 = vunpack.c.l.bf16 %v6395_v60  ;;  %v6416_v53 = vunpack.c.h.bf16 %v6395_v60  ;;  %v6620_v4 = vmul.f32 %v13067_v57, %v8873_v21  ;;  %v6621_v18 = vmul.f32 %v13069_v14, %v14477_v27 }
 0x4cf   : >> { %15316 = vst [vmem:[#allocation24_spill] sm:$0xff] %v13154_v43  ;;  %v13161_v48 = vrot.slane %v6247_v58, 1  ;;  %v6622_v38 = vmul.f32 %v6606_v8, %v8873_v21  ;;  %v6623_v1 = vmul.f32 %v6607_v28, %v14477_v27  ;;  %v13170_v0 = vrot.slane %v6248_v24, 1 }
 0x4d0   : >> { %v13172_v33 = vrot.slane %v6415_v37, 2  ;;  %v13174_v58 = vrot.slane %v6416_v53, 2  ;;  %v13178_v55 = vmul.f32 %v13067_v57, %v14479_v23  ;;  %v13184_v22 = vmul.f32 %v13069_v14, %v9038_v16 }
 0x4d1   : >> { %15317 = vst [vmem:[#allocation169_spill] sm:$0xff] %v13161_v48  ;;  %v13180_v60 = vpack.c.bf16 %v6623_v1, %v6622_v38  ;;  %v6790_v25 = vmul.f32 %v6606_v8, %v14479_v23  ;;  %v6791_v31 = vmul.f32 %v6607_v28, %v9038_v16  ;;  %v13188_v24 = vpack.c.bf16 %v6621_v18, %v6620_v4  ;;  %v15323_v38 = vld [vmem:[#allocation56_spill] sm:$0xff] }
 0x4d2   : >> { %15318 = vst [vmem:[#allocation168_spill] sm:$0xff] %v13170_v0  ;;  %v1294_v37 = vshrl.u32 %v13049_v3, 16  ;;  %v5196_v53 = vadd.f32 %v13057_v10, %v13028_v29  ;;  %v5197_v57 = vadd.f32 %v13074_v2, %v13041_v15  ;;  %v1297_v14 = vshll.u32 %v13049_v3, 16  ;;  %v15321_v29 = vld [vmem:[#allocation67_spill] sm:$0xff]  ;;  %v15322_v10 = vld [vmem:[#allocation117_spill] sm:$0xff]  ;;  %v15324_v3 = vld [vmem:[#allocation74_spill] sm:$0xff] }
 0x4d3   : >> { %15319 = vst [vmem:[#allocation63_spill] sm:$0xff] %v13172_v33  ;;  %v5198_v8 = vadd.f32 %v13061_v49, %v13032_v6  ;;  %v13200_v28 = vpack.c.bf16 %v6791_v31, %v6790_v25  ;;  %v5199_v18 = vadd.f32 %v13083_v59, %v13043_v56  ;;  %v5250_v5 = vpack.c.bf16 %v15322_v10, %v15321_v29  ;;  %v1469_v15 = vld [vmem:[#allocation2 + $0x180] sm:$0xff] }
 0x4d4   : >> { %15320 = vst [vmem:[#allocation215_spill] sm:$0xff] %v13174_v58  ;;  %v13202_v4 = vrot.slane %v1294_v37, 7  ;;  %v5261_v2 = vunpack.c.l.bf16 %v13065_v54  ;;  %v5262_v1 = vunpack.c.h.bf16 %v13065_v54  ;;  %v5328_v26 = vpack.c.bf16 %v15324_v3, %v15323_v38  ;;  %v15325_v58 = vld [vmem:[#allocation113_spill] sm:$0xff] }
 0x4d5   : >> { %v5345_v6 = vunpack.c.l.bf16 %v13078_v39  ;;  %v5263_v25 = vunpack.c.l.bf16 %v5250_v5  ;;  %v5346_v56 = vunpack.c.h.bf16 %v13078_v39  ;;  %v5264_v54 = vunpack.c.h.bf16 %v5250_v5 }
 0x4d6   : >> { %v1299_v49 = vor.u32 %v1297_v14, %v13202_v4  ;;  %v5277_v59 = vadd.f32 %v5261_v2, %v5196_v53  ;;  %v5278_v37 = vadd.f32 %v5262_v1, %v5197_v57  ;;  %v5347_v29 = vunpack.c.l.bf16 %v5328_v26 }
 0x4d7   : >> { %v5348_v10 = vunpack.c.h.bf16 %v5328_v26  ;;  %v5279_v45 = vadd.f32 %v5263_v25, %v5198_v8  ;;  %v5349_v38 = vunpack.c.l.bf16 %v15325_v58  ;;  %v5350_v14 = vunpack.c.h.bf16 %v15325_v58 }
 0x4d8   : >> { %v1470_v46 = vsel %vm8724_vm7, %v1299_v49, %v1469_v15  ;;  %v5401_v31 = vrot.slane %v5345_v6, 1  ;;  %v5402_v32 = vrot.slane %v5347_v29, 1  ;;  %v5404_v0 = vrot.slane %v5346_v56, 1 }
 0x4d9   : >> { %1471 = vst [vmem:[#allocation2 + $0x180] sm:$0xff] %v1470_v46  ;;  %v6123_v3 = vunpack.c.l.bf16 %v1470_v46  ;;  %v6124_v33 = vunpack.c.h.bf16 %v1470_v46  ;;  %v5405_v39 = vrot.slane %v5348_v10, 1  ;;  %v5407_v53 = vrot.slane %v5349_v38, 1  ;;  %v15331_v38 = vld [vmem:[#allocation62_spill] sm:$0xff] }
 0x4da   : >> { %v5403_v6 = vsel %vm1708_vm13, %v5401_v31, %v5402_v32  ;;  %v5280_v56 = vadd.f32 %v5264_v54, %v5199_v18  ;;  %v5409_v10 = vrot.slane %v5350_v14, 1 }
 0x4db   : >> { %v6139_v57 = vmul.f32 %v6123_v3, %v8772_v12  ;;  %v6140_v26 = vmul.f32 %v6124_v33, %v8776_v13  ;;  %v6213_v34 = vmul.f32 %v6123_v3, %v8790_v19  ;;  %v6214_v5 = vmul.f32 %v6124_v33, %v8792_v20 }
 0x4dc   : >> { %v6552_v1 = vmul.f32 %v6123_v3, %v14472_v36  ;;  %v6553_v8 = vmul.f32 %v6124_v33, %v14474_v7  ;;  %v6624_v46 = vmul.f32 %v6123_v3, %v8873_v21  ;;  %v6625_v58 = vmul.f32 %v6124_v33, %v14477_v27 }
 0x4dd   : >> { %v13228_v15 = vpack.c.bf16 %v6140_v26, %v6139_v57  ;;  %v6228_v2 = vpack.c.bf16 %v6214_v5, %v6213_v34  ;;  %v5406_v49 = vsel %vm1708_vm13, %v5404_v0, %v5405_v39  ;;  %v5408_v29 = vsel %vm1708_vm13, %v5402_v32, %v5407_v53 }
 0x4de   : >> { %v13232_v25 = vpack.c.bf16 %v6553_v8, %v6552_v1  ;;  %v13236_v3 = vpack.c.bf16 %v6625_v58, %v6624_v46  ;;  %v5410_v31 = vsel %vm1708_vm13, %v5405_v39, %v5409_v10  ;;  %v5445_v34 = vadd.f32 %v5403_v6, %v5277_v59  ;;  %v15329_v8 = vld [vmem:[#allocation38_spill] sm:$0xff]  ;;  %v15330_v46 = vld [vmem:[#allocation81_spill] sm:$0xff]  ;;  %v15332_v39 = vld [vmem:[#allocation123_spill] sm:$0xff] }
 0x4df   : >> { %15326 = vst [vmem:[#allocation202_spill] sm:$0xff] %v13228_v15  ;;  %v6249_v48 = vunpack.c.l.bf16 %v6228_v2  ;;  %v6250_v43 = vunpack.c.h.bf16 %v6228_v2  ;;  %v5446_v0 = vadd.f32 %v5406_v49, %v5278_v37  ;;  %v5447_v32 = vadd.f32 %v5408_v29, %v5279_v45  ;;  %v15333_v37 = vld [vmem:[#allocation124_spill] sm:$0xff]  ;;  %v15337_v15 = vld [vmem:[#allocation217_spill] sm:$0xff] }
 0x4e0   : >> { %v6354_v57 = vld [vmem:[#allocation2 + $0x180] sm:$0xee]  ;;  %v5495_v58 = vpack.c.bf16 %v15330_v46, %v15329_v8  ;;  %v5496_v59 = vpack.c.bf16 %v15332_v39, %v15331_v38  ;;  %v7324_v8 = vpop.f32.mrf.mxu2  ;;  %v5448_v38 = vadd.f32 %v5410_v31, %v5280_v56 }
 0x4e1   : >> { %v6770_v26 = vld [vmem:[#allocation2 + $0x180] sm:$0xee]  ;;  %v13240_v5 = vrot.slane %v6249_v48, 1  ;;  %v6361_v18 = vunpack.c.l.bf16 %v6354_v57  ;;  %v6362_v54 = vunpack.c.h.bf16 %v6354_v57  ;;  %v13242_v14 = vrot.slane %v6250_v43, 1 }
 0x4e2   : >> { %v6776_v53 = vunpack.c.l.bf16 %v6770_v26  ;;  %v6777_v1 = vunpack.c.h.bf16 %v6770_v26  ;;  %v15334_v48 = vld [vmem:[#allocation134_spill] sm:$0xff]  ;;  %v5513_v43 = vunpack.c.l.bf16 %v5495_v58  ;;  %v5514_v29 = vunpack.c.h.bf16 %v5495_v58 }
 0x4e3   : >> { %15327 = vst [vmem:[#allocation172_spill] sm:$0xff] %v13240_v5  ;;  %v6381_v2 = vmul.f32 %v6361_v18, %v8810_v47  ;;  %v6382_v33 = vmul.f32 %v6362_v54, %v8814_v41  ;;  %v5497_v6 = vpack.c.bf16 %v15334_v48, %v15333_v37  ;;  %v5515_v57 = vunpack.c.l.bf16 %v5496_v59  ;;  %v784_v54 = vpop.f32.mrf.mxu0 }
 0x4e4   : >> { %15328 = vst [vmem:[#allocation193_spill] sm:$0xff] %v13242_v14  ;;  %v6792_v49 = vmul.f32 %v6776_v53, %v14479_v23  ;;  %v6793_v45 = vmul.f32 %v6777_v1, %v9038_v16  ;;  %v5516_v26 = vunpack.c.h.bf16 %v5496_v59  ;;  %v5569_v14 = vrot.slane %v5513_v43, 2 }
 0x4e5   : >> { %v13254_v10 = vpack.c.bf16 %v6382_v33, %v6381_v2  ;;  %v5517_v18 = vunpack.c.l.bf16 %v5497_v6  ;;  %v5518_v39 = vunpack.c.h.bf16 %v5497_v6  ;;  %v5570_v53 = vrot.slane %v5515_v57, 2  ;;  %v13260_v33 = vld [vmem:[%s12136_s20] ss:$0 sm:$0xff]  ;;  %v7413_v6 = vpop.f32.mrf.mxu3 }
 0x4e6   : >> { %v13256_v46 = vpack.c.bf16 %v6793_v45, %v6792_v49  ;;  %v5572_v48 = vrot.slane %v5514_v29, 2  ;;  %v5573_v1 = vrot.slane %v5516_v26, 2  ;;  %v7325_v2 = vadd.f32 %v13260_v33, %v7324_v8  ;;  %v873_v45 = vpop.f32.mrf.mxu1 }
 0x4e7   : >> { %v6417_v37 = vunpack.c.l.bf16 %v13254_v10  ;;  %v5575_v5 = vrot.slane %v5517_v18, 2  ;;  %v5577_v58 = vrot.slane %v5518_v39, 2  ;;  %v785_v59 = vadd.f32 %v784_v54, %v8699_v51 }
 0x4e8   : >> { %15335 = vst [vmem:[#allocation203_spill] sm:$0xff] %v13256_v46  ;;  %v5571_v56 = vsel %vm1912_vm14, %v5569_v14, %v5570_v53  ;;  %v5574_v31 = vsel %vm1912_vm14, %v5572_v48, %v5573_v1  ;;  %v7414_v39 = vadd.f32 %v7413_v6, %v7325_v2  ;;  %v874_v14 = vadd.f32 %v873_v45, %v8701_v52  ;;  %v15338_v48 = vld [vmem:[#allocation183_spill] sm:$0xff] }
 0x4e9   : >> { %v13265_v49 = vrot.slane %v6417_v37, 2  ;;  %v5576_v43 = vsel %vm1912_vm14, %v5570_v53, %v5575_v5  ;;  %v5578_v29 = vsel %vm1912_vm14, %v5573_v1, %v5577_v58  ;;  %v5613_v57 = vadd.f32 %v5571_v56, %v5445_v34  ;;  %v15342_v6 = vld [vmem:[#allocation39_spill] sm:$0xff] }
 0x4ea   : >> { %v5614_v26 = vadd.f32 %v5574_v31, %v5446_v0  ;;  %v5615_v18 = vadd.f32 %v5576_v43, %v5447_v32  ;;  %v5616_v8 = vadd.f32 %v5578_v29, %v5448_v38  ;;  %v938_v51 = vmax.f32 %v785_v59, 0.0  ;;  %v15339_v0 = vld [vmem:[#allocation64_spill] sm:$0xff]  ;;  %v15341_v59 = vld [vmem:[#allocation89_spill] sm:$0xff] }
 0x4eb   : >> { %15336 = vst [vmem:[#allocation199_spill] sm:$0xff] %v13265_v49  ;;  %v5629_v54 = vadd.f32 %v5613_v57, %v9956_v40  ;;  %v4579_v49 = vsel %vm1708_vm13, %v15338_v48, %v15337_v15  ;;  %v15340_v32 = vld [vmem:[#allocation204_spill] sm:$0xff]  ;;  %v939_v2 = vmax.f32 %v874_v14, 0.0  ;;  %v4584_v52 = vsel %vm1708_vm13, %v15337_v15, %v15341_v59  ;;  %v15343_v43 = vld [vmem:[#allocation177_spill] sm:$0xff]  ;;  %v7326_v48 = vpop.f32.mrf.mxu2 }
 0x4ec   : >> { %v5630_v37 = vadd.f32 %v5614_v26, %v15267_v30  ;;  %v5631_v5 = vadd.f32 %v5615_v18, %v9956_v40  ;;  %v5632_v53 = vadd.f32 %v5616_v8, %v15267_v30  ;;  %v1002_v34 = vmin.f32 %v938_v51, 6.0 }
 0x4ed   : >> { %v4582_v38 = vsel %vm1708_vm13, %v15340_v32, %v15339_v0  ;;  %v5645_v1 = vmax.f32 %v5629_v54, 0.0  ;;  %v4586_v45 = vsel %vm1708_vm13, %v15339_v0, %v15342_v6  ;;  %v15344_v29 = vunpack.c.l.bf16 %v15343_v43  ;;  %v15346_v32 = vld [vmem:[#allocation53_spill] sm:$0xff] }
 0x4ee   : >> { %v5646_v58 = vmax.f32 %v5630_v37, 0.0  ;;  %v5647_v56 = vmax.f32 %v5631_v5, 0.0  ;;  %v5648_v31 = vmax.f32 %v5632_v53, 0.0  ;;  %v1003_v8 = vmin.f32 %v939_v2, 6.0 }
 0x4ef   : >> { %v4615_v57 = vadd.f32 %v4579_v49, %v15344_v29  ;;  %v5661_v26 = vmin.f32 %v5645_v1, 6.0  ;;  %v15345_v51 = vunpack.c.h.bf16 %v15343_v43  ;;  %v15347_v15 = vunpack.c.l.bf16 %v15346_v32  ;;  %v15349_v49 = vld [vmem:[#allocation18_spill] sm:$0xff]  ;;  %v15350_v1 = vld [vmem:[#allocation45_spill] sm:$0xff]  ;;  %v7415_v43 = vpop.f32.mrf.mxu3  ;;  %v15353_v29 = vld [vmem:[#allocation36_spill] sm:$0xff] }
 0x4f0   : >> { %v5662_v18 = vmin.f32 %v5646_v58, 6.0  ;;  %v5663_v37 = vmin.f32 %v5647_v56, 6.0  ;;  %v5664_v14 = vmin.f32 %v5648_v31, 6.0  ;;  %v15348_v53 = vunpack.c.h.bf16 %v15346_v32  ;;  %v15352_v56 = vld [vmem:[#allocation46_spill] sm:$0xff]  ;;  %v15355_v32 = vld [vmem:[#allocation47_spill] sm:$0xff] }
 0x4f1   : >> { %v4616_v54 = vadd.f32 %v4582_v38, %v15345_v51  ;;  %v4617_v5 = vadd.f32 %v4584_v52, %v15347_v15  ;;  %v1035_v0 = vpack.c.bf16 %v1003_v8, %v1002_v34  ;;  %v7327_v6 = vadd.f32 %v13260_v33, %v7326_v48  ;;  %v15351_v38 = vld [vmem:[#allocation121_spill] sm:$0xff]  ;;  %v15354_v51 = vld [vmem:[#allocation22_spill] sm:$0xff] }
 0x4f2   : >> { %v4618_v59 = vadd.f32 %v4586_v45, %v15348_v53  ;;  %v5673_v46 = vpack.c.bf16 %v5662_v18, %v5661_v26  ;;  %v4747_v58 = vsel %vm1912_vm14, %v15350_v1, %v15349_v49  ;;  %v5674_v2 = vpack.c.bf16 %v5664_v14, %v5663_v37 }
 0x4f3   : >> { %v4750_v31 = vsel %vm1912_vm14, %v15352_v56, %v15351_v38  ;;  %v4752_v52 = vsel %vm1912_vm14, %v15349_v49, %v15353_v29  ;;  %v4754_v34 = vsel %vm1912_vm14, %v15351_v38, %v15354_v51  ;;  %v1302_v45 = vshrl.u32 %v1035_v0, 16  ;;  %v15356_v38 = vld [vmem:[#allocation102_spill] sm:$0xff] }
 0x4f4   : >> { %5681 = vst.msk [vmem:[#allocation3 + $0xa0] sm:$0xff] %vm8519_vm2, %v5673_v46  ;;  %v1305_v26 = vshll.u32 %v1035_v0, 16  ;;  %v7416_v18 = vadd.f32 %v7415_v43, %v7327_v6  ;;  %v4783_v8 = vadd.f32 %v4747_v58, %v4615_v57  ;;  %v4784_v37 = vadd.f32 %v4750_v31, %v4616_v54  ;;  %v1473_v46 = vld [vmem:[#allocation2 + $0x190] sm:$0x11]  ;;  %v15357_v57 = vld [vmem:[#allocation43_spill] sm:$0xff] }
 0x4f5   : >> { %5682 = vst.msk [vmem:[#allocation3 + $0xa8] sm:$0xff] %vm8519_vm2, %v5674_v2  ;;  %v4785_v14 = vadd.f32 %v4752_v52, %v4617_v5  ;;  %v4786_v48 = vadd.f32 %v4754_v34, %v4618_v59  ;;  %v4848_v15 = vunpack.c.l.bf16 %v15355_v32  ;;  %v1304_v53 = vrot.slane %v1302_v45, 7  ;;  %v15360_v52 = vld [vmem:[#allocation220_spill] sm:$0xff] }
 0x4f6   : >> { %v8060_v49 = vpack.c.bf16 %v7416_v18, %v7414_v39  ;;  %v4849_v1 = vunpack.c.h.bf16 %v15355_v32  ;;  %v4850_v56 = vunpack.c.l.bf16 %v15356_v38  ;;  %v4851_v0 = vunpack.c.h.bf16 %v15356_v38  ;;  %v15361_v34 = vld [vmem:[#allocation52_spill] sm:$0xff]  ;;  %v15362_v18 = vld [vmem:[#allocation75_spill] sm:$0xff] }
 0x4f7   : >> { %v4864_v6 = vadd.f32 %v4848_v15, %v4783_v8  ;;  %v15358_v58 = vunpack.c.l.bf16 %v15357_v57  ;;  %v15359_v2 = vunpack.c.h.bf16 %v15357_v57  ;;  %v1307_v5 = vor.u32 %v1305_v26, %v1304_v53 }
 0x4f8   : >> { %v1309_v59 = vrot.slane %v1304_v53, 4  ;;  %8128 = vst [vmem:[%s12674_s29 + $0x10] sm:$0xff] %v8060_v49   ;;  %v4865_v31 = vadd.f32 %v4849_v1, %v4784_v37  ;;  %v4866_v29 = vadd.f32 %v4850_v56, %v4785_v14  ;;  %v4867_v39 = vadd.f32 %v4851_v0, %v4786_v48  ;;  %v15364_v37 = vld [vmem:[#allocation129_spill] sm:$0xff] }
 0x4f9   : >> { %v4995_v43 = vrot.slane %v15358_v58, 1  ;;  %v4998_v54 = vrot.slane %v15359_v2, 1  ;;  %v15363_v32 = vrot.slane %v13202_v4, 4  ;;  %v15365_v53 = vunpack.c.h.bf16 %v13254_v10  ;;  %v15368_v58 = vld [vmem:[#allocation103_spill] sm:$0xff]  ;;  %v15370_v2 = vld [vmem:[#allocation42_spill] sm:$0xff] }
 0x4fa   : >> { %v1474_v26 = vsel %vm8542_vm10, %v1309_v59, %v1473_v46  ;;  %v5102_v0 = vunpack.c.l.bf16 %v15367_v61  ;;  %v5103_v46 = vunpack.c.h.bf16 %v15367_v61  ;;  %v5105_v10 = vunpack.c.h.bf16 %v15368_v58 }
 0x4fb   : >> { %v4996_v51 = vsel %vm1708_vm13, %v15360_v52, %v4995_v43  ;;  %v4999_v45 = vsel %vm1708_vm13, %v15361_v34, %v4998_v54  ;;  %v5001_v8 = vsel %vm1708_vm13, %v4995_v43, %v15362_v18  ;;  %v1308_v15 = vsel %vm8765_vm9, %v15363_v32, %v1307_v5  ;;  %v7881_v1 = vld [vmem:[#allocation3 + $0xa0] sm:$0xf]  ;;  %v8024_v38 = vld [vmem:[#allocation3 + $0xa4] sm:$0xf]  ;;  %1475 = vst [vmem:[#allocation2 + $0x190] sm:$0x11] %v1474_v26 }
 0x4fc   : >> { %v5003_v14 = vsel %vm1708_vm13, %v4998_v54, %v15364_v37  ;;  %v5032_v48 = vadd.f32 %v4996_v51, %v4864_v6  ;;  %v13338_v49 = vrot.slane %v15365_v53, 2  ;;  %1472 = vst.msk [vmem:[#allocation2 + $0x188] sm:$0xff] %vm8519_vm2, %v1308_v15  ;;  %v5033_v4 = vadd.f32 %v4999_v45, %v4865_v31  ;;  %v8025_v57 = vld [vmem:[#allocation3 + $0xa4] sm:$0xf0]  ;;  %v7883_v44 = vld [vmem:[#allocation3 + $0xa8] sm:$0xf0] }
 0x4fd   : >> { %v5034_v56 = vadd.f32 %v5001_v8, %v4866_v29  ;;  %v5104_v6 = vunpack.c.l.bf16 %v15368_v58  ;;  %v15369_v43 = vld [vmem:[#allocation87_spill] sm:$0xff]  ;;  %v7882_v5 = vor.u32 %v8025_v57, %v7881_v1  ;;  %v7886_v59 = vor.u32 %v8024_v38, %v7883_v44  ;;  %v15371_v51 = vld [vmem:[#allocation65_spill] sm:$0xff]  ;;  %v15374_v53 = vld [vmem:[#allocation84_spill] sm:$0xff] }
 0x4fe   : >> { %15366 = vst [vmem:[#allocation176_spill] sm:$0xff] %v13338_v49  ;;  %v5251_v54 = vpack.c.bf16 %v15370_v2, %v15369_v43  ;;  %v5035_v52 = vadd.f32 %v5003_v14, %v4867_v39  ;;  %v15372_v31 = vld [vmem:[#allocation131_spill] sm:$0xff]  ;;  %v5162_v34 = vrot.slane %v5102_v0, 2  ;;  %v5165_v18 = vrot.slane %v5103_v46, 2  ;;  %v15375_v38 = vld [vmem:[#allocation72_spill] sm:$0xff]  ;;  %v15376_v57 = vld [vmem:[#allocation101_spill] sm:$0xff] }
 0x4ff   : >> { %v13350_v29 = vpack.c.bf16 %v15372_v31, %v15371_v51  ;;  %v5163_v45 = vrot.slane %v5104_v6, 2  ;;  %v5166_v8 = vrot.slane %v5105_v10, 2  ;;  %7363 = vmatmul.bf16.gmra.mxu2 %v7882_v5  ;;  %7973 = vmatmul.msk.bf16.gmra.mxu3 %vm7256_vm15, %v7886_v59  ;;  %v15373_v37 = vld [vmem:[#allocation71_spill] sm:$0xff]  ;;  %v15377_v2 = vld [vmem:[#allocation132_spill] sm:$0xff] }
 0x500   : >> { %v5265_v32 = vunpack.c.l.bf16 %v5251_v54  ;;  %v5266_v15 = vunpack.c.h.bf16 %v5251_v54  ;;  %v13356_v1 = vpack.c.bf16 %v15374_v53, %v15373_v37  ;;  %v15378_v54 = vld [vmem:[#allocation66_spill] sm:$0xff] }
 0x501   : >> { %v5267_v26 = vunpack.c.l.bf16 %v13350_v29  ;;  %v5164_v39 = vsel %vm1912_vm14, %v5162_v34, %v5163_v45  ;;  %v5167_v14 = vsel %vm1912_vm14, %v5165_v18, %v5166_v8  ;;  %v5169_v61 = vsel %vm1912_vm14, %v5163_v45, %v15375_v38 }
 0x502   : >> { %v5268_v0 = vunpack.c.h.bf16 %v13350_v29  ;;  %v5171_v44 = vsel %vm1912_vm14, %v5166_v8, %v15376_v57  ;;  %v5200_v46 = vadd.f32 %v5164_v39, %v5032_v48  ;;  %v5201_v58 = vadd.f32 %v5167_v14, %v5033_v4  ;;  %v6186_v45 = vld [vmem:[#allocation2 + $0x190] sm:$0x11] }
 0x503   : >> { %v5202_v6 = vadd.f32 %v5169_v61, %v5034_v56  ;;  %v6110_v10 = vld [vmem:[#allocation2 + $0x188] sm:$0xff]  ;;  %v5203_v43 = vadd.f32 %v5171_v44, %v5035_v52  ;;  %v13367_v5 = vpack.c.bf16 %v15378_v54, %v15377_v2  ;;  %v6602_v18 = vld [vmem:[#allocation2 + $0x190] sm:$0x11]  ;;  %v6193_v48 = vunpack.c.l.bf16 %v6186_v45  ;;  %v15379_v52 = vld [vmem:[#allocation149_spill] sm:$0xff] }
 0x504   : >> { %v6125_v31 = vunpack.c.l.bf16 %v6110_v10  ;;  %v6126_v34 = vunpack.c.h.bf16 %v6110_v10  ;;  %v13371_v37 = vadd.f32 %v5265_v32, %v5200_v46  ;;  %v13373_v8 = vadd.f32 %v5266_v15, %v5201_v58 }
 0x505   : >> { %v6194_v4 = vunpack.c.h.bf16 %v6186_v45  ;;  %v6608_v56 = vunpack.c.l.bf16 %v6602_v18  ;;  %v5355_v53 = vunpack.c.l.bf16 %v15379_v52  ;;  %v6217_v57 = vmul.f32 %v6193_v48, %v8790_v19 }
 0x506   : >> { %v6141_v39 = vmul.f32 %v6125_v31, %v8772_v12  ;;  %v6142_v14 = vmul.f32 %v6126_v34, %v8776_v13  ;;  %v6215_v38 = vmul.f32 %v6125_v31, %v8790_v19  ;;  %v6216_v61 = vmul.f32 %v6126_v34, %v8792_v20 }
 0x507   : >> { %v6218_v32 = vmul.f32 %v6194_v4, %v8792_v20  ;;  %v6383_v15 = vmul.f32 %v6125_v31, %v8810_v47  ;;  %v6384_v44 = vmul.f32 %v6126_v34, %v8814_v41  ;;  %v6385_v10 = vmul.f32 %v6193_v48, %v8810_v47 }
 0x508   : >> { %v13384_v46 = vpack.c.bf16 %v6142_v14, %v6141_v39  ;;  %v6229_v58 = vpack.c.bf16 %v6216_v61, %v6215_v38  ;;  %v6386_v12 = vmul.f32 %v6194_v4, %v8814_v41  ;;  %v13391_v54 = vmul.f32 %v6125_v31, %v14472_v36 }
 0x509   : >> { %v6230_v13 = vpack.c.bf16 %v6218_v32, %v6217_v57  ;;  %v13388_v2 = vpack.c.bf16 %v6384_v44, %v6383_v15  ;;  %v6609_v19 = vunpack.c.h.bf16 %v6602_v18  ;;  %v13395_v59 = vmul.f32 %v6126_v34, %v14474_v7 }
 0x50a   : >> { %v6251_v45 = vunpack.c.l.bf16 %v6229_v58  ;;  %v6252_v51 = vunpack.c.h.bf16 %v6229_v58  ;;  %v13398_v48 = vpack.c.bf16 %v6386_v12, %v6385_v10  ;;  %v6626_v18 = vmul.f32 %v6125_v31, %v8873_v21 }
 0x50b   : >> { %v6253_v14 = vunpack.c.l.bf16 %v6230_v13  ;;  %v6254_v47 = vunpack.c.h.bf16 %v6230_v13  ;;  %v6627_v58 = vmul.f32 %v6126_v34, %v14477_v27  ;;  %v6628_v10 = vmul.f32 %v6608_v56, %v8873_v21 }
 0x50c   : >> { %v13400_v41 = vrot.slane %v6251_v45, 1  ;;  %v13402_v4 = vrot.slane %v6252_v51, 1  ;;  %v6421_v15 = vunpack.c.l.bf16 %v13398_v48  ;;  %v6629_v51 = vmul.f32 %v6609_v19, %v14477_v27  ;;  %v15386_v27 = vld [vmem:[#allocation95_spill] sm:$0xff] }
 0x50d   : >> { %v13406_v61 = vrot.slane %v6253_v14, 1  ;;  %v13408_v57 = vrot.slane %v6254_v47, 1  ;;  %v13419_v13 = vmul.f32 %v6125_v31, %v14479_v23  ;;  %v13422_v45 = vmul.f32 %v6126_v34, %v9038_v16 }
 0x50e   : >> { %v13416_v12 = vrot.slane %v6421_v15, 2  ;;  %v6796_v14 = vmul.f32 %v6608_v56, %v14479_v23  ;;  %v13425_v47 = vpack.c.bf16 %v6627_v58, %v6626_v18  ;;  %v13427_v32 = vpack.c.bf16 %v6629_v51, %v6628_v10  ;;  %v7329_v51 = vpop.f32.mrf.mxu2  ;;  %v15385_v56 = vld [vmem:[#allocation97_spill] sm:$0xff] }
 0x50f   : >> { %v6797_v38 = vmul.f32 %v6609_v19, %v9038_v16  ;;  %v5283_v44 = vadd.f32 %v5267_v26, %v5202_v6  ;;  %v5284_v15 = vadd.f32 %v5268_v0, %v5203_v43  ;;  %v5353_v31 = vunpack.c.l.bf16 %v13367_v5  ;;  %v7418_v26 = vpop.f32.mrf.mxu3  ;;  %v15383_v16 = vld [vmem:[#allocation120_spill] sm:$0xff] }
 0x510   : >> { %15380 = vst [vmem:[#allocation41_spill] sm:$0xff] %v13416_v12  ;;  %v5354_v39 = vunpack.c.h.bf16 %v13367_v5  ;;  %v5356_v34 = vunpack.c.h.bf16 %v15379_v52  ;;  %v15381_v19 = vunpack.c.l.bf16 %v13356_v1  ;;  %v15382_v29 = vunpack.c.h.bf16 %v13356_v1  ;;  %v15384_v52 = vld [vmem:[#allocation76_spill] sm:$0xff] }
 0x511   : >> { %v13439_v58 = vpack.c.bf16 %v6797_v38, %v6796_v14  ;;  %v5412_v6 = vrot.slane %v5353_v31, 1  ;;  %v5417_v20 = vrot.slane %v5355_v53, 1  ;;  %v5498_v23 = vpack.c.bf16 %v15384_v52, %v15383_v16  ;;  %v15387_v38 = vld [vmem:[#allocation109_spill] sm:$0xff] }
 0x512   : >> { %v5411_v10 = vrot.slane %v15381_v19, 1  ;;  %v5414_v0 = vrot.slane %v15382_v29, 1  ;;  %v5415_v43 = vrot.slane %v5354_v39, 1  ;;  %v5419_v5 = vrot.slane %v5356_v34, 1  ;;  %v15388_v14 = vld [vmem:[#allocation137_spill] sm:$0xff] }
 0x513   : >> { %v5499_v18 = vpack.c.bf16 %v15386_v27, %v15385_v56  ;;  %v5500_v21 = vpack.c.bf16 %v15388_v14, %v15387_v38  ;;  %v5418_v31 = vsel %vm1708_vm13, %v5412_v6, %v5417_v20  ;;  %v7330_v1 = vadd.f32 %v13260_v33, %v7329_v51  ;;  %v15390_v51 = vld [vmem:[#allocation40_spill] sm:$0xff] }
 0x514   : >> { %v5413_v19 = vsel %vm1708_vm13, %v5411_v10, %v5412_v6  ;;  %v5416_v7 = vsel %vm1708_vm13, %v5414_v0, %v5415_v43  ;;  %v5420_v53 = vsel %vm1708_vm13, %v5415_v43, %v5419_v5  ;;  %v5451_v34 = vadd.f32 %v5418_v31, %v5283_v44  ;;  %v15389_v6 = vld [vmem:[#allocation155_spill] sm:$0xff]  ;;  %v15392_v44 = vld [vmem:[#allocation58_spill] sm:$0xff] }
 0x515   : >> { %v5449_v39 = vadd.f32 %v5413_v19, %v13371_v37  ;;  %v5450_v16 = vadd.f32 %v5416_v7, %v13373_v8  ;;  %v5452_v29 = vadd.f32 %v5420_v53, %v5284_v15  ;;  %v5519_v27 = vunpack.c.l.bf16 %v5498_v23  ;;  %v15391_v8 = vld [vmem:[#allocation77_spill] sm:$0xff] }
 0x516   : >> { %v5520_v56 = vunpack.c.h.bf16 %v5498_v23  ;;  %v5521_v52 = vunpack.c.l.bf16 %v5499_v18  ;;  %v5522_v38 = vunpack.c.h.bf16 %v5499_v18  ;;  %v5523_v14 = vunpack.c.l.bf16 %v5500_v21  ;;  %v7331_v7 = vpop.f32.mrf.mxu2  ;;  %v15393_v18 = vld [vmem:[#allocation51_spill] sm:$0xff] }
 0x517   : >> { %v5524_v10 = vunpack.c.h.bf16 %v5500_v21  ;;  %v7419_v36 = vadd.f32 %v7418_v26, %v7330_v1  ;;  %v5579_v0 = vrot.slane %v5519_v27, 2  ;;  %v5864_v43 = vsel %vm1708_vm13, %v15390_v51, %v15389_v6 }
 0x518   : >> { %v5580_v12 = vrot.slane %v5521_v52, 2  ;;  %v5582_v20 = vrot.slane %v5520_v56, 2  ;;  %v5583_v5 = vrot.slane %v5522_v38, 2  ;;  %v5585_v37 = vrot.slane %v5523_v14, 2  ;;  %v7420_v14 = vpop.f32.mrf.mxu3 }
 0x519   : >> { %v5587_v19 = vrot.slane %v5524_v10, 2  ;;  %v5867_v23 = vsel %vm1708_vm13, %v15392_v44, %v15391_v8  ;;  %v7332_v21 = vadd.f32 %v13260_v33, %v7331_v7  ;;  %v15394_v26 = vunpack.c.l.bf16 %v15393_v18  ;;  %v15396_v8 = vld [vmem:[#allocation79_spill] sm:$0xff] }
 0x51a   : >> { %v5581_v15 = vsel %vm1912_vm14, %v5579_v0, %v5580_v12  ;;  %v15395_v1 = vunpack.c.h.bf16 %v15393_v18  ;;  %v5584_v27 = vsel %vm1912_vm14, %v5582_v20, %v5583_v5  ;;  %v5586_v56 = vsel %vm1912_vm14, %v5580_v12, %v5585_v37  ;;  %v15399_v18 = vld [vmem:[#allocation29_spill] sm:$0xff]  ;;  %v15400_v12 = vld [vmem:[#allocation135_spill] sm:$0xff]  ;;  %v15401_v37 = vld [vmem:[#allocation86_spill] sm:$0xff] }
 0x51b   : >> { %v5918_v31 = vadd.f32 %v5864_v43, %v15394_v26  ;;  %v5588_v52 = vsel %vm1912_vm14, %v5583_v5, %v5587_v19  ;;  %v5617_v38 = vadd.f32 %v5581_v15, %v5449_v39  ;;  %v5618_v10 = vadd.f32 %v5584_v27, %v5450_v16  ;;  %v15397_v43 = vld [vmem:[#allocation69_spill] sm:$0xff]  ;;  %v15402_v26 = vld [vmem:[#allocation160_spill] sm:$0xff] }
 0x51c   : >> { %v5919_v53 = vadd.f32 %v5867_v23, %v15395_v1  ;;  %v5619_v6 = vadd.f32 %v5586_v56, %v5451_v34  ;;  %v5620_v51 = vadd.f32 %v5588_v52, %v5452_v29  ;;  %v7421_v0 = vadd.f32 %v7420_v14, %v7332_v21  ;;  %v15398_v23 = vld [vmem:[#allocation114_spill] sm:$0xff]  ;;  %v15403_v1 = vld [vmem:[#allocation28_spill] sm:$0xff] }
 0x51d   : >> { %v5633_v7 = vadd.f32 %v5617_v38, %v9956_v40  ;;  %v6032_v44 = vsel %vm1912_vm14, %v15397_v43, %v15396_v8  ;;  %v6035_v20 = vsel %vm1912_vm14, %v15399_v18, %v15398_v23  ;;  %v6088_v5 = vadd.f32 %v15401_v37, %v15400_v12  ;;  %v15404_v14 = vld [vmem:[#allocation136_spill] sm:$0xff]  ;;  %v15411_v12 = vld [vmem:[#allocation78_spill] sm:$0xff] }
 0x51e   : >> { %v5634_v39 = vadd.f32 %v5618_v10, %v15267_v30  ;;  %v5635_v16 = vadd.f32 %v5619_v6, %v9956_v40  ;;  %v5636_v34 = vadd.f32 %v5620_v51, %v15267_v30  ;;  %v8065_v29 = vpack.c.bf16 %v7421_v0, %v7419_v36  ;;  %v15406_v10 = vld [vmem:[#allocation23_spill] sm:$0xff] }
 0x51f   : >> { %v5649_v19 = vmax.f32 %v5633_v7, 0.0  ;;  %v6086_v15 = vadd.f32 %v6032_v44, %v5918_v31  ;;  %v6087_v21 = vadd.f32 %v6035_v20, %v5919_v53  ;;  %v6089_v27 = vadd.f32 %v15403_v1, %v15402_v26  ;;  %v15410_v20 = vld [vmem:[#allocation141_spill] sm:$0xff] }
 0x520   : >> { %v5650_v56 = vmax.f32 %v5634_v39, 0.0  ;;  %v5651_v52 = vmax.f32 %v5635_v16, 0.0  ;;  %v5652_v38 = vmax.f32 %v5636_v34, 0.0  ;;  %8129 = vst [vmem:[%s12674_s29 + $0x18] sm:$0xff] %v8065_v29   ;;  %v15405_v8 = vunpack.c.l.bf16 %v15404_v14  ;;  %v15412_v39 = vld [vmem:[#allocation170_spill] sm:$0xff]  ;;  %v15413_v16 = vld [vmem:[#allocation99_spill] sm:$0xff] }
 0x521   : >> { %v5665_v23 = vmin.f32 %v5649_v19, 6.0  ;;  %v15407_v18 = vunpack.c.l.bf16 %v15406_v10  ;;  %v15408_v51 = vunpack.c.h.bf16 %v15406_v10  ;;  %v15409_v31 = vunpack.c.h.bf16 %v15404_v14  ;;  %v15414_v34 = vld [vmem:[#allocation171_spill] sm:$0xff]  ;;  %v15415_v19 = vld [vmem:[#allocation138_spill] sm:$0xff] }
 0x522   : >> { %v6169_v43 = vadd.f32 %v15405_v8, %v6088_v5  ;;  %v5666_v0 = vmin.f32 %v5650_v56, 6.0  ;;  %v5667_v7 = vmin.f32 %v5651_v52, 6.0  ;;  %v5668_v44 = vmin.f32 %v5652_v38, 6.0  ;;  %v15416_v38 = vld [vmem:[#allocation153_spill] sm:$0xff] }
 0x523   : >> { %v6167_v6 = vadd.f32 %v15407_v18, %v6086_v15  ;;  %v6168_v36 = vadd.f32 %v15408_v51, %v6087_v21  ;;  %v6170_v53 = vadd.f32 %v15409_v31, %v6089_v27  ;;  %v6281_v37 = vsel %vm1708_vm13, %v15411_v12, %v15410_v20  ;;  %v15419_v31 = vld [vmem:[#allocation106_spill] sm:$0xff] }
 0x524   : >> { %v6284_v5 = vsel %vm1708_vm13, %v15413_v16, %v15412_v39  ;;  %v6286_v29 = vsel %vm1708_vm13, %v15410_v20, %v15414_v34  ;;  %v6288_v15 = vsel %vm1708_vm13, %v15412_v39, %v15415_v19  ;;  %v5675_v26 = vpack.c.bf16 %v5666_v0, %v5665_v23  ;;  %v15424_v12 = vld [vmem:[#allocation142_spill] sm:$0xff] }
 0x525   : >> { %v6335_v21 = vadd.f32 %v6281_v37, %v6167_v6  ;;  %v5676_v1 = vpack.c.bf16 %v5668_v44, %v5667_v7  ;;  %v6336_v27 = vadd.f32 %v6284_v5, %v6168_v36  ;;  %v6337_v56 = vadd.f32 %v6286_v29, %v6169_v43  ;;  %v15420_v6 = vld [vmem:[#allocation161_spill] sm:$0xff]  ;;  %v15422_v7 = vld [vmem:[#allocation96_spill] sm:$0xff] }
 0x526   : >> { %v6338_v52 = vadd.f32 %v6288_v15, %v6170_v53  ;;  %v15417_v14 = vunpack.c.l.bf16 %v15416_v38  ;;  %v15418_v10 = vunpack.c.h.bf16 %v15416_v38  ;;  %v6561_v51 = vpack.c.bf16 %v12811_v35, %v12807_v62  ;;  %5683 = vst.msk [vmem:[#allocation3 + $0xb0] sm:$0xff] %vm8519_vm2, %v5675_v26  ;;  %v15421_v53 = vld [vmem:[#allocation73_spill] sm:$0xff]  ;;  %v15423_v35 = vld [vmem:[#allocation80_spill] sm:$0xff] }
 0x527   : >> { %v6568_v20 = vunpack.c.l.bf16 %v15419_v31  ;;  %v6569_v23 = vunpack.c.h.bf16 %v15419_v31  ;;  %v6648_v36 = vunpack.c.l.bf16 %v15420_v6  ;;  %v6649_v43 = vunpack.c.h.bf16 %v15420_v6  ;;  %5684 = vst.msk [vmem:[#allocation3 + $0xb8] sm:$0xff] %vm8519_vm2, %v5676_v1  ;;  %v7334_v31 = vpop.f32.mrf.mxu2 }
 0x528   : >> { %v6448_v8 = vrot.slane %v15417_v14, 2  ;;  %v6451_v18 = vrot.slane %v15418_v10, 2  ;;  %v6570_v29 = vunpack.c.l.bf16 %v6561_v51  ;;  %v6571_v19 = vunpack.c.h.bf16 %v6561_v51 }
 0x529   : >> { %v6650_v15 = vunpack.c.l.bf16 %v12829_v11  ;;  %v6651_v26 = vunpack.c.h.bf16 %v12829_v11  ;;  %v6696_v14 = vrot.slane %v6648_v36, 1  ;;  %v6699_v10 = vrot.slane %v6649_v43, 1  ;;  %v15430_v11 = vld [vmem:[#allocation107_spill] sm:$0xff] }
 0x52a   : >> { %v6449_v0 = vsel %vm1912_vm14, %v15421_v53, %v6448_v8  ;;  %v6452_v62 = vsel %vm1912_vm14, %v15422_v7, %v6451_v18  ;;  %v6454_v44 = vsel %vm1912_vm14, %v6448_v8, %v15423_v35  ;;  %v6456_v37 = vsel %vm1912_vm14, %v6451_v18, %v15424_v12  ;;  %v7423_v18 = vpop.f32.mrf.mxu3 }
 0x52b   : >> { %v6503_v39 = vadd.f32 %v6449_v0, %v6335_v21  ;;  %v6504_v16 = vadd.f32 %v6452_v62, %v6336_v27  ;;  %v6505_v5 = vadd.f32 %v6454_v44, %v6337_v56  ;;  %v6506_v34 = vadd.f32 %v6456_v37, %v6338_v52  ;;  %v15425_v21 = vld [vmem:[#allocation37_spill] sm:$0xff]  ;;  %v15428_v0 = vld [vmem:[#allocation200_spill] sm:$0xff]  ;;  %v15429_v62 = vld [vmem:[#allocation175_spill] sm:$0xff] }
 0x52c   : >> { %v6697_v53 = vrot.slane %v6650_v15, 1  ;;  %v6700_v7 = vrot.slane %v6651_v26, 1  ;;  %v15426_v27 = vunpack.c.l.bf16 %v15425_v21  ;;  %v15427_v52 = vunpack.c.h.bf16 %v15425_v21  ;;  %v15431_v37 = vld [vmem:[#allocation180_spill] sm:$0xff] }
 0x52d   : >> { %v6584_v1 = vadd.f32 %v6568_v20, %v6503_v39  ;;  %v6585_v38 = vadd.f32 %v6569_v23, %v6504_v16  ;;  %v6586_v6 = vadd.f32 %v6570_v29, %v6505_v5  ;;  %v6587_v8 = vadd.f32 %v6571_v19, %v6506_v34  ;;  %v7889_v23 = vld [vmem:[#allocation3 + $0xb0] sm:$0xf]  ;;  %v8026_v36 = vld [vmem:[#allocation3 + $0xb4] sm:$0xf] }
 0x52e   : >> { %v6702_v56 = vrot.slane %v15426_v27, 1  ;;  %v6704_v51 = vrot.slane %v15427_v52, 1  ;;  %v6805_v35 = vpack.c.bf16 %v15429_v62, %v15428_v0  ;;  %v6816_v20 = vunpack.c.l.bf16 %v15430_v11  ;;  %v8027_v16 = vld [vmem:[#allocation3 + $0xb4] sm:$0xf0]  ;;  %v7891_v5 = vld [vmem:[#allocation3 + $0xb8] sm:$0xf0] }
 0x52f   : >> { %v6698_v43 = vsel %vm1708_vm13, %v6696_v14, %v6697_v53  ;;  %v6701_v44 = vsel %vm1708_vm13, %v6699_v10, %v6700_v7  ;;  %v6817_v12 = vunpack.c.h.bf16 %v15430_v11  ;;  %v6820_v39 = vunpack.c.l.bf16 %v15431_v37 }
 0x530   : >> { %v6703_v34 = vsel %vm1708_vm13, %v6697_v53, %v6702_v56  ;;  %v6705_v29 = vsel %vm1708_vm13, %v6700_v7, %v6704_v51  ;;  %v6752_v19 = vadd.f32 %v6698_v43, %v6584_v1  ;;  %v6753_v15 = vadd.f32 %v6701_v44, %v6585_v38  ;;  %v15432_v56 = vld [vmem:[#allocation110_spill] sm:$0xff]  ;;  %v15436_v44 = vld [vmem:[#allocation59_spill] sm:$0xff] }
 0x531   : >> { %v7890_v26 = vor.u32 %v8027_v16, %v7889_v23  ;;  %v7894_v21 = vor.u32 %v8026_v36, %v7891_v5  ;;  %v6754_v27 = vadd.f32 %v6703_v34, %v6586_v6  ;;  %v6755_v52 = vadd.f32 %v6705_v29, %v6587_v8  ;;  %v15433_v7 = vld [vmem:[#allocation70_spill] sm:$0xff]  ;;  %v7336_v8 = vpop.f32.mrf.mxu2  ;;  %v15434_v23 = vld [vmem:[#allocation61_spill] sm:$0xff] }
 0x532   : >> { %v6818_v0 = vunpack.c.l.bf16 %v6805_v35  ;;  %v6819_v14 = vunpack.c.h.bf16 %v6805_v35  ;;  %v6821_v10 = vunpack.c.h.bf16 %v15431_v37  ;;  %v6864_v62 = vrot.slane %v6816_v20, 2  ;;  %v15435_v35 = vld [vmem:[#allocation35_spill] sm:$0xff] }
 0x533   : >> { %7368 = vmatmul.bf16.gmra.mxu2 %v7890_v26  ;;  %7974 = vmatmul.msk.bf16.gmra.mxu3 %vm7256_vm15, %v7894_v21  ;;  %v6867_v11 = vrot.slane %v6817_v12, 2  ;;  %v6870_v49 = vrot.slane %v6820_v39, 2  ;;  %v7335_v53 = vadd.f32 %v13260_v33, %v7334_v31  ;;  %v5874_v1 = vsel %vm1708_vm13, %v15433_v7, %v15432_v56  ;;  %v15440_v56 = vld [vmem:[#allocation57_spill] sm:$0xff] }
 0x534   : >> { %v6865_v38 = vrot.slane %v6818_v0, 2  ;;  %v6868_v51 = vrot.slane %v6819_v14, 2  ;;  %v6872_v6 = vrot.slane %v6821_v10, 2  ;;  %v5877_v36 = vsel %vm1708_vm13, %v15435_v35, %v15434_v23  ;;  %v7425_v14 = vpop.f32.mrf.mxu3  ;;  %v15444_v23 = vld [vmem:[#allocation111_spill] sm:$0xff]  ;;  %v15445_v35 = vld [vmem:[#allocation144_spill] sm:$0xff] }
 0x535   : >> { %v7424_v20 = vadd.f32 %v7423_v18, %v7335_v53  ;;  %v7337_v43 = vadd.f32 %v13260_v33, %v7336_v8  ;;  %v15437_v12 = vunpack.c.l.bf16 %v15436_v44  ;;  %v15438_v31 = vunpack.c.h.bf16 %v15436_v44  ;;  %v15439_v53 = vld [vmem:[#allocation151_spill] sm:$0xff]  ;;  %v15442_v8 = vld [vmem:[#allocation98_spill] sm:$0xff] }
 0x536   : >> { %v6866_v16 = vsel %vm1912_vm14, %v6864_v62, %v6865_v38  ;;  %v6869_v5 = vsel %vm1912_vm14, %v6867_v11, %v6868_v51  ;;  %v6871_v34 = vsel %vm1912_vm14, %v6865_v38, %v6870_v49  ;;  %v6873_v29 = vsel %vm1912_vm14, %v6868_v51, %v6872_v6  ;;  %v15443_v11 = vld [vmem:[#allocation152_spill] sm:$0xff] }
 0x537   : >> { %v5922_v37 = vadd.f32 %v5874_v1, %v15437_v12  ;;  %v5923_v39 = vadd.f32 %v5877_v36, %v15438_v31  ;;  %v6920_v26 = vadd.f32 %v6866_v16, %v6752_v19  ;;  %v6921_v21 = vadd.f32 %v6869_v5, %v6753_v15  ;;  %v15441_v1 = vld [vmem:[#allocation154_spill] sm:$0xff]  ;;  %v15446_v36 = vld [vmem:[#allocation100_spill] sm:$0xff] }
 0x538   : >> { %v6922_v0 = vadd.f32 %v6871_v34, %v6754_v27  ;;  %v6923_v18 = vadd.f32 %v6873_v29, %v6755_v52  ;;  %v7426_v10 = vadd.f32 %v7425_v14, %v7337_v43  ;;  %v6042_v7 = vsel %vm1912_vm14, %v15440_v56, %v15439_v53  ;;  %v15447_v5 = vld [vmem:[#allocation156_spill] sm:$0xff] }
 0x539   : >> { %v6045_v62 = vsel %vm1912_vm14, %v15442_v8, %v15441_v1  ;;  %v6092_v49 = vadd.f32 %v15444_v23, %v15443_v11  ;;  %v6936_v38 = vadd.f32 %v6920_v26, %v9956_v40  ;;  %v6937_v19 = vadd.f32 %v6921_v21, %v15267_v30  ;;  %v15454_v1 = vld [vmem:[#allocation150_spill] sm:$0xff]  ;;  %v15456_v11 = vld [vmem:[#allocation159_spill] sm:$0xff] }
 0x53a   : >> { %v6938_v15 = vadd.f32 %v6922_v0, %v9956_v40  ;;  %v6939_v27 = vadd.f32 %v6923_v18, %v15267_v30  ;;  %v8070_v52 = vpack.c.bf16 %v7426_v10, %v7424_v20  ;;  %v6090_v51 = vadd.f32 %v6042_v7, %v5922_v37  ;;  %v15450_v0 = vld [vmem:[#allocation116_spill] sm:$0xff]  ;;  %v15453_v7 = vld [vmem:[#allocation166_spill] sm:$0xff] }
 0x53b   : >> { %v6091_v6 = vadd.f32 %v6045_v62, %v5923_v39  ;;  %v6093_v43 = vadd.f32 %v15446_v36, %v15445_v35  ;;  %v6952_v44 = vmax.f32 %v6936_v38, 0.0  ;;  %v6953_v12 = vmax.f32 %v6937_v19, 0.0  ;;  %v15455_v62 = vld [vmem:[#allocation143_spill] sm:$0xff]  ;;  %v15457_v38 = vld [vmem:[#allocation145_spill] sm:$0xff] }
 0x53c   : >> { %v6954_v31 = vmax.f32 %v6938_v15, 0.0  ;;  %v6955_v16 = vmax.f32 %v6939_v27, 0.0  ;;  %8130 = vst [vmem:[%s12674_s29 + $0x20] sm:$0xff] %v8070_v52   ;;  %v15448_v34 = vunpack.c.l.bf16 %v15447_v5  ;;  %v15449_v26 = vunpack.c.h.bf16 %v15447_v5 }
 0x53d   : >> { %v15451_v14 = vunpack.c.l.bf16 %v15450_v0  ;;  %v15452_v20 = vunpack.c.h.bf16 %v15450_v0  ;;  %v6968_v39 = vmin.f32 %v6952_v44, 6.0  ;;  %v6969_v10 = vmin.f32 %v6953_v12, 6.0 }
 0x53e   : >> { %v6171_v29 = vadd.f32 %v15448_v34, %v6090_v51  ;;  %v6172_v21 = vadd.f32 %v15449_v26, %v6091_v6  ;;  %v6970_v53 = vmin.f32 %v6954_v31, 6.0  ;;  %v6971_v56 = vmin.f32 %v6955_v16, 6.0  ;;  %v15462_v34 = vld [vmem:[#allocation174_spill] sm:$0xff] }
 0x53f   : >> { %v6173_v18 = vadd.f32 %v15451_v14, %v6092_v49  ;;  %v6174_v37 = vadd.f32 %v15452_v20, %v6093_v43  ;;  %v6291_v8 = vsel %vm1708_vm13, %v15454_v1, %v15453_v7  ;;  %v6294_v23 = vsel %vm1708_vm13, %v15456_v11, %v15455_v62  ;;  %v15458_v49 = vld [vmem:[#allocation218_spill] sm:$0xff]  ;;  %v15464_v14 = vld [vmem:[#allocation105_spill] sm:$0xff] }
 0x540   : >> { %v6296_v19 = vsel %vm1708_vm13, %v15453_v7, %v15457_v38  ;;  %v6298_v15 = vsel %vm1708_vm13, %v15455_v62, %v15458_v49  ;;  %v6984_v27 = vpack.c.bf16 %v6969_v10, %v6968_v39  ;;  %v6985_v52 = vpack.c.bf16 %v6971_v56, %v6970_v53  ;;  %v15459_v43 = vld [vmem:[#allocation158_spill] sm:$0xff]  ;;  %v15465_v20 = vld [vmem:[#allocation197_spill] sm:$0xff]  ;;  %v15466_v39 = vld [vmem:[#allocation88_spill] sm:$0xff] }
 0x541   : >> { %v6339_v51 = vadd.f32 %v6291_v8, %v6171_v29  ;;  %v6340_v6 = vadd.f32 %v6294_v23, %v6172_v21  ;;  %v6341_v35 = vadd.f32 %v6296_v19, %v6173_v18  ;;  %v6342_v36 = vadd.f32 %v6298_v15, %v6174_v37  ;;  %v15463_v29 = vld [vmem:[#allocation104_spill] sm:$0xff]  ;;  %v15467_v53 = vld [vmem:[#allocation91_spill] sm:$0xff] }
 0x542   : >> { %v15460_v44 = vunpack.c.l.bf16 %v15459_v43  ;;  %v15461_v31 = vunpack.c.h.bf16 %v15459_v43  ;;  %6992 = vst.msk [vmem:[#allocation3 + $0xc0] sm:$0xff] %vm8519_vm2, %v6984_v27  ;;  %v6563_v5 = vpack.c.bf16 %v13159_v63, %v13148_v42  ;;  %v6572_v26 = vunpack.c.l.bf16 %v15462_v34  ;;  %v7339_v27 = vpop.f32.mrf.mxu2 }
 0x543   : >> { %v6573_v0 = vunpack.c.h.bf16 %v15462_v34  ;;  %v6654_v21 = vunpack.c.l.bf16 %v15463_v29  ;;  %6993 = vst.msk [vmem:[#allocation3 + $0xc8] sm:$0xff] %vm8519_vm2, %v6985_v52  ;;  %v6655_v11 = vunpack.c.h.bf16 %v15463_v29  ;;  %v6656_v23 = vunpack.c.l.bf16 %v13188_v24 }
 0x544   : >> { %v6458_v12 = vrot.slane %v15460_v44, 2  ;;  %v6461_v16 = vrot.slane %v15461_v31, 2  ;;  %v6574_v8 = vunpack.c.l.bf16 %v6563_v5  ;;  %v6575_v62 = vunpack.c.h.bf16 %v6563_v5 }
 0x545   : >> { %v6657_v49 = vunpack.c.h.bf16 %v13188_v24  ;;  %v6706_v15 = vrot.slane %v6654_v21, 1  ;;  %v6707_v44 = vrot.slane %v6656_v23, 1  ;;  %v15469_v31 = vunpack.c.h.bf16 %v13180_v60 }
 0x546   : >> { %v6459_v18 = vsel %vm1912_vm14, %v15464_v14, %v6458_v12  ;;  %v6462_v37 = vsel %vm1912_vm14, %v15465_v20, %v6461_v16  ;;  %v6464_v10 = vsel %vm1912_vm14, %v6458_v12, %v15466_v39  ;;  %v6466_v42 = vsel %vm1912_vm14, %v6461_v16, %v15467_v53 }
 0x547   : >> { %v6507_v63 = vadd.f32 %v6459_v18, %v6339_v51  ;;  %v6508_v56 = vadd.f32 %v6462_v37, %v6340_v6  ;;  %v6509_v7 = vadd.f32 %v6464_v10, %v6341_v35  ;;  %v6510_v1 = vadd.f32 %v6466_v42, %v6342_v36  ;;  %v7428_v51 = vpop.f32.mrf.mxu3 }
 0x548   : >> { %v6709_v12 = vrot.slane %v6655_v11, 1  ;;  %v6710_v6 = vrot.slane %v6657_v49, 1  ;;  %v15468_v35 = vunpack.c.l.bf16 %v13180_v60  ;;  %v6714_v16 = vrot.slane %v15469_v31, 1  ;;  %v15475_v31 = vld [vmem:[#allocation68_spill] sm:$0xff] }
 0x549   : >> { %v6588_v38 = vadd.f32 %v6572_v26, %v6507_v63  ;;  %v6589_v19 = vadd.f32 %v6573_v0, %v6508_v56  ;;  %v6590_v52 = vadd.f32 %v6574_v8, %v6509_v7  ;;  %v6591_v43 = vadd.f32 %v6575_v62, %v6510_v1  ;;  %v7897_v34 = vld [vmem:[#allocation3 + $0xc0] sm:$0xf]  ;;  %v8028_v26 = vld [vmem:[#allocation3 + $0xc4] sm:$0xf]  ;;  %v15470_v0 = vld [vmem:[#allocation190_spill] sm:$0xff] }
 0x54a   : >> { %v6712_v36 = vrot.slane %v15468_v35, 1  ;;  %v6808_v5 = vpack.c.bf16 %v13184_v22, %v13178_v55  ;;  %v6708_v24 = vsel %vm1708_vm13, %v6706_v15, %v6707_v44  ;;  %v6822_v29 = vunpack.c.l.bf16 %v15470_v0  ;;  %v8029_v18 = vld [vmem:[#allocation3 + $0xc4] sm:$0xf0]  ;;  %v7899_v20 = vld [vmem:[#allocation3 + $0xc8] sm:$0xf0] }
 0x54b   : >> { %v6823_v21 = vunpack.c.h.bf16 %v15470_v0  ;;  %v6826_v14 = vunpack.c.l.bf16 %v13200_v28  ;;  %v6711_v37 = vsel %vm1708_vm13, %v6709_v12, %v6710_v6  ;;  %v6715_v39 = vsel %vm1708_vm13, %v6710_v6, %v6714_v16  ;;  %v15471_v12 = vld [vmem:[#allocation179_spill] sm:$0xff]  ;;  %v15474_v35 = vld [vmem:[#allocation34_spill] sm:$0xff] }
 0x54c   : >> { %v6713_v60 = vsel %vm1708_vm13, %v6707_v44, %v6712_v36  ;;  %v6756_v10 = vadd.f32 %v6708_v24, %v6588_v38  ;;  %v7898_v22 = vor.u32 %v8029_v18, %v7897_v34  ;;  %v7902_v55 = vor.u32 %v8028_v26, %v7899_v20  ;;  %v7341_v44 = vpop.f32.mrf.mxu2 }
 0x54d   : >> { %v6757_v53 = vadd.f32 %v6711_v37, %v6589_v19  ;;  %v6758_v42 = vadd.f32 %v6713_v60, %v6590_v52  ;;  %v6759_v63 = vadd.f32 %v6715_v39, %v6591_v43  ;;  %v6824_v56 = vunpack.c.l.bf16 %v6808_v5  ;;  %v15472_v19 = vld [vmem:[#allocation157_spill] sm:$0xff]  ;;  %v15478_v37 = vld [vmem:[#allocation196_spill] sm:$0xff]  ;;  %v15479_v60 = vld [vmem:[#allocation119_spill] sm:$0xff] }
 0x54e   : >> { %v6825_v7 = vunpack.c.h.bf16 %v6808_v5  ;;  %v6827_v1 = vunpack.c.h.bf16 %v13200_v28  ;;  %7373 = vmatmul.bf16.gmra.mxu2 %v7898_v22  ;;  %7975 = vmatmul.msk.bf16.gmra.mxu3 %vm7256_vm15, %v7902_v55  ;;  %v6874_v8 = vrot.slane %v6822_v29, 2  ;;  %v6877_v62 = vrot.slane %v6823_v21, 2  ;;  %v15473_v28 = vld [vmem:[#allocation115_spill] sm:$0xff]  ;;  %v15480_v22 = vld [vmem:[#allocation162_spill] sm:$0xff] }
 0x54f   : >> { %v6880_v11 = vrot.slane %v6826_v14, 2  ;;  %v7340_v23 = vadd.f32 %v13260_v33, %v7339_v27  ;;  %v6875_v49 = vrot.slane %v6824_v56, 2  ;;  %v5884_v52 = vsel %vm1708_vm13, %v15472_v19, %v15471_v12  ;;  %v15481_v55 = vld [vmem:[#allocation94_spill] sm:$0xff]  ;;  %v15484_v12 = vld [vmem:[#allocation195_spill] sm:$0xff]  ;;  %v15485_v19 = vld [vmem:[#allocation133_spill] sm:$0xff] }
 0x550   : >> { %v6878_v15 = vrot.slane %v6825_v7, 2  ;;  %v6882_v38 = vrot.slane %v6827_v1, 2  ;;  %v7342_v6 = vadd.f32 %v13260_v33, %v7341_v44  ;;  %v5887_v36 = vsel %vm1708_vm13, %v15474_v35, %v15473_v28  ;;  %v7430_v33 = vpop.f32.mrf.mxu3 }
 0x551   : >> { %v7429_v43 = vadd.f32 %v7428_v51, %v7340_v23  ;;  %v15476_v16 = vunpack.c.l.bf16 %v15475_v31  ;;  %v6876_v27 = vsel %vm1912_vm14, %v6874_v8, %v6875_v49  ;;  %v6881_v26 = vsel %vm1912_vm14, %v6875_v49, %v6880_v11  ;;  %v15483_v11 = vld [vmem:[#allocation165_spill] sm:$0xff] }
 0x552   : >> { %v6879_v34 = vsel %vm1912_vm14, %v6877_v62, %v6878_v15  ;;  %v6883_v24 = vsel %vm1912_vm14, %v6878_v15, %v6882_v38  ;;  %v6924_v0 = vadd.f32 %v6876_v27, %v6756_v10  ;;  %v6926_v51 = vadd.f32 %v6881_v26, %v6758_v42  ;;  %v15482_v62 = vld [vmem:[#allocation148_spill] sm:$0xff] }
 0x553   : >> { %v5926_v5 = vadd.f32 %v5884_v52, %v15476_v16  ;;  %v6925_v29 = vadd.f32 %v6879_v34, %v6757_v53  ;;  %v6927_v21 = vadd.f32 %v6883_v24, %v6759_v63  ;;  %v7431_v14 = vadd.f32 %v7430_v33, %v7342_v6  ;;  %v15486_v6 = vld [vmem:[#allocation90_spill] sm:$0xff]  ;;  %v15493_v33 = vld [vmem:[#allocation112_spill] sm:$0xff] }
 0x554   : >> { %v15477_v18 = vunpack.c.h.bf16 %v15475_v31  ;;  %v6052_v39 = vsel %vm1912_vm14, %v15479_v60, %v15478_v37  ;;  %v6055_v56 = vsel %vm1912_vm14, %v15481_v55, %v15480_v22  ;;  %v6940_v7 = vadd.f32 %v6924_v0, %v9956_v40 }
 0x555   : >> { %v6941_v10 = vadd.f32 %v6925_v29, %v15267_v30  ;;  %v6942_v53 = vadd.f32 %v6926_v51, %v9956_v40  ;;  %v6943_v42 = vadd.f32 %v6927_v21, %v15267_v30  ;;  %v8075_v63 = vpack.c.bf16 %v7431_v14, %v7429_v43  ;;  %v15491_v29 = vld [vmem:[#allocation173_spill] sm:$0xff]  ;;  %v15492_v21 = vld [vmem:[#allocation24_spill] sm:$0xff] }
 0x556   : >> { %v5927_v20 = vadd.f32 %v5887_v36, %v15477_v18  ;;  %v6094_v1 = vadd.f32 %v6052_v39, %v5926_v5  ;;  %v6096_v23 = vadd.f32 %v15483_v11, %v15482_v62  ;;  %v6956_v49 = vmax.f32 %v6940_v7, 0.0  ;;  %v15494_v18 = vld [vmem:[#allocation169_spill] sm:$0xff]  ;;  %v15495_v39 = vld [vmem:[#allocation168_spill] sm:$0xff] }
 0x557   : >> { %v6957_v15 = vmax.f32 %v6941_v10, 0.0  ;;  %v6958_v38 = vmax.f32 %v6942_v53, 0.0  ;;  %v6959_v44 = vmax.f32 %v6943_v42, 0.0  ;;  %8131 = vst [vmem:[%s12674_s29 + $0x28] sm:$0xff] %v8075_v63   ;;  %v6097_v52 = vadd.f32 %v15485_v19, %v15484_v12  ;;  %v15496_v10 = vld [vmem:[#allocation147_spill] sm:$0xff]  ;;  %v15499_v11 = vld [vmem:[#allocation140_spill] sm:$0xff] }
 0x558   : >> { %v6095_v8 = vadd.f32 %v6055_v56, %v5927_v20  ;;  %v15487_v28 = vunpack.c.l.bf16 %v15486_v6  ;;  %v15488_v36 = vunpack.c.h.bf16 %v15486_v6  ;;  %v15489_v43 = vunpack.c.l.bf16 %v13110_v9  ;;  %v15501_v12 = vld [vmem:[#allocation194_spill] sm:$0xff] }
 0x559   : >> { %v6972_v5 = vmin.f32 %v6956_v49, 6.0  ;;  %v6973_v27 = vmin.f32 %v6957_v15, 6.0  ;;  %v6974_v34 = vmin.f32 %v6958_v38, 6.0  ;;  %v6975_v26 = vmin.f32 %v6959_v44, 6.0  ;;  %v15500_v49 = vld [vmem:[#allocation63_spill] sm:$0xff] }
 0x55a   : >> { %v6175_v35 = vadd.f32 %v15487_v28, %v6094_v1  ;;  %v6176_v31 = vadd.f32 %v15488_v36, %v6095_v8  ;;  %v6177_v16 = vadd.f32 %v15489_v43, %v6096_v23  ;;  %v15490_v24 = vunpack.c.h.bf16 %v13110_v9 }
 0x55b   : >> { %v6301_v51 = vsel %vm1708_vm13, %v15491_v29, %v13152_v17  ;;  %v6304_v14 = vsel %vm1708_vm13, %v15493_v33, %v15492_v21  ;;  %v6306_v20 = vsel %vm1708_vm13, %v13152_v17, %v15494_v18  ;;  %v6986_v37 = vpack.c.bf16 %v6973_v27, %v6972_v5  ;;  %v7344_v27 = vpop.f32.mrf.mxu2 }
 0x55c   : >> { %v6178_v0 = vadd.f32 %v15490_v24, %v6097_v52  ;;  %v6987_v60 = vpack.c.bf16 %v6975_v26, %v6974_v34  ;;  %v6308_v22 = vsel %vm1708_vm13, %v15492_v21, %v15495_v39  ;;  %v6343_v9 = vadd.f32 %v6301_v51, %v6175_v35 }
 0x55d   : >> { %v6344_v55 = vadd.f32 %v6304_v14, %v6176_v31  ;;  %v6345_v56 = vadd.f32 %v6306_v20, %v6177_v16  ;;  %v15497_v53 = vunpack.c.l.bf16 %v15496_v10  ;;  %6994 = vst.msk [vmem:[#allocation3 + $0xd0] sm:$0xff] %vm8519_vm2, %v6986_v37  ;;  %v15498_v63 = vunpack.c.h.bf16 %v15496_v10 }
 0x55e   : >> { %v6346_v7 = vadd.f32 %v6308_v22, %v6178_v0  ;;  %v6565_v17 = vpack.c.bf16 %v13395_v59, %v13391_v54  ;;  %v6576_v8 = vunpack.c.l.bf16 %v13232_v25  ;;  %v6577_v62 = vunpack.c.h.bf16 %v13232_v25  ;;  %6995 = vst.msk [vmem:[#allocation3 + $0xd8] sm:$0xff] %vm8519_vm2, %v6987_v60  ;;  %v15502_v54 = vld [vmem:[#allocation215_spill] sm:$0xff]  ;;  %v7433_v0 = vpop.f32.mrf.mxu3 }
 0x55f   : >> { %v6468_v42 = vrot.slane %v15497_v53, 2  ;;  %v6471_v1 = vrot.slane %v15498_v63, 2  ;;  %v6660_v38 = vunpack.c.l.bf16 %v13236_v3  ;;  %v6661_v44 = vunpack.c.h.bf16 %v13236_v3  ;;  %v15505_v60 = vld [vmem:[#allocation203_spill] sm:$0xff] }
 0x560   : >> { %v6578_v35 = vunpack.c.l.bf16 %v6565_v17  ;;  %v6579_v36 = vunpack.c.h.bf16 %v6565_v17  ;;  %v6662_v43 = vunpack.c.l.bf16 %v13425_v47  ;;  %v6663_v16 = vunpack.c.h.bf16 %v13425_v47 }
 0x561   : >> { %v6469_v23 = vsel %vm1912_vm14, %v15499_v11, %v6468_v42  ;;  %v6474_v15 = vsel %vm1912_vm14, %v6468_v42, %v15500_v49  ;;  %v6472_v59 = vsel %vm1912_vm14, %v15501_v12, %v6471_v1  ;;  %v6476_v19 = vsel %vm1912_vm14, %v6471_v1, %v15502_v54  ;;  %v13728_v12 = vld [vmem:[%s12136_s20] ss:$0 sm:$0xff] }
 0x562   : >> { %v6511_v25 = vadd.f32 %v6469_v23, %v6343_v9  ;;  %v6513_v52 = vadd.f32 %v6474_v15, %v6345_v56  ;;  %v6512_v6 = vadd.f32 %v6472_v59, %v6344_v55  ;;  %v6514_v28 = vadd.f32 %v6476_v19, %v6346_v7  ;;  %v15506_v19 = vld [vmem:[#allocation130_spill] sm:$0xff] }
 0x563   : >> { %v6716_v5 = vrot.slane %v6660_v38, 1  ;;  %v6719_v24 = vrot.slane %v6661_v44, 1  ;;  %v6717_v29 = vrot.slane %v6662_v43, 1  ;;  %v6720_v51 = vrot.slane %v6663_v16, 1  ;;  %v7346_v54 = vpop.f32.mrf.mxu2 }
 0x564   : >> { %v6592_v31 = vadd.f32 %v6576_v8, %v6511_v25  ;;  %v6593_v3 = vadd.f32 %v6577_v62, %v6512_v6  ;;  %v6594_v34 = vadd.f32 %v6578_v35, %v6513_v52  ;;  %v6595_v26 = vadd.f32 %v6579_v36, %v6514_v28  ;;  %v7905_v20 = vld [vmem:[#allocation3 + $0xd0] sm:$0xf]  ;;  %v8030_v37 = vld [vmem:[#allocation3 + $0xd4] sm:$0xf]  ;;  %v15507_v25 = vld [vmem:[#allocation92_spill] sm:$0xff] }
 0x565   : >> { %v15503_v21 = vunpack.c.l.bf16 %v13427_v32  ;;  %v15504_v14 = vunpack.c.h.bf16 %v13427_v32  ;;  %v6811_v47 = vpack.c.bf16 %v13422_v45, %v13419_v13  ;;  %v6828_v39 = vunpack.c.l.bf16 %v15505_v60  ;;  %v8031_v55 = vld [vmem:[#allocation3 + $0xd4] sm:$0xf0]  ;;  %v7907_v56 = vld [vmem:[#allocation3 + $0xd8] sm:$0xf0]  ;;  %v15508_v35 = vld [vmem:[#allocation178_spill] sm:$0xff] }
 0x566   : >> { %v6829_v22 = vunpack.c.h.bf16 %v15505_v60  ;;  %v6832_v9 = vunpack.c.l.bf16 %v13439_v58  ;;  %v6718_v7 = vsel %vm1708_vm13, %v6716_v5, %v6717_v29  ;;  %v6721_v10 = vsel %vm1708_vm13, %v6719_v24, %v6720_v51  ;;  %v15509_v36 = vld [vmem:[#allocation93_spill] sm:$0xff] }
 0x567   : >> { %v6722_v33 = vrot.slane %v15503_v21, 1  ;;  %v6724_v18 = vrot.slane %v15504_v14, 1  ;;  %v7906_v42 = vor.u32 %v8031_v55, %v7905_v20  ;;  %v7910_v63 = vor.u32 %v8030_v37, %v7907_v56  ;;  %v7435_v21 = vpop.f32.mrf.mxu3  ;;  %v15513_v37 = vld [vmem:[#allocation139_spill] sm:$0xff]  ;;  %v15516_v55 = vld [vmem:[#allocation108_spill] sm:$0xff] }
 0x568   : >> { %v6760_v13 = vadd.f32 %v6718_v7, %v6592_v31  ;;  %v6761_v45 = vadd.f32 %v6721_v10, %v6593_v3  ;;  %v6830_v8 = vunpack.c.l.bf16 %v6811_v47  ;;  %v6831_v62 = vunpack.c.h.bf16 %v6811_v47  ;;  %v15510_v31 = vld [vmem:[#allocation219_spill] sm:$0xff]  ;;  %v15514_v47 = vld [vmem:[#allocation189_spill] sm:$0xff] }
 0x569   : >> { %v6723_v32 = vsel %vm1708_vm13, %v6717_v29, %v6722_v33  ;;  %v6725_v53 = vsel %vm1708_vm13, %v6720_v51, %v6724_v18  ;;  %7378 = vmatmul.bf16.gmra.mxu2 %v7906_v42  ;;  %7976 = vmatmul.msk.bf16.gmra.mxu3 %vm7256_vm15, %v7910_v63  ;;  %v6833_v11 = vunpack.c.h.bf16 %v13439_v58  ;;  %v6884_v23 = vrot.slane %v6828_v39, 2 }
 0x56a   : >> { %v6762_v1 = vadd.f32 %v6723_v32, %v6594_v34  ;;  %v6763_v17 = vadd.f32 %v6725_v53, %v6595_v26  ;;  %v6887_v49 = vrot.slane %v6829_v22, 2  ;;  %v6890_v15 = vrot.slane %v6832_v9, 2  ;;  %v15515_v9 = vld [vmem:[#allocation191_spill] sm:$0xff] }
 0x56b   : >> { %v6885_v38 = vrot.slane %v6830_v8, 2  ;;  %v6888_v44 = vrot.slane %v6831_v62, 2  ;;  %v7345_v59 = vadd.f32 %v13728_v12, %v7344_v27  ;;  %v5894_v52 = vsel %vm1708_vm13, %v15507_v25, %v15506_v19  ;;  %v15519_v62 = vld [vmem:[#allocation164_spill] sm:$0xff] }
 0x56c   : >> { %v6892_v6 = vrot.slane %v6833_v11, 2  ;;  %v7347_v28 = vadd.f32 %v13728_v12, %v7346_v54  ;;  %v5897_v58 = vsel %vm1708_vm13, %v15509_v36, %v15508_v35  ;;  %v15511_v43 = vunpack.c.l.bf16 %v15510_v31  ;;  %v15520_v11 = vld [vmem:[#allocation54_spill] sm:$0xff] }
 0x56d   : >> { %v6886_v5 = vsel %vm1912_vm14, %v6884_v23, %v6885_v38  ;;  %v6889_v3 = vsel %vm1912_vm14, %v6887_v49, %v6888_v44  ;;  %v6891_v27 = vsel %vm1912_vm14, %v6885_v38, %v6890_v15  ;;  %v7434_v34 = vadd.f32 %v7433_v0, %v7345_v59  ;;  %v15521_v49 = vld [vmem:[#allocation202_spill] sm:$0xff] }
 0x56e   : >> { %v5930_v16 = vadd.f32 %v5894_v52, %v15511_v43  ;;  %v6893_v26 = vsel %vm1912_vm14, %v6888_v44, %v6892_v6  ;;  %v6928_v24 = vadd.f32 %v6886_v5, %v6760_v13  ;;  %v6929_v29 = vadd.f32 %v6889_v3, %v6761_v45  ;;  %v15517_v45 = vld [vmem:[#allocation192_spill] sm:$0xff]  ;;  %v15527_v43 = vld [vmem:[#allocation193_spill] sm:$0xff] }
 0x56f   : >> { %v6930_v51 = vadd.f32 %v6891_v27, %v6762_v1  ;;  %v6931_v33 = vadd.f32 %v6893_v26, %v6763_v17  ;;  %v7436_v14 = vadd.f32 %v7435_v21, %v7347_v28  ;;  %v15512_v18 = vunpack.c.h.bf16 %v15510_v31  ;;  %v15518_v1 = vld [vmem:[#allocation211_spill] sm:$0xff]  ;;  %v6526_v5 = vld [vmem:[#allocation2 + $0x198] sm:$0xff] }
 0x570   : >> { %v6062_v60 = vsel %vm1912_vm14, %v15514_v47, %v15513_v37  ;;  %v6944_v39 = vadd.f32 %v6928_v24, %v9956_v40  ;;  %v6945_v0 = vadd.f32 %v6929_v29, %v15267_v30  ;;  %v6065_v56 = vsel %vm1912_vm14, %v15516_v55, %v15515_v9  ;;  %v6527_v26 = vld [vmem:[#allocation2 + $0x1a0] sm:$0xff]  ;;  %v13781_v24 = vld [vmem:[#allocation2 + $0x1a8] sm:$0x11]  ;;  %v15533_v55 = vld [vmem:[#allocation41_spill] sm:$0xff] }
 0x571   : >> { %v5931_v20 = vadd.f32 %v5897_v58, %v15512_v18  ;;  %v6946_v22 = vadd.f32 %v6930_v51, %v9956_v40  ;;  %v6947_v7 = vadd.f32 %v6931_v33, %v15267_v30  ;;  %v8080_v10 = vpack.c.bf16 %v7436_v14, %v7434_v34  ;;  %v15526_v58 = vld [vmem:[#allocation172_spill] sm:$0xff] }
 0x572   : >> { %v6098_v32 = vadd.f32 %v6062_v60, %v5930_v16  ;;  %v6960_v42 = vmax.f32 %v6944_v39, 0.0  ;;  %v6961_v63 = vmax.f32 %v6945_v0, 0.0  ;;  %v6100_v17 = vadd.f32 %v15518_v1, %v15517_v45  ;;  %v15531_v39 = vld [vmem:[#allocation199_spill] sm:$0xff] }
 0x573   : >> { %v6099_v53 = vadd.f32 %v6065_v56, %v5931_v20  ;;  %v6962_v13 = vmax.f32 %v6946_v22, 0.0  ;;  %v6963_v8 = vmax.f32 %v6947_v7, 0.0  ;;  %8132 = vst [vmem:[%s12674_s29 + $0x30] sm:$0xff] %v8080_v10   ;;  %v6101_v23 = vadd.f32 %v15520_v11, %v15519_v62  ;;  %v15532_v22 = vld [vmem:[#allocation176_spill] sm:$0xff]  ;;  %v15536_v62 = vld [vmem:[#allocation31_spill] sm:$0xff] }
 0x574   : >> { %v15522_v15 = vunpack.c.l.bf16 %v15521_v49  ;;  %v15523_v44 = vunpack.c.h.bf16 %v15521_v49  ;;  %v6976_v54 = vmin.f32 %v6960_v42, 6.0  ;;  %v6977_v19 = vmin.f32 %v6961_v63, 6.0  ;;  %v15534_v42 = vld [vmem:[#allocation27_spill] sm:$0xff] }
 0x575   : >> { %v6978_v25 = vmin.f32 %v6962_v13, 6.0  ;;  %v15524_v52 = vunpack.c.l.bf16 %v13384_v46  ;;  %v6979_v28 = vmin.f32 %v6963_v8, 6.0  ;;  %v15525_v35 = vunpack.c.h.bf16 %v13384_v46  ;;  %v15535_v13 = vld [vmem:[#allocation30_spill] sm:$0xff] }
 0x576   : >> { %v6179_v38 = vadd.f32 %v15522_v15, %v6098_v32  ;;  %v6180_v59 = vadd.f32 %v15523_v44, %v6099_v53  ;;  %v6311_v31 = vsel %vm1708_vm13, %v15526_v58, %v13400_v41  ;;  %v6314_v16 = vsel %vm1708_vm13, %v15527_v43, %v13402_v4  ;;  %v6771_v8 = vld [vmem:[#allocation2 + $0x198] sm:$0xee] }
 0x577   : >> { %v6181_v6 = vadd.f32 %v15524_v52, %v6100_v17  ;;  %v6182_v36 = vadd.f32 %v15525_v35, %v6101_v23  ;;  %v6988_v3 = vpack.c.bf16 %v6977_v19, %v6976_v54  ;;  %v6316_v27 = vsel %vm1708_vm13, %v13400_v41, %v13406_v61  ;;  %v15537_v23 = vld [vmem:[#allocation32_spill] sm:$0xff] }
 0x578   : >> { %v6318_v34 = vsel %vm1708_vm13, %v13402_v4, %v13408_v57  ;;  %v6347_v46 = vadd.f32 %v6311_v31, %v6179_v38  ;;  %v15528_v29 = vunpack.c.h.bf16 %v13398_v48  ;;  %v6989_v21 = vpack.c.bf16 %v6979_v28, %v6978_v25 }
 0x579   : >> { %v6348_v33 = vadd.f32 %v6314_v16, %v6180_v59  ;;  %v6349_v14 = vadd.f32 %v6316_v27, %v6181_v6  ;;  %6996 = vst.msk [vmem:[#allocation3 + $0xe0] sm:$0xff] %vm8519_vm2, %v6988_v3  ;;  %v15529_v18 = vunpack.c.l.bf16 %v13388_v2  ;;  %v15530_v61 = vunpack.c.h.bf16 %v13388_v2 }
 0x57a   : >> { %v6485_v51 = vrot.slane %v15528_v29, 2  ;;  %v6540_v4 = vunpack.c.l.bf16 %v6526_v5  ;;  %v6541_v57 = vunpack.c.h.bf16 %v6526_v5  ;;  %6997 = vst.msk [vmem:[#allocation3 + $0xe8] sm:$0xff] %vm8519_vm2, %v6989_v21  ;;  %v6350_v37 = vadd.f32 %v6318_v34, %v6182_v36 }
 0x57b   : >> { %v6478_v41 = vrot.slane %v15529_v18, 2  ;;  %v6481_v20 = vrot.slane %v15530_v61, 2  ;;  %v6542_v48 = vunpack.c.l.bf16 %v6527_v26  ;;  %v6543_v47 = vunpack.c.h.bf16 %v6527_v26 }
 0x57c   : >> { %v6610_v60 = vunpack.c.l.bf16 %v13781_v24  ;;  %v6611_v56 = vunpack.c.h.bf16 %v13781_v24  ;;  %v6556_v63 = vmul.f32 %v6540_v4, %v15534_v42  ;;  %v6557_v45 = vmul.f32 %v6541_v57, %v15535_v13 }
 0x57d   : >> { %v6479_v0 = vsel %vm1912_vm14, %v15531_v39, %v6478_v41  ;;  %v6482_v9 = vsel %vm1912_vm14, %v15532_v22, %v6481_v20  ;;  %v6484_v2 = vsel %vm1912_vm14, %v6478_v41, %v15533_v55  ;;  %v6486_v7 = vsel %vm1912_vm14, %v6481_v20, %v6485_v51 }
 0x57e   : >> { %v6515_v10 = vadd.f32 %v6479_v0, %v6347_v46  ;;  %v6516_v32 = vadd.f32 %v6482_v9, %v6348_v33  ;;  %v6517_v53 = vadd.f32 %v6484_v2, %v6349_v14  ;;  %v6558_v1 = vmul.f32 %v6542_v48, %v15534_v42  ;;  %v7349_v2 = vpop.f32.mrf.mxu2 }
 0x57f   : >> { %v6559_v17 = vmul.f32 %v6543_v47, %v15535_v13  ;;  %v6630_v11 = vmul.f32 %v6540_v4, %v15536_v62  ;;  %v6631_v49 = vmul.f32 %v6541_v57, %v15537_v23  ;;  %v6632_v15 = vmul.f32 %v6542_v48, %v15536_v62  ;;  %v15538_v4 = vld [vmem:[#allocation33_spill] sm:$0xff] }
 0x580   : >> { %v6633_v38 = vmul.f32 %v6543_v47, %v15537_v23  ;;  %v6566_v44 = vpack.c.bf16 %v6557_v45, %v6556_v63  ;;  %v6634_v54 = vmul.f32 %v6610_v60, %v15536_v62  ;;  %v6635_v19 = vmul.f32 %v6611_v56, %v15537_v23  ;;  %v7913_v25 = vld [vmem:[#allocation3 + $0xe0] sm:$0xf]  ;;  %v8032_v52 = vld [vmem:[#allocation3 + $0xe4] sm:$0xf] }
 0x581   : >> { %v6567_v59 = vpack.c.bf16 %v6559_v17, %v6558_v1  ;;  %v6518_v6 = vadd.f32 %v6486_v7, %v6350_v37  ;;  %v6645_v28 = vpack.c.bf16 %v6631_v49, %v6630_v11  ;;  %v6778_v36 = vunpack.c.l.bf16 %v6771_v8  ;;  %v8033_v58 = vld [vmem:[#allocation3 + $0xe4] sm:$0xf0]  ;;  %v7915_v31 = vld [vmem:[#allocation3 + $0xe8] sm:$0xf0]  ;;  %v15539_v37 = vld [vmem:[#allocation60_spill] sm:$0xff]  ;;  %v7438_v7 = vpop.f32.mrf.mxu3 }
 0x582   : >> { %v6646_v35 = vpack.c.bf16 %v6633_v38, %v6632_v15  ;;  %v6580_v43 = vunpack.c.l.bf16 %v6566_v44  ;;  %v6581_v16 = vunpack.c.h.bf16 %v6566_v44  ;;  %v6779_v3 = vunpack.c.h.bf16 %v6771_v8 }
 0x583   : >> { %v6582_v5 = vunpack.c.l.bf16 %v6567_v59  ;;  %v7914_v27 = vor.u32 %v8033_v58, %v7913_v25  ;;  %v7918_v34 = vor.u32 %v8032_v52, %v7915_v31  ;;  %v6647_v46 = vpack.c.bf16 %v6635_v19, %v6634_v54 }
 0x584   : >> { %v6666_v26 = vunpack.c.l.bf16 %v6645_v28  ;;  %v6583_v24 = vunpack.c.h.bf16 %v6567_v59  ;;  %v6596_v29 = vadd.f32 %v6580_v43, %v6515_v10  ;;  %v6597_v51 = vadd.f32 %v6581_v16, %v6516_v32 }
 0x585   : >> { %v6598_v21 = vadd.f32 %v6582_v5, %v6517_v53  ;;  %7383 = vmatmul.bf16.gmra.mxu2 %v7914_v27  ;;  %7977 = vmatmul.msk.bf16.gmra.mxu3 %vm7256_vm15, %v7918_v34  ;;  %v6667_v33 = vunpack.c.h.bf16 %v6645_v28  ;;  %v6668_v14 = vunpack.c.l.bf16 %v6646_v35  ;;  %v6669_v18 = vunpack.c.h.bf16 %v6646_v35 }
 0x586   : >> { %v6670_v41 = vunpack.c.l.bf16 %v6647_v46  ;;  %v6671_v61 = vunpack.c.h.bf16 %v6647_v46  ;;  %v6726_v20 = vrot.slane %v6666_v26, 1  ;;  %v6798_v57 = vmul.f32 %v6778_v36, %v15538_v4  ;;  %v7351_v35 = vpop.f32.mrf.mxu2 }
 0x587   : >> { %v6799_v39 = vmul.f32 %v6779_v3, %v15539_v37  ;;  %v6727_v0 = vrot.slane %v6668_v14, 1  ;;  %v6729_v22 = vrot.slane %v6667_v33, 1  ;;  %v6730_v9 = vrot.slane %v6669_v18, 1 }
 0x588   : >> { %v6732_v55 = vrot.slane %v6670_v41, 1  ;;  %v6734_v10 = vrot.slane %v6671_v61, 1  ;;  %v6800_v32 = vmul.f32 %v6542_v48, %v15538_v4  ;;  %v6801_v53 = vmul.f32 %v6543_v47, %v15539_v37 }
 0x589   : >> { %v6802_v42 = vmul.f32 %v6610_v60, %v15538_v4  ;;  %v6728_v63 = vsel %vm1708_vm13, %v6726_v20, %v6727_v0  ;;  %v6731_v13 = vsel %vm1708_vm13, %v6729_v22, %v6730_v9  ;;  %v6803_v1 = vmul.f32 %v6611_v56, %v15539_v37  ;;  %v7440_v36 = vpop.f32.mrf.mxu3 }
 0x58a   : >> { %v6733_v45 = vsel %vm1708_vm13, %v6727_v0, %v6732_v55  ;;  %v6599_v17 = vadd.f32 %v6583_v24, %v6518_v6  ;;  %v6735_v8 = vsel %vm1708_vm13, %v6730_v9, %v6734_v10  ;;  %v6813_v62 = vpack.c.bf16 %v6799_v39, %v6798_v57 }
 0x58b   : >> { %v6814_v11 = vpack.c.bf16 %v6801_v53, %v6800_v32  ;;  %v6815_v23 = vpack.c.bf16 %v6803_v1, %v6802_v42  ;;  %v6764_v49 = vadd.f32 %v6728_v63, %v6596_v29  ;;  %v6765_v48 = vadd.f32 %v6731_v13, %v6597_v51 }
 0x58c   : >> { %v6766_v15 = vadd.f32 %v6733_v45, %v6598_v21  ;;  %v6834_v47 = vunpack.c.l.bf16 %v6813_v62  ;;  %v6835_v38 = vunpack.c.h.bf16 %v6813_v62  ;;  %v6767_v59 = vadd.f32 %v6735_v8, %v6599_v17 }
 0x58d   : >> { %v6836_v60 = vunpack.c.l.bf16 %v6814_v11  ;;  %v6837_v44 = vunpack.c.h.bf16 %v6814_v11  ;;  %v6838_v54 = vunpack.c.l.bf16 %v6815_v23  ;;  %v6839_v19 = vunpack.c.h.bf16 %v6815_v23 }
 0x58e   : >> { %v7350_v25 = vadd.f32 %v13728_v12, %v7349_v2  ;;  %v6894_v52 = vrot.slane %v6834_v47, 2  ;;  %v6897_v6 = vrot.slane %v6835_v38, 2  ;;  %v7352_v43 = vadd.f32 %v13728_v12, %v7351_v35  ;;  %v7354_v37 = vpop.f32.mrf.mxu2 }
 0x58f   : >> { %v6895_v56 = vrot.slane %v6836_v60, 2  ;;  %v6898_v28 = vrot.slane %v6837_v44, 2  ;;  %v6900_v58 = vrot.slane %v6838_v54, 2  ;;  %v6902_v31 = vrot.slane %v6839_v19, 2 }
 0x590   : >> { %v7439_v29 = vadd.f32 %v7438_v7, %v7350_v25  ;;  %v7441_v51 = vadd.f32 %v7440_v36, %v7352_v43 }
 0x591   : >> { %v6896_v16 = vsel %vm1912_vm14, %v6894_v52, %v6895_v56  ;;  %v6899_v5 = vsel %vm1912_vm14, %v6897_v6, %v6898_v28  ;;  %v6901_v3 = vsel %vm1912_vm14, %v6895_v56, %v6900_v58  ;;  %v6903_v27 = vsel %vm1912_vm14, %v6898_v28, %v6902_v31  ;;  %v7443_v39 = vpop.f32.mrf.mxu3 }
 0x592   : >> { %v6932_v34 = vadd.f32 %v6896_v16, %v6764_v49  ;;  %v6933_v46 = vadd.f32 %v6899_v5, %v6765_v48  ;;  %v6934_v26 = vadd.f32 %v6901_v3, %v6766_v15  ;;  %v6935_v24 = vadd.f32 %v6903_v27, %v6767_v59 }
 0x593   : >> { %v8085_v41 = vpack.c.bf16 %v7441_v51, %v7439_v29 }
 0x594   : >> { %v6948_v21 = vadd.f32 %v6932_v34, %v9956_v40  ;;  %v6949_v33 = vadd.f32 %v6933_v46, %v15267_v30  ;;  %v6950_v14 = vadd.f32 %v6934_v26, %v9956_v40  ;;  %v6951_v18 = vadd.f32 %v6935_v24, %v15267_v30 }
 0x595   : >> { %8133 = vst [vmem:[%s12674_s29 + $0x38] sm:$0xff] %v8085_v41   ;;  %v7355_v40 = vadd.f32 %v13728_v12, %v7354_v37 }
 0x596   : >> { %v6964_v61 = vmax.f32 %v6948_v21, 0.0  ;;  %v6965_v20 = vmax.f32 %v6949_v33, 0.0  ;;  %v6966_v4 = vmax.f32 %v6950_v14, 0.0  ;;  %v6967_v57 = vmax.f32 %v6951_v18, 0.0  ;;  %v7356_v30 = vpop.f32.mrf.mxu2 }
 0x597   : >> { %v7357_v32 = vadd.f32 %v13728_v12, %v7356_v30  ;;  %v7444_v53 = vadd.f32 %v7443_v39, %v7355_v40 }
 0x598   : >> { %v6980_v0 = vmin.f32 %v6964_v61, 6.0  ;;  %v6981_v22 = vmin.f32 %v6965_v20, 6.0  ;;  %v6982_v9 = vmin.f32 %v6966_v4, 6.0  ;;  %v6983_v55 = vmin.f32 %v6967_v57, 6.0 }
 0x599   : >> { %v7445_v10 = vpop.f32.mrf.mxu3 }
 0x59a   : >> { %v6990_v2 = vpack.c.bf16 %v6981_v22, %v6980_v0  ;;  %v6991_v7 = vpack.c.bf16 %v6983_v55, %v6982_v9  ;;  %v7446_v42 = vadd.f32 %v7445_v10, %v7357_v32 }
 0x59c   : >> { %6998 = vst.msk [vmem:[#allocation3 + $0xf0] sm:$0xff] %vm8519_vm2, %v6990_v2  ;;  %v8090_v17 = vpack.c.bf16 %v7446_v42, %v7444_v53 }
 0x59d   : >> { %6999 = vst.msk [vmem:[#allocation3 + $0xf8] sm:$0xff] %vm8519_vm2, %v6991_v7 }
 0x59e   : >> { %8134 = vst [vmem:[%s12674_s29 + $0x40] sm:$0xff] %v8090_v17   ;;  %v7359_v50 = vpop.f32.mrf.mxu2 }
 0x59f   : >> { %v7360_v23 = vadd.f32 %v13728_v12, %v7359_v50 }
 0x5a1   : >> { %v7448_v11 = vpop.f32.mrf.mxu3 }
 0x5a2   : >> { %v7449_v47 = vadd.f32 %v7448_v11, %v7360_v23 }
 0x5a3   : >> { %v7921_v63 = vld [vmem:[#allocation3 + $0xf0] sm:$0xf]  ;;  %v8034_v13 = vld [vmem:[#allocation3 + $0xf4] sm:$0xf] }
 0x5a4   : >> { %v8035_v45 = vld [vmem:[#allocation3 + $0xf4] sm:$0xf0]  ;;  %v7923_v1 = vld [vmem:[#allocation3 + $0xf8] sm:$0xf0] }
 0x5a5   : >> { %v7922_v8 = vor.u32 %v8035_v45, %v7921_v63  ;;  %v7926_v62 = vor.u32 %v8034_v13, %v7923_v1 }
 0x5a6   : >> { %v7361_v49 = vpop.f32.mrf.mxu2 }
 0x5a7   : >> { %7388 = vmatmul.bf16.gmra.mxu2 %v7922_v8  ;;  %7978 = vmatmul.msk.bf16.gmra.mxu3 %vm7256_vm15, %v7926_v62  ;;  %v7362_v15 = vadd.f32 %v13728_v12, %v7361_v49 }
 0x5a9   : >> { %v7450_v48 = vpop.f32.mrf.mxu3 }
 0x5aa   : >> { %v7451_v38 = vadd.f32 %v7450_v48, %v7362_v15 }
 0x5ac   : >> { %v8095_v60 = vpack.c.bf16 %v7451_v38, %v7449_v47 }
 0x5ae   : >> { %8135 = vst [vmem:[%s12674_s29 + $0x48] sm:$0xff] %v8095_v60   ;;  %v7364_v44 = vpop.f32.mrf.mxu2 }
 0x5af   : >> { %v7365_v54 = vadd.f32 %v13728_v12, %v7364_v44 }
 0x5b1   : >> { %v7453_v59 = vpop.f32.mrf.mxu3 }
 0x5b2   : >> { %v7454_v56 = vadd.f32 %v7453_v59, %v7365_v54 }
 0x5b6   : >> { %v7366_v19 = vpop.f32.mrf.mxu2 }
 0x5b7   : >> { %v7367_v52 = vadd.f32 %v13728_v12, %v7366_v19 }
 0x5b9   : >> { %v7455_v25 = vpop.f32.mrf.mxu3 }
 0x5ba   : >> { %v7456_v6 = vadd.f32 %v7455_v25, %v7367_v52 }
 0x5bc   : >> { %v8100_v28 = vpack.c.bf16 %v7456_v6, %v7454_v56 }
 0x5be   : >> { %8136 = vst [vmem:[%s12674_s29 + $0x50] sm:$0xff] %v8100_v28   ;;  %v7369_v35 = vpop.f32.mrf.mxu2 }
 0x5bf   : >> { %v7370_v58 = vadd.f32 %v13728_v12, %v7369_v35 }
 0x5c1   : >> { %v7458_v36 = vpop.f32.mrf.mxu3 }
 0x5c2   : >> { %v7459_v5 = vadd.f32 %v7458_v36, %v7370_v58 }
 0x5c6   : >> { %v7371_v31 = vpop.f32.mrf.mxu2 }
 0x5c7   : >> { %v7372_v16 = vadd.f32 %v13728_v12, %v7371_v31 }
 0x5c9   : >> { %v7460_v43 = vpop.f32.mrf.mxu3 }
 0x5ca   : >> { %v7461_v3 = vadd.f32 %v7460_v43, %v7372_v16 }
 0x5cc   : >> { %v8105_v27 = vpack.c.bf16 %v7461_v3, %v7459_v5 }
 0x5ce   : >> { %8137 = vst [vmem:[%s12674_s29 + $0x58] sm:$0xff] %v8105_v27  }
 0x5d1   : >> { %v7374_v34 = vpop.f32.mrf.mxu2  ;;  %v7463_v46 = vpop.f32.mrf.mxu3 }
 0x5d2   : >> { %v7375_v26 = vadd.f32 %v13728_v12, %v7374_v34 }
 0x5d4   : >> { %v7464_v21 = vadd.f32 %v7463_v46, %v7375_v26 }
 0x5d9   : >> { %v7376_v24 = vpop.f32.mrf.mxu2  ;;  %v7465_v51 = vpop.f32.mrf.mxu3 }
 0x5da   : >> { %v7377_v29 = vadd.f32 %v13728_v12, %v7376_v24 }
 0x5dc   : >> { %v7466_v33 = vadd.f32 %v7465_v51, %v7377_v29 }
 0x5de   : >> { %v8110_v14 = vpack.c.bf16 %v7466_v33, %v7464_v21 }
 0x5e0   : >> { %8138 = vst [vmem:[%s12674_s29 + $0x60] sm:$0xff] %v8110_v14  }
 0x5ec   : >> { %v7379_v18 = vpop.f32.mrf.mxu2  ;;  %v7468_v41 = vpop.f32.mrf.mxu3 }
 0x5ed   : >> { %v7380_v61 = vadd.f32 %v13728_v12, %v7379_v18 }
 0x5ef   : >> { %v7469_v37 = vadd.f32 %v7468_v41, %v7380_v61 }
 0x5f4   : >> { %v7381_v20 = vpop.f32.mrf.mxu2  ;;  %v7470_v57 = vpop.f32.mrf.mxu3 }
 0x5f5   : >> { %v7382_v4 = vadd.f32 %v13728_v12, %v7381_v20 }
 0x5f7   : >> { %v7471_v39 = vadd.f32 %v7470_v57, %v7382_v4 }
 0x5f9   : >> { %v8115_v0 = vpack.c.bf16 %v7471_v39, %v7469_v37 }
 0x5fb   : >> { %8139 = vst [vmem:[%s12674_s29 + $0x68] sm:$0xff] %v8115_v0  }
 0x608   : >> { %v7384_v22 = vpop.f32.mrf.mxu2  ;;  %v7473_v9 = vpop.f32.mrf.mxu3 }
 0x609   : >> { %v7385_v55 = vadd.f32 %v13728_v12, %v7384_v22 }
 0x60b   : >> { %v7474_v30 = vadd.f32 %v7473_v9, %v7385_v55 }
 0x610   : >> { %v7386_v2 = vpop.f32.mrf.mxu2  ;;  %v7475_v40 = vpop.f32.mrf.mxu3 }
 0x611   : >> { %v7387_v7 = vadd.f32 %v13728_v12, %v7386_v2 }
 0x613   : >> { %v7476_v10 = vadd.f32 %v7475_v40, %v7387_v7 }
 0x615   : >> { %v8120_v32 = vpack.c.bf16 %v7476_v10, %v7474_v30 }
 0x617   : >> { %8140 = vst [vmem:[%s12674_s29 + $0x70] sm:$0xff] %v8120_v32  }
 0x62a   : >> { %v7389_v53 = vpop.f32.mrf.mxu2  ;;  %v7478_v42 = vpop.f32.mrf.mxu3 }
 0x62b   : >> { %v7390_v63 = vadd.f32 %v13728_v12, %v7389_v53 }
 0x62d   : >> { %v7479_v17 = vadd.f32 %v7478_v42, %v7390_v63 }
 0x632   : >> { %v7391_v13 = vpop.f32.mrf.mxu2  ;;  %v7480_v1 = vpop.f32.mrf.mxu3 }
 0x633   : >> { %v7392_v45 = vadd.f32 %v13728_v12, %v7391_v13 }
 0x635   : >> { %v7481_v8 = vadd.f32 %v7480_v1, %v7392_v45  ;;  %500 = sbr.rel (!%p498_p7) target bundleno = 80 (0x50), region = 125 }
 0x637   : >> { %v8125_v62 = vpack.c.bf16 %v7481_v8, %v7479_v17 }
 0x639   : >> { %8141 = vst [vmem:[%s12674_s29 + $0x78] sm:$0xff] %v8125_v62  }
 0x63a PF: > { %s20_s24 = sadd.s32 1, %s8394_s24  }
 0x63b   : > { %p17_p8 = scmp.ge.s32.totalorder %s20_s24, 4  }
 0x63d   :  { %19 = sbr.rel (!%p17_p8) target bundleno = 3 (0x3), region = 136 }
 0x642   :  { %7571 = vsyncpa [#allocation5], 1 }
 0x643   :  { %7573 = vsyncpa [#allocation5 + $0x1], 1 }
 0x644   :  { %7574 = vsyncpa [#allocation7], 1 }
 0x645   :  { %7575 = vsyncpa [#allocation10], 1 }

</bundles_post_ra>
